<compile_context>
chip_gen: v7x
topology: tpu7x:2x2x1
jax: 0.10.0
libtpu: 0.0.40
codegen_flags: <defaults>
</compile_context>

<pallas_src>
import functools
import math

import jax
import jax.numpy as jnp
from jax import lax
from jax.experimental import pallas as pl
from jax.experimental.pallas import tpu as pltpu


def _xt_loss_kernel(left_ref, right_ref, dl_ref, dr_ref, out_ref, *,
                    lcn_weight, occluded_weight, kpad):
    f32 = jnp.float32
    left = left_ref[...]          # (1, 3, H, W)
    right = right_ref[...]
    dl = dl_ref[...]              # (1, 1, H, W)
    dr = dr_ref[...]
    nb, c, h, w = left.shape
    KP = kpad

    # ---------------- bounded-shift horizontal bilinear warp (== F.grid_sample) ----------
    # With an identity affine grid and align_corners=False the sampled source column is
    # exactly ix = j -/+ d, so only shifts k = 0 .. floor(max_disp)+1 carry weight:
    #   value = (1 - frac(d)) * img[j -/+ floor(d)] + frac(d) * img[j -/+ (floor(d)+1)]
    # Zero padding comes from the zeroed halo of the small scoped scratch pad.
    def warp(img3, disp1, d, direction):
        d = jnp.clip(d, 0.0, float(KP))     # defensive; identity for in-contract disparities
        fl = jnp.floor(d)
        fr = d - fl

        def body(wpad):
            wpad[:, :, :, 0:KP] = jnp.zeros((nb, 4, h, KP), f32)
            wpad[:, :, :, KP + w:2 * KP + w] = jnp.zeros((nb, 4, h, KP), f32)
            wpad[:, 0:3, :, KP:KP + w] = img3
            wpad[:, 3:4, :, KP:KP + w] = disp1
            acc = jnp.zeros((nb, 4, h, w), f32)
            for k in range(KP + 1):
                wk = (jnp.where(fl == float(k), 1.0 - fr, 0.0)
                      + jnp.where(fl == float(k - 1), fr, 0.0))    # (1,1,H,W)
                start = KP - k if direction < 0 else KP + k
                acc = acc + wk * wpad[:, :, :, start:start + w]
            return acc

        return pl.run_scoped(body, pltpu.VMEM((nb, 4, h, w + 2 * KP), f32))

    # view 'left' : sample right image / right disp at column j - dispmap_left
    rec_r = warp(right, dr, dl, direction=-1)
    recon_img_right, recon_disp_right = rec_r[:, 0:3], rec_r[:, 3:4]
    # view 'right': sample left image / left disp at column j + dispmap_right
    rec_l = warp(left, dl, dr, direction=+1)
    recon_img_left, recon_disp_left = rec_l[:, 0:3], rec_l[:, 3:4]

    losses_left_photo = jnp.abs(left - recon_img_right)
    losses_right_photo = jnp.abs(right - recon_img_left)

    if lcn_weight > 0.0:
        # ---------------- LCN: batched 24-channel 9x9 separable box filter ----------------
        K_LCN = 9
        P = K_LCN // 2                       # 4

        def lcn_phase(vpad):
            imgs = jnp.concatenate([left, right, recon_img_right, recon_img_left], axis=1)
            stack = jnp.concatenate([imgs, imgs * imgs], axis=1)       # (1, 24, H, W)
            # Horizontal 9-tap box as an MXU matmul with a constant 0/1 band matrix; the
            # zero padding of conv2d(padding=4) is implicit (missing columns are not summed).
            ii = lax.broadcasted_iota(jnp.int32, (w, w), 0)
            jj = lax.broadcasted_iota(jnp.int32, (w, w), 1)
            band = (jnp.abs(ii - jj) <= P).astype(f32)                 # (W, W)
            hs = jnp.dot(stack.reshape(nb * 24 * h, w), band,
                         preferred_element_type=jnp.float32).reshape(nb, 24, h, w)
            # Vertical 9-tap box via a zero-haloed pad + sublane-shifted adds.
            vpad[:, :, 0:P, :] = jnp.zeros((nb, 24, P, w), f32)
            vpad[:, :, P + h:2 * P + h, :] = jnp.zeros((nb, 24, P, w), f32)
            vpad[:, :, P:P + h, :] = hs
            vs = vpad[:, :, 0:h, :]
            for t in range(1, K_LCN):
                vs = vs + vpad[:, :, t:t + h, :]
            return vs * (1.0 / float(K_LCN * K_LCN))

        box = pl.run_scoped(lcn_phase, pltpu.VMEM((nb, 24, h + K_LCN - 1, w), f32))

        mean = box[:, 0:12]
        mean_sq = box[:, 12:24]
        var = jnp.maximum(mean_sq - mean * mean, 0.0)                 # ReLU, as in reference
        # Reference applies the correction OUTSIDE the sqrt: sqrt(var) * k^2/(k^2-1).
        std = jnp.sqrt(var) * (float(K_LCN * K_LCN) / float(K_LCN * K_LCN - 1))
        inv_std = pl.reciprocal(std + 1e-5, approx=True)              # EUP slot

        l_lcn = (left - mean[:, 0:3]) * inv_std[:, 0:3]
        r_lcn = (right - mean[:, 3:6]) * inv_std[:, 3:6]
        rr_lcn = (recon_img_right - mean[:, 6:9]) * inv_std[:, 6:9]
        rl_lcn = (recon_img_left - mean[:, 9:12]) * inv_std[:, 9:12]

        cost_left = jnp.abs((l_lcn - rr_lcn) * std[:, 0:3])
        cost_right = jnp.abs((r_lcn - rl_lcn) * std[:, 3:6])

        # ---------------- ASW: 12x12 adaptive support weights (guide = left for BOTH) -----
        # Taps cover offsets [-6, +5] in rows/cols, matching the reference's F.pad(6) + 12x12
        # unrolled loop exactly. Exp is hoisted out of the tap loop via the exact identity
        #   exp(-|a-b|/s) = min(exp((a-m)/s)*exp((m-b)/s), exp((m-a)/s)*exp((b-m)/s)).
        K_ASW = 12
        PA = K_ASW // 2                      # 6
        S = 0.5                              # 1 / sigma_omega (sigma_omega = 2)
        m0 = jnp.mean(left)                  # arbitrary shift, keeps exp arguments small
        gp = jnp.exp((left - m0) * S)        # exp((guide - m)/s), interior   (1,3,H,W)
        gm = jnp.exp((m0 - left) * S)        # exp((m - guide)/s), interior
        gph = jnp.exp((0.0 - m0) * S)        # halo guide value is 0 (F.pad zeros)
        gmh = jnp.exp(m0 * S)

        hp, wp = h + K_ASW, w + K_ASW

        def asw_phase(gpad, cpad):
            # guide pad: channels 0:3 = exp((g-m)/s), 3:6 = exp((m-g)/s); halos use g = 0
            gpad[:, 0:3, 0:PA, :] = jnp.full((nb, 3, PA, wp), gph, f32)
            gpad[:, 3:6, 0:PA, :] = jnp.full((nb, 3, PA, wp), gmh, f32)
            gpad[:, 0:3, PA + h:hp, :] = jnp.full((nb, 3, PA, wp), gph, f32)
            gpad[:, 3:6, PA + h:hp, :] = jnp.full((nb, 3, PA, wp), gmh, f32)
            gpad[:, 0:3, PA:PA + h, 0:PA] = jnp.full((nb, 3, h, PA), gph, f32)
            gpad[:, 3:6, PA:PA + h, 0:PA] = jnp.full((nb, 3, h, PA), gmh, f32)
            gpad[:, 0:3, PA:PA + h, PA + w:wp] = jnp.full((nb, 3, h, PA), gph, f32)
            gpad[:, 3:6, PA:PA + h, PA + w:wp] = jnp.full((nb, 3, h, PA), gmh, f32)
            gpad[:, 0:3, PA:PA + h, PA:PA + w] = gp
            gpad[:, 3:6, PA:PA + h, PA:PA + w] = gm
            # cost pad: channels 0:3 = cost_left, 3:6 = cost_right, zero halos
            cpad[:, :, 0:PA, :] = jnp.zeros((nb, 6, PA, wp), f32)
            cpad[:, :, PA + h:hp, :] = jnp.zeros((nb, 6, PA, wp), f32)
            cpad[:, :, PA:PA + h, 0:PA] = jnp.zeros((nb, 6, h, PA), f32)
            cpad[:, :, PA:PA + h, PA + w:wp] = jnp.zeros((nb, 6, h, PA), f32)
            cpad[:, 0:3, PA:PA + h, PA:PA + w] = cost_left
            cpad[:, 3:6, PA:PA + h, PA:PA + w] = cost_right

            def row_body(i, carry):
                wsum, acc_l, acc_r = carry
                gband = gpad[:, :, pl.ds(i, h), :]     # (1, 6, H, W + 12)
                cband = cpad[:, :, pl.ds(i, h), :]     # (1, 6, H, W + 12)
                for j in range(K_ASW):
                    t = jnp.minimum(gp * gband[:, 3:6, :, j:j + w],
                                    gm * gband[:, 0:3, :, j:j + w])   # exp(-|a-b|/sigma), no EUP
                    wsum = wsum + t
                    acc_l = acc_l + t * cband[:, 0:3, :, j:j + w]
                    acc_r = acc_r + t * cband[:, 3:6, :, j:j + w]
                return wsum, acc_l, acc_r

            z3 = jnp.zeros((nb, 3, h, w), f32)
            wsum, acc_l, acc_r = lax.fori_loop(0, K_ASW, row_body, (z3, z3, z3))
            inv_wsum = pl.reciprocal(wsum, approx=True)
            return jnp.concatenate([acc_l * inv_wsum, acc_r * inv_wsum], axis=1)

        asw = pl.run_scoped(asw_phase,
                            pltpu.VMEM((nb, 6, hp, wp), f32),
                            pltpu.VMEM((nb, 6, hp, wp), f32))
        losses_left_lcn = asw[:, 0:3]
        losses_right_lcn = asw[:, 3:6]
    else:
        losses_left_lcn = jnp.zeros_like(losses_left_photo)
        losses_right_lcn = jnp.zeros_like(losses_right_photo)

    losses_left = (1.0 - lcn_weight) * losses_left_photo + lcn_weight * losses_left_lcn
    losses_right = (1.0 - lcn_weight) * losses_right_photo + lcn_weight * losses_right_lcn

    # ---------------- occlusion probabilities + cross entropy partials --------------------
    if occluded_weight > 0.0:
        diff_l = jnp.abs(dl - recon_disp_right)
        p_l = jnp.exp(-0.6931 * jnp.maximum(diff_l, 0.0))    # 0.6931 matches the reference
        diff_r = jnp.abs(dr - recon_disp_left)
        p_r = jnp.exp(-0.6931 * jnp.maximum(diff_r, 0.0))
        valid_l = (p_l > 0.5).astype(f32)
        valid_r = (p_r > 0.5).astype(f32)

        def ce_sum(p):
            # logits = [1 - p, p], target class = 1 -> per-pixel loss = logsumexp - p
            a = 1.0 - p
            b = p
            mx = jnp.maximum(a, b)
            lse = mx + jnp.log(jnp.exp(a - mx) + jnp.exp(b - mx))
            return jnp.sum(lse - b)

        ce_l = ce_sum(p_l)
        ce_r = ce_sum(p_r)
    else:
        valid_l = jnp.ones((nb, 1, h, w), f32)
        valid_r = jnp.ones((nb, 1, h, w), f32)
        ce_l = jnp.zeros((), f32)
        ce_r = jnp.zeros((), f32)

    sum_l = jnp.sum(losses_left * valid_l)
    cnt_l = jnp.sum(valid_l) * float(c)
    sum_r = jnp.sum(losses_right * valid_r)
    cnt_r = jnp.sum(valid_r) * float(c)

    # per-sample partial sums in the first 6 lanes of a lane-aligned (1, 1, 128) block
    lane = lax.broadcasted_iota(jnp.int32, (1, 1, 128), 2)
    vec = jnp.where(lane == 0, sum_l,
          jnp.where(lane == 1, cnt_l,
          jnp.where(lane == 2, sum_r,
          jnp.where(lane == 3, cnt_r,
          jnp.where(lane == 4, ce_l,
          jnp.where(lane == 5, ce_r, 0.0))))))
    out_ref[...] = vec.astype(f32)


def _vmem_limit_bytes(c, h, w, kpad):
    """Per-step VMEM request: real scratch peak + pipelined IO + live-value estimate."""
    f32 = 4
    nb = 1                                                   # one batch element per grid step
    warp_scr = nb * 4 * h * (w + 2 * kpad) * f32
    lcn_scr = nb * 24 * (h + 8) * w * f32
    asw_scr = 2 * nb * 6 * (h + 12) * (w + 12) * f32
    scratch_peak = max(warp_scr, lcn_scr, asw_scr)           # sequential run_scoped regions
    io_step = nb * (2 * c + 2) * h * w * f32 + 128 * f32     # double-buffered inputs + output
    live_vals = 192 * nb * h * w * f32                       # traced (H, W) slabs across phases
    need = scratch_peak + 2 * io_step + live_vals + (2 << 20)
    try:
        cap = int(0.85 * pltpu.get_tpu_info().vmem_capacity_bytes)
    except Exception:
        cap = 48 * 1024 * 1024
    return int(max(32 * 1024 * 1024, min(need, cap)))


def xt_loss(left_img, right_img, dispmap_left, dispmap_right, dispmap_gt, weight,
            max_disp=4, lcn_weight=0.5, occluded_weight=0.1):
    """JAX/Pallas equivalent of XTLoss(max_disp).forward(...)."""
    del dispmap_gt            # only its shape (all-ones target) is used by the reference
    N, C, H, W = left_img.shape
    assert C == 3, "XTLoss assumes 3-channel images (inplanes = outplanes = 3)"
    kpad = int(math.floor(float(max_disp))) + 1

    kernel = functools.partial(_xt_loss_kernel,
                               lcn_weight=float(lcn_weight),
                               occluded_weight=float(occluded_weight),
                               kpad=kpad)

    partials = pl.pallas_call(
        kernel,
        out_shape=jax.ShapeDtypeStruct((N, 1, 128), jnp.float32),
        grid=(N,),
        in_specs=[
            pl.BlockSpec((1, C, H, W), lambda n: (n, 0, 0, 0)),   # left_img
            pl.BlockSpec((1, C, H, W), lambda n: (n, 0, 0, 0)),   # right_img
            pl.BlockSpec((1, 1, H, W), lambda n: (n, 0, 0, 0)),   # dispmap_left
            pl.BlockSpec((1, 1, H, W), lambda n: (n, 0, 0, 0)),   # dispmap_right
        ],
        out_specs=pl.BlockSpec((1, 1, 128), lambda n: (n, 0, 0)),
        compiler_params=pltpu.CompilerParams(
            dimension_semantics=("parallel",),                    # batch shards across TCs (v7x)
            vmem_limit_bytes=_vmem_limit_bytes(C, H, W, kpad)),
    )(left_img.astype(jnp.float32), right_img.astype(jnp.float32),
      dispmap_left.astype(jnp.float32), dispmap_right.astype(jnp.float32))

    # scalar epilogue: cross-batch normalization + loss mixing (matches the reference exactly)
    tot = jnp.sum(partials[:, 0, :6], axis=0)
    sum_l, cnt_l, sum_r, cnt_r, ce_l, ce_r = (tot[i] for i in range(6))
    loss_valid = sum_l / (cnt_l + 1e-6) + sum_r / (cnt_r + 1e-6)
    loss_invalid = (ce_l + ce_r) / float(N * H * W)
    weight = jnp.asarray(weight, jnp.float32)
    return weight * ((1.0 - occluded_weight) * loss_valid + occluded_weight * loss_invalid)


if __name__ == "__main__":
    key = jax.random.PRNGKey(0)
    k1, k2, k3, k4, k5 = jax.random.split(key, 5)
    N, C, H, W = 2, 3, 16, 16
    max_disp = 4

    left_img = jax.random.uniform(k1, (N, C, H, W), jnp.float32)
    right_img = jax.random.uniform(k2, (N, C, H, W), jnp.float32)
    dispmap_left = jax.random.uniform(k3, (N, 1, H, W), jnp.float32, 0.0, float(max_disp))
    dispmap_right = jax.random.uniform(k4, (N, 1, H, W), jnp.float32, 0.0, float(max_disp))
    dispmap_gt = jax.random.uniform(k5, (N, 1, H, W), jnp.float32, 0.0, float(max_disp))
    weight = 1.0

    loss = xt_loss(left_img, right_img, dispmap_left, dispmap_right, dispmap_gt, weight,
                   max_disp=max_disp)
    loss = jax.block_until_ready(loss)
    assert not bool(jnp.isnan(loss)), "loss is NaN"
    print("KERNEL_OK")
</pallas_src>

<mosaic_0001>
module attributes {stable_mosaic.version = 11 : i64} {
  func.func @_xt_loss_kernel(%arg0: i32, %arg1: memref<1x3x16x16xf32, #tpu.memory_space<vmem>>, %arg2: memref<1x3x16x16xf32, #tpu.memory_space<vmem>>, %arg3: memref<1x1x16x16xf32, #tpu.memory_space<vmem>>, %arg4: memref<1x1x16x16xf32, #tpu.memory_space<vmem>>, %arg5: memref<1x1x128xf32, #tpu.memory_space<vmem>>) attributes {dimension_semantics = [#tpu.dimension_semantics<parallel>], iteration_bounds = array<i64: 2>, scalar_prefetch = 0 : i64, scratch_operands = 0 : i64, tpu.core_type = #tpu.core_type<tc>, window_params = [{transform_indices = @transform_0, window_bounds = array<i64: 1, 3, 16, 16>}, {transform_indices = @transform_1, window_bounds = array<i64: 1, 3, 16, 16>}, {transform_indices = @transform_2, window_bounds = array<i64: 1, 1, 16, 16>}, {transform_indices = @transform_3, window_bounds = array<i64: 1, 1, 16, 16>}, {transform_indices = @transform_4, window_bounds = array<i64: 1, 1, 128>}]} {
    %c0 = arith.constant 0 : index
    %c0_0 = arith.constant 0 : index
    %c0_1 = arith.constant 0 : index
    %c0_2 = arith.constant 0 : index
    %0 = vector.load %arg1[%c0, %c0_0, %c0_1, %c0_2] : memref<1x3x16x16xf32, #tpu.memory_space<vmem>>, vector<1x3x16x16xf32>
    %c0_3 = arith.constant 0 : index
    %c0_4 = arith.constant 0 : index
    %c0_5 = arith.constant 0 : index
    %c0_6 = arith.constant 0 : index
    %1 = vector.load %arg2[%c0_3, %c0_4, %c0_5, %c0_6] : memref<1x3x16x16xf32, #tpu.memory_space<vmem>>, vector<1x3x16x16xf32>
    %c0_7 = arith.constant 0 : index
    %c0_8 = arith.constant 0 : index
    %c0_9 = arith.constant 0 : index
    %c0_10 = arith.constant 0 : index
    %2 = vector.load %arg3[%c0_7, %c0_8, %c0_9, %c0_10] : memref<1x1x16x16xf32, #tpu.memory_space<vmem>>, vector<1x1x16x16xf32>
    %c0_11 = arith.constant 0 : index
    %c0_12 = arith.constant 0 : index
    %c0_13 = arith.constant 0 : index
    %c0_14 = arith.constant 0 : index
    %3 = vector.load %arg4[%c0_11, %c0_12, %c0_13, %c0_14] : memref<1x1x16x16xf32, #tpu.memory_space<vmem>>, vector<1x1x16x16xf32>
    %cst = arith.constant 0.000000e+00 : f32
    %cst_15 = arith.constant 5.000000e+00 : f32
    %4 = vector.broadcast %cst : f32 to vector<1x1x16x16xf32>
    %5 = arith.maximumf %4, %2 : vector<1x1x16x16xf32>
    %6 = vector.broadcast %cst_15 : f32 to vector<1x1x16x16xf32>
    %7 = arith.minimumf %6, %5 : vector<1x1x16x16xf32>
    %8 = math.floor %7 : vector<1x1x16x16xf32>
    %9 = arith.subf %7, %8 : vector<1x1x16x16xf32>
    %10 = "tpu.region"() ({
      %alloca = memref.alloca() : memref<1x4x16x26xf32, #tpu.memory_space<vmem>>
      %cst_52 = arith.constant 0.000000e+00 : f32
      %197 = vector.broadcast %cst_52 : f32 to vector<1x4x16x5xf32>
      %c0_53 = arith.constant 0 : index
      %c0_54 = arith.constant 0 : index
      %c0_55 = arith.constant 0 : index
      %c0_56 = arith.constant 0 : index
      %198 = vector.load %alloca[%c0_53, %c0_54, %c0_55, %c0_56] : memref<1x4x16x26xf32, #tpu.memory_space<vmem>>, vector<1x4x16x5xf32>
      tpu.vector_store %alloca[%c0_53, %c0_54, %c0_55, %c0_56], %197 {strides = array<i32>} : memref<1x4x16x26xf32, #tpu.memory_space<vmem>>, vector<1x4x16x5xf32>,
      %cst_57 = arith.constant 0.000000e+00 : f32
      %199 = vector.broadcast %cst_57 : f32 to vector<1x4x16x5xf32>
      %c0_58 = arith.constant 0 : index
      %c0_59 = arith.constant 0 : index
      %c0_60 = arith.constant 0 : index
      %c21 = arith.constant 21 : index
      %200 = vector.load %alloca[%c0_58, %c0_59, %c0_60, %c21] : memref<1x4x16x26xf32, #tpu.memory_space<vmem>>, vector<1x4x16x5xf32>
      tpu.vector_store %alloca[%c0_58, %c0_59, %c0_60, %c21], %199 {strides = array<i32>} : memref<1x4x16x26xf32, #tpu.memory_space<vmem>>, vector<1x4x16x5xf32>,
      %c0_61 = arith.constant 0 : index
      %c0_62 = arith.constant 0 : index
      %c0_63 = arith.constant 0 : index
      %c5 = arith.constant 5 : index
      %201 = vector.load %alloca[%c0_61, %c0_62, %c0_63, %c5] : memref<1x4x16x26xf32, #tpu.memory_space<vmem>>, vector<1x3x16x16xf32>
      tpu.vector_store %alloca[%c0_61, %c0_62, %c0_63, %c5], %1 {strides = array<i32>} : memref<1x4x16x26xf32, #tpu.memory_space<vmem>>, vector<1x3x16x16xf32>,
      %c0_64 = arith.constant 0 : index
      %c3 = arith.constant 3 : index
      %c0_65 = arith.constant 0 : index
      %c5_66 = arith.constant 5 : index
      %202 = vector.load %alloca[%c0_64, %c3, %c0_65, %c5_66] : memref<1x4x16x26xf32, #tpu.memory_space<vmem>>, vector<1x1x16x16xf32>
      tpu.vector_store %alloca[%c0_64, %c3, %c0_65, %c5_66], %3 {strides = array<i32>} : memref<1x4x16x26xf32, #tpu.memory_space<vmem>>, vector<1x1x16x16xf32>,
      %cst_67 = arith.constant 0.000000e+00 : f32
      %203 = vector.broadcast %cst_67 : f32 to vector<1x4x16x16xf32>
      %cst_68 = arith.constant 0.000000e+00 : f32
      %204 = vector.broadcast %cst_68 : f32 to vector<1x1x16x16xf32>
      %205 = arith.cmpf oeq, %8, %204 : vector<1x1x16x16xf32>
      %cst_69 = arith.constant 1.000000e+00 : f32
      %206 = vector.broadcast %cst_69 : f32 to vector<1x1x16x16xf32>
      %207 = arith.subf %206, %9 : vector<1x1x16x16xf32>
      %cst_70 = arith.constant 0.000000e+00 : f32
      %208 = vector.broadcast %cst_70 : f32 to vector<1x1x16x16xf32>
      %209 = arith.select %205, %207, %208 : vector<1x1x16x16xi1>, vector<1x1x16x16xf32>
      %cst_71 = arith.constant -1.000000e+00 : f32
      %210 = vector.broadcast %cst_71 : f32 to vector<1x1x16x16xf32>
      %211 = arith.cmpf oeq, %8, %210 : vector<1x1x16x16xf32>
      %cst_72 = arith.constant 0.000000e+00 : f32
      %212 = vector.broadcast %cst_72 : f32 to vector<1x1x16x16xf32>
      %213 = arith.select %211, %9, %212 : vector<1x1x16x16xi1>, vector<1x1x16x16xf32>
      %214 = arith.addf %209, %213 : vector<1x1x16x16xf32>
      %c0_73 = arith.constant 0 : index
      %c0_74 = arith.constant 0 : index
      %c0_75 = arith.constant 0 : index
      %c5_76 = arith.constant 5 : index
      %215 = vector.load %alloca[%c0_73, %c0_74, %c0_75, %c5_76] : memref<1x4x16x26xf32, #tpu.memory_space<vmem>>, vector<1x4x16x16xf32>
      %216 = vector.broadcast %214 : vector<1x1x16x16xf32> to vector<1x4x16x16xf32>
      %217 = arith.mulf %216, %215 : vector<1x4x16x16xf32>
      %218 = arith.addf %203, %217 : vector<1x4x16x16xf32>
      %cst_77 = arith.constant 1.000000e+00 : f32
      %219 = vector.broadcast %cst_77 : f32 to vector<1x1x16x16xf32>
      %220 = arith.cmpf oeq, %8, %219 : vector<1x1x16x16xf32>
      %cst_78 = arith.constant 1.000000e+00 : f32
      %221 = vector.broadcast %cst_78 : f32 to vector<1x1x16x16xf32>
      %222 = arith.subf %221, %9 : vector<1x1x16x16xf32>
      %cst_79 = arith.constant 0.000000e+00 : f32
      %223 = vector.broadcast %cst_79 : f32 to vector<1x1x16x16xf32>
      %224 = arith.select %220, %222, %223 : vector<1x1x16x16xi1>, vector<1x1x16x16xf32>
      %cst_80 = arith.constant 0.000000e+00 : f32
      %225 = vector.broadcast %cst_80 : f32 to vector<1x1x16x16xf32>
      %226 = arith.cmpf oeq, %8, %225 : vector<1x1x16x16xf32>
      %cst_81 = arith.constant 0.000000e+00 : f32
      %227 = vector.broadcast %cst_81 : f32 to vector<1x1x16x16xf32>
      %228 = arith.select %226, %9, %227 : vector<1x1x16x16xi1>, vector<1x1x16x16xf32>
      %229 = arith.addf %224, %228 : vector<1x1x16x16xf32>
      %c0_82 = arith.constant 0 : index
      %c0_83 = arith.constant 0 : index
      %c0_84 = arith.constant 0 : index
      %c4 = arith.constant 4 : index
      %230 = vector.load %alloca[%c0_82, %c0_83, %c0_84, %c4] : memref<1x4x16x26xf32, #tpu.memory_space<vmem>>, vector<1x4x16x16xf32>
      %231 = vector.broadcast %229 : vector<1x1x16x16xf32> to vector<1x4x16x16xf32>
      %232 = arith.mulf %231, %230 : vector<1x4x16x16xf32>
      %233 = arith.addf %218, %232 : vector<1x4x16x16xf32>
      %cst_85 = arith.constant 2.000000e+00 : f32
      %234 = vector.broadcast %cst_85 : f32 to vector<1x1x16x16xf32>
      %235 = arith.cmpf oeq, %8, %234 : vector<1x1x16x16xf32>
      %cst_86 = arith.constant 1.000000e+00 : f32
      %236 = vector.broadcast %cst_86 : f32 to vector<1x1x16x16xf32>
      %237 = arith.subf %236, %9 : vector<1x1x16x16xf32>
      %cst_87 = arith.constant 0.000000e+00 : f32
      %238 = vector.broadcast %cst_87 : f32 to vector<1x1x16x16xf32>
      %239 = arith.select %235, %237, %238 : vector<1x1x16x16xi1>, vector<1x1x16x16xf32>
      %cst_88 = arith.constant 1.000000e+00 : f32
      %240 = vector.broadcast %cst_88 : f32 to vector<1x1x16x16xf32>
      %241 = arith.cmpf oeq, %8, %240 : vector<1x1x16x16xf32>
      %cst_89 = arith.constant 0.000000e+00 : f32
      %242 = vector.broadcast %cst_89 : f32 to vector<1x1x16x16xf32>
      %243 = arith.select %241, %9, %242 : vector<1x1x16x16xi1>, vector<1x1x16x16xf32>
      %244 = arith.addf %239, %243 : vector<1x1x16x16xf32>
      %c0_90 = arith.constant 0 : index
      %c0_91 = arith.constant 0 : index
      %c0_92 = arith.constant 0 : index
      %c3_93 = arith.constant 3 : index
      %245 = vector.load %alloca[%c0_90, %c0_91, %c0_92, %c3_93] : memref<1x4x16x26xf32, #tpu.memory_space<vmem>>, vector<1x4x16x16xf32>
      %246 = vector.broadcast %244 : vector<1x1x16x16xf32> to vector<1x4x16x16xf32>
      %247 = arith.mulf %246, %245 : vector<1x4x16x16xf32>
      %248 = arith.addf %233, %247 : vector<1x4x16x16xf32>
      %cst_94 = arith.constant 3.000000e+00 : f32
      %249 = vector.broadcast %cst_94 : f32 to vector<1x1x16x16xf32>
      %250 = arith.cmpf oeq, %8, %249 : vector<1x1x16x16xf32>
      %cst_95 = arith.constant 1.000000e+00 : f32
      %251 = vector.broadcast %cst_95 : f32 to vector<1x1x16x16xf32>
      %252 = arith.subf %251, %9 : vector<1x1x16x16xf32>
      %cst_96 = arith.constant 0.000000e+00 : f32
      %253 = vector.broadcast %cst_96 : f32 to vector<1x1x16x16xf32>
      %254 = arith.select %250, %252, %253 : vector<1x1x16x16xi1>, vector<1x1x16x16xf32>
      %cst_97 = arith.constant 2.000000e+00 : f32
      %255 = vector.broadcast %cst_97 : f32 to vector<1x1x16x16xf32>
      %256 = arith.cmpf oeq, %8, %255 : vector<1x1x16x16xf32>
      %cst_98 = arith.constant 0.000000e+00 : f32
      %257 = vector.broadcast %cst_98 : f32 to vector<1x1x16x16xf32>
      %258 = arith.select %256, %9, %257 : vector<1x1x16x16xi1>, vector<1x1x16x16xf32>
      %259 = arith.addf %254, %258 : vector<1x1x16x16xf32>
      %c0_99 = arith.constant 0 : index
      %c0_100 = arith.constant 0 : index
      %c0_101 = arith.constant 0 : index
      %c2 = arith.constant 2 : index
      %260 = vector.load %alloca[%c0_99, %c0_100, %c0_101, %c2] : memref<1x4x16x26xf32, #tpu.memory_space<vmem>>, vector<1x4x16x16xf32>
      %261 = vector.broadcast %259 : vector<1x1x16x16xf32> to vector<1x4x16x16xf32>
      %262 = arith.mulf %261, %260 : vector<1x4x16x16xf32>
      %263 = arith.addf %248, %262 : vector<1x4x16x16xf32>
      %cst_102 = arith.constant 4.000000e+00 : f32
      %264 = vector.broadcast %cst_102 : f32 to vector<1x1x16x16xf32>
      %265 = arith.cmpf oeq, %8, %264 : vector<1x1x16x16xf32>
      %cst_103 = arith.constant 1.000000e+00 : f32
      %266 = vector.broadcast %cst_103 : f32 to vector<1x1x16x16xf32>
      %267 = arith.subf %266, %9 : vector<1x1x16x16xf32>
      %cst_104 = arith.constant 0.000000e+00 : f32
      %268 = vector.broadcast %cst_104 : f32 to vector<1x1x16x16xf32>
      %269 = arith.select %265, %267, %268 : vector<1x1x16x16xi1>, vector<1x1x16x16xf32>
      %cst_105 = arith.constant 3.000000e+00 : f32
      %270 = vector.broadcast %cst_105 : f32 to vector<1x1x16x16xf32>
      %271 = arith.cmpf oeq, %8, %270 : vector<1x1x16x16xf32>
      %cst_106 = arith.constant 0.000000e+00 : f32
      %272 = vector.broadcast %cst_106 : f32 to vector<1x1x16x16xf32>
      %273 = arith.select %271, %9, %272 : vector<1x1x16x16xi1>, vector<1x1x16x16xf32>
      %274 = arith.addf %269, %273 : vector<1x1x16x16xf32>
      %c0_107 = arith.constant 0 : index
      %c0_108 = arith.constant 0 : index
      %c0_109 = arith.constant 0 : index
      %c1 = arith.constant 1 : index
      %275 = vector.load %alloca[%c0_107, %c0_108, %c0_109, %c1] : memref<1x4x16x26xf32, #tpu.memory_space<vmem>>, vector<1x4x16x16xf32>
      %276 = vector.broadcast %274 : vector<1x1x16x16xf32> to vector<1x4x16x16xf32>
      %277 = arith.mulf %276, %275 : vector<1x4x16x16xf32>
      %278 = arith.addf %263, %277 : vector<1x4x16x16xf32>
      %cst_110 = arith.constant 5.000000e+00 : f32
      %279 = vector.broadcast %cst_110 : f32 to vector<1x1x16x16xf32>
      %280 = arith.cmpf oeq, %8, %279 : vector<1x1x16x16xf32>
      %cst_111 = arith.constant 1.000000e+00 : f32
      %281 = vector.broadcast %cst_111 : f32 to vector<1x1x16x16xf32>
      %282 = arith.subf %281, %9 : vector<1x1x16x16xf32>
      %cst_112 = arith.constant 0.000000e+00 : f32
      %283 = vector.broadcast %cst_112 : f32 to vector<1x1x16x16xf32>
      %284 = arith.select %280, %282, %283 : vector<1x1x16x16xi1>, vector<1x1x16x16xf32>
      %cst_113 = arith.constant 4.000000e+00 : f32
      %285 = vector.broadcast %cst_113 : f32 to vector<1x1x16x16xf32>
      %286 = arith.cmpf oeq, %8, %285 : vector<1x1x16x16xf32>
      %cst_114 = arith.constant 0.000000e+00 : f32
      %287 = vector.broadcast %cst_114 : f32 to vector<1x1x16x16xf32>
      %288 = arith.select %286, %9, %287 : vector<1x1x16x16xi1>, vector<1x1x16x16xf32>
      %289 = arith.addf %284, %288 : vector<1x1x16x16xf32>
      %c0_115 = arith.constant 0 : index
      %c0_116 = arith.constant 0 : index
      %c0_117 = arith.constant 0 : index
      %c0_118 = arith.constant 0 : index
      %290 = vector.load %alloca[%c0_115, %c0_116, %c0_117, %c0_118] : memref<1x4x16x26xf32, #tpu.memory_space<vmem>>, vector<1x4x16x16xf32>
      %291 = vector.broadcast %289 : vector<1x1x16x16xf32> to vector<1x4x16x16xf32>
      %292 = arith.mulf %291, %290 : vector<1x4x16x16xf32>
      %293 = arith.addf %278, %292 : vector<1x4x16x16xf32>
      tpu.yield %293 : vector<1x4x16x16xf32>
    }) : () -> vector<1x4x16x16xf32>
    %11 = vector.extract_strided_slice %10 {offsets = [0, 0, 0, 0], sizes = [1, 3, 16, 16], strides = [1, 1, 1, 1]} : vector<1x4x16x16xf32> to vector<1x3x16x16xf32>
    %12 = vector.extract_strided_slice %10 {offsets = [0, 3, 0, 0], sizes = [1, 1, 16, 16], strides = [1, 1, 1, 1]} : vector<1x4x16x16xf32> to vector<1x1x16x16xf32>
    %cst_16 = arith.constant 0.000000e+00 : f32
    %cst_17 = arith.constant 5.000000e+00 : f32
    %13 = vector.broadcast %cst_16 : f32 to vector<1x1x16x16xf32>
    %14 = arith.maximumf %13, %3 : vector<1x1x16x16xf32>
    %15 = vector.broadcast %cst_17 : f32 to vector<1x1x16x16xf32>
    %16 = arith.minimumf %15, %14 : vector<1x1x16x16xf32>
    %17 = math.floor %16 : vector<1x1x16x16xf32>
    %18 = arith.subf %16, %17 : vector<1x1x16x16xf32>
    %19 = "tpu.region"() ({
      %alloca = memref.alloca() : memref<1x4x16x26xf32, #tpu.memory_space<vmem>>
      %cst_52 = arith.constant 0.000000e+00 : f32
      %197 = vector.broadcast %cst_52 : f32 to vector<1x4x16x5xf32>
      %c0_53 = arith.constant 0 : index
      %c0_54 = arith.constant 0 : index
      %c0_55 = arith.constant 0 : index
      %c0_56 = arith.constant 0 : index
      %198 = vector.load %alloca[%c0_53, %c0_54, %c0_55, %c0_56] : memref<1x4x16x26xf32, #tpu.memory_space<vmem>>, vector<1x4x16x5xf32>
      tpu.vector_store %alloca[%c0_53, %c0_54, %c0_55, %c0_56], %197 {strides = array<i32>} : memref<1x4x16x26xf32, #tpu.memory_space<vmem>>, vector<1x4x16x5xf32>,
      %cst_57 = arith.constant 0.000000e+00 : f32
      %199 = vector.broadcast %cst_57 : f32 to vector<1x4x16x5xf32>
      %c0_58 = arith.constant 0 : index
      %c0_59 = arith.constant 0 : index
      %c0_60 = arith.constant 0 : index
      %c21 = arith.constant 21 : index
      %200 = vector.load %alloca[%c0_58, %c0_59, %c0_60, %c21] : memref<1x4x16x26xf32, #tpu.memory_space<vmem>>, vector<1x4x16x5xf32>
      tpu.vector_store %alloca[%c0_58, %c0_59, %c0_60, %c21], %199 {strides = array<i32>} : memref<1x4x16x26xf32, #tpu.memory_space<vmem>>, vector<1x4x16x5xf32>,
      %c0_61 = arith.constant 0 : index
      %c0_62 = arith.constant 0 : index
      %c0_63 = arith.constant 0 : index
      %c5 = arith.constant 5 : index
      %201 = vector.load %alloca[%c0_61, %c0_62, %c0_63, %c5] : memref<1x4x16x26xf32, #tpu.memory_space<vmem>>, vector<1x3x16x16xf32>
      tpu.vector_store %alloca[%c0_61, %c0_62, %c0_63, %c5], %0 {strides = array<i32>} : memref<1x4x16x26xf32, #tpu.memory_space<vmem>>, vector<1x3x16x16xf32>,
      %c0_64 = arith.constant 0 : index
      %c3 = arith.constant 3 : index
      %c0_65 = arith.constant 0 : index
      %c5_66 = arith.constant 5 : index
      %202 = vector.load %alloca[%c0_64, %c3, %c0_65, %c5_66] : memref<1x4x16x26xf32, #tpu.memory_space<vmem>>, vector<1x1x16x16xf32>
      tpu.vector_store %alloca[%c0_64, %c3, %c0_65, %c5_66], %2 {strides = array<i32>} : memref<1x4x16x26xf32, #tpu.memory_space<vmem>>, vector<1x1x16x16xf32>,
      %cst_67 = arith.constant 0.000000e+00 : f32
      %203 = vector.broadcast %cst_67 : f32 to vector<1x4x16x16xf32>
      %cst_68 = arith.constant 0.000000e+00 : f32
      %204 = vector.broadcast %cst_68 : f32 to vector<1x1x16x16xf32>
      %205 = arith.cmpf oeq, %17, %204 : vector<1x1x16x16xf32>
      %cst_69 = arith.constant 1.000000e+00 : f32
      %206 = vector.broadcast %cst_69 : f32 to vector<1x1x16x16xf32>
      %207 = arith.subf %206, %18 : vector<1x1x16x16xf32>
      %cst_70 = arith.constant 0.000000e+00 : f32
      %208 = vector.broadcast %cst_70 : f32 to vector<1x1x16x16xf32>
      %209 = arith.select %205, %207, %208 : vector<1x1x16x16xi1>, vector<1x1x16x16xf32>
      %cst_71 = arith.constant -1.000000e+00 : f32
      %210 = vector.broadcast %cst_71 : f32 to vector<1x1x16x16xf32>
      %211 = arith.cmpf oeq, %17, %210 : vector<1x1x16x16xf32>
      %cst_72 = arith.constant 0.000000e+00 : f32
      %212 = vector.broadcast %cst_72 : f32 to vector<1x1x16x16xf32>
      %213 = arith.select %211, %18, %212 : vector<1x1x16x16xi1>, vector<1x1x16x16xf32>
      %214 = arith.addf %209, %213 : vector<1x1x16x16xf32>
      %c0_73 = arith.constant 0 : index
      %c0_74 = arith.constant 0 : index
      %c0_75 = arith.constant 0 : index
      %c5_76 = arith.constant 5 : index
      %215 = vector.load %alloca[%c0_73, %c0_74, %c0_75, %c5_76] : memref<1x4x16x26xf32, #tpu.memory_space<vmem>>, vector<1x4x16x16xf32>
      %216 = vector.broadcast %214 : vector<1x1x16x16xf32> to vector<1x4x16x16xf32>
      %217 = arith.mulf %216, %215 : vector<1x4x16x16xf32>
      %218 = arith.addf %203, %217 : vector<1x4x16x16xf32>
      %cst_77 = arith.constant 1.000000e+00 : f32
      %219 = vector.broadcast %cst_77 : f32 to vector<1x1x16x16xf32>
      %220 = arith.cmpf oeq, %17, %219 : vector<1x1x16x16xf32>
      %cst_78 = arith.constant 1.000000e+00 : f32
      %221 = vector.broadcast %cst_78 : f32 to vector<1x1x16x16xf32>
      %222 = arith.subf %221, %18 : vector<1x1x16x16xf32>
      %cst_79 = arith.constant 0.000000e+00 : f32
      %223 = vector.broadcast %cst_79 : f32 to vector<1x1x16x16xf32>
      %224 = arith.select %220, %222, %223 : vector<1x1x16x16xi1>, vector<1x1x16x16xf32>
      %cst_80 = arith.constant 0.000000e+00 : f32
      %225 = vector.broadcast %cst_80 : f32 to vector<1x1x16x16xf32>
      %226 = arith.cmpf oeq, %17, %225 : vector<1x1x16x16xf32>
      %cst_81 = arith.constant 0.000000e+00 : f32
      %227 = vector.broadcast %cst_81 : f32 to vector<1x1x16x16xf32>
      %228 = arith.select %226, %18, %227 : vector<1x1x16x16xi1>, vector<1x1x16x16xf32>
      %229 = arith.addf %224, %228 : vector<1x1x16x16xf32>
      %c0_82 = arith.constant 0 : index
      %c0_83 = arith.constant 0 : index
      %c0_84 = arith.constant 0 : index
      %c6 = arith.constant 6 : index
      %230 = vector.load %alloca[%c0_82, %c0_83, %c0_84, %c6] : memref<1x4x16x26xf32, #tpu.memory_space<vmem>>, vector<1x4x16x16xf32>
      %231 = vector.broadcast %229 : vector<1x1x16x16xf32> to vector<1x4x16x16xf32>
      %232 = arith.mulf %231, %230 : vector<1x4x16x16xf32>
      %233 = arith.addf %218, %232 : vector<1x4x16x16xf32>
      %cst_85 = arith.constant 2.000000e+00 : f32
      %234 = vector.broadcast %cst_85 : f32 to vector<1x1x16x16xf32>
      %235 = arith.cmpf oeq, %17, %234 : vector<1x1x16x16xf32>
      %cst_86 = arith.constant 1.000000e+00 : f32
      %236 = vector.broadcast %cst_86 : f32 to vector<1x1x16x16xf32>
      %237 = arith.subf %236, %18 : vector<1x1x16x16xf32>
      %cst_87 = arith.constant 0.000000e+00 : f32
      %238 = vector.broadcast %cst_87 : f32 to vector<1x1x16x16xf32>
      %239 = arith.select %235, %237, %238 : vector<1x1x16x16xi1>, vector<1x1x16x16xf32>
      %cst_88 = arith.constant 1.000000e+00 : f32
      %240 = vector.broadcast %cst_88 : f32 to vector<1x1x16x16xf32>
      %241 = arith.cmpf oeq, %17, %240 : vector<1x1x16x16xf32>
      %cst_89 = arith.constant 0.000000e+00 : f32
      %242 = vector.broadcast %cst_89 : f32 to vector<1x1x16x16xf32>
      %243 = arith.select %241, %18, %242 : vector<1x1x16x16xi1>, vector<1x1x16x16xf32>
      %244 = arith.addf %239, %243 : vector<1x1x16x16xf32>
      %c0_90 = arith.constant 0 : index
      %c0_91 = arith.constant 0 : index
      %c0_92 = arith.constant 0 : index
      %c7 = arith.constant 7 : index
      %245 = vector.load %alloca[%c0_90, %c0_91, %c0_92, %c7] : memref<1x4x16x26xf32, #tpu.memory_space<vmem>>, vector<1x4x16x16xf32>
      %246 = vector.broadcast %244 : vector<1x1x16x16xf32> to vector<1x4x16x16xf32>
      %247 = arith.mulf %246, %245 : vector<1x4x16x16xf32>
      %248 = arith.addf %233, %247 : vector<1x4x16x16xf32>
      %cst_93 = arith.constant 3.000000e+00 : f32
      %249 = vector.broadcast %cst_93 : f32 to vector<1x1x16x16xf32>
      %250 = arith.cmpf oeq, %17, %249 : vector<1x1x16x16xf32>
      %cst_94 = arith.constant 1.000000e+00 : f32
      %251 = vector.broadcast %cst_94 : f32 to vector<1x1x16x16xf32>
      %252 = arith.subf %251, %18 : vector<1x1x16x16xf32>
      %cst_95 = arith.constant 0.000000e+00 : f32
      %253 = vector.broadcast %cst_95 : f32 to vector<1x1x16x16xf32>
      %254 = arith.select %250, %252, %253 : vector<1x1x16x16xi1>, vector<1x1x16x16xf32>
      %cst_96 = arith.constant 2.000000e+00 : f32
      %255 = vector.broadcast %cst_96 : f32 to vector<1x1x16x16xf32>
      %256 = arith.cmpf oeq, %17, %255 : vector<1x1x16x16xf32>
      %cst_97 = arith.constant 0.000000e+00 : f32
      %257 = vector.broadcast %cst_97 : f32 to vector<1x1x16x16xf32>
      %258 = arith.select %256, %18, %257 : vector<1x1x16x16xi1>, vector<1x1x16x16xf32>
      %259 = arith.addf %254, %258 : vector<1x1x16x16xf32>
      %c0_98 = arith.constant 0 : index
      %c0_99 = arith.constant 0 : index
      %c0_100 = arith.constant 0 : index
      %c8 = arith.constant 8 : index
      %260 = vector.load %alloca[%c0_98, %c0_99, %c0_100, %c8] : memref<1x4x16x26xf32, #tpu.memory_space<vmem>>, vector<1x4x16x16xf32>
      %261 = vector.broadcast %259 : vector<1x1x16x16xf32> to vector<1x4x16x16xf32>
      %262 = arith.mulf %261, %260 : vector<1x4x16x16xf32>
      %263 = arith.addf %248, %262 : vector<1x4x16x16xf32>
      %cst_101 = arith.constant 4.000000e+00 : f32
      %264 = vector.broadcast %cst_101 : f32 to vector<1x1x16x16xf32>
      %265 = arith.cmpf oeq, %17, %264 : vector<1x1x16x16xf32>
      %cst_102 = arith.constant 1.000000e+00 : f32
      %266 = vector.broadcast %cst_102 : f32 to vector<1x1x16x16xf32>
      %267 = arith.subf %266, %18 : vector<1x1x16x16xf32>
      %cst_103 = arith.constant 0.000000e+00 : f32
      %268 = vector.broadcast %cst_103 : f32 to vector<1x1x16x16xf32>
      %269 = arith.select %265, %267, %268 : vector<1x1x16x16xi1>, vector<1x1x16x16xf32>
      %cst_104 = arith.constant 3.000000e+00 : f32
      %270 = vector.broadcast %cst_104 : f32 to vector<1x1x16x16xf32>
      %271 = arith.cmpf oeq, %17, %270 : vector<1x1x16x16xf32>
      %cst_105 = arith.constant 0.000000e+00 : f32
      %272 = vector.broadcast %cst_105 : f32 to vector<1x1x16x16xf32>
      %273 = arith.select %271, %18, %272 : vector<1x1x16x16xi1>, vector<1x1x16x16xf32>
      %274 = arith.addf %269, %273 : vector<1x1x16x16xf32>
      %c0_106 = arith.constant 0 : index
      %c0_107 = arith.constant 0 : index
      %c0_108 = arith.constant 0 : index
      %c9 = arith.constant 9 : index
      %275 = vector.load %alloca[%c0_106, %c0_107, %c0_108, %c9] : memref<1x4x16x26xf32, #tpu.memory_space<vmem>>, vector<1x4x16x16xf32>
      %276 = vector.broadcast %274 : vector<1x1x16x16xf32> to vector<1x4x16x16xf32>
      %277 = arith.mulf %276, %275 : vector<1x4x16x16xf32>
      %278 = arith.addf %263, %277 : vector<1x4x16x16xf32>
      %cst_109 = arith.constant 5.000000e+00 : f32
      %279 = vector.broadcast %cst_109 : f32 to vector<1x1x16x16xf32>
      %280 = arith.cmpf oeq, %17, %279 : vector<1x1x16x16xf32>
      %cst_110 = arith.constant 1.000000e+00 : f32
      %281 = vector.broadcast %cst_110 : f32 to vector<1x1x16x16xf32>
      %282 = arith.subf %281, %18 : vector<1x1x16x16xf32>
      %cst_111 = arith.constant 0.000000e+00 : f32
      %283 = vector.broadcast %cst_111 : f32 to vector<1x1x16x16xf32>
      %284 = arith.select %280, %282, %283 : vector<1x1x16x16xi1>, vector<1x1x16x16xf32>
      %cst_112 = arith.constant 4.000000e+00 : f32
      %285 = vector.broadcast %cst_112 : f32 to vector<1x1x16x16xf32>
      %286 = arith.cmpf oeq, %17, %285 : vector<1x1x16x16xf32>
      %cst_113 = arith.constant 0.000000e+00 : f32
      %287 = vector.broadcast %cst_113 : f32 to vector<1x1x16x16xf32>
      %288 = arith.select %286, %18, %287 : vector<1x1x16x16xi1>, vector<1x1x16x16xf32>
      %289 = arith.addf %284, %288 : vector<1x1x16x16xf32>
      %c0_114 = arith.constant 0 : index
      %c0_115 = arith.constant 0 : index
      %c0_116 = arith.constant 0 : index
      %c10 = arith.constant 10 : index
      %290 = vector.load %alloca[%c0_114, %c0_115, %c0_116, %c10] : memref<1x4x16x26xf32, #tpu.memory_space<vmem>>, vector<1x4x16x16xf32>
      %291 = vector.broadcast %289 : vector<1x1x16x16xf32> to vector<1x4x16x16xf32>
      %292 = arith.mulf %291, %290 : vector<1x4x16x16xf32>
      %293 = arith.addf %278, %292 : vector<1x4x16x16xf32>
      tpu.yield %293 : vector<1x4x16x16xf32>
    }) : () -> vector<1x4x16x16xf32>
    %20 = vector.extract_strided_slice %19 {offsets = [0, 0, 0, 0], sizes = [1, 3, 16, 16], strides = [1, 1, 1, 1]} : vector<1x4x16x16xf32> to vector<1x3x16x16xf32>
    %21 = vector.extract_strided_slice %19 {offsets = [0, 3, 0, 0], sizes = [1, 1, 16, 16], strides = [1, 1, 1, 1]} : vector<1x4x16x16xf32> to vector<1x1x16x16xf32>
    %22 = arith.subf %0, %11 : vector<1x3x16x16xf32>
    %23 = math.absf %22 : vector<1x3x16x16xf32>
    %24 = arith.subf %1, %20 : vector<1x3x16x16xf32>
    %25 = math.absf %24 : vector<1x3x16x16xf32>
    %26 = "tpu.region"() ({
      %alloca = memref.alloca() : memref<1x24x24x16xf32, #tpu.memory_space<vmem>>
      %197 = tpu.concatenate %0, %1, %11, %20 in 1 : vector<1x3x16x16xf32>, vector<1x3x16x16xf32>, vector<1x3x16x16xf32>, vector<1x3x16x16xf32> -> vector<1x12x16x16xf32>
      %198 = arith.mulf %197, %197 : vector<1x12x16x16xf32>
      %199 = tpu.concatenate %197, %198 in 1 : vector<1x12x16x16xf32>, vector<1x12x16x16xf32> -> vector<1x24x16x16xf32>
      %200 = tpu.iota {dimensions = array<i32: 0>} : vector<16x16xi32>
      %201 = tpu.iota {dimensions = array<i32: 1>} : vector<16x16xi32>
      %202 = arith.subi %200, %201 : vector<16x16xi32>
      %203 = math.absi %202 : vector<16x16xi32>
      %c4_i32_52 = arith.constant 4 : i32
      %204 = vector.broadcast %c4_i32_52 : i32 to vector<16x16xi32>
      %205 = arith.cmpi sle, %203, %204 : vector<16x16xi32>
      %206 = arith.extui %205 : vector<16x16xi1> to vector<16x16xi32>
      %207 = arith.sitofp %206 : vector<16x16xi32> to vector<16x16xf32>
      %208 = vector.shape_cast %199 : vector<1x24x16x16xf32> to vector<384x16xf32>
      %cst_53 = arith.constant dense<0.000000e+00> : vector<384x16xf32>
      %209 = tpu.matmul %208, %207, %cst_53 {dimension_numbers = #tpu.dot_dimension_numbers<[1], [0], [0], [1], [0, 0, 1, 1], [], []>} : vector<384x16xf32>, vector<16x16xf32>, vector<384x16xf32> -> vector<384x16xf32>
      %210 = vector.shape_cast %209 : vector<384x16xf32> to vector<1x24x16x16xf32>
      %cst_54 = arith.constant 0.000000e+00 : f32
      %211 = vector.broadcast %cst_54 : f32 to vector<1x24x4x16xf32>
      %c0_55 = arith.constant 0 : index
      %c0_56 = arith.constant 0 : index
      %c0_57 = arith.constant 0 : index
      %c0_58 = arith.constant 0 : index
      %212 = vector.load %alloca[%c0_55, %c0_56, %c0_57, %c0_58] : memref<1x24x24x16xf32, #tpu.memory_space<vmem>>, vector<1x24x4x16xf32>
      tpu.vector_store %alloca[%c0_55, %c0_56, %c0_57, %c0_58], %211 {strides = array<i32>} : memref<1x24x24x16xf32, #tpu.memory_space<vmem>>, vector<1x24x4x16xf32>,
      %cst_59 = arith.constant 0.000000e+00 : f32
      %213 = vector.broadcast %cst_59 : f32 to vector<1x24x4x16xf32>
      %c0_60 = arith.constant 0 : index
      %c0_61 = arith.constant 0 : index
      %c20 = arith.constant 20 : index
      %c0_62 = arith.constant 0 : index
      %214 = vector.load %alloca[%c0_60, %c0_61, %c20, %c0_62] : memref<1x24x24x16xf32, #tpu.memory_space<vmem>>, vector<1x24x4x16xf32>
      tpu.vector_store %alloca[%c0_60, %c0_61, %c20, %c0_62], %213 {strides = array<i32>} : memref<1x24x24x16xf32, #tpu.memory_space<vmem>>, vector<1x24x4x16xf32>,
      %c0_63 = arith.constant 0 : index
      %c0_64 = arith.constant 0 : index
      %c4 = arith.constant 4 : index
      %c0_65 = arith.constant 0 : index
      %215 = vector.load %alloca[%c0_63, %c0_64, %c4, %c0_65] : memref<1x24x24x16xf32, #tpu.memory_space<vmem>>, vector<1x24x16x16xf32>
      tpu.vector_store %alloca[%c0_63, %c0_64, %c4, %c0_65], %210 {strides = array<i32>} : memref<1x24x24x16xf32, #tpu.memory_space<vmem>>, vector<1x24x16x16xf32>,
      %c0_66 = arith.constant 0 : index
      %c0_67 = arith.constant 0 : index
      %c0_68 = arith.constant 0 : index
      %c0_69 = arith.constant 0 : index
      %216 = vector.load %alloca[%c0_66, %c0_67, %c0_68, %c0_69] : memref<1x24x24x16xf32, #tpu.memory_space<vmem>>, vector<1x24x16x16xf32>
      %c0_70 = arith.constant 0 : index
      %c0_71 = arith.constant 0 : index
      %c1 = arith.constant 1 : index
      %c0_72 = arith.constant 0 : index
      %217 = vector.load %alloca[%c0_70, %c0_71, %c1, %c0_72] : memref<1x24x24x16xf32, #tpu.memory_space<vmem>>, vector<1x24x16x16xf32>
      %218 = arith.addf %216, %217 : vector<1x24x16x16xf32>
      %c0_73 = arith.constant 0 : index
      %c0_74 = arith.constant 0 : index
      %c2 = arith.constant 2 : index
      %c0_75 = arith.constant 0 : index
      %219 = vector.load %alloca[%c0_73, %c0_74, %c2, %c0_75] : memref<1x24x24x16xf32, #tpu.memory_space<vmem>>, vector<1x24x16x16xf32>
      %220 = arith.addf %218, %219 : vector<1x24x16x16xf32>
      %c0_76 = arith.constant 0 : index
      %c0_77 = arith.constant 0 : index
      %c3 = arith.constant 3 : index
      %c0_78 = arith.constant 0 : index
      %221 = vector.load %alloca[%c0_76, %c0_77, %c3, %c0_78] : memref<1x24x24x16xf32, #tpu.memory_space<vmem>>, vector<1x24x16x16xf32>
      %222 = arith.addf %220, %221 : vector<1x24x16x16xf32>
      %c0_79 = arith.constant 0 : index
      %c0_80 = arith.constant 0 : index
      %c4_81 = arith.constant 4 : index
      %c0_82 = arith.constant 0 : index
      %223 = vector.load %alloca[%c0_79, %c0_80, %c4_81, %c0_82] : memref<1x24x24x16xf32, #tpu.memory_space<vmem>>, vector<1x24x16x16xf32>
      %224 = arith.addf %222, %223 : vector<1x24x16x16xf32>
      %c0_83 = arith.constant 0 : index
      %c0_84 = arith.constant 0 : index
      %c5 = arith.constant 5 : index
      %c0_85 = arith.constant 0 : index
      %225 = vector.load %alloca[%c0_83, %c0_84, %c5, %c0_85] : memref<1x24x24x16xf32, #tpu.memory_space<vmem>>, vector<1x24x16x16xf32>
      %226 = arith.addf %224, %225 : vector<1x24x16x16xf32>
      %c0_86 = arith.constant 0 : index
      %c0_87 = arith.constant 0 : index
      %c6 = arith.constant 6 : index
      %c0_88 = arith.constant 0 : index
      %227 = vector.load %alloca[%c0_86, %c0_87, %c6, %c0_88] : memref<1x24x24x16xf32, #tpu.memory_space<vmem>>, vector<1x24x16x16xf32>
      %228 = arith.addf %226, %227 : vector<1x24x16x16xf32>
      %c0_89 = arith.constant 0 : index
      %c0_90 = arith.constant 0 : index
      %c7 = arith.constant 7 : index
      %c0_91 = arith.constant 0 : index
      %229 = vector.load %alloca[%c0_89, %c0_90, %c7, %c0_91] : memref<1x24x24x16xf32, #tpu.memory_space<vmem>>, vector<1x24x16x16xf32>
      %230 = arith.addf %228, %229 : vector<1x24x16x16xf32>
      %c0_92 = arith.constant 0 : index
      %c0_93 = arith.constant 0 : index
      %c8 = arith.constant 8 : index
      %c0_94 = arith.constant 0 : index
      %231 = vector.load %alloca[%c0_92, %c0_93, %c8, %c0_94] : memref<1x24x24x16xf32, #tpu.memory_space<vmem>>, vector<1x24x16x16xf32>
      %232 = arith.addf %230, %231 : vector<1x24x16x16xf32>
      %cst_95 = arith.constant 0.0123456791 : f32
      %233 = vector.broadcast %cst_95 : f32 to vector<1x24x16x16xf32>
      %234 = arith.mulf %232, %233 : vector<1x24x16x16xf32>
      tpu.yield %234 : vector<1x24x16x16xf32>
    }) : () -> vector<1x24x16x16xf32>
    %27 = vector.extract_strided_slice %26 {offsets = [0, 0, 0, 0], sizes = [1, 12, 16, 16], strides = [1, 1, 1, 1]} : vector<1x24x16x16xf32> to vector<1x12x16x16xf32>
    %28 = vector.extract_strided_slice %26 {offsets = [0, 12, 0, 0], sizes = [1, 12, 16, 16], strides = [1, 1, 1, 1]} : vector<1x24x16x16xf32> to vector<1x12x16x16xf32>
    %29 = arith.mulf %27, %27 : vector<1x12x16x16xf32>
    %30 = arith.subf %28, %29 : vector<1x12x16x16xf32>
    %cst_18 = arith.constant 0.000000e+00 : f32
    %31 = vector.broadcast %cst_18 : f32 to vector<1x12x16x16xf32>
    %32 = arith.maximumf %30, %31 : vector<1x12x16x16xf32>
    %33 = math.sqrt %32 : vector<1x12x16x16xf32>
    %cst_19 = arith.constant 1.012500e+00 : f32
    %34 = vector.broadcast %cst_19 : f32 to vector<1x12x16x16xf32>
    %35 = arith.mulf %33, %34 : vector<1x12x16x16xf32>
    %cst_20 = arith.constant 9.99999974E-6 : f32
    %36 = vector.broadcast %cst_20 : f32 to vector<1x12x16x16xf32>
    %37 = arith.addf %35, %36 : vector<1x12x16x16xf32>
    %38 = tpu.reciprocal %37 {approx = true} : vector<1x12x16x16xf32> -> vector<1x12x16x16xf32>
    %39 = vector.extract_strided_slice %27 {offsets = [0, 0, 0, 0], sizes = [1, 3, 16, 16], strides = [1, 1, 1, 1]} : vector<1x12x16x16xf32> to vector<1x3x16x16xf32>
    %40 = arith.subf %0, %39 : vector<1x3x16x16xf32>
    %41 = vector.extract_strided_slice %38 {offsets = [0, 0, 0, 0], sizes = [1, 3, 16, 16], strides = [1, 1, 1, 1]} : vector<1x12x16x16xf32> to vector<1x3x16x16xf32>
    %42 = arith.mulf %40, %41 : vector<1x3x16x16xf32>
    %43 = vector.extract_strided_slice %27 {offsets = [0, 3, 0, 0], sizes = [1, 3, 16, 16], strides = [1, 1, 1, 1]} : vector<1x12x16x16xf32> to vector<1x3x16x16xf32>
    %44 = arith.subf %1, %43 : vector<1x3x16x16xf32>
    %45 = vector.extract_strided_slice %38 {offsets = [0, 3, 0, 0], sizes = [1, 3, 16, 16], strides = [1, 1, 1, 1]} : vector<1x12x16x16xf32> to vector<1x3x16x16xf32>
    %46 = arith.mulf %44, %45 : vector<1x3x16x16xf32>
    %47 = vector.extract_strided_slice %27 {offsets = [0, 6, 0, 0], sizes = [1, 3, 16, 16], strides = [1, 1, 1, 1]} : vector<1x12x16x16xf32> to vector<1x3x16x16xf32>
    %48 = arith.subf %11, %47 : vector<1x3x16x16xf32>
    %49 = vector.extract_strided_slice %38 {offsets = [0, 6, 0, 0], sizes = [1, 3, 16, 16], strides = [1, 1, 1, 1]} : vector<1x12x16x16xf32> to vector<1x3x16x16xf32>
    %50 = arith.mulf %48, %49 : vector<1x3x16x16xf32>
    %51 = vector.extract_strided_slice %27 {offsets = [0, 9, 0, 0], sizes = [1, 3, 16, 16], strides = [1, 1, 1, 1]} : vector<1x12x16x16xf32> to vector<1x3x16x16xf32>
    %52 = arith.subf %20, %51 : vector<1x3x16x16xf32>
    %53 = vector.extract_strided_slice %38 {offsets = [0, 9, 0, 0], sizes = [1, 3, 16, 16], strides = [1, 1, 1, 1]} : vector<1x12x16x16xf32> to vector<1x3x16x16xf32>
    %54 = arith.mulf %52, %53 : vector<1x3x16x16xf32>
    %55 = arith.subf %42, %50 : vector<1x3x16x16xf32>
    %56 = vector.extract_strided_slice %35 {offsets = [0, 0, 0, 0], sizes = [1, 3, 16, 16], strides = [1, 1, 1, 1]} : vector<1x12x16x16xf32> to vector<1x3x16x16xf32>
    %57 = arith.mulf %55, %56 : vector<1x3x16x16xf32>
    %58 = math.absf %57 : vector<1x3x16x16xf32>
    %59 = arith.subf %46, %54 : vector<1x3x16x16xf32>
    %60 = vector.extract_strided_slice %35 {offsets = [0, 3, 0, 0], sizes = [1, 3, 16, 16], strides = [1, 1, 1, 1]} : vector<1x12x16x16xf32> to vector<1x3x16x16xf32>
    %61 = arith.mulf %59, %60 : vector<1x3x16x16xf32>
    %62 = math.absf %61 : vector<1x3x16x16xf32>
    %63 = vector.shape_cast %0 : vector<1x3x16x16xf32> to vector<1x1x3x16x16xf32>
    %cst_21 = arith.constant dense<0.000000e+00> : vector<1xf32>
    %64 = vector.multi_reduction <add>, %63, %cst_21 [1, 2, 3, 4] : vector<1x1x3x16x16xf32> to vector<1xf32>
    %65 = vector.shape_cast %64 : vector<1xf32> to vector<1x1x1x1x1xf32>
    %66 = vector.extract %65[0, 0, 0, 0, 0] : f32 from vector<1x1x1x1x1xf32>
    %cst_22 = arith.constant 7.680000e+02 : f32
    %67 = arith.divf %66, %cst_22 : f32
    %68 = vector.broadcast %67 : f32 to vector<1x3x16x16xf32>
    %69 = arith.subf %0, %68 : vector<1x3x16x16xf32>
    %cst_23 = arith.constant 5.000000e-01 : f32
    %70 = vector.broadcast %cst_23 : f32 to vector<1x3x16x16xf32>
    %71 = arith.mulf %69, %70 : vector<1x3x16x16xf32>
    %72 = math.exp %71 : vector<1x3x16x16xf32>
    %73 = vector.broadcast %67 : f32 to vector<1x3x16x16xf32>
    %74 = arith.subf %73, %0 : vector<1x3x16x16xf32>
    %cst_24 = arith.constant 5.000000e-01 : f32
    %75 = vector.broadcast %cst_24 : f32 to vector<1x3x16x16xf32>
    %76 = arith.mulf %74, %75 : vector<1x3x16x16xf32>
    %77 = math.exp %76 : vector<1x3x16x16xf32>
    %cst_25 = arith.constant 0.000000e+00 : f32
    %78 = arith.subf %cst_25, %67 : f32
    %cst_26 = arith.constant 5.000000e-01 : f32
    %79 = arith.mulf %78, %cst_26 : f32
    %80 = math.exp %79 : f32
    %cst_27 = arith.constant 5.000000e-01 : f32
    %81 = arith.mulf %67, %cst_27 : f32
    %82 = math.exp %81 : f32
    %83 = "tpu.region"() ({
      %alloca = memref.alloca() : memref<1x6x28x28xf32, #tpu.memory_space<vmem>>
      %alloca_52 = memref.alloca() : memref<1x6x28x28xf32, #tpu.memory_space<vmem>>
      %197 = vector.broadcast %80 : f32 to vector<1x3x6x28xf32>
      %c0_53 = arith.constant 0 : index
      %c0_54 = arith.constant 0 : index
      %c0_55 = arith.constant 0 : index
      %c0_56 = arith.constant 0 : index
      %198 = vector.load %alloca[%c0_53, %c0_54, %c0_55, %c0_56] : memref<1x6x28x28xf32, #tpu.memory_space<vmem>>, vector<1x3x6x28xf32>
      tpu.vector_store %alloca[%c0_53, %c0_54, %c0_55, %c0_56], %197 {strides = array<i32>} : memref<1x6x28x28xf32, #tpu.memory_space<vmem>>, vector<1x3x6x28xf32>,
      %199 = vector.broadcast %82 : f32 to vector<1x3x6x28xf32>
      %c0_57 = arith.constant 0 : index
      %c3 = arith.constant 3 : index
      %c0_58 = arith.constant 0 : index
      %c0_59 = arith.constant 0 : index
      %200 = vector.load %alloca[%c0_57, %c3, %c0_58, %c0_59] : memref<1x6x28x28xf32, #tpu.memory_space<vmem>>, vector<1x3x6x28xf32>
      tpu.vector_store %alloca[%c0_57, %c3, %c0_58, %c0_59], %199 {strides = array<i32>} : memref<1x6x28x28xf32, #tpu.memory_space<vmem>>, vector<1x3x6x28xf32>,
      %201 = vector.broadcast %80 : f32 to vector<1x3x6x28xf32>
      %c0_60 = arith.constant 0 : index
      %c0_61 = arith.constant 0 : index
      %c22 = arith.constant 22 : index
      %c0_62 = arith.constant 0 : index
      %202 = vector.load %alloca[%c0_60, %c0_61, %c22, %c0_62] : memref<1x6x28x28xf32, #tpu.memory_space<vmem>>, vector<1x3x6x28xf32>
      tpu.vector_store %alloca[%c0_60, %c0_61, %c22, %c0_62], %201 {strides = array<i32>} : memref<1x6x28x28xf32, #tpu.memory_space<vmem>>, vector<1x3x6x28xf32>,
      %203 = vector.broadcast %82 : f32 to vector<1x3x6x28xf32>
      %c0_63 = arith.constant 0 : index
      %c3_64 = arith.constant 3 : index
      %c22_65 = arith.constant 22 : index
      %c0_66 = arith.constant 0 : index
      %204 = vector.load %alloca[%c0_63, %c3_64, %c22_65, %c0_66] : memref<1x6x28x28xf32, #tpu.memory_space<vmem>>, vector<1x3x6x28xf32>
      tpu.vector_store %alloca[%c0_63, %c3_64, %c22_65, %c0_66], %203 {strides = array<i32>} : memref<1x6x28x28xf32, #tpu.memory_space<vmem>>, vector<1x3x6x28xf32>,
      %205 = vector.broadcast %80 : f32 to vector<1x3x16x6xf32>
      %c0_67 = arith.constant 0 : index
      %c0_68 = arith.constant 0 : index
      %c6 = arith.constant 6 : index
      %c0_69 = arith.constant 0 : index
      %206 = vector.load %alloca[%c0_67, %c0_68, %c6, %c0_69] : memref<1x6x28x28xf32, #tpu.memory_space<vmem>>, vector<1x3x16x6xf32>
      tpu.vector_store %alloca[%c0_67, %c0_68, %c6, %c0_69], %205 {strides = array<i32>} : memref<1x6x28x28xf32, #tpu.memory_space<vmem>>, vector<1x3x16x6xf32>,
      %207 = vector.broadcast %82 : f32 to vector<1x3x16x6xf32>
      %c0_70 = arith.constant 0 : index
      %c3_71 = arith.constant 3 : index
      %c6_72 = arith.constant 6 : index
      %c0_73 = arith.constant 0 : index
      %208 = vector.load %alloca[%c0_70, %c3_71, %c6_72, %c0_73] : memref<1x6x28x28xf32, #tpu.memory_space<vmem>>, vector<1x3x16x6xf32>
      tpu.vector_store %alloca[%c0_70, %c3_71, %c6_72, %c0_73], %207 {strides = array<i32>} : memref<1x6x28x28xf32, #tpu.memory_space<vmem>>, vector<1x3x16x6xf32>,
      %209 = vector.broadcast %80 : f32 to vector<1x3x16x6xf32>
      %c0_74 = arith.constant 0 : index
      %c0_75 = arith.constant 0 : index
      %c6_76 = arith.constant 6 : index
      %c22_77 = arith.constant 22 : index
      %210 = vector.load %alloca[%c0_74, %c0_75, %c6_76, %c22_77] : memref<1x6x28x28xf32, #tpu.memory_space<vmem>>, vector<1x3x16x6xf32>
      tpu.vector_store %alloca[%c0_74, %c0_75, %c6_76, %c22_77], %209 {strides = array<i32>} : memref<1x6x28x28xf32, #tpu.memory_space<vmem>>, vector<1x3x16x6xf32>,
      %211 = vector.broadcast %82 : f32 to vector<1x3x16x6xf32>
      %c0_78 = arith.constant 0 : index
      %c3_79 = arith.constant 3 : index
      %c6_80 = arith.constant 6 : index
      %c22_81 = arith.constant 22 : index
      %212 = vector.load %alloca[%c0_78, %c3_79, %c6_80, %c22_81] : memref<1x6x28x28xf32, #tpu.memory_space<vmem>>, vector<1x3x16x6xf32>
      tpu.vector_store %alloca[%c0_78, %c3_79, %c6_80, %c22_81], %211 {strides = array<i32>} : memref<1x6x28x28xf32, #tpu.memory_space<vmem>>, vector<1x3x16x6xf32>,
      %c0_82 = arith.constant 0 : index
      %c0_83 = arith.constant 0 : index
      %c6_84 = arith.constant 6 : index
      %c6_85 = arith.constant 6 : index
      %213 = vector.load %alloca[%c0_82, %c0_83, %c6_84, %c6_85] : memref<1x6x28x28xf32, #tpu.memory_space<vmem>>, vector<1x3x16x16xf32>
      tpu.vector_store %alloca[%c0_82, %c0_83, %c6_84, %c6_85], %72 {strides = array<i32>} : memref<1x6x28x28xf32, #tpu.memory_space<vmem>>, vector<1x3x16x16xf32>,
      %c0_86 = arith.constant 0 : index
      %c3_87 = arith.constant 3 : index
      %c6_88 = arith.constant 6 : index
      %c6_89 = arith.constant 6 : index
      %214 = vector.load %alloca[%c0_86, %c3_87, %c6_88, %c6_89] : memref<1x6x28x28xf32, #tpu.memory_space<vmem>>, vector<1x3x16x16xf32>
      tpu.vector_store %alloca[%c0_86, %c3_87, %c6_88, %c6_89], %77 {strides = array<i32>} : memref<1x6x28x28xf32, #tpu.memory_space<vmem>>, vector<1x3x16x16xf32>,
      %cst_90 = arith.constant 0.000000e+00 : f32
      %215 = vector.broadcast %cst_90 : f32 to vector<1x6x6x28xf32>
      %c0_91 = arith.constant 0 : index
      %c0_92 = arith.constant 0 : index
      %c0_93 = arith.constant 0 : index
      %c0_94 = arith.constant 0 : index
      %216 = vector.load %alloca_52[%c0_91, %c0_92, %c0_93, %c0_94] : memref<1x6x28x28xf32, #tpu.memory_space<vmem>>, vector<1x6x6x28xf32>
      tpu.vector_store %alloca_52[%c0_91, %c0_92, %c0_93, %c0_94], %215 {strides = array<i32>} : memref<1x6x28x28xf32, #tpu.memory_space<vmem>>, vector<1x6x6x28xf32>,
      %cst_95 = arith.constant 0.000000e+00 : f32
      %217 = vector.broadcast %cst_95 : f32 to vector<1x6x6x28xf32>
      %c0_96 = arith.constant 0 : index
      %c0_97 = arith.constant 0 : index
      %c22_98 = arith.constant 22 : index
      %c0_99 = arith.constant 0 : index
      %218 = vector.load %alloca_52[%c0_96, %c0_97, %c22_98, %c0_99] : memref<1x6x28x28xf32, #tpu.memory_space<vmem>>, vector<1x6x6x28xf32>
      tpu.vector_store %alloca_52[%c0_96, %c0_97, %c22_98, %c0_99], %217 {strides = array<i32>} : memref<1x6x28x28xf32, #tpu.memory_space<vmem>>, vector<1x6x6x28xf32>,
      %cst_100 = arith.constant 0.000000e+00 : f32
      %219 = vector.broadcast %cst_100 : f32 to vector<1x6x16x6xf32>
      %c0_101 = arith.constant 0 : index
      %c0_102 = arith.constant 0 : index
      %c6_103 = arith.constant 6 : index
      %c0_104 = arith.constant 0 : index
      %220 = vector.load %alloca_52[%c0_101, %c0_102, %c6_103, %c0_104] : memref<1x6x28x28xf32, #tpu.memory_space<vmem>>, vector<1x6x16x6xf32>
      tpu.vector_store %alloca_52[%c0_101, %c0_102, %c6_103, %c0_104], %219 {strides = array<i32>} : memref<1x6x28x28xf32, #tpu.memory_space<vmem>>, vector<1x6x16x6xf32>,
      %cst_105 = arith.constant 0.000000e+00 : f32
      %221 = vector.broadcast %cst_105 : f32 to vector<1x6x16x6xf32>
      %c0_106 = arith.constant 0 : index
      %c0_107 = arith.constant 0 : index
      %c6_108 = arith.constant 6 : index
      %c22_109 = arith.constant 22 : index
      %222 = vector.load %alloca_52[%c0_106, %c0_107, %c6_108, %c22_109] : memref<1x6x28x28xf32, #tpu.memory_space<vmem>>, vector<1x6x16x6xf32>
      tpu.vector_store %alloca_52[%c0_106, %c0_107, %c6_108, %c22_109], %221 {strides = array<i32>} : memref<1x6x28x28xf32, #tpu.memory_space<vmem>>, vector<1x6x16x6xf32>,
      %c0_110 = arith.constant 0 : index
      %c0_111 = arith.constant 0 : index
      %c6_112 = arith.constant 6 : index
      %c6_113 = arith.constant 6 : index
      %223 = vector.load %alloca_52[%c0_110, %c0_111, %c6_112, %c6_113] : memref<1x6x28x28xf32, #tpu.memory_space<vmem>>, vector<1x3x16x16xf32>
      tpu.vector_store %alloca_52[%c0_110, %c0_111, %c6_112, %c6_113], %58 {strides = array<i32>} : memref<1x6x28x28xf32, #tpu.memory_space<vmem>>, vector<1x3x16x16xf32>,
      %c0_114 = arith.constant 0 : index
      %c3_115 = arith.constant 3 : index
      %c6_116 = arith.constant 6 : index
      %c6_117 = arith.constant 6 : index
      %224 = vector.load %alloca_52[%c0_114, %c3_115, %c6_116, %c6_117] : memref<1x6x28x28xf32, #tpu.memory_space<vmem>>, vector<1x3x16x16xf32>
      tpu.vector_store %alloca_52[%c0_114, %c3_115, %c6_116, %c6_117], %62 {strides = array<i32>} : memref<1x6x28x28xf32, #tpu.memory_space<vmem>>, vector<1x3x16x16xf32>,
      %cst_118 = arith.constant 0.000000e+00 : f32
      %225 = vector.broadcast %cst_118 : f32 to vector<1x3x16x16xf32>
      %c0_i32_119 = arith.constant 0 : i32
      %c12_i32 = arith.constant 12 : i32
      %226 = arith.addi %c0_i32_119, %c12_i32 : i32
      %c1_i32_120 = arith.constant 1 : i32
      %227:3 = scf.for %arg6 = %c0_i32_119 to %226 step %c1_i32_120 iter_args(%arg7 = %225, %arg8 = %225, %arg9 = %225) -> (vector<1x3x16x16xf32>, vector<1x3x16x16xf32>, vector<1x3x16x16xf32>)  : i32 {
        %c0_122 = arith.constant 0 : index
        %c0_123 = arith.constant 0 : index
        %232 = arith.index_cast %arg6 : i32 to index
        %c0_124 = arith.constant 0 : index
        %233 = vector.load %alloca[%c0_122, %c0_123, %232, %c0_124] : memref<1x6x28x28xf32, #tpu.memory_space<vmem>>, vector<1x6x16x28xf32>
        %c0_125 = arith.constant 0 : index
        %c0_126 = arith.constant 0 : index
        %234 = arith.index_cast %arg6 : i32 to index
        %c0_127 = arith.constant 0 : index
        %235 = vector.load %alloca_52[%c0_125, %c0_126, %234, %c0_127] : memref<1x6x28x28xf32, #tpu.memory_space<vmem>>, vector<1x6x16x28xf32>
        %236 = vector.extract_strided_slice %233 {offsets = [0, 3, 0, 0], sizes = [1, 3, 16, 16], strides = [1, 1, 1, 1]} : vector<1x6x16x28xf32> to vector<1x3x16x16xf32>
        %237 = arith.mulf %72, %236 : vector<1x3x16x16xf32>
        %238 = vector.extract_strided_slice %233 {offsets = [0, 0, 0, 0], sizes = [1, 3, 16, 16], strides = [1, 1, 1, 1]} : vector<1x6x16x28xf32> to vector<1x3x16x16xf32>
        %239 = arith.mulf %77, %238 : vector<1x3x16x16xf32>
        %240 = arith.minimumf %237, %239 : vector<1x3x16x16xf32>
        %241 = arith.addf %arg7, %240 : vector<1x3x16x16xf32>
        %242 = vector.extract_strided_slice %235 {offsets = [0, 0, 0, 0], sizes = [1, 3, 16, 16], strides = [1, 1, 1, 1]} : vector<1x6x16x28xf32> to vector<1x3x16x16xf32>
        %243 = arith.mulf %240, %242 : vector<1x3x16x16xf32>
        %244 = arith.addf %arg8, %243 : vector<1x3x16x16xf32>
        %245 = vector.extract_strided_slice %235 {offsets = [0, 3, 0, 0], sizes = [1, 3, 16, 16], strides = [1, 1, 1, 1]} : vector<1x6x16x28xf32> to vector<1x3x16x16xf32>
        %246 = arith.mulf %240, %245 : vector<1x3x16x16xf32>
        %247 = arith.addf %arg9, %246 : vector<1x3x16x16xf32>
        %248 = vector.extract_strided_slice %233 {offsets = [0, 3, 0, 1], sizes = [1, 3, 16, 16], strides = [1, 1, 1, 1]} : vector<1x6x16x28xf32> to vector<1x3x16x16xf32>
        %249 = arith.mulf %72, %248 : vector<1x3x16x16xf32>
        %250 = vector.extract_strided_slice %233 {offsets = [0, 0, 0, 1], sizes = [1, 3, 16, 16], strides = [1, 1, 1, 1]} : vector<1x6x16x28xf32> to vector<1x3x16x16xf32>
        %251 = arith.mulf %77, %250 : vector<1x3x16x16xf32>
        %252 = arith.minimumf %249, %251 : vector<1x3x16x16xf32>
        %253 = arith.addf %241, %252 : vector<1x3x16x16xf32>
        %254 = vector.extract_strided_slice %235 {offsets = [0, 0, 0, 1], sizes = [1, 3, 16, 16], strides = [1, 1, 1, 1]} : vector<1x6x16x28xf32> to vector<1x3x16x16xf32>
        %255 = arith.mulf %252, %254 : vector<1x3x16x16xf32>
        %256 = arith.addf %244, %255 : vector<1x3x16x16xf32>
        %257 = vector.extract_strided_slice %235 {offsets = [0, 3, 0, 1], sizes = [1, 3, 16, 16], strides = [1, 1, 1, 1]} : vector<1x6x16x28xf32> to vector<1x3x16x16xf32>
        %258 = arith.mulf %252, %257 : vector<1x3x16x16xf32>
        %259 = arith.addf %247, %258 : vector<1x3x16x16xf32>
        %260 = vector.extract_strided_slice %233 {offsets = [0, 3, 0, 2], sizes = [1, 3, 16, 16], strides = [1, 1, 1, 1]} : vector<1x6x16x28xf32> to vector<1x3x16x16xf32>
        %261 = arith.mulf %72, %260 : vector<1x3x16x16xf32>
        %262 = vector.extract_strided_slice %233 {offsets = [0, 0, 0, 2], sizes = [1, 3, 16, 16], strides = [1, 1, 1, 1]} : vector<1x6x16x28xf32> to vector<1x3x16x16xf32>
        %263 = arith.mulf %77, %262 : vector<1x3x16x16xf32>
        %264 = arith.minimumf %261, %263 : vector<1x3x16x16xf32>
        %265 = arith.addf %253, %264 : vector<1x3x16x16xf32>
        %266 = vector.extract_strided_slice %235 {offsets = [0, 0, 0, 2], sizes = [1, 3, 16, 16], strides = [1, 1, 1, 1]} : vector<1x6x16x28xf32> to vector<1x3x16x16xf32>
        %267 = arith.mulf %264, %266 : vector<1x3x16x16xf32>
        %268 = arith.addf %256, %267 : vector<1x3x16x16xf32>
        %269 = vector.extract_strided_slice %235 {offsets = [0, 3, 0, 2], sizes = [1, 3, 16, 16], strides = [1, 1, 1, 1]} : vector<1x6x16x28xf32> to vector<1x3x16x16xf32>
        %270 = arith.mulf %264, %269 : vector<1x3x16x16xf32>
        %271 = arith.addf %259, %270 : vector<1x3x16x16xf32>
        %272 = vector.extract_strided_slice %233 {offsets = [0, 3, 0, 3], sizes = [1, 3, 16, 16], strides = [1, 1, 1, 1]} : vector<1x6x16x28xf32> to vector<1x3x16x16xf32>
        %273 = arith.mulf %72, %272 : vector<1x3x16x16xf32>
        %274 = vector.extract_strided_slice %233 {offsets = [0, 0, 0, 3], sizes = [1, 3, 16, 16], strides = [1, 1, 1, 1]} : vector<1x6x16x28xf32> to vector<1x3x16x16xf32>
        %275 = arith.mulf %77, %274 : vector<1x3x16x16xf32>
        %276 = arith.minimumf %273, %275 : vector<1x3x16x16xf32>
        %277 = arith.addf %265, %276 : vector<1x3x16x16xf32>
        %278 = vector.extract_strided_slice %235 {offsets = [0, 0, 0, 3], sizes = [1, 3, 16, 16], strides = [1, 1, 1, 1]} : vector<1x6x16x28xf32> to vector<1x3x16x16xf32>
        %279 = arith.mulf %276, %278 : vector<1x3x16x16xf32>
        %280 = arith.addf %268, %279 : vector<1x3x16x16xf32>
        %281 = vector.extract_strided_slice %235 {offsets = [0, 3, 0, 3], sizes = [1, 3, 16, 16], strides = [1, 1, 1, 1]} : vector<1x6x16x28xf32> to vector<1x3x16x16xf32>
        %282 = arith.mulf %276, %281 : vector<1x3x16x16xf32>
        %283 = arith.addf %271, %282 : vector<1x3x16x16xf32>
        %284 = vector.extract_strided_slice %233 {offsets = [0, 3, 0, 4], sizes = [1, 3, 16, 16], strides = [1, 1, 1, 1]} : vector<1x6x16x28xf32> to vector<1x3x16x16xf32>
        %285 = arith.mulf %72, %284 : vector<1x3x16x16xf32>
        %286 = vector.extract_strided_slice %233 {offsets = [0, 0, 0, 4], sizes = [1, 3, 16, 16], strides = [1, 1, 1, 1]} : vector<1x6x16x28xf32> to vector<1x3x16x16xf32>
        %287 = arith.mulf %77, %286 : vector<1x3x16x16xf32>
        %288 = arith.minimumf %285, %287 : vector<1x3x16x16xf32>
        %289 = arith.addf %277, %288 : vector<1x3x16x16xf32>
        %290 = vector.extract_strided_slice %235 {offsets = [0, 0, 0, 4], sizes = [1, 3, 16, 16], strides = [1, 1, 1, 1]} : vector<1x6x16x28xf32> to vector<1x3x16x16xf32>
        %291 = arith.mulf %288, %290 : vector<1x3x16x16xf32>
        %292 = arith.addf %280, %291 : vector<1x3x16x16xf32>
        %293 = vector.extract_strided_slice %235 {offsets = [0, 3, 0, 4], sizes = [1, 3, 16, 16], strides = [1, 1, 1, 1]} : vector<1x6x16x28xf32> to vector<1x3x16x16xf32>
        %294 = arith.mulf %288, %293 : vector<1x3x16x16xf32>
        %295 = arith.addf %283, %294 : vector<1x3x16x16xf32>
        %296 = vector.extract_strided_slice %233 {offsets = [0, 3, 0, 5], sizes = [1, 3, 16, 16], strides = [1, 1, 1, 1]} : vector<1x6x16x28xf32> to vector<1x3x16x16xf32>
        %297 = arith.mulf %72, %296 : vector<1x3x16x16xf32>
        %298 = vector.extract_strided_slice %233 {offsets = [0, 0, 0, 5], sizes = [1, 3, 16, 16], strides = [1, 1, 1, 1]} : vector<1x6x16x28xf32> to vector<1x3x16x16xf32>
        %299 = arith.mulf %77, %298 : vector<1x3x16x16xf32>
        %300 = arith.minimumf %297, %299 : vector<1x3x16x16xf32>
        %301 = arith.addf %289, %300 : vector<1x3x16x16xf32>
        %302 = vector.extract_strided_slice %235 {offsets = [0, 0, 0, 5], sizes = [1, 3, 16, 16], strides = [1, 1, 1, 1]} : vector<1x6x16x28xf32> to vector<1x3x16x16xf32>
        %303 = arith.mulf %300, %302 : vector<1x3x16x16xf32>
        %304 = arith.addf %292, %303 : vector<1x3x16x16xf32>
        %305 = vector.extract_strided_slice %235 {offsets = [0, 3, 0, 5], sizes = [1, 3, 16, 16], strides = [1, 1, 1, 1]} : vector<1x6x16x28xf32> to vector<1x3x16x16xf32>
        %306 = arith.mulf %300, %305 : vector<1x3x16x16xf32>
        %307 = arith.addf %295, %306 : vector<1x3x16x16xf32>
        %308 = vector.extract_strided_slice %233 {offsets = [0, 3, 0, 6], sizes = [1, 3, 16, 16], strides = [1, 1, 1, 1]} : vector<1x6x16x28xf32> to vector<1x3x16x16xf32>
        %309 = arith.mulf %72, %308 : vector<1x3x16x16xf32>
        %310 = vector.extract_strided_slice %233 {offsets = [0, 0, 0, 6], sizes = [1, 3, 16, 16], strides = [1, 1, 1, 1]} : vector<1x6x16x28xf32> to vector<1x3x16x16xf32>
        %311 = arith.mulf %77, %310 : vector<1x3x16x16xf32>
        %312 = arith.minimumf %309, %311 : vector<1x3x16x16xf32>
        %313 = arith.addf %301, %312 : vector<1x3x16x16xf32>
        %314 = vector.extract_strided_slice %235 {offsets = [0, 0, 0, 6], sizes = [1, 3, 16, 16], strides = [1, 1, 1, 1]} : vector<1x6x16x28xf32> to vector<1x3x16x16xf32>
        %315 = arith.mulf %312, %314 : vector<1x3x16x16xf32>
        %316 = arith.addf %304, %315 : vector<1x3x16x16xf32>
        %317 = vector.extract_strided_slice %235 {offsets = [0, 3, 0, 6], sizes = [1, 3, 16, 16], strides = [1, 1, 1, 1]} : vector<1x6x16x28xf32> to vector<1x3x16x16xf32>
        %318 = arith.mulf %312, %317 : vector<1x3x16x16xf32>
        %319 = arith.addf %307, %318 : vector<1x3x16x16xf32>
        %320 = vector.extract_strided_slice %233 {offsets = [0, 3, 0, 7], sizes = [1, 3, 16, 16], strides = [1, 1, 1, 1]} : vector<1x6x16x28xf32> to vector<1x3x16x16xf32>
        %321 = arith.mulf %72, %320 : vector<1x3x16x16xf32>
        %322 = vector.extract_strided_slice %233 {offsets = [0, 0, 0, 7], sizes = [1, 3, 16, 16], strides = [1, 1, 1, 1]} : vector<1x6x16x28xf32> to vector<1x3x16x16xf32>
        %323 = arith.mulf %77, %322 : vector<1x3x16x16xf32>
        %324 = arith.minimumf %321, %323 : vector<1x3x16x16xf32>
        %325 = arith.addf %313, %324 : vector<1x3x16x16xf32>
        %326 = vector.extract_strided_slice %235 {offsets = [0, 0, 0, 7], sizes = [1, 3, 16, 16], strides = [1, 1, 1, 1]} : vector<1x6x16x28xf32> to vector<1x3x16x16xf32>
        %327 = arith.mulf %324, %326 : vector<1x3x16x16xf32>
        %328 = arith.addf %316, %327 : vector<1x3x16x16xf32>
        %329 = vector.extract_strided_slice %235 {offsets = [0, 3, 0, 7], sizes = [1, 3, 16, 16], strides = [1, 1, 1, 1]} : vector<1x6x16x28xf32> to vector<1x3x16x16xf32>
        %330 = arith.mulf %324, %329 : vector<1x3x16x16xf32>
        %331 = arith.addf %319, %330 : vector<1x3x16x16xf32>
        %332 = vector.extract_strided_slice %233 {offsets = [0, 3, 0, 8], sizes = [1, 3, 16, 16], strides = [1, 1, 1, 1]} : vector<1x6x16x28xf32> to vector<1x3x16x16xf32>
        %333 = arith.mulf %72, %332 : vector<1x3x16x16xf32>
        %334 = vector.extract_strided_slice %233 {offsets = [0, 0, 0, 8], sizes = [1, 3, 16, 16], strides = [1, 1, 1, 1]} : vector<1x6x16x28xf32> to vector<1x3x16x16xf32>
        %335 = arith.mulf %77, %334 : vector<1x3x16x16xf32>
        %336 = arith.minimumf %333, %335 : vector<1x3x16x16xf32>
        %337 = arith.addf %325, %336 : vector<1x3x16x16xf32>
        %338 = vector.extract_strided_slice %235 {offsets = [0, 0, 0, 8], sizes = [1, 3, 16, 16], strides = [1, 1, 1, 1]} : vector<1x6x16x28xf32> to vector<1x3x16x16xf32>
        %339 = arith.mulf %336, %338 : vector<1x3x16x16xf32>
        %340 = arith.addf %328, %339 : vector<1x3x16x16xf32>
        %341 = vector.extract_strided_slice %235 {offsets = [0, 3, 0, 8], sizes = [1, 3, 16, 16], strides = [1, 1, 1, 1]} : vector<1x6x16x28xf32> to vector<1x3x16x16xf32>
        %342 = arith.mulf %336, %341 : vector<1x3x16x16xf32>
        %343 = arith.addf %331, %342 : vector<1x3x16x16xf32>
        %344 = vector.extract_strided_slice %233 {offsets = [0, 3, 0, 9], sizes = [1, 3, 16, 16], strides = [1, 1, 1, 1]} : vector<1x6x16x28xf32> to vector<1x3x16x16xf32>
        %345 = arith.mulf %72, %344 : vector<1x3x16x16xf32>
        %346 = vector.extract_strided_slice %233 {offsets = [0, 0, 0, 9], sizes = [1, 3, 16, 16], strides = [1, 1, 1, 1]} : vector<1x6x16x28xf32> to vector<1x3x16x16xf32>
        %347 = arith.mulf %77, %346 : vector<1x3x16x16xf32>
        %348 = arith.minimumf %345, %347 : vector<1x3x16x16xf32>
        %349 = arith.addf %337, %348 : vector<1x3x16x16xf32>
        %350 = vector.extract_strided_slice %235 {offsets = [0, 0, 0, 9], sizes = [1, 3, 16, 16], strides = [1, 1, 1, 1]} : vector<1x6x16x28xf32> to vector<1x3x16x16xf32>
        %351 = arith.mulf %348, %350 : vector<1x3x16x16xf32>
        %352 = arith.addf %340, %351 : vector<1x3x16x16xf32>
        %353 = vector.extract_strided_slice %235 {offsets = [0, 3, 0, 9], sizes = [1, 3, 16, 16], strides = [1, 1, 1, 1]} : vector<1x6x16x28xf32> to vector<1x3x16x16xf32>
        %354 = arith.mulf %348, %353 : vector<1x3x16x16xf32>
        %355 = arith.addf %343, %354 : vector<1x3x16x16xf32>
        %356 = vector.extract_strided_slice %233 {offsets = [0, 3, 0, 10], sizes = [1, 3, 16, 16], strides = [1, 1, 1, 1]} : vector<1x6x16x28xf32> to vector<1x3x16x16xf32>
        %357 = arith.mulf %72, %356 : vector<1x3x16x16xf32>
        %358 = vector.extract_strided_slice %233 {offsets = [0, 0, 0, 10], sizes = [1, 3, 16, 16], strides = [1, 1, 1, 1]} : vector<1x6x16x28xf32> to vector<1x3x16x16xf32>
        %359 = arith.mulf %77, %358 : vector<1x3x16x16xf32>
        %360 = arith.minimumf %357, %359 : vector<1x3x16x16xf32>
        %361 = arith.addf %349, %360 : vector<1x3x16x16xf32>
        %362 = vector.extract_strided_slice %235 {offsets = [0, 0, 0, 10], sizes = [1, 3, 16, 16], strides = [1, 1, 1, 1]} : vector<1x6x16x28xf32> to vector<1x3x16x16xf32>
        %363 = arith.mulf %360, %362 : vector<1x3x16x16xf32>
        %364 = arith.addf %352, %363 : vector<1x3x16x16xf32>
        %365 = vector.extract_strided_slice %235 {offsets = [0, 3, 0, 10], sizes = [1, 3, 16, 16], strides = [1, 1, 1, 1]} : vector<1x6x16x28xf32> to vector<1x3x16x16xf32>
        %366 = arith.mulf %360, %365 : vector<1x3x16x16xf32>
        %367 = arith.addf %355, %366 : vector<1x3x16x16xf32>
        %368 = vector.extract_strided_slice %233 {offsets = [0, 3, 0, 11], sizes = [1, 3, 16, 16], strides = [1, 1, 1, 1]} : vector<1x6x16x28xf32> to vector<1x3x16x16xf32>
        %369 = arith.mulf %72, %368 : vector<1x3x16x16xf32>
        %370 = vector.extract_strided_slice %233 {offsets = [0, 0, 0, 11], sizes = [1, 3, 16, 16], strides = [1, 1, 1, 1]} : vector<1x6x16x28xf32> to vector<1x3x16x16xf32>
        %371 = arith.mulf %77, %370 : vector<1x3x16x16xf32>
        %372 = arith.minimumf %369, %371 : vector<1x3x16x16xf32>
        %373 = arith.addf %361, %372 : vector<1x3x16x16xf32>
        %374 = vector.extract_strided_slice %235 {offsets = [0, 0, 0, 11], sizes = [1, 3, 16, 16], strides = [1, 1, 1, 1]} : vector<1x6x16x28xf32> to vector<1x3x16x16xf32>
        %375 = arith.mulf %372, %374 : vector<1x3x16x16xf32>
        %376 = arith.addf %364, %375 : vector<1x3x16x16xf32>
        %377 = vector.extract_strided_slice %235 {offsets = [0, 3, 0, 11], sizes = [1, 3, 16, 16], strides = [1, 1, 1, 1]} : vector<1x6x16x28xf32> to vector<1x3x16x16xf32>
        %378 = arith.mulf %372, %377 : vector<1x3x16x16xf32>
        %379 = arith.addf %367, %378 : vector<1x3x16x16xf32>
        scf.yield %373, %376, %379 : vector<1x3x16x16xf32>, vector<1x3x16x16xf32>, vector<1x3x16x16xf32>
      }
      %c12_i32_121 = arith.constant 12 : i32
      %228 = tpu.reciprocal %227#0 {approx = true} : vector<1x3x16x16xf32> -> vector<1x3x16x16xf32>
      %229 = arith.mulf %227#1, %228 : vector<1x3x16x16xf32>
      %230 = arith.mulf %227#2, %228 : vector<1x3x16x16xf32>
      %231 = tpu.concatenate %229, %230 in 1 : vector<1x3x16x16xf32>, vector<1x3x16x16xf32> -> vector<1x6x16x16xf32>
      tpu.yield %231 : vector<1x6x16x16xf32>
    }) : () -> vector<1x6x16x16xf32>
    %84 = vector.extract_strided_slice %83 {offsets = [0, 0, 0, 0], sizes = [1, 3, 16, 16], strides = [1, 1, 1, 1]} : vector<1x6x16x16xf32> to vector<1x3x16x16xf32>
    %85 = vector.extract_strided_slice %83 {offsets = [0, 3, 0, 0], sizes = [1, 3, 16, 16], strides = [1, 1, 1, 1]} : vector<1x6x16x16xf32> to vector<1x3x16x16xf32>
    %cst_28 = arith.constant 5.000000e-01 : f32
    %86 = vector.broadcast %cst_28 : f32 to vector<1x3x16x16xf32>
    %87 = arith.mulf %86, %23 : vector<1x3x16x16xf32>
    %cst_29 = arith.constant 5.000000e-01 : f32
    %88 = vector.broadcast %cst_29 : f32 to vector<1x3x16x16xf32>
    %89 = arith.mulf %88, %84 : vector<1x3x16x16xf32>
    %90 = arith.addf %87, %89 : vector<1x3x16x16xf32>
    %cst_30 = arith.constant 5.000000e-01 : f32
    %91 = vector.broadcast %cst_30 : f32 to vector<1x3x16x16xf32>
    %92 = arith.mulf %91, %25 : vector<1x3x16x16xf32>
    %cst_31 = arith.constant 5.000000e-01 : f32
    %93 = vector.broadcast %cst_31 : f32 to vector<1x3x16x16xf32>
    %94 = arith.mulf %93, %85 : vector<1x3x16x16xf32>
    %95 = arith.addf %92, %94 : vector<1x3x16x16xf32>
    %96 = arith.subf %2, %12 : vector<1x1x16x16xf32>
    %97 = math.absf %96 : vector<1x1x16x16xf32>
    %cst_32 = arith.constant 0.000000e+00 : f32
    %98 = vector.broadcast %cst_32 : f32 to vector<1x1x16x16xf32>
    %99 = arith.maximumf %97, %98 : vector<1x1x16x16xf32>
    %cst_33 = arith.constant -6.931000e-01 : f32
    %100 = vector.broadcast %cst_33 : f32 to vector<1x1x16x16xf32>
    %101 = arith.mulf %100, %99 : vector<1x1x16x16xf32>
    %102 = math.exp %101 : vector<1x1x16x16xf32>
    %103 = arith.subf %3, %21 : vector<1x1x16x16xf32>
    %104 = math.absf %103 : vector<1x1x16x16xf32>
    %cst_34 = arith.constant 0.000000e+00 : f32
    %105 = vector.broadcast %cst_34 : f32 to vector<1x1x16x16xf32>
    %106 = arith.maximumf %104, %105 : vector<1x1x16x16xf32>
    %cst_35 = arith.constant -6.931000e-01 : f32
    %107 = vector.broadcast %cst_35 : f32 to vector<1x1x16x16xf32>
    %108 = arith.mulf %107, %106 : vector<1x1x16x16xf32>
    %109 = math.exp %108 : vector<1x1x16x16xf32>
    %cst_36 = arith.constant 5.000000e-01 : f32
    %110 = vector.broadcast %cst_36 : f32 to vector<1x1x16x16xf32>
    %111 = arith.cmpf ogt, %102, %110 : vector<1x1x16x16xf32>
    %112 = arith.extui %111 : vector<1x1x16x16xi1> to vector<1x1x16x16xi32>
    %113 = arith.sitofp %112 : vector<1x1x16x16xi32> to vector<1x1x16x16xf32>
    %cst_37 = arith.constant 5.000000e-01 : f32
    %114 = vector.broadcast %cst_37 : f32 to vector<1x1x16x16xf32>
    %115 = arith.cmpf ogt, %109, %114 : vector<1x1x16x16xf32>
    %116 = arith.extui %115 : vector<1x1x16x16xi1> to vector<1x1x16x16xi32>
    %117 = arith.sitofp %116 : vector<1x1x16x16xi32> to vector<1x1x16x16xf32>
    %cst_38 = arith.constant 1.000000e+00 : f32
    %118 = vector.broadcast %cst_38 : f32 to vector<1x1x16x16xf32>
    %119 = arith.subf %118, %102 : vector<1x1x16x16xf32>
    %120 = arith.maximumf %119, %102 : vector<1x1x16x16xf32>
    %121 = arith.subf %119, %120 : vector<1x1x16x16xf32>
    %122 = math.exp %121 : vector<1x1x16x16xf32>
    %123 = arith.subf %102, %120 : vector<1x1x16x16xf32>
    %124 = math.exp %123 : vector<1x1x16x16xf32>
    %125 = arith.addf %122, %124 : vector<1x1x16x16xf32>
    %126 = math.log %125 : vector<1x1x16x16xf32>
    %127 = arith.addf %120, %126 : vector<1x1x16x16xf32>
    %128 = arith.subf %127, %102 : vector<1x1x16x16xf32>
    %129 = vector.shape_cast %128 : vector<1x1x16x16xf32> to vector<1x1x1x16x16xf32>
    %cst_39 = arith.constant dense<0.000000e+00> : vector<1xf32>
    %130 = vector.multi_reduction <add>, %129, %cst_39 [1, 2, 3, 4] : vector<1x1x1x16x16xf32> to vector<1xf32>
    %131 = vector.shape_cast %130 : vector<1xf32> to vector<1x1x1x1x1xf32>
    %132 = vector.extract %131[0, 0, 0, 0, 0] : f32 from vector<1x1x1x1x1xf32>
    %cst_40 = arith.constant 1.000000e+00 : f32
    %133 = vector.broadcast %cst_40 : f32 to vector<1x1x16x16xf32>
    %134 = arith.subf %133, %109 : vector<1x1x16x16xf32>
    %135 = arith.maximumf %134, %109 : vector<1x1x16x16xf32>
    %136 = arith.subf %134, %135 : vector<1x1x16x16xf32>
    %137 = math.exp %136 : vector<1x1x16x16xf32>
    %138 = arith.subf %109, %135 : vector<1x1x16x16xf32>
    %139 = math.exp %138 : vector<1x1x16x16xf32>
    %140 = arith.addf %137, %139 : vector<1x1x16x16xf32>
    %141 = math.log %140 : vector<1x1x16x16xf32>
    %142 = arith.addf %135, %141 : vector<1x1x16x16xf32>
    %143 = arith.subf %142, %109 : vector<1x1x16x16xf32>
    %144 = vector.shape_cast %143 : vector<1x1x16x16xf32> to vector<1x1x1x16x16xf32>
    %cst_41 = arith.constant dense<0.000000e+00> : vector<1xf32>
    %145 = vector.multi_reduction <add>, %144, %cst_41 [1, 2, 3, 4] : vector<1x1x1x16x16xf32> to vector<1xf32>
    %146 = vector.shape_cast %145 : vector<1xf32> to vector<1x1x1x1x1xf32>
    %147 = vector.extract %146[0, 0, 0, 0, 0] : f32 from vector<1x1x1x1x1xf32>
    %148 = vector.broadcast %113 : vector<1x1x16x16xf32> to vector<1x3x16x16xf32>
    %149 = arith.mulf %90, %148 : vector<1x3x16x16xf32>
    %150 = vector.shape_cast %149 : vector<1x3x16x16xf32> to vector<1x1x3x16x16xf32>
    %cst_42 = arith.constant dense<0.000000e+00> : vector<1xf32>
    %151 = vector.multi_reduction <add>, %150, %cst_42 [1, 2, 3, 4] : vector<1x1x3x16x16xf32> to vector<1xf32>
    %152 = vector.shape_cast %151 : vector<1xf32> to vector<1x1x1x1x1xf32>
    %153 = vector.extract %152[0, 0, 0, 0, 0] : f32 from vector<1x1x1x1x1xf32>
    %154 = vector.shape_cast %113 : vector<1x1x16x16xf32> to vector<1x1x1x16x16xf32>
    %cst_43 = arith.constant dense<0.000000e+00> : vector<1xf32>
    %155 = vector.multi_reduction <add>, %154, %cst_43 [1, 2, 3, 4] : vector<1x1x1x16x16xf32> to vector<1xf32>
    %156 = vector.shape_cast %155 : vector<1xf32> to vector<1x1x1x1x1xf32>
    %157 = vector.extract %156[0, 0, 0, 0, 0] : f32 from vector<1x1x1x1x1xf32>
    %cst_44 = arith.constant 3.000000e+00 : f32
    %158 = arith.mulf %157, %cst_44 : f32
    %159 = vector.broadcast %117 : vector<1x1x16x16xf32> to vector<1x3x16x16xf32>
    %160 = arith.mulf %95, %159 : vector<1x3x16x16xf32>
    %161 = vector.shape_cast %160 : vector<1x3x16x16xf32> to vector<1x1x3x16x16xf32>
    %cst_45 = arith.constant dense<0.000000e+00> : vector<1xf32>
    %162 = vector.multi_reduction <add>, %161, %cst_45 [1, 2, 3, 4] : vector<1x1x3x16x16xf32> to vector<1xf32>
    %163 = vector.shape_cast %162 : vector<1xf32> to vector<1x1x1x1x1xf32>
    %164 = vector.extract %163[0, 0, 0, 0, 0] : f32 from vector<1x1x1x1x1xf32>
    %165 = vector.shape_cast %117 : vector<1x1x16x16xf32> to vector<1x1x1x16x16xf32>
    %cst_46 = arith.constant dense<0.000000e+00> : vector<1xf32>
    %166 = vector.multi_reduction <add>, %165, %cst_46 [1, 2, 3, 4] : vector<1x1x1x16x16xf32> to vector<1xf32>
    %167 = vector.shape_cast %166 : vector<1xf32> to vector<1x1x1x1x1xf32>
    %168 = vector.extract %167[0, 0, 0, 0, 0] : f32 from vector<1x1x1x1x1xf32>
    %cst_47 = arith.constant 3.000000e+00 : f32
    %169 = arith.mulf %168, %cst_47 : f32
    %170 = tpu.iota {dimensions = array<i32: 2>} : vector<1x1x128xi32>
    %c0_i32 = arith.constant 0 : i32
    %171 = vector.broadcast %c0_i32 : i32 to vector<1x1x128xi32>
    %172 = arith.cmpi eq, %170, %171 : vector<1x1x128xi32>
    %c1_i32 = arith.constant 1 : i32
    %173 = vector.broadcast %c1_i32 : i32 to vector<1x1x128xi32>
    %174 = arith.cmpi eq, %170, %173 : vector<1x1x128xi32>
    %c2_i32 = arith.constant 2 : i32
    %175 = vector.broadcast %c2_i32 : i32 to vector<1x1x128xi32>
    %176 = arith.cmpi eq, %170, %175 : vector<1x1x128xi32>
    %c3_i32 = arith.constant 3 : i32
    %177 = vector.broadcast %c3_i32 : i32 to vector<1x1x128xi32>
    %178 = arith.cmpi eq, %170, %177 : vector<1x1x128xi32>
    %c4_i32 = arith.constant 4 : i32
    %179 = vector.broadcast %c4_i32 : i32 to vector<1x1x128xi32>
    %180 = arith.cmpi eq, %170, %179 : vector<1x1x128xi32>
    %c5_i32 = arith.constant 5 : i32
    %181 = vector.broadcast %c5_i32 : i32 to vector<1x1x128xi32>
    %182 = arith.cmpi eq, %170, %181 : vector<1x1x128xi32>
    %cst_48 = arith.constant 0.000000e+00 : f32
    %183 = vector.broadcast %147 : f32 to vector<1x1x128xf32>
    %184 = vector.broadcast %cst_48 : f32 to vector<1x1x128xf32>
    %185 = arith.select %182, %183, %184 : vector<1x1x128xi1>, vector<1x1x128xf32>
    %186 = vector.broadcast %132 : f32 to vector<1x1x128xf32>
    %187 = arith.select %180, %186, %185 : vector<1x1x128xi1>, vector<1x1x128xf32>
    %188 = vector.broadcast %169 : f32 to vector<1x1x128xf32>
    %189 = arith.select %178, %188, %187 : vector<1x1x128xi1>, vector<1x1x128xf32>
    %190 = vector.broadcast %164 : f32 to vector<1x1x128xf32>
    %191 = arith.select %176, %190, %189 : vector<1x1x128xi1>, vector<1x1x128xf32>
    %192 = vector.broadcast %158 : f32 to vector<1x1x128xf32>
    %193 = arith.select %174, %192, %191 : vector<1x1x128xi1>, vector<1x1x128xf32>
    %194 = vector.broadcast %153 : f32 to vector<1x1x128xf32>
    %195 = arith.select %172, %194, %193 : vector<1x1x128xi1>, vector<1x1x128xf32>
    %c0_49 = arith.constant 0 : index
    %c0_50 = arith.constant 0 : index
    %c0_51 = arith.constant 0 : index
    %196 = vector.load %arg5[%c0_49, %c0_50, %c0_51] : memref<1x1x128xf32, #tpu.memory_space<vmem>>, vector<1x1x128xf32>
    tpu.vector_store %arg5[%c0_49, %c0_50, %c0_51], %195 {strides = array<i32>} : memref<1x1x128xf32, #tpu.memory_space<vmem>>, vector<1x1x128xf32>,
    return
  }
  func.func @transform_0(%arg0: i32) -> (i32, i32, i32, i32) {
    %c0_i32 = arith.constant 0 : i32
    %c0_i32_0 = arith.constant 0 : i32
    %c0_i32_1 = arith.constant 0 : i32
    %c0_i32_2 = arith.constant 0 : i32
    return %arg0, %c0_i32, %c0_i32_0, %c0_i32_1 : i32, i32, i32, i32
  }
  func.func @transform_1(%arg0: i32) -> (i32, i32, i32, i32) {
    %c0_i32 = arith.constant 0 : i32
    %c0_i32_0 = arith.constant 0 : i32
    %c0_i32_1 = arith.constant 0 : i32
    %c0_i32_2 = arith.constant 0 : i32
    return %arg0, %c0_i32, %c0_i32_0, %c0_i32_1 : i32, i32, i32, i32
  }
  func.func @transform_2(%arg0: i32) -> (i32, i32, i32, i32) {
    %c0_i32 = arith.constant 0 : i32
    %c0_i32_0 = arith.constant 0 : i32
    %c0_i32_1 = arith.constant 0 : i32
    %c0_i32_2 = arith.constant 0 : i32
    return %arg0, %c0_i32, %c0_i32_0, %c0_i32_1 : i32, i32, i32, i32
  }
  func.func @transform_3(%arg0: i32) -> (i32, i32, i32, i32) {
    %c0_i32 = arith.constant 0 : i32
    %c0_i32_0 = arith.constant 0 : i32
    %c0_i32_1 = arith.constant 0 : i32
    %c0_i32_2 = arith.constant 0 : i32
    return %arg0, %c0_i32, %c0_i32_0, %c0_i32_1 : i32, i32, i32, i32
  }
  func.func @transform_4(%arg0: i32) -> (i32, i32, i32) {
    %c0_i32 = arith.constant 0 : i32
    %c0_i32_0 = arith.constant 0 : i32
    %c0_i32_1 = arith.constant 0 : i32
    return %arg0, %c0_i32, %c0_i32_0 : i32, i32, i32
  }
}

</mosaic_0001>

<bundles_post_ra>
// kernel: tpu_custom_call.1
= control target key start
LH: loop header
LB: loop body
LE: loop exit
PB: predicated region body
PF: predicated region fallthrough
CT: control target
= control target key end

     0   :  { %s10576_s0 = inlined_call_operand.hbm [shape: f32[2,3,16,16], index: 0, kind: input, shape index: {}]   ;;  %s10577_s1 = inlined_call_operand.hbm [shape: f32[2,3,16,16], index: 1, kind: input, shape index: {}]   ;;  %s10578_s2 = inlined_call_operand.hbm [shape: f32[2,1,16,16], index: 2, kind: input, shape index: {}]   ;;  %s10579_s3 = inlined_call_operand.hbm [shape: f32[2,1,16,16], index: 3, kind: input, shape index: {}]   ;;  %s10580_s4 = inlined_call_operand.hbm [shape: f32[2,1,128], index: 4, kind: output, shape index: {}]  }
   0x1   :  { %10690 = sst [smem:[#allocation237_spill]] %s10576_s0 }
   0x2   :  { %10691 = sst [smem:[#allocation238_spill]] %s10577_s1 }
   0x3   :  { %9 = vsyncpa [#allocation3], 0 }
   0x4   :  { %11 = vsyncpa [#allocation3 + $0x1], 0 }
   0x5   :  { %12 = vsyncpa [#allocation6], 0 }
   0x6   :  { %14 = vsyncpa [#allocation6 + $0x1], 0 }
   0x7   :  { %15 = vsyncpa [#allocation9], 0 }
   0x8   :  { %17 = vsyncpa [#allocation9 + $0x1], 0 }
   0x9   :  { %18 = vsyncpa [#allocation4], 0 }
   0xa   :  { %20 = vsyncpa [#allocation4 + $0x1], 0  ;;  %s6204_s15 = smov 0   ;;  %s6206_s16 = smov 0  }
   0xb   :  { %s6208_s17 = smov 0   ;;  %s6210_s18 = smov 0  }
   0xc LB: > { %s6225_s19 = sadd.s32 4294967295, %s6063_s18   ;;  %s5123_s20 = sadd.s32 4294967294, %s6063_s18   ;;  %s6063_s18 = sphi %s6210_s18, %s11365_s18   ;;  %s6059_s17 = sphi %s6208_s17, %s11364_s17   ;;  %s6055_s16 = sphi %s6206_s16, %s11363_s16   ;;  %s6051_s15 = sphi %s6204_s15, %s11362_s15  }
   0xd   : > { %s6229_s21 = sadd.s32 1, %s6063_s18   ;;  %s33_s22 = sadd.s32 1, %s6059_s17 }
   0xe   : > { %s30_s23 = ssub.s32 %s6063_s18, %s6229_s21  ;;  %p40_p0 = scmp.ne.s32.totalorder %s6059_s17, %s6055_s16 }
   0xf   : > { %p31_p1 = scmp.eq.s32.totalorder %s30_s23, 0  ;;  %p41_p2 = scmp.eq.s32.totalorder %s6063_s18, 0 }
  0x10   : > { %p46_p3 = scmp.ne.s32.totalorder %s6055_s16, %s6051_s15  ;;  %p47_p4 = scmp.eq.s32.totalorder %s6225_s19, 0 }
  0x11   : > { %s6241_s24 = scalar_select %p31_p1, %s6059_s17, %s33_s22  }
  0x12   : > { %p42_p5 = por %p41_p2, %p40_p0  ;;  %p6243_p6 = por %p47_p4, %p46_p3 }
  0x13   : > { %p148_p7 = scmp.eq.s32.totalorder %s6225_s19, 1  ;;  %p154_p8 = scmp.eq.s32.totalorder %s5123_s20, 1 }
  0x14   : > { %s10692_s25 = scalar_select %p6243_p6, 1, 0 }
  0x15   : > { %p5382_p10 = scmp.lt.s32.totalorder %s6063_s18, 2  ;;  %p6250_p11 = por %p148_p7, %p40_p0 }
  0x16   : > { %p6254_p12 = por %p154_p8, %p46_p3  ;;  %s6259_s28 = sand.u32 1, %s6059_s17  }
  0x17   : > { %s10693_s26 = scalar_select %p6250_p11, 1, 0 }
  0x18   : > { %s10694_s27 = scalar_select %p6254_p12, 1, 0 }
  0x19   : > { %s5333_s29 = smul.u32 768, %s6063_s18  ;;  %p6263_p13 = pnand %p5382_p10, %p42_p5 }
  0x1a   : > { %s5332_s30 = smul.u32 48, %s6259_s28  ;;  %s195_s6 = sand.u32 1, %s6063_s18  }
  0x1b   : > { %s10696_s1 = sld [smem:[#allocation238_spill]]  ;;  %s6280_s12 = scalar_lea.sflag [#allocation6], %s195_s6 }
  0x1c   : > { %s199_s10 = scalar_lea.vmem [#allocation5], %s5332_s30  ;;  %p6286_p2 = pneg %p6263_p13 }
  0x1d   : > { %s206_s11 = sshll.u32 %s199_s10, 4  ;;  %s6277_s11 = int_to_ptr.vmem [resolvable:$true] %s206_s11 }
  0x21   : > { %s6273_s9 = scalar_lea.hbm %s10696_s1, %s5333_s29  ;;  %s5798_s23 = scalar_lea.hbm %s10696_s1, 1536 }
  0x22   : > { %s5793_s13 = scalar_lea.hbm %s6273_s9, 768  ;;  %p5799_p5 = scmp.lt.u32.totalorder %s6273_s9, %s10696_s1 }
  0x23   : > { %p5794_p1 = scmp.ne.s32.totalorder %s6273_s9, %s5793_s13  ;;  %p5800_p7 = scmp.lt.u32.totalorder %s5798_s23, %s5793_s13 }
  0x24   : > { %p5802_p10 = scmp.lt.u32.totalorder %s5793_s13, %s6273_s9 }
  0x25   : > { %p5796_p3 = pnand %p6286_p2, %p5794_p1  ;;  %p5801_p8 = por %p5800_p7, %p5799_p5 }
  0x27   : > { %p5797_p4 = pneg %p5796_p3  ;;  %p5803_p9 = por %p5802_p10, %p5801_p8 }
  0x29   : > { %p5804_p0 = pnand %p5803_p9, %p5797_p4 }
  0x2b   : > { %5807 = shalt.err (!%p5804_p0)
}
  0x2c   : > { %s5808_s6 = scalar_lea.vmem %s6277_s11, 768  ;;  %s6141_s10 = smov [#allocation5]  }
  0x2d   : > { %p5809_p1 = scmp.ne.s32.totalorder %s6277_s11, %s5808_s6  ;;  %s5813_s20 = sshll.u32 %s6141_s10, 4  ;;  %s5814_s20 = int_to_ptr.vmem [resolvable:$false] %s5813_s20 }
  0x2e   : > { %s5815_s22 = scalar_lea.vmem %s5814_s20, 1536  ;;  %p5816_p11 = scmp.lt.s32.totalorder %s6277_s11, %s5814_s20 }
  0x2f   : > { %p5811_p3 = pnand %p5809_p1, %p6286_p2  ;;  %p5817_p6 = scmp.lt.s32.totalorder %s5815_s22, %s5808_s6 }
  0x31   : > { %p5812_p12 = pneg %p5811_p3  ;;  %p5818_p5 = por %p5817_p6, %p5816_p11 }
  0x33   : > { %p5819_p7 = pnand %p5818_p5, %p5812_p12 }
  0x35   : > { %5822 = shalt.err (!%p5819_p7)
}
  0x36   : > { %s10583_s13 = smov 128   ;;  %s10585_s23 = smov 8  }
  0x37   : > { %5371 = dma.hbm_to_vmem [thread:$0]  (!%p6263_p13), %s6273_s9, 768, %s6277_s11, %s6280_s12, %s10583_s13, %s10583_s13, %s10585_s23  }
  0x38   : > { %p256_p6 = scmp.lt.s32.totalorder %s6063_s18, 3  ;;  %s10698_s0 = sld [smem:[#allocation237_spill]] }
  0x39   : > { %p10699_p9 = scmp.ge.s32.totalorder %s6063_s18, 1  ;;  %s178_s20 = scalar_lea.vmem [#allocation2], %s5332_s30 }
  0x3a   : > { %s185_s22 = sshll.u32 %s178_s20, 4  ;;  %s5128_s9 = sshll.u32 %s6259_s28, 4  ;;  %s6329_s22 = int_to_ptr.vmem [resolvable:$true] %s185_s22 }
  0x3b   : > { %p6323_p11 = pnand %p10699_p9, %p256_p6  ;;  %s175_s11 = scalar_lea.sflag [#allocation3], %s6259_s28 }
  0x3d   : > { %s10700_s10 = scalar_select %p6323_p11, 1, 0 }
  0x3e   : > { %s6319_s6 = scalar_lea.hbm %s10698_s0, %s5333_s29  ;;  %s5828_s8 = scalar_lea.hbm %s10698_s0, 1536 }
  0x3f   : > { %s5823_s13 = scalar_lea.hbm %s6319_s6, 768  ;;  %p5829_p8 = scmp.lt.u32.totalorder %s6319_s6, %s10698_s0 }
  0x40   : > { %p5824_p12 = scmp.ne.s32.totalorder %s6319_s6, %s5823_s13  ;;  %p5830_p10 = scmp.lt.u32.totalorder %s5828_s8, %s5823_s13 }
  0x41   : > { %p5832_p3 = scmp.lt.u32.totalorder %s5823_s13, %s6319_s6 }
  0x42   : > { %p5826_p0 = pnand %p5824_p12, %p6286_p2  ;;  %p5831_p1 = por %p5830_p10, %p5829_p8 }
  0x44   : > { %p5827_p4 = pneg %p5826_p0  ;;  %p5833_p5 = por %p5832_p3, %p5831_p1 }
  0x46   : > { %p5834_p7 = pnand %p5833_p5, %p5827_p4 }
  0x48   : > { %5837 = shalt.err (!%p5834_p7)
}
  0x49   : > { %s5838_s30 = scalar_lea.vmem %s6329_s22, 768  ;;  %s6144_s20 = smov [#allocation2]  }
  0x4a   : > { %p5839_p6 = scmp.ne.s32.totalorder %s6329_s22, %s5838_s30  ;;  %s5843_s29 = sshll.u32 %s6144_s20, 4  ;;  %s5844_s29 = int_to_ptr.vmem [resolvable:$false] %s5843_s29 }
  0x4b   : > { %s5845_s1 = scalar_lea.vmem %s5844_s29, 1536  ;;  %p5846_p0 = scmp.lt.s32.totalorder %s6329_s22, %s5844_s29 }
  0x4c   : > { %p5841_p9 = pnand %p5839_p6, %p6286_p2  ;;  %p5847_p11 = scmp.lt.s32.totalorder %s5845_s1, %s5838_s30 }
  0x4e   : > { %p5842_p12 = pneg %p5841_p9  ;;  %p5848_p8 = por %p5847_p11, %p5846_p0 }
  0x50   : > { %p5849_p10 = pnand %p5848_p8, %p5842_p12 }
  0x52   : > { %5852 = shalt.err (!%p5849_p10)
}
  0x53   : > { %s10701_s13 = smov 8   ;;  %s10702_s23 = smov 128  }
  0x54   : > { %5368 = dma.hbm_to_vmem [thread:$0]  (!%p6263_p13), %s6319_s6, 768, %s6329_s22, %s175_s11, %s10702_s23, %s10702_s23, %s10701_s13  }
  0x55   : > { %s5198_s7 = sshll.u32 %s6063_s18, 8  ;;  %s220_s29 = scalar_lea.vmem [#allocation7], %s5128_s9 }
  0x56   : > { %s6365_s20 = scalar_lea.hbm %s10578_s2, %s5198_s7  ;;  %s227_s1 = sshll.u32 %s220_s29, 4  ;;  %s6369_s1 = int_to_ptr.vmem [resolvable:$true] %s227_s1 }
  0x57   : > { %s5853_s0 = scalar_lea.hbm %s6365_s20, 256  ;;  %s5858_s11 = scalar_lea.hbm %s10578_s2, 512 }
  0x58   : > { %p5854_p11 = scmp.ne.s32.totalorder %s6365_s20, %s5853_s0  ;;  %p5859_p3 = scmp.lt.u32.totalorder %s6365_s20, %s10578_s2 }
  0x59   : > { %p5860_p5 = scmp.lt.u32.totalorder %s5858_s11, %s5853_s0  ;;  %p5862_p6 = scmp.lt.u32.totalorder %s5853_s0, %s6365_s20 }
  0x5a   : > { %p5856_p4 = pnand %p5854_p11, %p6286_p2 }
  0x5b   : > { %p5861_p7 = por %p5860_p5, %p5859_p3 }
  0x5c   : > { %p5857_p1 = pneg %p5856_p4 }
  0x5d   : > { %p5863_p9 = por %p5862_p6, %p5861_p7 }
  0x5f   : > { %p5864_p12 = pnand %p5863_p9, %p5857_p1 }
  0x61   : > { %5867 = shalt.err (!%p5864_p12)
}
  0x62   : > { %s5868_s29 = scalar_lea.vmem %s6369_s1, 256  ;;  %s6145_s6 = smov [#allocation7]  }
  0x63   : > { %p5869_p0 = scmp.ne.s32.totalorder %s6369_s1, %s5868_s29  ;;  %s5873_s22 = sshll.u32 %s6145_s6, 4  ;;  %s5874_s22 = int_to_ptr.vmem [resolvable:$false] %s5873_s22 }
  0x64   : > { %s5875_s8 = scalar_lea.vmem %s5874_s22, 512  ;;  %p5876_p11 = scmp.lt.s32.totalorder %s6369_s1, %s5874_s22 }
  0x65   : > { %p5871_p8 = pnand %p5869_p0, %p6286_p2  ;;  %p5877_p4 = scmp.lt.s32.totalorder %s5875_s8, %s5868_s29 }
  0x67   : > { %p5872_p10 = pneg %p5871_p8  ;;  %p5878_p3 = por %p5877_p4, %p5876_p11 }
  0x69   : > { %p5879_p5 = pnand %p5878_p3, %p5872_p10 }
  0x6b   : > { %5882 = shalt.err (!%p5879_p5)
}
  0x6c   : > { %5374 = dma.hbm_to_vmem [thread:$0]  (!%p6263_p13), %s6365_s20, 256, %s6369_s1, %s6280_s12, %s10702_s23, %s10702_s23, %s10701_s13  }
  0x6d   : > { %s6401_s30 = scalar_lea.hbm %s10579_s3, %s5198_s7  ;;  %s241_s29 = scalar_lea.vmem [#allocation8], %s5128_s9 }
  0x6e   : > { %s248_s6 = sshll.u32 %s241_s29, 4  ;;  %s238_s22 = scalar_lea.sflag [#allocation9], %s6259_s28  ;;  %s6405_s6 = int_to_ptr.vmem [resolvable:$true] %s248_s6 }
  0x6f   : > { %s5883_s8 = scalar_lea.hbm %s6401_s30, 256  ;;  %s5888_s7 = scalar_lea.hbm %s10579_s3, 512 }
  0x70   : > { %p5884_p1 = scmp.ne.s32.totalorder %s6401_s30, %s5883_s8  ;;  %p5889_p9 = scmp.lt.u32.totalorder %s6401_s30, %s10579_s3 }
  0x71   : > { %p5890_p12 = scmp.lt.u32.totalorder %s5888_s7, %s5883_s8  ;;  %p5892_p8 = scmp.lt.u32.totalorder %s5883_s8, %s6401_s30 }
  0x72   : > { %p5886_p7 = pnand %p5884_p1, %p6286_p2 }
  0x73   : > { %p5891_p0 = por %p5890_p12, %p5889_p9 }
  0x74   : > { %p5887_p6 = pneg %p5886_p7 }
  0x75   : > { %p5893_p10 = por %p5892_p8, %p5891_p0 }
  0x77   : > { %p5894_p11 = pnand %p5893_p10, %p5887_p6 }
  0x79   : > { %5897 = shalt.err (!%p5894_p11)
}
  0x7a   : > { %s5898_s9 = scalar_lea.vmem %s6405_s6, 256  ;;  %s6146_s11 = smov [#allocation8]  }
  0x7b   : > { %p5899_p4 = scmp.ne.s32.totalorder %s6405_s6, %s5898_s9  ;;  %s5903_s29 = sshll.u32 %s6146_s11, 4  ;;  %s5904_s29 = int_to_ptr.vmem [resolvable:$false] %s5903_s29 }
  0x7c   : > { %s5905_s12 = scalar_lea.vmem %s5904_s29, 512  ;;  %p5906_p1 = scmp.lt.s32.totalorder %s6405_s6, %s5904_s29 }
  0x7d   : > { %p5901_p3 = pnand %p5899_p4, %p6286_p2  ;;  %p5907_p7 = scmp.lt.s32.totalorder %s5905_s12, %s5898_s9 }
  0x7f   : > { %p5902_p5 = pneg %p5901_p3  ;;  %p5908_p9 = por %p5907_p7, %p5906_p1 }
  0x81   : > { %p5909_p12 = pnand %p5908_p9, %p5902_p5 }
  0x83   : > { %5912 = shalt.err (!%p5909_p12)
}
  0x84   : > { %5377 = dma.hbm_to_vmem [thread:$0]  (!%p6263_p13), %s6401_s30, 256, %s6405_s6, %s238_s22, %s10702_s23, %s10702_s23, %s10701_s13  }
  0x85   : > { %p10703_p2 = scmp.ne.s32.totalorder %s10700_s10, 0 }
  0x87   : > { %260 = sbr.rel (%p10703_p2) target bundleno = 2731 (0xaab), region = 36 }
  0x8e   : > { %s6437_s14 = sand.u32 1, %s6055_s16   ;;  %p10704_p6 = scmp.ne.s32.totalorder %s10692_s25, 0 }
  0x8f   : > { %s5336_s8 = smul.u32 48, %s6437_s14  ;;  %s263_s20 = scalar_lea.sflag [#allocation3], %s6437_s14 }
  0x91   : > { %s266_s5 = scalar_lea.vmem [#allocation2], %s5336_s8 }
  0x92   : > { %6034 = dma.done.wait (%p10704_p6), %s263_s20, 768  }
  0x93   : > { %6036 = vsyncadd (%p10704_p6), %s263_s20, 4294966528  ;;  %s271_s28 = sand.u32 1, %s6225_s19   ;;  %s275_s10 = scalar_lea.vmem [#allocation5], %s5336_s8 }
  0x94   : > { %s272_s13 = scalar_lea.sflag [#allocation6], %s271_s28 }
  0x95   : > { %6038 = dma.done.wait (%p10704_p6), %s272_s13, 1024  }
  0x96   : > { %6040 = vsyncadd (%p10704_p6), %s272_s13, 4294966272  ;;  %s5135_s23 = sshll.u32 %s6437_s14, 4  ;;  %s290_s6 = scalar_lea.sflag [#allocation9], %s6437_s14 }
  0x97   : > { %s284_s30 = scalar_lea.vmem [#allocation7], %s5135_s23  ;;  %s293_s22 = scalar_lea.vmem [#allocation8], %s5135_s23 }
  0x98   : > { %6042 = dma.done.wait (%p10704_p6), %s290_s6, 256  }
  0x99   : > { %6044 = vsyncadd (%p10704_p6), %s290_s6, 4294967040  ;;  %v6456_v0 = vld [vmem:[%s266_s5] sm:$0xff]  ;;  %v6458_v1 = vld [vmem:[%s266_s5 + $0x8] sm:$0xff]  ;;  %s331_s25 = scalar_lea.vmem [#allocation10], %s6437_s14 }
  0x9a   : > { %10705 = vst [vmem:[#allocation20_spill] sm:$0xff] %v6456_v0  ;;  %10706 = vst [vmem:[#allocation21_spill] sm:$0xff] %v6458_v1  ;;  %v6460_v2 = vld [vmem:[%s266_s5 + $0x10] sm:$0xff]  ;;  %v6462_v3 = vld [vmem:[%s266_s5 + $0x18] sm:$0xff] }
  0x9b   : > { %10707 = vst [vmem:[#allocation22_spill] sm:$0xff] %v6460_v2  ;;  %10708 = vst [vmem:[#allocation23_spill] sm:$0xff] %v6462_v3  ;;  %v6464_v4 = vld [vmem:[%s266_s5 + $0x20] sm:$0xff]  ;;  %v6466_v5 = vld [vmem:[%s266_s5 + $0x28] sm:$0xff] }
  0x9c   : > { %10709 = vst [vmem:[#allocation24_spill] sm:$0xff] %v6464_v4  ;;  %10710 = vst [vmem:[#allocation25_spill] sm:$0xff] %v6466_v5  ;;  %v6468_v6 = vld [vmem:[%s275_s10] sm:$0xff]  ;;  %v6470_v7 = vld [vmem:[%s275_s10 + $0x8] sm:$0xff] }
  0x9d   : > { %10711 = vst [vmem:[#allocation26_spill] sm:$0xff] %v6468_v6  ;;  %10712 = vst [vmem:[#allocation27_spill] sm:$0xff] %v6470_v7  ;;  %v6472_v8 = vld [vmem:[%s275_s10 + $0x10] sm:$0xff]  ;;  %v6474_v9 = vld [vmem:[%s275_s10 + $0x18] sm:$0xff] }
  0x9e   : > { %10713 = vst [vmem:[#allocation28_spill] sm:$0xff] %v6472_v8  ;;  %10714 = vst [vmem:[#allocation29_spill] sm:$0xff] %v6474_v9  ;;  %v6476_v10 = vld [vmem:[%s275_s10 + $0x20] sm:$0xff]  ;;  %v6478_v11 = vld [vmem:[%s275_s10 + $0x28] sm:$0xff] }
  0x9f   : > { %10715 = vst [vmem:[#allocation30_spill] sm:$0xff] %v6476_v10  ;;  %10716 = vst [vmem:[#allocation31_spill] sm:$0xff] %v6478_v11  ;;  %v6480_v12 = vld [vmem:[%s284_s30] sm:$0xff]  ;;  %v6482_v13 = vld [vmem:[%s284_s30 + $0x8] sm:$0xff] }
  0xa0   : > { %10717 = vst [vmem:[#allocation32_spill] sm:$0xff] %v6480_v12  ;;  %10718 = vst [vmem:[#allocation33_spill] sm:$0xff] %v6482_v13  ;;  %v6484_v14 = vld [vmem:[%s293_s22] sm:$0xff]  ;;  %v6486_v15 = vld [vmem:[%s293_s22 + $0x8] sm:$0xff]  ;;  %v348_v16 = vmax.f32 %v6480_v12, 0.0  ;;  %v349_v17 = vmax.f32 %v6482_v13, 0.0 }
  0xa1   : > { %10719 = vst [vmem:[#allocation34_spill] sm:$0xff] %v6484_v14  ;;  %10720 = vst [vmem:[#allocation35_spill] sm:$0xff] %v6486_v15 }
  0xa2   : > { %v350_v18 = vmin.f32 %v348_v16, 5.0  ;;  %v351_v19 = vmin.f32 %v349_v17, 5.0 }
  0xa4   : > { %v6490_v20 = vfloor.f32 %v350_v18  ;;  %v6492_v21 = vfloor.f32 %v351_v19 }
  0xa6   : > { %v6495_v22 = vsub.f32 %v350_v18, %v6490_v20  ;;  %v6498_v23 = vsub.f32 %v351_v19, %v6492_v21 }
  0xa7   : > { %vm356_vm0 = vcmask 39936   ;;  %vm365_vm1 = vcmask 212136   ;;  %s6147_s7 = smov 5   ;;  %v6148_v24 = vmov 0.0   ;;  %vm398_vm2 = vcmask 171048   ;;  %s6149_s1 = smov 123  }
  0xa8   : > { %380 = vrot.lane.b32.xlu0 %v6468_v6, %s6147_s7  ;;  %384 = vrot.lane.b32.xlu1 %v6472_v8, %s6147_s7  ;;  %357 = vst.msk [vmem:[#allocation11] sm:$0xff] %vm356_vm0, %v6148_v24  ;;  %358 = vst.msk [vmem:[#allocation11 + $0x8] sm:$0xff] %vm356_vm0, %v6148_v24  ;;  %s6150_s0 = smov 124   ;;  %s6151_s9 = smov 125   ;;  %vm628_vm3 = vcmp.eq.f32.partialorder %v6490_v20, 4.0  ;;  %v418_v16 = vsub.f32 1.0, %v6495_v22 }
  0xa9   : > { %359 = vst.msk [vmem:[#allocation11 + $0x10] sm:$0xff] %vm356_vm0, %v6148_v24  ;;  %360 = vst.msk [vmem:[#allocation11 + $0x18] sm:$0xff] %vm356_vm0, %v6148_v24  ;;  %s6152_s11 = smov 126   ;;  %s6153_s29 = smov 127   ;;  %v419_v17 = vsub.f32 1.0, %v6498_v23  ;;  %vm676_vm4 = vcmp.eq.f32.partialorder %v6490_v20, 5.0 }
  0xaa   : > { %361 = vst.msk [vmem:[#allocation11 + $0x20] sm:$0xff] %vm356_vm0, %v6148_v24  ;;  %362 = vst.msk [vmem:[#allocation11 + $0x28] sm:$0xff] %vm356_vm0, %v6148_v24  ;;  %vm629_vm5 = vcmp.eq.f32.partialorder %v6492_v21, 4.0  ;;  %vm677_vm6 = vcmp.eq.f32.partialorder %v6492_v21, 5.0  ;;  %vm416_vm7 = vcmp.eq.f32.partialorder %v6490_v20, 0.0  ;;  %vm484_vm8 = vcmp.eq.f32.partialorder %v6490_v20, 1.0 }
  0xab   : > { %363 = vst.msk [vmem:[#allocation11 + $0x30] sm:$0xff] %vm356_vm0, %v6148_v24  ;;  %364 = vst.msk [vmem:[#allocation11 + $0x38] sm:$0xff] %vm356_vm0, %v6148_v24  ;;  %v680_v18 = vsel %vm628_vm3, %v6495_v22, 0.0  ;;  %vm422_vm9 = vcmp.eq.f32.partialorder %v6490_v20, -1.0  ;;  %vm417_vm10 = vcmp.eq.f32.partialorder %v6492_v21, 0.0  ;;  %vm423_vm11 = vcmp.eq.f32.partialorder %v6492_v21, -1.0 }
  0xac   : > { %366 = vst.msk [vmem:[#allocation11] sm:$0xff] %vm365_vm1, %v6148_v24  ;;  %368 = vst.msk [vmem:[#allocation11 + $0x10] sm:$0xff] %vm365_vm1, %v6148_v24  ;;  %382 = vrot.lane.b32.xlu0 %v6470_v7, %s6147_s7  ;;  %386 = vrot.lane.b32.xlu1 %v6474_v9, %s6147_s7  ;;  %vm485_vm12 = vcmp.eq.f32.partialorder %v6492_v21, 1.0  ;;  %vm532_vm13 = vcmp.eq.f32.partialorder %v6490_v20, 2.0  ;;  %vm580_vm14 = vcmp.eq.f32.partialorder %v6490_v20, 3.0  ;;  %v489_v9 = vsel %vm417_vm10, %v6498_v23, 0.0 }
  0xad   : > { %367 = vst.msk [vmem:[#allocation11 + $0x8] sm:$0xff] %vm365_vm1, %v6148_v24  ;;  %369 = vst.msk [vmem:[#allocation11 + $0x18] sm:$0xff] %vm365_vm1, %v6148_v24  ;;  %v534_v8 = vsel %vm532_vm13, %v418_v16, 0.0  ;;  %v536_v7 = vsel %vm484_vm8, %v6495_v22, 0.0  ;;  %vm533_vm15 = vcmp.eq.f32.partialorder %v6492_v21, 2.0  ;;  %v582_v5 = vsel %vm580_vm14, %v418_v16, 0.0 }
  0xae   : > { %370 = vst.msk [vmem:[#allocation11 + $0x20] sm:$0xff] %vm365_vm1, %v6148_v24  ;;  %371 = vst.msk [vmem:[#allocation11 + $0x28] sm:$0xff] %vm365_vm1, %v6148_v24  ;;  %v584_v4 = vsel %vm532_vm13, %v6495_v22, 0.0 }
  0xaf   : > { %372 = vst.msk [vmem:[#allocation11 + $0x30] sm:$0xff] %vm365_vm1, %v6148_v24  ;;  %373 = vst.msk [vmem:[#allocation11 + $0x38] sm:$0xff] %vm365_vm1, %v6148_v24 }
  0xb0   : > { %388 = vrot.lane.b32.xlu0 %v6476_v10, %s6147_s7  ;;  %390 = vrot.lane.b32.xlu1 %v6478_v11, %s6147_s7  ;;  %v425_v11 = vsel %vm423_vm11, %v6498_v23, 0.0  ;;  %v487_v10 = vsel %vm485_vm12, %v419_v17, 0.0 }
  0xb4   : > { %407 = vrot.lane.b32.xlu0 %v6484_v14, %s6147_s7  ;;  %409 = vrot.lane.b32.xlu1 %v6486_v15, %s6147_s7  ;;  %v6687_v15 = vadd.f32 %v489_v9, %v487_v10  ;;  %v6689_v14 = vadd.f32 %v536_v7, %v534_v8  ;;  %v630_v7 = vsel %vm628_vm3, %v418_v16, 0.0 }
 0x11a   : > { %v381_v25 = vpop.permute.xlu0 %380  ;;  %v385_v26 = vpop.permute.xlu1 %384 }
 0x11b   : > { %399 = vst.msk [vmem:[#allocation11] sm:$0xff] %vm398_vm2, %v381_v25  ;;  %401 = vst.msk [vmem:[#allocation11 + $0x10] sm:$0xff] %vm398_vm2, %v385_v26  ;;  %v678_v25 = vsel %vm676_vm4, %v418_v16, 0.0  ;;  %v679_v26 = vsel %vm677_vm6, %v419_v17, 0.0  ;;  %vm581_vm4 = vcmp.eq.f32.partialorder %v6492_v21, 3.0 }
 0x11c   : > { %v6683_v2 = vadd.f32 %v680_v18, %v678_v25  ;;  %v585_v18 = vsel %vm533_vm15, %v6498_v23, 0.0  ;;  %v632_v25 = vsel %vm580_vm14, %v6495_v22, 0.0 }
 0x11e   : > { %v383_v27 = vpop.permute.xlu0 %382  ;;  %v387_v28 = vpop.permute.xlu1 %386 }
 0x11f   : > { %400 = vst.msk [vmem:[#allocation11 + $0x8] sm:$0xff] %vm398_vm2, %v383_v27  ;;  %402 = vst.msk [vmem:[#allocation11 + $0x18] sm:$0xff] %vm398_vm2, %v387_v28  ;;  %v681_v27 = vsel %vm629_vm5, %v6498_v23, 0.0  ;;  %v420_v28 = vsel %vm416_vm7, %v418_v16, 0.0 }
 0x120   : > { %v6685_v0 = vadd.f32 %v681_v27, %v679_v26 }
 0x122   : > { %v389_v29 = vpop.permute.xlu0 %388  ;;  %v6529_v30 = vld [vmem:[#allocation11] sm:$0xff]  ;;  %v391_v31 = vpop.permute.xlu1 %390  ;;  %v6534_v32 = vld [vmem:[#allocation11 + $0x10] sm:$0xff] }
 0x123   : > { %403 = vst.msk [vmem:[#allocation11 + $0x20] sm:$0xff] %vm398_vm2, %v389_v29  ;;  %444 = vrot.lane.b32.xlu0 %v6529_v30, %s6149_s1  ;;  %404 = vst.msk [vmem:[#allocation11 + $0x28] sm:$0xff] %vm398_vm2, %v391_v31  ;;  %v486_v29 = vsel %vm484_vm8, %v418_v16, 0.0  ;;  %v488_v31 = vsel %vm416_vm7, %v6495_v22, 0.0  ;;  %v684_v27 = vmul.f32 %v6683_v2, %v6529_v30  ;;  %v6720_v16 = vmul.f32 %v6683_v2, %v6534_v32 }
 0x124   : > { %v490_v12 = vadd.f32 %v488_v31, %v486_v29  ;;  %v535_v29 = vsel %vm533_vm15, %v419_v17, 0.0  ;;  %v537_v31 = vsel %vm485_vm12, %v6498_v23, 0.0 }
 0x125   : > { %v6714_v26 = vadd.f32 %v537_v31, %v535_v29 }
 0x126   : > { %v408_v33 = vpop.permute.xlu0 %407  ;;  %v6536_v34 = vld [vmem:[#allocation11 + $0x8] sm:$0xff]  ;;  %v410_v35 = vpop.permute.xlu1 %409  ;;  %v6542_v36 = vld [vmem:[#allocation11 + $0x18] sm:$0xff] }
 0x127   : > { %414 = vst.msk [vmem:[#allocation11 + $0x30] sm:$0xff] %vm398_vm2, %v408_v33  ;;  %446 = vrot.lane.b32.xlu1 %v6536_v34, %s6149_s1  ;;  %448 = vrot.lane.b32.xlu0 %v6534_v32, %s6149_s1  ;;  %415 = vst.msk [vmem:[#allocation11 + $0x38] sm:$0xff] %vm398_vm2, %v410_v35  ;;  %v424_v33 = vsel %vm422_vm9, %v6495_v22, 0.0  ;;  %v421_v35 = vsel %vm417_vm10, %v419_v17, 0.0  ;;  %v685_v21 = vmul.f32 %v6685_v0, %v6536_v34 }
 0x128   : > { %v426_v3 = vadd.f32 %v424_v33, %v420_v28  ;;  %v6681_v1 = vadd.f32 %v425_v11, %v421_v35  ;;  %v583_v11 = vsel %vm581_vm4, %v419_v17, 0.0 }
 0x129   : > { %v6725_v22 = vadd.f32 %v585_v18, %v583_v11 }
 0x12a   : > { %v6544_v37 = vld [vmem:[#allocation11 + $0x20] sm:$0xff]  ;;  %v6548_v38 = vld [vmem:[#allocation11 + $0x28] sm:$0xff] }
 0x12b   : > { %450 = vrot.lane.b32.xlu1 %v6542_v36, %s6149_s1  ;;  %452 = vrot.lane.b32.xlu0 %v6544_v37, %s6149_s1 }
 0x12e   : > { %v6550_v39 = vld [vmem:[#allocation11 + $0x30] sm:$0xff]  ;;  %v6554_v40 = vld [vmem:[#allocation11 + $0x38] sm:$0xff] }
 0x12f   : > { %454 = vrot.lane.b32.xlu1 %v6548_v38, %s6149_s1  ;;  %456 = vrot.lane.b32.xlu0 %v6550_v39, %s6149_s1  ;;  %10721 = vst [vmem:[#allocation36_spill] sm:$0xff] %v6554_v40 }
 0x133   : > { %458 = vrot.lane.b32.xlu1 %v6554_v40, %s6149_s1  ;;  %492 = vrot.lane.b32.xlu0 %v6529_v30, %s6150_s0 }
 0x137   : > { %494 = vrot.lane.b32.xlu1 %v6536_v34, %s6150_s0  ;;  %496 = vrot.lane.b32.xlu0 %v6534_v32, %s6150_s0 }
 0x13b   : > { %498 = vrot.lane.b32.xlu1 %v6542_v36, %s6150_s0  ;;  %500 = vrot.lane.b32.xlu0 %v6544_v37, %s6150_s0 }
 0x13f   : > { %502 = vrot.lane.b32.xlu1 %v6548_v38, %s6150_s0  ;;  %504 = vrot.lane.b32.xlu0 %v6550_v39, %s6150_s0 }
 0x143   : > { %506 = vrot.lane.b32.xlu1 %v6554_v40, %s6150_s0  ;;  %540 = vrot.lane.b32.xlu0 %v6529_v30, %s6151_s9 }
 0x147   : > { %542 = vrot.lane.b32.xlu1 %v6536_v34, %s6151_s9  ;;  %544 = vrot.lane.b32.xlu0 %v6534_v32, %s6151_s9 }
 0x14b   : > { %546 = vrot.lane.b32.xlu1 %v6542_v36, %s6151_s9  ;;  %548 = vrot.lane.b32.xlu0 %v6544_v37, %s6151_s9 }
 0x14f   : > { %550 = vrot.lane.b32.xlu1 %v6548_v38, %s6151_s9  ;;  %552 = vrot.lane.b32.xlu0 %v6550_v39, %s6151_s9 }
 0x153   : > { %554 = vrot.lane.b32.xlu1 %v6554_v40, %s6151_s9  ;;  %588 = vrot.lane.b32.xlu0 %v6529_v30, %s6152_s11 }
 0x157   : > { %590 = vrot.lane.b32.xlu1 %v6536_v34, %s6152_s11  ;;  %592 = vrot.lane.b32.xlu0 %v6534_v32, %s6152_s11 }
 0x15b   : > { %594 = vrot.lane.b32.xlu1 %v6542_v36, %s6152_s11  ;;  %596 = vrot.lane.b32.xlu0 %v6544_v37, %s6152_s11 }
 0x15f   : > { %598 = vrot.lane.b32.xlu1 %v6548_v38, %s6152_s11  ;;  %600 = vrot.lane.b32.xlu0 %v6550_v39, %s6152_s11 }
 0x163   : > { %602 = vrot.lane.b32.xlu1 %v6554_v40, %s6152_s11  ;;  %636 = vrot.lane.b32.xlu0 %v6529_v30, %s6153_s29 }
 0x167   : > { %638 = vrot.lane.b32.xlu1 %v6536_v34, %s6153_s29  ;;  %640 = vrot.lane.b32.xlu0 %v6534_v32, %s6153_s29  ;;  %v6733_v32 = vadd.f32 %v632_v25, %v630_v7 }
 0x16b   : > { %642 = vrot.lane.b32.xlu1 %v6542_v36, %s6153_s29  ;;  %644 = vrot.lane.b32.xlu0 %v6544_v37, %s6153_s29 }
 0x16f   : > { %646 = vrot.lane.b32.xlu1 %v6548_v38, %s6153_s29  ;;  %648 = vrot.lane.b32.xlu0 %v6550_v39, %s6153_s29 }
 0x173   : > { %650 = vrot.lane.b32.xlu1 %v6554_v40, %s6153_s29  ;;  %v6696_v40 = vadd.f32 %v584_v4, %v582_v5  ;;  %v631_v4 = vsel %vm629_vm5, %v419_v17, 0.0  ;;  %v633_v5 = vsel %vm581_vm4, %v6498_v23, 0.0 }
 0x174   : > { %v6735_v33 = vadd.f32 %v633_v5, %v631_v4 }
 0x195   : > { %v6589_v41 = vpop.permute.xlu0 %444 }
 0x199   : > { %v6591_v42 = vpop.permute.xlu1 %446  ;;  %v6593_v43 = vpop.permute.xlu0 %448 }
 0x19a   : > { %v469_v23 = vmul.f32 %v6591_v42, %v6681_v1 }
 0x19d   : > { %v6595_v44 = vpop.permute.xlu1 %450  ;;  %v6597_v45 = vpop.permute.xlu0 %452 }
 0x19e   : > { %v471_v34 = vmul.f32 %v6595_v44, %v6681_v1  ;;  %v472_v42 = vmul.f32 %v6597_v45, %v426_v3 }
 0x1a1   : > { %v6599_v46 = vpop.permute.xlu1 %454  ;;  %v6601_v47 = vpop.permute.xlu0 %456 }
 0x1a2   : > { %v473_v11 = vmul.f32 %v6599_v46, %v6681_v1 }
 0x1a5   : > { %v6603_v48 = vpop.permute.xlu1 %458  ;;  %v6605_v49 = vpop.permute.xlu0 %492 }
 0x1a6   : > { %v516_v8 = vmul.f32 %v6605_v49, %v490_v12  ;;  %v468_v49 = vmul.f32 %v6589_v41, %v426_v3  ;;  %v470_v41 = vmul.f32 %v6593_v43, %v426_v3 }
 0x1a9   : > { %v6607_v50 = vpop.permute.xlu1 %494  ;;  %v6609_v51 = vpop.permute.xlu0 %496 }
 0x1aa   : > { %v517_v30 = vmul.f32 %v6607_v50, %v6687_v15  ;;  %v518_v35 = vmul.f32 %v6609_v51, %v490_v12 }
 0x1ac   : > { %v525_v44 = vadd.f32 %v517_v30, %v469_v23 }
 0x1ad   : > { %v6611_v52 = vpop.permute.xlu1 %498  ;;  %v6613_v53 = vpop.permute.xlu0 %500 }
 0x1ae   : > { %v519_v50 = vmul.f32 %v6611_v52, %v6687_v15  ;;  %v520_v43 = vmul.f32 %v6613_v53, %v490_v12 }
 0x1b0   : > { %v527_v4 = vadd.f32 %v519_v50, %v471_v34 }
 0x1b1   : > { %v6615_v54 = vpop.permute.xlu1 %502  ;;  %v6617_v55 = vpop.permute.xlu0 %504 }
 0x1b2   : > { %v521_v45 = vmul.f32 %v6615_v54, %v6687_v15  ;;  %v522_v54 = vmul.f32 %v6617_v55, %v490_v12 }
 0x1b5   : > { %v6619_v56 = vpop.permute.xlu1 %506  ;;  %v6621_v57 = vpop.permute.xlu0 %540 }
 0x1b6   : > { %v564_v20 = vmul.f32 %v6621_v57, %v6689_v14  ;;  %v524_v57 = vadd.f32 %v516_v8, %v468_v49 }
 0x1b8   : > { %v572_v18 = vadd.f32 %v564_v20, %v524_v57  ;;  %v529_v20 = vadd.f32 %v521_v45, %v473_v11 }
 0x1b9   : > { %v6623_v58 = vpop.permute.xlu1 %542  ;;  %v6625_v59 = vpop.permute.xlu0 %544 }
 0x1ba   : > { %v565_v31 = vmul.f32 %v6623_v58, %v6714_v26  ;;  %v566_v51 = vmul.f32 %v6625_v59, %v6689_v14  ;;  %v526_v58 = vadd.f32 %v518_v35, %v470_v41 }
 0x1bc   : > { %v573_v5 = vadd.f32 %v565_v31, %v525_v44 }
 0x1bd   : > { %v6627_v60 = vpop.permute.xlu1 %546  ;;  %v6629_v61 = vpop.permute.xlu0 %548 }
 0x1be   : > { %v567_v59 = vmul.f32 %v6627_v60, %v6714_v26 }
 0x1c0   : > { %v575_v34 = vadd.f32 %v567_v59, %v527_v4 }
 0x1c1   : > { %v6631_v62 = vpop.permute.xlu1 %550  ;;  %v6633_v63 = vpop.permute.xlu0 %552 }
 0x1c2   : > { %v569_v12 = vmul.f32 %v6631_v62, %v6714_v26  ;;  %v570_v55 = vmul.f32 %v6633_v63, %v6689_v14 }
 0x1c5   : > { %v6650_v19 = vpop.permute.xlu1 %554  ;;  %v589_v24 = vpop.permute.xlu0 %588 }
 0x1c6   : > { %v612_v29 = vmul.f32 %v589_v24, %v6696_v40  ;;  %v474_v24 = vmul.f32 %v6601_v47, %v426_v3  ;;  %v568_v3 = vmul.f32 %v6629_v61, %v6689_v14  ;;  %v528_v47 = vadd.f32 %v520_v43, %v472_v42 }
 0x1c8   : > { %v620_v25 = vadd.f32 %v612_v29, %v572_v18  ;;  %v576_v42 = vadd.f32 %v568_v3, %v528_v47 }
 0x1c9   : > { %v591_v6 = vpop.permute.xlu1 %590  ;;  %v593_v13 = vpop.permute.xlu0 %592 }
 0x1ca   : > { %v613_v52 = vmul.f32 %v591_v6, %v6725_v22  ;;  %v614_v46 = vmul.f32 %v593_v13, %v6696_v40  ;;  %v574_v6 = vadd.f32 %v566_v51, %v526_v58 }
 0x1cc   : > { %v621_v23 = vadd.f32 %v613_v52, %v573_v5  ;;  %v622_v35 = vadd.f32 %v614_v46, %v574_v6  ;;  %v690_v5 = vmul.f32 %v6683_v2, %v6550_v39  ;;  %v10729_v6 = vld [vmem:[#allocation36_spill] sm:$0xff] }
 0x1cd   : > { %v595_v9 = vpop.permute.xlu1 %594  ;;  %v597_v10 = vpop.permute.xlu0 %596 }
 0x1ce   : > { %v615_v30 = vmul.f32 %v595_v9, %v6725_v22  ;;  %v616_v13 = vmul.f32 %v597_v10, %v6696_v40  ;;  %v530_v9 = vadd.f32 %v522_v54, %v474_v24  ;;  %v523_v10 = vmul.f32 %v6619_v56, %v6687_v15 }
 0x1cf   : > { %v475_v15 = vmul.f32 %v6603_v48, %v6681_v1  ;;  %v577_v56 = vadd.f32 %v569_v12, %v529_v20 }
 0x1d0   : > { %v624_v11 = vadd.f32 %v616_v13, %v576_v42  ;;  %v578_v24 = vadd.f32 %v570_v55, %v530_v9 }
 0x1d1   : > { %v599_v17 = vpop.permute.xlu1 %598  ;;  %v601_v28 = vpop.permute.xlu0 %600  ;;  %v531_v52 = vadd.f32 %v523_v10, %v475_v15 }
 0x1d2   : > { %v617_v43 = vmul.f32 %v599_v17, %v6725_v22  ;;  %v618_v18 = vmul.f32 %v601_v28, %v6696_v40  ;;  %v687_v17 = vmul.f32 %v6685_v0, %v6542_v36  ;;  %v571_v40 = vmul.f32 %v6650_v19, %v6714_v26 }
 0x1d3   : > { %v689_v26 = vmul.f32 %v6685_v0, %v6548_v38  ;;  %v10731_v38 = vld [vmem:[#allocation34_spill] sm:$0xff] }
 0x1d4   : > { %v626_v58 = vadd.f32 %v618_v18, %v578_v24 }
 0x1d5   : > { %v603_v7 = vpop.permute.xlu1 %602  ;;  %v637_v8 = vpop.permute.xlu0 %636 }
 0x1d6   : > { %v660_v53 = vmul.f32 %v637_v8, %v6733_v32  ;;  %v625_v8 = vadd.f32 %v617_v43, %v577_v56 }
 0x1d8   : > { %v668_v49 = vadd.f32 %v660_v53, %v620_v25  ;;  %v619_v25 = vmul.f32 %v603_v7, %v6725_v22 }
 0x1d9   : > { %v639_v41 = vpop.permute.xlu1 %638  ;;  %v641_v57 = vpop.permute.xlu0 %640 }
 0x1da   : > { %v6765_v29 = vadd.f32 %v684_v27, %v668_v49  ;;  %v661_v60 = vmul.f32 %v639_v41, %v6735_v33  ;;  %v662_v61 = vmul.f32 %v641_v57, %v6733_v32  ;;  %v623_v27 = vadd.f32 %v615_v30, %v575_v34  ;;  %v10732_v30 = vld [vmem:[#allocation35_spill] sm:$0xff] }
 0x1db   : > { %v701_v13 = vmax.f32 %v10732_v30, 0.0 }
 0x1dc   : > { %10722 = vst [vmem:[#allocation37_spill] sm:$0xff] %v6765_v29  ;;  %v669_v50 = vadd.f32 %v661_v60, %v621_v23  ;;  %v670_v31 = vadd.f32 %v662_v61, %v622_v35  ;;  %v700_v23 = vmax.f32 %v10731_v38, 0.0 }
 0x1dd   : > { %v643_v51 = vpop.permute.xlu1 %642  ;;  %v645_v44 = vpop.permute.xlu0 %644  ;;  %v703_v39 = vmin.f32 %v701_v13, 5.0 }
 0x1de   : > { %v6777_v45 = vadd.f32 %v685_v21, %v669_v50  ;;  %v6780_v62 = vadd.f32 %v6720_v16, %v670_v31  ;;  %v663_v14 = vmul.f32 %v643_v51, %v6735_v33  ;;  %v664_v63 = vmul.f32 %v645_v44, %v6733_v32 }
 0x1df   : > { %v688_v16 = vmul.f32 %v6683_v2, %v6544_v37  ;;  %v579_v37 = vadd.f32 %v571_v40, %v531_v52  ;;  %v702_v2 = vmin.f32 %v700_v23, 5.0  ;;  %v6816_v57 = vfloor.f32 %v703_v39 }
 0x1e0   : > { %10723 = vst [vmem:[#allocation38_spill] sm:$0xff] %v6777_v45  ;;  %10724 = vst [vmem:[#allocation39_spill] sm:$0xff] %v6780_v62  ;;  %v671_v21 = vadd.f32 %v663_v14, %v623_v27  ;;  %v672_v28 = vadd.f32 %v664_v63, %v624_v11 }
 0x1e1   : > { %v647_v46 = vpop.permute.xlu1 %646  ;;  %v649_v1 = vpop.permute.xlu0 %648  ;;  %v627_v7 = vadd.f32 %v619_v25, %v579_v37  ;;  %v6814_v41 = vfloor.f32 %v702_v2 }
 0x1e2   : > { %v6793_v48 = vadd.f32 %v687_v17, %v671_v21  ;;  %v6795_v53 = vadd.f32 %v688_v16, %v672_v28  ;;  %v665_v36 = vmul.f32 %v647_v46, %v6735_v33  ;;  %v666_v19 = vmul.f32 %v649_v1, %v6733_v32 }
 0x1e3   : > { %v691_v32 = vmul.f32 %v6685_v0, %v10729_v6  ;;  %v6819_v35 = vsub.f32 %v702_v2, %v6814_v41 }
 0x1e4   : > { %10725 = vst [vmem:[#allocation40_spill] sm:$0xff] %v6793_v48  ;;  %10726 = vst [vmem:[#allocation41_spill] sm:$0xff] %v6795_v53  ;;  %v673_v4 = vadd.f32 %v665_v36, %v625_v8  ;;  %v674_v59 = vadd.f32 %v666_v19, %v626_v58 }
 0x1e5   : > { %v651_v22 = vpop.permute.xlu1 %650 }
 0x1e6   : > { %v6803_v3 = vadd.f32 %v689_v26, %v673_v4  ;;  %v6805_v47 = vadd.f32 %v690_v5, %v674_v59  ;;  %v667_v54 = vmul.f32 %v651_v22, %v6735_v33  ;;  %v6822_v33 = vsub.f32 %v703_v39, %v6816_v57 }
 0x1e8   : > { %10727 = vst [vmem:[#allocation42_spill] sm:$0xff] %v6803_v3  ;;  %10728 = vst [vmem:[#allocation43_spill] sm:$0xff] %v6805_v47  ;;  %v675_v49 = vadd.f32 %v667_v54, %v627_v7 }
 0x1ea   : > { %v6810_v20 = vadd.f32 %v691_v32, %v675_v49 }
 0x1ec   : > { %10730 = vst [vmem:[#allocation44_spill] sm:$0xff] %v6810_v20 }
 0x1ed   : > { %s6154_s12 = smov 5   ;;  %v10733_v0 = vld [vmem:[#allocation20_spill] sm:$0xff]  ;;  %v10734_v60 = vld [vmem:[#allocation22_spill] sm:$0xff]  ;;  %v6155_v61 = vmov 0.0   ;;  %v10735_v34 = vld [vmem:[#allocation21_spill] sm:$0xff]  ;;  %s6156_s8 = smov 123  }
 0x1ee   : > { %732 = vrot.lane.b32.xlu0 %v10733_v0, %s6154_s12  ;;  %736 = vrot.lane.b32.xlu1 %v10734_v60, %s6154_s12  ;;  %709 = vst.msk [vmem:[#allocation12] sm:$0xff] %vm356_vm0, %v6155_v61  ;;  %710 = vst.msk [vmem:[#allocation12 + $0x8] sm:$0xff] %vm356_vm0, %v6155_v61  ;;  %v10736_v42 = vld [vmem:[#allocation23_spill] sm:$0xff]  ;;  %v10737_v12 = vld [vmem:[#allocation24_spill] sm:$0xff]  ;;  %s6157_s20 = smov 122   ;;  %s6158_s5 = smov 121  }
 0x1ef   : > { %711 = vst.msk [vmem:[#allocation12 + $0x10] sm:$0xff] %vm356_vm0, %v6155_v61  ;;  %712 = vst.msk [vmem:[#allocation12 + $0x18] sm:$0xff] %vm356_vm0, %v6155_v61  ;;  %v10738_v55 = vld [vmem:[#allocation25_spill] sm:$0xff]  ;;  %v10739_v9 = vld [vmem:[#allocation32_spill] sm:$0xff]  ;;  %s6159_s28 = smov 120   ;;  %s6160_s13 = smov 119  }
 0x1f0   : > { %713 = vst.msk [vmem:[#allocation12 + $0x20] sm:$0xff] %vm356_vm0, %v6155_v61  ;;  %714 = vst.msk [vmem:[#allocation12 + $0x28] sm:$0xff] %vm356_vm0, %v6155_v61  ;;  %v10740_v10 = vld [vmem:[#allocation33_spill] sm:$0xff]  ;;  %s6161_s10 = smov 118   ;;  %v6857_v8 = vsub.f32 1.0, %v6819_v35  ;;  %v6867_v36 = vsub.f32 1.0, %v6822_v33 }
 0x1f1   : > { %715 = vst.msk [vmem:[#allocation12 + $0x30] sm:$0xff] %vm356_vm0, %v6155_v61  ;;  %716 = vst.msk [vmem:[#allocation12 + $0x38] sm:$0xff] %vm356_vm0, %v6155_v61  ;;  %vm774_vm0 = vcmp.eq.f32.partialorder %v6814_v41, -1.0  ;;  %vm769_vm3 = vcmp.eq.f32.partialorder %v6816_v57, 0.0  ;;  %vm775_vm5 = vcmp.eq.f32.partialorder %v6816_v57, -1.0  ;;  %vm837_vm6 = vcmp.eq.f32.partialorder %v6816_v57, 1.0 }
 0x1f2   : > { %718 = vst.msk [vmem:[#allocation12] sm:$0xff] %vm365_vm1, %v6155_v61  ;;  %720 = vst.msk [vmem:[#allocation12 + $0x10] sm:$0xff] %vm365_vm1, %v6155_v61  ;;  %734 = vrot.lane.b32.xlu0 %v10735_v34, %s6154_s12  ;;  %738 = vrot.lane.b32.xlu1 %v10736_v42, %s6154_s12  ;;  %v776_v46 = vsel %vm774_vm0, %v6819_v35, 0.0  ;;  %v773_v22 = vsel %vm769_vm3, %v6867_v36, 0.0  ;;  %v777_v7 = vsel %vm775_vm5, %v6822_v33, 0.0  ;;  %v839_v54 = vsel %vm837_vm6, %v6867_v36, 0.0 }
 0x1f3   : > { %719 = vst.msk [vmem:[#allocation12 + $0x8] sm:$0xff] %vm365_vm1, %v6155_v61  ;;  %721 = vst.msk [vmem:[#allocation12 + $0x18] sm:$0xff] %vm365_vm1, %v6155_v61  ;;  %v841_v6 = vsel %vm769_vm3, %v6822_v33, 0.0  ;;  %v6893_v23 = vadd.f32 %v777_v7, %v773_v22  ;;  %vm884_vm7 = vcmp.eq.f32.partialorder %v6814_v41, 2.0  ;;  %vm885_vm8 = vcmp.eq.f32.partialorder %v6816_v57, 2.0 }
 0x1f4   : > { %722 = vst.msk [vmem:[#allocation12 + $0x20] sm:$0xff] %vm365_vm1, %v6155_v61  ;;  %723 = vst.msk [vmem:[#allocation12 + $0x28] sm:$0xff] %vm365_vm1, %v6155_v61  ;;  %v6896_v13 = vadd.f32 %v841_v6, %v839_v54  ;;  %vm932_vm9 = vcmp.eq.f32.partialorder %v6814_v41, 3.0  ;;  %vm980_vm10 = vcmp.eq.f32.partialorder %v6814_v41, 4.0  ;;  %vm933_vm11 = vcmp.eq.f32.partialorder %v6816_v57, 3.0 }
 0x1f5   : > { %724 = vst.msk [vmem:[#allocation12 + $0x30] sm:$0xff] %vm365_vm1, %v6155_v61  ;;  %725 = vst.msk [vmem:[#allocation12 + $0x38] sm:$0xff] %vm365_vm1, %v6155_v61  ;;  %vm768_vm1 = vcmp.eq.f32.partialorder %v6814_v41, 0.0  ;;  %vm981_vm12 = vcmp.eq.f32.partialorder %v6816_v57, 4.0  ;;  %vm1028_vm13 = vcmp.eq.f32.partialorder %v6814_v41, 5.0  ;;  %vm1029_vm14 = vcmp.eq.f32.partialorder %v6816_v57, 5.0 }
 0x1f6   : > { %740 = vrot.lane.b32.xlu0 %v10737_v12, %s6154_s12  ;;  %742 = vrot.lane.b32.xlu1 %v10738_v55, %s6154_s12  ;;  %v772_v1 = vsel %vm768_vm1, %v6857_v8, 0.0  ;;  %v840_v26 = vsel %vm768_vm1, %v6819_v35, 0.0  ;;  %v935_v55 = vsel %vm933_vm11, %v6867_v36, 0.0  ;;  %v985_v3 = vsel %vm933_vm11, %v6822_v33, 0.0 }
 0x1f7   : > { %v6880_v5 = vadd.f32 %v776_v46, %v772_v1  ;;  %v1030_v42 = vsel %vm1028_vm13, %v6857_v8, 0.0  ;;  %v1033_v48 = vsel %vm981_vm12, %v6822_v33, 0.0 }
 0x1fa   : > { %759 = vrot.lane.b32.xlu0 %v10739_v9, %s6154_s12  ;;  %761 = vrot.lane.b32.xlu1 %v10740_v10, %s6154_s12 }
 0x260   : > { %v733_v50 = vpop.permute.xlu0 %732  ;;  %v737_v31 = vpop.permute.xlu1 %736 }
 0x261   : > { %751 = vst.msk [vmem:[#allocation12] sm:$0xff] %vm398_vm2, %v733_v50  ;;  %753 = vst.msk [vmem:[#allocation12 + $0x10] sm:$0xff] %vm398_vm2, %v737_v31 }
 0x264   : > { %v735_v27 = vpop.permute.xlu0 %734  ;;  %v739_v11 = vpop.permute.xlu1 %738 }
 0x265   : > { %752 = vst.msk [vmem:[#allocation12 + $0x8] sm:$0xff] %vm398_vm2, %v735_v27  ;;  %754 = vst.msk [vmem:[#allocation12 + $0x18] sm:$0xff] %vm398_vm2, %v739_v11 }
 0x268   : > { %v741_v43 = vpop.permute.xlu0 %740  ;;  %v780_v18 = vld [vmem:[#allocation12] sm:$0xff]  ;;  %v743_v51 = vpop.permute.xlu1 %742  ;;  %v782_v44 = vld [vmem:[#allocation12 + $0x10] sm:$0xff] }
 0x269   : > { %755 = vst.msk [vmem:[#allocation12 + $0x20] sm:$0xff] %vm398_vm2, %v741_v43  ;;  %796 = vrot.lane.b32.xlu0 %v780_v18, %s6156_s8  ;;  %756 = vst.msk [vmem:[#allocation12 + $0x28] sm:$0xff] %vm398_vm2, %v743_v51 }
 0x26c   : > { %v760_v14 = vpop.permute.xlu0 %759  ;;  %v781_v63 = vld [vmem:[#allocation12 + $0x8] sm:$0xff]  ;;  %v762_v15 = vpop.permute.xlu1 %761  ;;  %v783_v56 = vld [vmem:[#allocation12 + $0x18] sm:$0xff] }
 0x26d   : > { %766 = vst.msk [vmem:[#allocation12 + $0x30] sm:$0xff] %vm398_vm2, %v760_v14  ;;  %798 = vrot.lane.b32.xlu1 %v781_v63, %s6156_s8  ;;  %800 = vrot.lane.b32.xlu0 %v782_v44, %s6156_s8  ;;  %767 = vst.msk [vmem:[#allocation12 + $0x38] sm:$0xff] %vm398_vm2, %v762_v15  ;;  %vm836_vm2 = vcmp.eq.f32.partialorder %v6814_v41, 1.0 }
 0x26e   : > { %v838_v19 = vsel %vm836_vm2, %v6857_v8, 0.0 }
 0x26f   : > { %v6882_v59 = vadd.f32 %v840_v26, %v838_v19 }
 0x270   : > { %v784_v24 = vld [vmem:[#allocation12 + $0x20] sm:$0xff]  ;;  %v785_v17 = vld [vmem:[#allocation12 + $0x28] sm:$0xff] }
 0x271   : > { %802 = vrot.lane.b32.xlu1 %v783_v56, %s6156_s8  ;;  %804 = vrot.lane.b32.xlu0 %v784_v24, %s6156_s8 }
 0x274   : > { %v786_v40 = vld [vmem:[#allocation12 + $0x30] sm:$0xff]  ;;  %v787_v21 = vld [vmem:[#allocation12 + $0x38] sm:$0xff] }
 0x275   : > { %806 = vrot.lane.b32.xlu1 %v785_v17, %s6156_s8  ;;  %808 = vrot.lane.b32.xlu0 %v786_v40, %s6156_s8 }
 0x279   : > { %810 = vrot.lane.b32.xlu1 %v787_v21, %s6156_s8  ;;  %844 = vrot.lane.b32.xlu0 %v780_v18, %s6157_s20 }
 0x27d   : > { %846 = vrot.lane.b32.xlu1 %v781_v63, %s6157_s20  ;;  %848 = vrot.lane.b32.xlu0 %v782_v44, %s6157_s20 }
 0x281   : > { %850 = vrot.lane.b32.xlu1 %v783_v56, %s6157_s20  ;;  %852 = vrot.lane.b32.xlu0 %v784_v24, %s6157_s20 }
 0x285   : > { %854 = vrot.lane.b32.xlu1 %v785_v17, %s6157_s20  ;;  %856 = vrot.lane.b32.xlu0 %v786_v40, %s6157_s20 }
 0x289   : > { %858 = vrot.lane.b32.xlu1 %v787_v21, %s6157_s20  ;;  %892 = vrot.lane.b32.xlu0 %v780_v18, %s6158_s5 }
 0x28d   : > { %894 = vrot.lane.b32.xlu1 %v781_v63, %s6158_s5  ;;  %896 = vrot.lane.b32.xlu0 %v782_v44, %s6158_s5 }
 0x291   : > { %898 = vrot.lane.b32.xlu1 %v783_v56, %s6158_s5  ;;  %900 = vrot.lane.b32.xlu0 %v784_v24, %s6158_s5 }
 0x295   : > { %902 = vrot.lane.b32.xlu1 %v785_v17, %s6158_s5  ;;  %904 = vrot.lane.b32.xlu0 %v786_v40, %s6158_s5 }
 0x299   : > { %906 = vrot.lane.b32.xlu1 %v787_v21, %s6158_s5  ;;  %940 = vrot.lane.b32.xlu0 %v780_v18, %s6159_s28 }
 0x29d   : > { %942 = vrot.lane.b32.xlu1 %v781_v63, %s6159_s28  ;;  %944 = vrot.lane.b32.xlu0 %v782_v44, %s6159_s28 }
 0x2a1   : > { %946 = vrot.lane.b32.xlu1 %v783_v56, %s6159_s28  ;;  %948 = vrot.lane.b32.xlu0 %v784_v24, %s6159_s28 }
 0x2a5   : > { %950 = vrot.lane.b32.xlu1 %v785_v17, %s6159_s28  ;;  %952 = vrot.lane.b32.xlu0 %v786_v40, %s6159_s28 }
 0x2a9   : > { %954 = vrot.lane.b32.xlu1 %v787_v21, %s6159_s28  ;;  %988 = vrot.lane.b32.xlu0 %v780_v18, %s6160_s13 }
 0x2ad   : > { %990 = vrot.lane.b32.xlu1 %v781_v63, %s6160_s13  ;;  %992 = vrot.lane.b32.xlu0 %v782_v44, %s6160_s13 }
 0x2b1   : > { %994 = vrot.lane.b32.xlu1 %v783_v56, %s6160_s13  ;;  %996 = vrot.lane.b32.xlu0 %v784_v24, %s6160_s13 }
 0x2b5   : > { %998 = vrot.lane.b32.xlu1 %v785_v17, %s6160_s13  ;;  %1000 = vrot.lane.b32.xlu0 %v786_v40, %s6160_s13 }
 0x2b9   : > { %1002 = vrot.lane.b32.xlu1 %v787_v21, %s6160_s13  ;;  %1036 = vrot.lane.b32.xlu0 %v780_v18, %s6161_s10 }
 0x2bd   : > { %1038 = vrot.lane.b32.xlu1 %v781_v63, %s6161_s10  ;;  %1040 = vrot.lane.b32.xlu0 %v782_v44, %s6161_s10 }
 0x2c1   : > { %1042 = vrot.lane.b32.xlu1 %v783_v56, %s6161_s10  ;;  %1044 = vrot.lane.b32.xlu0 %v784_v24, %s6161_s10 }
 0x2c5   : > { %1046 = vrot.lane.b32.xlu1 %v785_v17, %s6161_s10  ;;  %1048 = vrot.lane.b32.xlu0 %v786_v40, %s6161_s10 }
 0x2c9   : > { %1050 = vrot.lane.b32.xlu1 %v787_v21, %s6161_s10 }
 0x2db   : > { %v797_v16 = vpop.permute.xlu0 %796 }
 0x2dc   : > { %v820_v38 = vmul.f32 %v797_v16, %v6880_v5 }
 0x2df   : > { %v799_v28 = vpop.permute.xlu1 %798  ;;  %v801_v52 = vpop.permute.xlu0 %800 }
 0x2e0   : > { %v821_v9 = vmul.f32 %v799_v28, %v6893_v23  ;;  %v822_v10 = vmul.f32 %v801_v52, %v6880_v5 }
 0x2e3   : > { %v803_v58 = vpop.permute.xlu1 %802  ;;  %v6862_v25 = vpop.permute.xlu0 %804 }
 0x2e4   : > { %v823_v51 = vmul.f32 %v803_v58, %v6893_v23  ;;  %v824_v41 = vmul.f32 %v6862_v25, %v6880_v5 }
 0x2e7   : > { %v6876_v37 = vpop.permute.xlu1 %806  ;;  %v6878_v4 = vpop.permute.xlu0 %808 }
 0x2eb   : > { %v6890_v32 = vpop.permute.xlu1 %810  ;;  %v845_v49 = vpop.permute.xlu0 %844 }
 0x2ec   : > { %v868_v30 = vmul.f32 %v845_v49, %v6882_v59  ;;  %v827_v25 = vmul.f32 %v6890_v32, %v6893_v23 }
 0x2ee   : > { %v6898_v2 = vadd.f32 %v868_v30, %v820_v38  ;;  %v886_v38 = vsel %vm884_vm7, %v6857_v8, 0.0  ;;  %v888_v30 = vsel %vm836_vm2, %v6819_v35, 0.0 }
 0x2ef   : > { %v847_v39 = vpop.permute.xlu1 %846  ;;  %v849_v61 = vpop.permute.xlu0 %848 }
 0x2f0   : > { %v869_v50 = vmul.f32 %v847_v39, %v6896_v13  ;;  %v870_v31 = vmul.f32 %v849_v61, %v6882_v59  ;;  %v887_v39 = vsel %vm885_vm8, %v6867_v36, 0.0  ;;  %v889_v61 = vsel %vm837_vm6, %v6822_v33, 0.0 }
 0x2f1   : > { %v6960_v20 = vadd.f32 %v889_v61, %v887_v39  ;;  %v1032_v39 = vsel %vm980_vm10, %v6819_v35, 0.0 }
 0x2f2   : > { %v6904_v27 = vadd.f32 %v869_v50, %v821_v9  ;;  %v6906_v11 = vadd.f32 %v870_v31, %v822_v10  ;;  %v934_v9 = vsel %vm932_vm9, %v6857_v8, 0.0  ;;  %v936_v10 = vsel %vm884_vm7, %v6819_v35, 0.0 }
 0x2f3   : > { %v851_v43 = vpop.permute.xlu1 %850  ;;  %v853_v18 = vpop.permute.xlu0 %852  ;;  %v6962_v47 = vadd.f32 %v936_v10, %v934_v9  ;;  %v1031_v10 = vsel %vm1029_vm14, %v6867_v36, 0.0  ;;  %v6988_v45 = vadd.f32 %v1032_v39, %v1030_v42 }
 0x2f4   : > { %v871_v44 = vmul.f32 %v851_v43, %v6896_v13  ;;  %v890_v43 = vadd.f32 %v888_v30, %v886_v38  ;;  %v937_v38 = vsel %vm885_vm8, %v6822_v33, 0.0  ;;  %v983_v30 = vsel %vm981_vm12, %v6867_v36, 0.0 }
 0x2f5   : > { %v6982_v60 = vadd.f32 %v937_v38, %v935_v55  ;;  %v872_v62 = vmul.f32 %v853_v18, %v6882_v59  ;;  %v6994_v33 = vadd.f32 %v1033_v48, %v1031_v10  ;;  %v825_v55 = vmul.f32 %v6876_v37, %v6893_v23 }
 0x2f6   : > { %v6910_v14 = vadd.f32 %v871_v44, %v823_v51  ;;  %v982_v51 = vsel %vm980_vm10, %v6857_v8, 0.0  ;;  %v984_v44 = vsel %vm932_vm9, %v6819_v35, 0.0  ;;  %v6986_v8 = vadd.f32 %v985_v3, %v983_v30 }
 0x2f7   : > { %v855_v63 = vpop.permute.xlu1 %854  ;;  %v6912_v15 = vpop.permute.xlu0 %856  ;;  %v6976_v9 = vadd.f32 %v984_v44, %v982_v51 }
 0x2f8   : > { %v873_v35 = vmul.f32 %v855_v63, %v6896_v13  ;;  %v874_v63 = vmul.f32 %v6912_v15, %v6882_v59 }
 0x2fb   : > { %v6914_v56 = vpop.permute.xlu1 %858  ;;  %v893_v24 = vpop.permute.xlu0 %892 }
 0x2fc   : > { %v916_v61 = vmul.f32 %v893_v24, %v890_v43 }
 0x2fe   : > { %v924_v18 = vadd.f32 %v916_v61, %v6898_v2 }
 0x2ff   : > { %v895_v17 = vpop.permute.xlu1 %894  ;;  %v897_v40 = vpop.permute.xlu0 %896 }
 0x300   : > { %v917_v36 = vmul.f32 %v895_v17, %v6960_v20  ;;  %v918_v3 = vmul.f32 %v897_v40, %v890_v43  ;;  %v880_v17 = vadd.f32 %v872_v62, %v824_v41  ;;  %v881_v40 = vadd.f32 %v873_v35, %v825_v55 }
 0x302   : > { %v926_v59 = vadd.f32 %v918_v3, %v6906_v11 }
 0x303   : > { %v6916_v21 = vpop.permute.xlu1 %898  ;;  %v6918_v16 = vpop.permute.xlu0 %900 }
 0x304   : > { %v919_v37 = vmul.f32 %v6916_v21, %v6960_v20 }
 0x307   : > { %v6920_v28 = vpop.permute.xlu1 %902  ;;  %v6922_v52 = vpop.permute.xlu0 %904 }
 0x30b   : > { %v6924_v58 = vpop.permute.xlu1 %906  ;;  %v941_v46 = vpop.permute.xlu0 %940 }
 0x30c   : > { %v964_v34 = vmul.f32 %v941_v46, %v6962_v47  ;;  %v826_v46 = vmul.f32 %v6878_v4, %v6880_v5  ;;  %v920_v4 = vmul.f32 %v6918_v16, %v890_v43  ;;  %v927_v16 = vadd.f32 %v919_v37, %v6910_v14 }
 0x30d   : > { %v923_v3 = vmul.f32 %v6924_v58, %v6960_v20 }
 0x30e   : > { %v972_v51 = vadd.f32 %v964_v34, %v924_v18  ;;  %v882_v21 = vadd.f32 %v874_v63, %v826_v46  ;;  %v921_v34 = vmul.f32 %v6920_v28, %v6960_v20  ;;  %v928_v38 = vadd.f32 %v920_v4, %v880_v17 }
 0x30f   : > { %v943_v1 = vpop.permute.xlu1 %942  ;;  %v945_v19 = vpop.permute.xlu0 %944 }
 0x310   : > { %v965_v48 = vmul.f32 %v943_v1, %v6982_v60  ;;  %v966_v2 = vmul.f32 %v945_v19, %v6962_v47  ;;  %v929_v35 = vadd.f32 %v921_v34, %v881_v40  ;;  %v10751_v34 = vld [vmem:[#allocation39_spill] sm:$0xff] }
 0x313   : > { %v6926_v26 = vpop.permute.xlu1 %946  ;;  %v6928_v22 = vpop.permute.xlu0 %948 }
 0x314   : > { %v968_v44 = vmul.f32 %v6928_v22, %v6962_v47  ;;  %v875_v22 = vmul.f32 %v6914_v56, %v6896_v13 }
 0x317   : > { %v6930_v7 = vpop.permute.xlu1 %950  ;;  %v6932_v54 = vpop.permute.xlu0 %952 }
 0x31b   : > { %v6936_v6 = vpop.permute.xlu1 %954  ;;  %v989_v49 = vpop.permute.xlu0 %988 }
 0x31c   : > { %v1012_v42 = vmul.f32 %v989_v49, %v6976_v9  ;;  %v925_v49 = vadd.f32 %v917_v36, %v6904_v27  ;;  %v967_v27 = vmul.f32 %v6926_v26, %v6982_v60 }
 0x31e   : > { %v1020_v15 = vadd.f32 %v1012_v42, %v972_v51  ;;  %v973_v19 = vadd.f32 %v965_v48, %v925_v49  ;;  %v975_v36 = vadd.f32 %v967_v27, %v927_v16  ;;  %v971_v51 = vmul.f32 %v6936_v6, %v6982_v60  ;;  %v10753_v27 = vld [vmem:[#allocation40_spill] sm:$0xff] }
 0x31f   : > { %v991_v50 = vpop.permute.xlu1 %990  ;;  %v993_v31 = vpop.permute.xlu0 %992  ;;  %v10754_v16 = vld [vmem:[#allocation23_spill] sm:$0xff] }
 0x320   : > { %v1013_v5 = vmul.f32 %v991_v50, %v6986_v8  ;;  %v1014_v62 = vmul.f32 %v993_v31, %v6976_v9  ;;  %v974_v50 = vadd.f32 %v966_v2, %v926_v59  ;;  %v922_v31 = vmul.f32 %v6922_v52, %v890_v43 }
 0x321   : > { %v969_v52 = vmul.f32 %v6930_v7, %v6982_v60  ;;  %v976_v43 = vadd.f32 %v968_v44, %v928_v38  ;;  %v10755_v44 = vld [vmem:[#allocation41_spill] sm:$0xff] }
 0x322   : > { %v1021_v30 = vadd.f32 %v1013_v5, %v973_v19  ;;  %v1022_v10 = vadd.f32 %v1014_v62, %v974_v50  ;;  %v10752_v19 = vld [vmem:[#allocation22_spill] sm:$0xff]  ;;  %v1079_v50 = vsub.f32 %v10754_v16, %v10753_v27  ;;  %v10756_v38 = vld [vmem:[#allocation24_spill] sm:$0xff] }
 0x323   : > { %v995_v12 = vpop.permute.xlu1 %994  ;;  %v997_v53 = vpop.permute.xlu0 %996  ;;  %v977_v17 = vadd.f32 %v969_v52, %v929_v35  ;;  %v10764_v35 = vld [vmem:[#allocation28_spill] sm:$0xff] }
 0x324   : > { %v1015_v39 = vmul.f32 %v995_v12, %v6986_v8  ;;  %v1016_v41 = vmul.f32 %v997_v53, %v6976_v9  ;;  %v970_v12 = vmul.f32 %v6932_v54, %v6962_v47  ;;  %v930_v53 = vadd.f32 %v922_v31, %v882_v21  ;;  %v10749_v21 = vld [vmem:[#allocation38_spill] sm:$0xff] }
 0x325   : > { %v883_v54 = vadd.f32 %v875_v22, %v827_v25  ;;  %v1080_v31 = vsub.f32 %v10756_v38, %v10755_v44  ;;  %v7086_v52 = vand.u32 2147483647, %v1079_v50 }
 0x326   : > { %v1023_v42 = vadd.f32 %v1015_v39, %v975_v36  ;;  %v1024_v63 = vadd.f32 %v1016_v41, %v976_v43  ;;  %v978_v37 = vadd.f32 %v970_v12, %v930_v53  ;;  %v10758_v39 = vld [vmem:[#allocation25_spill] sm:$0xff] }
 0x327   : > { %v999_v24 = vpop.permute.xlu1 %998  ;;  %v1001_v57 = vpop.permute.xlu0 %1000  ;;  %v931_v58 = vadd.f32 %v923_v3, %v883_v54  ;;  %10765 = vst [vmem:[#allocation56_spill] sm:$0xff] %v7086_v52  ;;  %v7088_v43 = vand.u32 2147483647, %v1080_v31  ;;  %v10768_v53 = vld [vmem:[#allocation29_spill] sm:$0xff] }
 0x328   : > { %v1017_v13 = vmul.f32 %v999_v24, %v6986_v8  ;;  %v1018_v7 = vmul.f32 %v1001_v57, %v6976_v9 }
 0x329   : > { %v979_v5 = vadd.f32 %v971_v51, %v931_v58  ;;  %10766 = vst [vmem:[#allocation57_spill] sm:$0xff] %v7088_v43 }
 0x32a   : > { %v1025_v24 = vadd.f32 %v1017_v13, %v977_v17  ;;  %v1026_v4 = vadd.f32 %v1018_v7, %v978_v37 }
 0x32b   : > { %v1003_v32 = vpop.permute.xlu1 %1002  ;;  %v1037_v23 = vpop.permute.xlu0 %1036 }
 0x32c   : > { %v1060_v1 = vmul.f32 %v1037_v23, %v6988_v45  ;;  %v1019_v9 = vmul.f32 %v1003_v32, %v6986_v8  ;;  %v10750_v8 = vld [vmem:[#allocation21_spill] sm:$0xff] }
 0x32d   : > { %v1077_v32 = vsub.f32 %v10750_v8, %v10749_v21 }
 0x32e   : > { %v7023_v11 = vadd.f32 %v1060_v1, %v1020_v15  ;;  %v1027_v6 = vadd.f32 %v1019_v9, %v979_v5  ;;  %v1076_v1 = vsub.f32 %v10733_v0, %v6765_v29 }
 0x32f   : > { %v1039_v61 = vpop.permute.xlu1 %1038  ;;  %v1041_v28 = vpop.permute.xlu0 %1040 }
 0x330   : > { %10741 = vst [vmem:[#allocation45_spill] sm:$0xff] %v7023_v11  ;;  %v1061_v26 = vmul.f32 %v1039_v61, %v6994_v33  ;;  %v1062_v14 = vmul.f32 %v1041_v28, %v6988_v45  ;;  %v10759_v61 = vld [vmem:[#allocation26_spill] sm:$0xff] }
 0x331   : > { %v1088_v28 = vsub.f32 %v10759_v61, %v7023_v11 }
 0x332   : > { %v7036_v55 = vadd.f32 %v1061_v26, %v1021_v30  ;;  %v7038_v18 = vadd.f32 %v1062_v14, %v1022_v10  ;;  %v10757_v30 = vld [vmem:[#allocation42_spill] sm:$0xff]  ;;  %v10760_v10 = vld [vmem:[#allocation27_spill] sm:$0xff]  ;;  %v7078_v26 = vand.u32 2147483647, %v1076_v1  ;;  %v7080_v14 = vand.u32 2147483647, %v1077_v32 }
 0x333   : > { %v1043_v56 = vpop.permute.xlu1 %1042  ;;  %v1045_v46 = vpop.permute.xlu0 %1044 }
 0x334   : > { %10742 = vst [vmem:[#allocation46_spill] sm:$0xff] %v7036_v55  ;;  %10743 = vst [vmem:[#allocation47_spill] sm:$0xff] %v7038_v18  ;;  %v1063_v48 = vmul.f32 %v1043_v56, %v6994_v33  ;;  %v1064_v47 = vmul.f32 %v1045_v46, %v6988_v45  ;;  %v1089_v41 = vsub.f32 %v10760_v10, %v7036_v55  ;;  %v10770_v56 = vld [vmem:[#allocation31_spill] sm:$0xff] }
 0x335   : > { %10761 = vst [vmem:[#allocation53_spill] sm:$0xff] %v7078_v26  ;;  %10762 = vst [vmem:[#allocation54_spill] sm:$0xff] %v7080_v14  ;;  %v1090_v36 = vsub.f32 %v10764_v35, %v7038_v18 }
 0x336   : > { %v7048_v2 = vadd.f32 %v1063_v48, %v1023_v42  ;;  %v7050_v20 = vadd.f32 %v1064_v47, %v1024_v63  ;;  %v10769_v42 = vld [vmem:[#allocation30_spill] sm:$0xff]  ;;  %v7098_v63 = vand.u32 2147483647, %v1088_v28  ;;  %v7100_v7 = vand.u32 2147483647, %v1089_v41 }
 0x337   : > { %v1047_v40 = vpop.permute.xlu1 %1046  ;;  %v1049_v49 = vpop.permute.xlu0 %1048  ;;  %v7102_v48 = vand.u32 2147483647, %v1090_v36 }
 0x338   : > { %10744 = vst [vmem:[#allocation48_spill] sm:$0xff] %v7048_v2  ;;  %10745 = vst [vmem:[#allocation49_spill] sm:$0xff] %v7050_v20  ;;  %v1065_v57 = vmul.f32 %v1047_v40, %v6994_v33  ;;  %v1066_v25 = vmul.f32 %v1049_v49, %v6988_v45  ;;  %v1078_v45 = vsub.f32 %v10752_v19, %v10751_v34 }
 0x339   : > { %v1091_v3 = vsub.f32 %v10768_v53, %v7048_v2  ;;  %v1092_v13 = vsub.f32 %v10769_v42, %v7050_v20  ;;  %10771 = vst [vmem:[#allocation59_spill] sm:$0xff] %v7098_v63  ;;  %10772 = vst [vmem:[#allocation60_spill] sm:$0xff] %v7100_v7 }
 0x33a   : > { %v7055_v23 = vadd.f32 %v1065_v57, %v1025_v24  ;;  %v7057_v59 = vadd.f32 %v1066_v25, %v1026_v4  ;;  %v7082_v22 = vand.u32 2147483647, %v1078_v45  ;;  %10773 = vst [vmem:[#allocation61_spill] sm:$0xff] %v7102_v48 }
 0x33b   : > { %v1051_v60 = vpop.permute.xlu1 %1050  ;;  %v7104_v47 = vand.u32 2147483647, %v1091_v3  ;;  %v7106_v54 = vand.u32 2147483647, %v1092_v13 }
 0x33c   : > { %10746 = vst [vmem:[#allocation50_spill] sm:$0xff] %v7055_v23  ;;  %10747 = vst [vmem:[#allocation51_spill] sm:$0xff] %v7057_v59  ;;  %v1067_v15 = vmul.f32 %v1051_v60, %v6994_v33  ;;  %v1081_v33 = vsub.f32 %v10758_v39, %v10757_v30  ;;  %v1093_v46 = vsub.f32 %v10770_v56, %v7055_v23 }
 0x33d   : > { %10763 = vst [vmem:[#allocation55_spill] sm:$0xff] %v7082_v22  ;;  %10774 = vst [vmem:[#allocation62_spill] sm:$0xff] %v7104_v47 }
 0x33e   : > { %v7060_v62 = vadd.f32 %v1067_v15, %v1027_v6  ;;  %v7090_v12 = vand.u32 2147483647, %v1081_v33  ;;  %10775 = vst [vmem:[#allocation63_spill] sm:$0xff] %v7106_v54  ;;  %v7108_v17 = vand.u32 2147483647, %v1093_v46 }
 0x340   : > { %10748 = vst [vmem:[#allocation52_spill] sm:$0xff] %v7060_v62  ;;  %10767 = vst [vmem:[#allocation58_spill] sm:$0xff] %v7090_v12 }
 0x341   : > { %10776 = vst [vmem:[#allocation64_spill] sm:$0xff] %v7108_v17 }
 0x342   : > { %v1124_v37 = vlaneseq  ;;  %vm10648_vm15 = vcmask 130048   ;;  %v1100_v51 = vmul.f32 %v10733_v0, %v10733_v0  ;;  %v6162_v60 = vmov 1.0|1.0  }
 0x343   : > { %5254 = vmatprep.mubr.msk.f32.mxu0 %vm10648_vm15, %v10733_v0  ;;  %v1101_v6 = vmul.f32 %v10750_v8, %v10750_v8  ;;  %v1102_v15 = vmul.f32 %v10752_v19, %v10752_v19  ;;  %v1103_v1 = vmul.f32 %v10754_v16, %v10754_v16  ;;  %v1104_v32 = vmul.f32 %v10756_v38, %v10756_v38 }
 0x344   : > { %v1125_v58 = vshrl.u32 %v1124_v37, 7  ;;  %v7114_v24 = vand.u32 127, %v1124_v37  ;;  %5290 = vmatprep.mubr.msk.f32.mxu1 %vm10648_vm15, %v1100_v51  ;;  %v1105_v45 = vmul.f32 %v10758_v39, %v10758_v39  ;;  %v1106_v50 = vmul.f32 %v10759_v61, %v10759_v61 }
 0x345   : > { %v1107_v31 = vmul.f32 %v10760_v10, %v10760_v10  ;;  %v1108_v33 = vmul.f32 %v10764_v35, %v10764_v35  ;;  %v1109_v28 = vmul.f32 %v10768_v53, %v10768_v53  ;;  %v1110_v41 = vmul.f32 %v10769_v42, %v10769_v42 }
 0x346   : > { %10777 = vst [vmem:[#allocation65_spill] sm:$0xff] %v7114_v24  ;;  %v1126_v40 = vadd.s32 8, %v1125_v58  ;;  %v1129_v49 = vsub.s32 %v1125_v58, %v7114_v24  ;;  %v1111_v36 = vmul.f32 %v10770_v56, %v10770_v56  ;;  %v1112_v3 = vmul.f32 %v6765_v29, %v6765_v29 }
 0x347   : > { %v1113_v13 = vmul.f32 %v10749_v21, %v10749_v21  ;;  %v1114_v46 = vmul.f32 %v10751_v34, %v10751_v34  ;;  %v1115_v37 = vmul.f32 %v10753_v27, %v10753_v27  ;;  %v1116_v51 = vmul.f32 %v10755_v44, %v10755_v44 }
 0x348   : > { %v1130_v4 = vsub.s32 %v1126_v40, %v7114_v24  ;;  %v1132_v9 = vsub.s32 0, %v1129_v49  ;;  %v1117_v58 = vmul.f32 %v10757_v30, %v10757_v30  ;;  %v1118_v40 = vmul.f32 %v7023_v11, %v7023_v11 }
 0x349   : > { %vm1593_vm2 = vcmask 125952  }
 0x34a   : > { %v5137_v57 = vmin.u32 %v1132_v9, %v1129_v49  ;;  %v1135_v25 = vsub.s32 0, %v1130_v4  ;;  %v1119_v49 = vmul.f32 %v7036_v55, %v7036_v55  ;;  %v1121_v9 = vmul.f32 %v7048_v2, %v7048_v2 }
 0x34c   : > { %v5138_v5 = vmin.u32 %v1135_v25, %v1130_v4  ;;  %vm1137_vm4 = vcmp.le.s32.totalorder %v5137_v57, 4  ;;  %v1120_v4 = vmul.f32 %v7038_v18, %v7038_v18  ;;  %v1122_v57 = vmul.f32 %v7050_v20, %v7050_v20 }
 0x34d   : > { %v1123_v25 = vmul.f32 %v7055_v23, %v7055_v23 }
 0x34e   : > { %vm1138_vm0 = vcmp.le.s32.totalorder %v5138_v5, 4  ;;  %v6163_v5 = vmov 0.0  }
 0x34f   : > { %vm5326_vm1 = vmpackc.low %vm1138_vm0, %vm1137_vm4  ;;  %1618 = vst.msk [vmem:[#allocation13 + $0x14] sm:$0xf] %vm1593_vm2, %v6163_v5 }
 0x350   : > { %5327 = vmatprep.subr.msk.bf16.mxu0 %vm5326_vm1, %v6162_v60  ;;  %5330 = vmatprep.subr.msk.bf16.mxu1 %vm5326_vm1, %v6162_v60  ;;  %1594 = vst.msk [vmem:[#allocation13] sm:$0xf] %vm1593_vm2, %v6163_v5  ;;  %1595 = vst.msk [vmem:[#allocation13 + $0x18] sm:$0xf] %vm1593_vm2, %v6163_v5 }
 0x351   : > { %5329 = vmatpush3.bf16.msk.msra.mxu0 %vm5326_vm1, %v6162_v60  ;;  %5331 = vmatpush3.bf16.msk.msra.mxu1 %vm5326_vm1, %v6162_v60  ;;  %1596 = vst.msk [vmem:[#allocation13 + $0x30] sm:$0xf] %vm1593_vm2, %v6163_v5  ;;  %1597 = vst.msk [vmem:[#allocation13 + $0x48] sm:$0xf] %vm1593_vm2, %v6163_v5 }
 0x352   : > { %1598 = vst.msk [vmem:[#allocation13 + $0x60] sm:$0xf] %vm1593_vm2, %v6163_v5  ;;  %1599 = vst.msk [vmem:[#allocation13 + $0x78] sm:$0xf] %vm1593_vm2, %v6163_v5 }
 0x353   : > { %1600 = vst.msk [vmem:[#allocation13 + $0x90] sm:$0xf] %vm1593_vm2, %v6163_v5  ;;  %1601 = vst.msk [vmem:[#allocation13 + $0xa8] sm:$0xf] %vm1593_vm2, %v6163_v5 }
 0x354   : > { %5255 = vmatmul.mubr.msk.f32.vlgmr.msra.gmra.mrb[0].mxu0 %vm10648_vm15, %v10750_v8  ;;  %5291 = vmatmul.mubr.msk.f32.vlgmr.msra.gmra.mrb[0].mxu1 %vm10648_vm15, %v1101_v6  ;;  %1602 = vst.msk [vmem:[#allocation13 + $0xc0] sm:$0xf] %vm1593_vm2, %v6163_v5  ;;  %1603 = vst.msk [vmem:[#allocation13 + $0xd8] sm:$0xf] %vm1593_vm2, %v6163_v5 }
 0x355   : > { %5257 = vmatprep.mubr.msk.f32.mxu0 %vm10648_vm15, %v10752_v19  ;;  %5293 = vmatprep.mubr.msk.f32.mxu1 %vm10648_vm15, %v1102_v15  ;;  %1604 = vst.msk [vmem:[#allocation13 + $0xf0] sm:$0xf] %vm1593_vm2, %v6163_v5  ;;  %1605 = vst.msk [vmem:[#allocation13 + $0x108] sm:$0xf] %vm1593_vm2, %v6163_v5 }
 0x356   : > { %1606 = vst.msk [vmem:[#allocation13 + $0x120] sm:$0xf] %vm1593_vm2, %v6163_v5  ;;  %1607 = vst.msk [vmem:[#allocation13 + $0x138] sm:$0xf] %vm1593_vm2, %v6163_v5 }
 0x357   : > { %1608 = vst.msk [vmem:[#allocation13 + $0x150] sm:$0xf] %vm1593_vm2, %v6163_v5  ;;  %1609 = vst.msk [vmem:[#allocation13 + $0x168] sm:$0xf] %vm1593_vm2, %v6163_v5 }
 0x358   : > { %5258 = vmatmul.mubr.msk.f32.gmra.mrb[2].mxu0 %vm10648_vm15, %v10754_v16  ;;  %5294 = vmatmul.mubr.msk.f32.gmra.mrb[2].mxu1 %vm10648_vm15, %v1103_v1  ;;  %1610 = vst.msk [vmem:[#allocation13 + $0x180] sm:$0xf] %vm1593_vm2, %v6163_v5  ;;  %1611 = vst.msk [vmem:[#allocation13 + $0x198] sm:$0xf] %vm1593_vm2, %v6163_v5 }
 0x359   : > { %5260 = vmatprep.mubr.msk.f32.mxu0 %vm10648_vm15, %v10756_v38  ;;  %5296 = vmatprep.mubr.msk.f32.mxu1 %vm10648_vm15, %v1104_v32  ;;  %1612 = vst.msk [vmem:[#allocation13 + $0x1b0] sm:$0xf] %vm1593_vm2, %v6163_v5  ;;  %1613 = vst.msk [vmem:[#allocation13 + $0x1c8] sm:$0xf] %vm1593_vm2, %v6163_v5 }
 0x35a   : > { %1614 = vst.msk [vmem:[#allocation13 + $0x1e0] sm:$0xf] %vm1593_vm2, %v6163_v5  ;;  %1615 = vst.msk [vmem:[#allocation13 + $0x1f8] sm:$0xf] %vm1593_vm2, %v6163_v5 }
 0x35b   : > { %1616 = vst.msk [vmem:[#allocation13 + $0x210] sm:$0xf] %vm1593_vm2, %v6163_v5  ;;  %1617 = vst.msk [vmem:[#allocation13 + $0x228] sm:$0xf] %vm1593_vm2, %v6163_v5 }
 0x35c   : > { %5261 = vmatmul.mubr.msk.f32.gmra.mrb[4].mxu0 %vm10648_vm15, %v10758_v39  ;;  %5297 = vmatmul.mubr.msk.f32.gmra.mrb[4].mxu1 %vm10648_vm15, %v1105_v45  ;;  %1619 = vst.msk [vmem:[#allocation13 + $0x2c] sm:$0xf] %vm1593_vm2, %v6163_v5  ;;  %1620 = vst.msk [vmem:[#allocation13 + $0x44] sm:$0xf] %vm1593_vm2, %v6163_v5 }
 0x35d   : > { %5263 = vmatprep.mubr.msk.f32.mxu0 %vm10648_vm15, %v10759_v61  ;;  %5299 = vmatprep.mubr.msk.f32.mxu1 %vm10648_vm15, %v1106_v50  ;;  %1621 = vst.msk [vmem:[#allocation13 + $0x5c] sm:$0xf] %vm1593_vm2, %v6163_v5  ;;  %1622 = vst.msk [vmem:[#allocation13 + $0x74] sm:$0xf] %vm1593_vm2, %v6163_v5 }
 0x35e   : > { %1623 = vst.msk [vmem:[#allocation13 + $0x8c] sm:$0xf] %vm1593_vm2, %v6163_v5  ;;  %1624 = vst.msk [vmem:[#allocation13 + $0xa4] sm:$0xf] %vm1593_vm2, %v6163_v5 }
 0x35f   : > { %1625 = vst.msk [vmem:[#allocation13 + $0xbc] sm:$0xf] %vm1593_vm2, %v6163_v5  ;;  %1626 = vst.msk [vmem:[#allocation13 + $0xd4] sm:$0xf] %vm1593_vm2, %v6163_v5 }
 0x360   : > { %5264 = vmatmul.mubr.msk.f32.gmra.mrb[6].mxu0 %vm10648_vm15, %v10760_v10  ;;  %5300 = vmatmul.mubr.msk.f32.gmra.mrb[6].mxu1 %vm10648_vm15, %v1107_v31  ;;  %1627 = vst.msk [vmem:[#allocation13 + $0xec] sm:$0xf] %vm1593_vm2, %v6163_v5  ;;  %1628 = vst.msk [vmem:[#allocation13 + $0x104] sm:$0xf] %vm1593_vm2, %v6163_v5 }
 0x361   : > { %5266 = vmatprep.mubr.msk.f32.mxu0 %vm10648_vm15, %v10764_v35  ;;  %5302 = vmatprep.mubr.msk.f32.mxu1 %vm10648_vm15, %v1108_v33  ;;  %1629 = vst.msk [vmem:[#allocation13 + $0x11c] sm:$0xf] %vm1593_vm2, %v6163_v5  ;;  %1630 = vst.msk [vmem:[#allocation13 + $0x134] sm:$0xf] %vm1593_vm2, %v6163_v5 }
 0x362   : > { %1631 = vst.msk [vmem:[#allocation13 + $0x14c] sm:$0xf] %vm1593_vm2, %v6163_v5  ;;  %1632 = vst.msk [vmem:[#allocation13 + $0x164] sm:$0xf] %vm1593_vm2, %v6163_v5 }
 0x363   : > { %1633 = vst.msk [vmem:[#allocation13 + $0x17c] sm:$0xf] %vm1593_vm2, %v6163_v5  ;;  %1634 = vst.msk [vmem:[#allocation13 + $0x194] sm:$0xf] %vm1593_vm2, %v6163_v5 }
 0x364   : > { %5267 = vmatmul.mubr.msk.f32.gmra.mrb[8].mxu0 %vm10648_vm15, %v10768_v53  ;;  %5303 = vmatmul.mubr.msk.f32.gmra.mrb[8].mxu1 %vm10648_vm15, %v1109_v28  ;;  %1635 = vst.msk [vmem:[#allocation13 + $0x1ac] sm:$0xf] %vm1593_vm2, %v6163_v5  ;;  %1636 = vst.msk [vmem:[#allocation13 + $0x1c4] sm:$0xf] %vm1593_vm2, %v6163_v5 }
 0x365   : > { %5269 = vmatprep.mubr.msk.f32.mxu0 %vm10648_vm15, %v10769_v42  ;;  %5305 = vmatprep.mubr.msk.f32.mxu1 %vm10648_vm15, %v1110_v41  ;;  %1637 = vst.msk [vmem:[#allocation13 + $0x1dc] sm:$0xf] %vm1593_vm2, %v6163_v5  ;;  %1638 = vst.msk [vmem:[#allocation13 + $0x1f4] sm:$0xf] %vm1593_vm2, %v6163_v5 }
 0x366   : > { %1639 = vst.msk [vmem:[#allocation13 + $0x20c] sm:$0xf] %vm1593_vm2, %v6163_v5  ;;  %1640 = vst.msk [vmem:[#allocation13 + $0x224] sm:$0xf] %vm1593_vm2, %v6163_v5 }
 0x367   : > { %1641 = vst.msk [vmem:[#allocation13 + $0x23c] sm:$0xf] %vm1593_vm2, %v6163_v5 }
 0x368   : > { %5270 = vmatmul.mubr.msk.f32.gmra.mrb[10].mxu0 %vm10648_vm15, %v10770_v56  ;;  %5306 = vmatmul.mubr.msk.f32.gmra.mrb[10].mxu1 %vm10648_vm15, %v1111_v36 }
 0x369   : > { %5272 = vmatprep.mubr.msk.f32.mxu0 %vm10648_vm15, %v6765_v29  ;;  %5308 = vmatprep.mubr.msk.f32.mxu1 %vm10648_vm15, %v1112_v3 }
 0x36c   : > { %5273 = vmatmul.mubr.msk.f32.gmra.mrb[12].mxu0 %vm10648_vm15, %v10749_v21  ;;  %5309 = vmatmul.mubr.msk.f32.gmra.mrb[12].mxu1 %vm10648_vm15, %v1113_v13 }
 0x36d   : > { %5275 = vmatprep.mubr.msk.f32.mxu0 %vm10648_vm15, %v10751_v34  ;;  %5311 = vmatprep.mubr.msk.f32.mxu1 %vm10648_vm15, %v1114_v46 }
 0x370   : > { %5276 = vmatmul.mubr.msk.f32.gmra.mrb[14].mxu0 %vm10648_vm15, %v10753_v27  ;;  %5312 = vmatmul.mubr.msk.f32.gmra.mrb[14].mxu1 %vm10648_vm15, %v1115_v37 }
 0x371   : > { %5278 = vmatprep.mubr.msk.f32.mxu0 %vm10648_vm15, %v10755_v44  ;;  %5314 = vmatprep.mubr.msk.f32.mxu1 %vm10648_vm15, %v1116_v51 }
 0x374   : > { %5279 = vmatmul.mubr.msk.f32.gmra.mrb[16].mxu0 %vm10648_vm15, %v10757_v30  ;;  %5315 = vmatmul.mubr.msk.f32.gmra.mrb[16].mxu1 %vm10648_vm15, %v1117_v58 }
 0x375   : > { %5281 = vmatprep.mubr.msk.f32.mxu0 %vm10648_vm15, %v7023_v11  ;;  %5317 = vmatprep.mubr.msk.f32.mxu1 %vm10648_vm15, %v1118_v40 }
 0x378   : > { %5282 = vmatmul.mubr.msk.f32.gmra.mrb[18].mxu0 %vm10648_vm15, %v7036_v55  ;;  %5318 = vmatmul.mubr.msk.f32.gmra.mrb[18].mxu1 %vm10648_vm15, %v1119_v49 }
 0x379   : > { %5284 = vmatprep.mubr.msk.f32.mxu0 %vm10648_vm15, %v7038_v18  ;;  %5320 = vmatprep.mubr.msk.f32.mxu1 %vm10648_vm15, %v1120_v4 }
 0x37c   : > { %5285 = vmatmul.mubr.msk.f32.gmra.mrb[20].mxu0 %vm10648_vm15, %v7048_v2  ;;  %5321 = vmatmul.mubr.msk.f32.gmra.mrb[20].mxu1 %vm10648_vm15, %v1121_v9 }
 0x37d   : > { %5287 = vmatprep.mubr.msk.f32.mxu0 %vm10648_vm15, %v7050_v20  ;;  %5323 = vmatprep.mubr.msk.f32.mxu1 %vm10648_vm15, %v1122_v57 }
 0x380   : > { %5288 = vmatmul.mubr.msk.f32.gmra.mrb[22].mxu0 %vm10648_vm15, %v7055_v23  ;;  %5324 = vmatmul.mubr.msk.f32.gmra.mrb[22].mxu1 %vm10648_vm15, %v1123_v25 }
 0x427   : > { %v5256_v60 = vpop.f32.mrb[0].mxu0  ;;  %v5292_v6 = vpop.f32.mrb[0].mxu1 }
 0x428   : > { %1643 = vst.msk [vmem:[#allocation13 + $0xc] sm:$0xff] %vm10648_vm15, %v5256_v60  ;;  %1667 = vst.msk [vmem:[#allocation13 + $0x12c] sm:$0xff] %vm10648_vm15, %v5292_v6  ;;  %v1354_v15 = vpop.f32.mrb[1].mxu0  ;;  %v1474_v1 = vpop.f32.mrb[1].mxu1 }
 0x429   : > { %1642 = vst.msk [vmem:[#allocation13 + $0x4] sm:$0xff] %vm10648_vm15, %v1354_v15  ;;  %1666 = vst.msk [vmem:[#allocation13 + $0x124] sm:$0xff] %vm10648_vm15, %v1474_v1 }
 0x42b   : > { %v5259_v32 = vpop.f32.mrb[2].mxu0  ;;  %v5295_v45 = vpop.f32.mrb[2].mxu1 }
 0x42c   : > { %1645 = vst.msk [vmem:[#allocation13 + $0x24] sm:$0xff] %vm10648_vm15, %v5259_v32  ;;  %1669 = vst.msk [vmem:[#allocation13 + $0x144] sm:$0xff] %vm10648_vm15, %v5295_v45  ;;  %v1364_v50 = vpop.f32.mrb[3].mxu0  ;;  %v1484_v31 = vpop.f32.mrb[3].mxu1 }
 0x42d   : > { %1644 = vst.msk [vmem:[#allocation13 + $0x1c] sm:$0xff] %vm10648_vm15, %v1364_v50  ;;  %1668 = vst.msk [vmem:[#allocation13 + $0x13c] sm:$0xff] %vm10648_vm15, %v1484_v31 }
 0x42f   : > { %v5262_v33 = vpop.f32.mrb[4].mxu0  ;;  %v5298_v28 = vpop.f32.mrb[4].mxu1 }
 0x430   : > { %1647 = vst.msk [vmem:[#allocation13 + $0x3c] sm:$0xff] %vm10648_vm15, %v5262_v33  ;;  %1671 = vst.msk [vmem:[#allocation13 + $0x15c] sm:$0xff] %vm10648_vm15, %v5298_v28  ;;  %v1374_v41 = vpop.f32.mrb[5].mxu0  ;;  %v1494_v36 = vpop.f32.mrb[5].mxu1  ;;  %v1690_v3 = vld [vmem:[#allocation13] sm:$0xff]  ;;  %v7294_v13 = vld [vmem:[#allocation13 + $0x8] sm:$0xff] }
 0x431   : > { %1646 = vst.msk [vmem:[#allocation13 + $0x34] sm:$0xff] %vm10648_vm15, %v1374_v41  ;;  %1670 = vst.msk [vmem:[#allocation13 + $0x154] sm:$0xff] %vm10648_vm15, %v1494_v36  ;;  %v1738_v46 = vld [vmem:[#allocation13 + $0x1] sm:$0xff]  ;;  %v1739_v37 = vld [vmem:[#allocation13 + $0x9] sm:$0xff] }
 0x432   : > { %v1786_v40 = vadd.f32 %v1738_v46, %v1690_v3  ;;  %v1787_v49 = vadd.f32 %v1739_v37, %v7294_v13  ;;  %v1834_v57 = vld [vmem:[#allocation13 + $0x2] sm:$0xff]  ;;  %v1835_v25 = vld [vmem:[#allocation13 + $0xa] sm:$0xff] }
 0x433   : > { %v5265_v51 = vpop.f32.mrb[6].mxu0  ;;  %v5301_v58 = vpop.f32.mrb[6].mxu1  ;;  %v1930_v6 = vld [vmem:[#allocation13 + $0x3] sm:$0xff]  ;;  %v1931_v32 = vld [vmem:[#allocation13 + $0xb] sm:$0xff] }
 0x434   : > { %1649 = vst.msk [vmem:[#allocation13 + $0x54] sm:$0xff] %vm10648_vm15, %v5265_v51  ;;  %1673 = vst.msk [vmem:[#allocation13 + $0x174] sm:$0xff] %vm10648_vm15, %v5301_v58  ;;  %v1384_v4 = vpop.f32.mrb[7].mxu0  ;;  %v1504_v9 = vpop.f32.mrb[7].mxu1  ;;  %v1882_v5 = vadd.f32 %v1834_v57, %v1786_v40  ;;  %v1883_v60 = vadd.f32 %v1835_v25, %v1787_v49  ;;  %v1714_v15 = vld [vmem:[#allocation13 + $0x120] sm:$0xff]  ;;  %v7301_v1 = vld [vmem:[#allocation13 + $0x128] sm:$0xff] }
 0x435   : > { %1648 = vst.msk [vmem:[#allocation13 + $0x4c] sm:$0xff] %vm10648_vm15, %v1384_v4  ;;  %1672 = vst.msk [vmem:[#allocation13 + $0x16c] sm:$0xff] %vm10648_vm15, %v1504_v9  ;;  %v1762_v45 = vld [vmem:[#allocation13 + $0x121] sm:$0xff]  ;;  %v1763_v50 = vld [vmem:[#allocation13 + $0x129] sm:$0xff] }
 0x436   : > { %v2027_v28 = vld [vmem:[#allocation13 + $0xc] sm:$0xff]  ;;  %v1978_v41 = vadd.f32 %v1930_v6, %v1882_v5  ;;  %v1979_v36 = vadd.f32 %v1931_v32, %v1883_v60  ;;  %v1810_v3 = vadd.f32 %v1762_v45, %v1714_v15  ;;  %v1811_v46 = vadd.f32 %v1763_v50, %v7301_v1  ;;  %v2026_v58 = vld [vmem:[#allocation13 + $0x4] sm:$0xff]  ;;  %v1716_v63 = vld [vmem:[#allocation13 + $0x138] sm:$0xff] }
 0x437   : > { %v5268_v31 = vpop.f32.mrb[8].mxu0  ;;  %v5304_v33 = vpop.f32.mrb[8].mxu1  ;;  %v1858_v40 = vld [vmem:[#allocation13 + $0x122] sm:$0xff]  ;;  %v1859_v49 = vld [vmem:[#allocation13 + $0x12a] sm:$0xff] }
 0x438   : > { %1651 = vst.msk [vmem:[#allocation13 + $0x6c] sm:$0xff] %vm10648_vm15, %v5268_v31  ;;  %1675 = vst.msk [vmem:[#allocation13 + $0x18c] sm:$0xff] %vm10648_vm15, %v5304_v33  ;;  %v1394_v37 = vpop.f32.mrb[9].mxu0  ;;  %v1514_v51 = vpop.f32.mrb[9].mxu1  ;;  %v2123_v4 = vld [vmem:[#allocation13 + $0xd] sm:$0xff]  ;;  %v2074_v9 = vadd.f32 %v2026_v58, %v1978_v41  ;;  %v2075_v57 = vadd.f32 %v2027_v28, %v1979_v36  ;;  %v1906_v25 = vadd.f32 %v1858_v40, %v1810_v3  ;;  %v2122_v60 = vld [vmem:[#allocation13 + $0x5] sm:$0xff] }
 0x439   : > { %1650 = vst.msk [vmem:[#allocation13 + $0x64] sm:$0xff] %vm10648_vm15, %v1394_v37  ;;  %1674 = vst.msk [vmem:[#allocation13 + $0x184] sm:$0xff] %vm10648_vm15, %v1514_v51  ;;  %v1907_v5 = vadd.f32 %v1859_v49, %v1811_v46  ;;  %v1954_v6 = vld [vmem:[#allocation13 + $0x123] sm:$0xff]  ;;  %v1955_v15 = vld [vmem:[#allocation13 + $0x12b] sm:$0xff] }
 0x43a   : > { %v2219_v50 = vld [vmem:[#allocation13 + $0xe] sm:$0xff]  ;;  %v2170_v33 = vadd.f32 %v2122_v60, %v2074_v9  ;;  %v2171_v24 = vadd.f32 %v2123_v4, %v2075_v57  ;;  %v2002_v17 = vadd.f32 %v1954_v6, %v1906_v25  ;;  %v2218_v3 = vld [vmem:[#allocation13 + $0x6] sm:$0xff]  ;;  %v1692_v51 = vld [vmem:[#allocation13 + $0x18] sm:$0xff] }
 0x43b   : > { %v5271_v32 = vpop.f32.mrb[10].mxu0  ;;  %v5307_v45 = vpop.f32.mrb[10].mxu1  ;;  %v2051_v31 = vld [vmem:[#allocation13 + $0x12c] sm:$0xff]  ;;  %v2003_v54 = vadd.f32 %v1955_v15, %v1907_v5  ;;  %v2050_v46 = vld [vmem:[#allocation13 + $0x124] sm:$0xff]  ;;  %v1740_v57 = vld [vmem:[#allocation13 + $0x19] sm:$0xff] }
 0x43c   : > { %1653 = vst.msk [vmem:[#allocation13 + $0x84] sm:$0xff] %vm10648_vm15, %v5271_v32  ;;  %1677 = vst.msk [vmem:[#allocation13 + $0x1a4] sm:$0xff] %vm10648_vm15, %v5307_v45  ;;  %v1404_v37 = vpop.f32.mrb[11].mxu0  ;;  %v1524_v41 = vpop.f32.mrb[11].mxu1  ;;  %v2315_v28 = vld [vmem:[#allocation13 + $0xf] sm:$0xff]  ;;  %v2266_v58 = vadd.f32 %v2218_v3, %v2170_v33  ;;  %v2267_v40 = vadd.f32 %v2219_v50, %v2171_v24  ;;  %v2098_v49 = vadd.f32 %v2050_v46, %v2002_v17  ;;  %v7312_v9 = vld [vmem:[#allocation13 + $0x20] sm:$0xff] }
 0x43d   : > { %v2147_v36 = vld [vmem:[#allocation13 + $0x12d] sm:$0xff]  ;;  %1652 = vst.msk [vmem:[#allocation13 + $0x7c] sm:$0xff] %vm10648_vm15, %v1404_v37  ;;  %1676 = vst.msk [vmem:[#allocation13 + $0x19c] sm:$0xff] %vm10648_vm15, %v1524_v41  ;;  %v2099_v4 = vadd.f32 %v2051_v31, %v2003_v54  ;;  %v1741_v25 = vld [vmem:[#allocation13 + $0x21] sm:$0xff]  ;;  %v1788_v32 = vadd.f32 %v1740_v57, %v1692_v51 }
 0x43e   : > { %v2410_v5 = vld [vmem:[#allocation13 + $0x10] sm:$0xff]  ;;  %v2314_v6 = vld [vmem:[#allocation13 + $0x7] sm:$0xff]  ;;  %v1789_v45 = vadd.f32 %v1741_v25, %v7312_v9  ;;  %v2363_v7 = vadd.f32 %v2315_v28, %v2267_v40  ;;  %v1836_v17 = vld [vmem:[#allocation13 + $0x1a] sm:$0xff] }
 0x43f   : > { %v2243_v60 = vld [vmem:[#allocation13 + $0x12e] sm:$0xff]  ;;  %v2146_v15 = vld [vmem:[#allocation13 + $0x125] sm:$0xff]  ;;  %v5274_v47 = vpop.f32.mrb[12].mxu0  ;;  %v5310_v48 = vpop.f32.mrb[12].mxu1  ;;  %v2362_v37 = vadd.f32 %v2314_v6, %v2266_v58  ;;  %v2195_v33 = vadd.f32 %v2147_v36, %v2099_v4  ;;  %v1884_v46 = vadd.f32 %v1836_v17, %v1788_v32  ;;  %v1932_v57 = vld [vmem:[#allocation13 + $0x1b] sm:$0xff] }
 0x440   : > { %v2194_v41 = vadd.f32 %v2146_v15, %v2098_v49  ;;  %v2242_v24 = vld [vmem:[#allocation13 + $0x126] sm:$0xff]  ;;  %1655 = vst.msk [vmem:[#allocation13 + $0x9c] sm:$0xff] %vm10648_vm15, %v5274_v47  ;;  %1679 = vst.msk [vmem:[#allocation13 + $0x1bc] sm:$0xff] %vm10648_vm15, %v5310_v48  ;;  %v1414_v50 = vpop.f32.mrb[13].mxu0  ;;  %v1534_v31 = vpop.f32.mrb[13].mxu1  ;;  %v2339_v3 = vld [vmem:[#allocation13 + $0x12f] sm:$0xff]  ;;  %v2435_v36 = vadd.f32 %v2410_v5, %v2363_v7 }
 0x441   : > { %v1837_v54 = vld [vmem:[#allocation13 + $0x22] sm:$0xff]  ;;  %1654 = vst.msk [vmem:[#allocation13 + $0x94] sm:$0xff] %vm10648_vm15, %v1414_v50  ;;  %1678 = vst.msk [vmem:[#allocation13 + $0x1b4] sm:$0xff] %vm10648_vm15, %v1534_v31  ;;  %v2434_v28 = vadd.f32 %v2362_v37, %v7294_v13  ;;  %v2291_v40 = vadd.f32 %v2243_v60, %v2195_v33  ;;  %v1764_v48 = vld [vmem:[#allocation13 + $0x139] sm:$0xff]  ;;  %v1980_v15 = vadd.f32 %v1932_v57, %v1884_v46 }
 0x442   : > { %v1885_v51 = vadd.f32 %v1837_v54, %v1789_v45  ;;  %v1933_v25 = vld [vmem:[#allocation13 + $0x23] sm:$0xff]  ;;  %v2290_v58 = vadd.f32 %v2242_v24, %v2194_v41  ;;  %v1812_v17 = vadd.f32 %v1764_v48, %v1716_v63  ;;  %v7325_v13 = vmul.f32 0.012345679, %v2435_v36  ;;  %v1860_v60 = vld [vmem:[#allocation13 + $0x13a] sm:$0xff]  ;;  %v2422_v41 = vld [vmem:[#allocation13 + $0x130] sm:$0xff] }
 0x443   : > { %v7320_v47 = vld [vmem:[#allocation13 + $0x140] sm:$0xff]  ;;  %v5277_v50 = vpop.f32.mrb[14].mxu0  ;;  %v5313_v12 = vpop.f32.mrb[14].mxu1  ;;  %v7323_v31 = vmul.f32 0.012345679, %v2434_v28  ;;  %v2387_v5 = vadd.f32 %v2339_v3, %v2291_v40  ;;  %v1862_v52 = vld [vmem:[#allocation13 + $0x152] sm:$0xff] }
 0x444   : > { %v1765_v49 = vld [vmem:[#allocation13 + $0x141] sm:$0xff]  ;;  %v1981_v32 = vadd.f32 %v1933_v25, %v1885_v51  ;;  %1657 = vst.msk [vmem:[#allocation13 + $0xb4] sm:$0xff] %vm10648_vm15, %v5277_v50  ;;  %1681 = vst.msk [vmem:[#allocation13 + $0x1d4] sm:$0xff] %vm10648_vm15, %v5313_v12  ;;  %v1908_v46 = vadd.f32 %v1860_v60, %v1812_v17  ;;  %v1424_v57 = vpop.f32.mrb[15].mxu0  ;;  %v1544_v25 = vpop.f32.mrb[15].mxu1  ;;  %v1937_v62 = vld [vmem:[#allocation13 + $0x53] sm:$0xff] }
 0x445   : > { %v2338_v4 = vld [vmem:[#allocation13 + $0x127] sm:$0xff]  ;;  %v2028_v45 = vld [vmem:[#allocation13 + $0x1c] sm:$0xff]  ;;  %v1813_v54 = vadd.f32 %v1765_v49, %v7320_v47  ;;  %v2459_v36 = vadd.f32 %v2422_v41, %v2387_v5  ;;  %1656 = vst.msk [vmem:[#allocation13 + $0xac] sm:$0xff] %vm10648_vm15, %v1424_v57  ;;  %1680 = vst.msk [vmem:[#allocation13 + $0x1cc] sm:$0xff] %vm10648_vm15, %v1544_v25 }
 0x446   : > { %v2029_v6 = vld [vmem:[#allocation13 + $0x24] sm:$0xff]  ;;  %v2386_v7 = vadd.f32 %v2338_v4, %v2290_v58  ;;  %v2076_v24 = vadd.f32 %v2028_v45, %v1980_v15  ;;  %v1956_v58 = vld [vmem:[#allocation13 + $0x13b] sm:$0xff]  ;;  %v2344_v2 = vld [vmem:[#allocation13 + $0x16f] sm:$0xff] }
 0x447   : > { %v1861_v37 = vld [vmem:[#allocation13 + $0x142] sm:$0xff]  ;;  %v2077_v63 = vadd.f32 %v2029_v6, %v1981_v32  ;;  %v2004_v15 = vadd.f32 %v1956_v58, %v1908_v46  ;;  %v5280_v32 = vpop.f32.mrb[16].mxu0  ;;  %v5316_v45 = vpop.f32.mrb[16].mxu1  ;;  %v1694_v46 = vld [vmem:[#allocation13 + $0x30] sm:$0xff]  ;;  %v7338_v25 = vld [vmem:[#allocation13 + $0x38] sm:$0xff] }
 0x448   : > { %v2125_v33 = vld [vmem:[#allocation13 + $0x25] sm:$0xff]  ;;  %v1909_v51 = vadd.f32 %v1861_v37, %v1813_v54  ;;  %v2458_v28 = vadd.f32 %v2386_v7, %v7301_v1  ;;  %v2124_v48 = vld [vmem:[#allocation13 + $0x1d] sm:$0xff]  ;;  %v7334_v54 = vmul.f32 0.012345679, %v2459_v36  ;;  %1659 = vst.msk [vmem:[#allocation13 + $0xcc] sm:$0xff] %vm10648_vm15, %v5280_v32  ;;  %1683 = vst.msk [vmem:[#allocation13 + $0x1ec] sm:$0xff] %vm10648_vm15, %v5316_v45 }
 0x449   : > { %v1957_v3 = vld [vmem:[#allocation13 + $0x143] sm:$0xff]  ;;  %v2172_v49 = vadd.f32 %v2124_v48, %v2076_v24  ;;  %v2173_v4 = vadd.f32 %v2125_v33, %v2077_v63  ;;  %v1554_v57 = vpop.f32.mrb[17].mxu1  ;;  %v1743_v36 = vld [vmem:[#allocation13 + $0x39] sm:$0xff]  ;;  %v1726_v29 = vld [vmem:[#allocation13 + $0x1b0] sm:$0xff] }
 0x44a   : > { %v2221_v40 = vld [vmem:[#allocation13 + $0x26] sm:$0xff]  ;;  %v2005_v6 = vadd.f32 %v1957_v3, %v1909_v51  ;;  %v7332_v17 = vmul.f32 0.012345679, %v2458_v28  ;;  %v2220_v7 = vld [vmem:[#allocation13 + $0x1e] sm:$0xff]  ;;  %v1434_v51 = vpop.f32.mrb[17].mxu0  ;;  %v1742_v28 = vld [vmem:[#allocation13 + $0x31] sm:$0xff] }
 0x44b   : > { %v2053_v12 = vld [vmem:[#allocation13 + $0x144] sm:$0xff]  ;;  %v2052_v5 = vld [vmem:[#allocation13 + $0x13c] sm:$0xff]  ;;  %v2268_v60 = vadd.f32 %v2220_v7, %v2172_v49  ;;  %v2269_v37 = vadd.f32 %v2221_v40, %v2173_v4  ;;  %1658 = vst.msk [vmem:[#allocation13 + $0xc4] sm:$0xff] %vm10648_vm15, %v1434_v51  ;;  %1682 = vst.msk [vmem:[#allocation13 + $0x1e4] sm:$0xff] %vm10648_vm15, %v1554_v57  ;;  %v1790_v7 = vadd.f32 %v1742_v28, %v1694_v46 }
 0x44c   : > { %v2317_v1 = vld [vmem:[#allocation13 + $0x27] sm:$0xff]  ;;  %v2316_v41 = vld [vmem:[#allocation13 + $0x1f] sm:$0xff]  ;;  %v2100_v33 = vadd.f32 %v2052_v5, %v2004_v15  ;;  %v2101_v24 = vadd.f32 %v2053_v12, %v2005_v6  ;;  %v5283_v15 = vpop.f32.mrb[18].mxu0  ;;  %v5319_v12 = vpop.f32.mrb[18].mxu1  ;;  %v1791_v5 = vadd.f32 %v1743_v36, %v7338_v25  ;;  %v1766_v28 = vld [vmem:[#allocation13 + $0x151] sm:$0xff] }
 0x44d   : > { %v2149_v50 = vld [vmem:[#allocation13 + $0x145] sm:$0xff]  ;;  %v2148_v63 = vld [vmem:[#allocation13 + $0x13d] sm:$0xff]  ;;  %v2364_v3 = vadd.f32 %v2316_v41, %v2268_v60  ;;  %v2365_v49 = vadd.f32 %v2317_v1, %v2269_v37  ;;  %1661 = vst.msk [vmem:[#allocation13 + $0xe4] sm:$0xff] %vm10648_vm15, %v5283_v15  ;;  %1685 = vst.msk [vmem:[#allocation13 + $0x204] sm:$0xff] %vm10648_vm15, %v5319_v12  ;;  %v1444_v51 = vpop.f32.mrb[19].mxu0  ;;  %v1564_v57 = vpop.f32.mrb[19].mxu1 }
 0x44e   : > { %v2411_v48 = vld [vmem:[#allocation13 + $0x28] sm:$0xff]  ;;  %v2196_v40 = vadd.f32 %v2148_v63, %v2100_v33  ;;  %v2197_v4 = vadd.f32 %v2149_v50, %v2101_v24  ;;  %v2244_v32 = vld [vmem:[#allocation13 + $0x13e] sm:$0xff]  ;;  %v1838_v50 = vld [vmem:[#allocation13 + $0x32] sm:$0xff]  ;;  %1660 = vst.msk [vmem:[#allocation13 + $0xdc] sm:$0xff] %vm10648_vm15, %v1444_v51 }
 0x44f   : > { %v2245_v58 = vld [vmem:[#allocation13 + $0x146] sm:$0xff]  ;;  %v2436_v43 = vadd.f32 %v2364_v3, %v7312_v9  ;;  %v2437_v60 = vadd.f32 %v2411_v48, %v2365_v49  ;;  %v1839_v41 = vld [vmem:[#allocation13 + $0x3a] sm:$0xff]  ;;  %v1718_v33 = vld [vmem:[#allocation13 + $0x150] sm:$0xff]  ;;  %1684 = vst.msk [vmem:[#allocation13 + $0x1fc] sm:$0xff] %vm10648_vm15, %v1564_v57  ;;  %v1886_v24 = vadd.f32 %v1838_v50, %v1790_v7  ;;  %v5322_v57 = vpop.f32.mrb[20].mxu1 }
 0x450   : > { %v2341_v6 = vld [vmem:[#allocation13 + $0x147] sm:$0xff]  ;;  %v2340_v45 = vld [vmem:[#allocation13 + $0x13f] sm:$0xff]  ;;  %v2292_v1 = vadd.f32 %v2244_v32, %v2196_v40  ;;  %v2293_v37 = vadd.f32 %v2245_v58, %v2197_v4  ;;  %v1887_v63 = vadd.f32 %v1839_v41, %v1791_v5  ;;  %v1934_v58 = vld [vmem:[#allocation13 + $0x33] sm:$0xff]  ;;  %v1814_v51 = vadd.f32 %v1766_v28, %v1718_v33  ;;  %v5286_v5 = vpop.f32.mrb[20].mxu0  ;;  %1687 = vst.msk [vmem:[#allocation13 + $0x21c] sm:$0xff] %vm10648_vm15, %v5322_v57 }
 0x451   : > { %v7348_v46 = vld [vmem:[#allocation13 + $0x158] sm:$0xff]  ;;  %v7350_v15 = vmul.f32 0.012345679, %v2436_v43  ;;  %v7352_v12 = vmul.f32 0.012345679, %v2437_v60  ;;  %v2423_v49 = vld [vmem:[#allocation13 + $0x148] sm:$0xff]  ;;  %v1982_v4 = vadd.f32 %v1934_v58, %v1886_v24 }
 0x452   : > { %v1767_v36 = vld [vmem:[#allocation13 + $0x159] sm:$0xff]  ;;  %v2388_v9 = vadd.f32 %v2340_v45, %v2292_v1  ;;  %v2389_v48 = vadd.f32 %v2341_v6, %v2293_v37  ;;  %1663 = vst.msk [vmem:[#allocation13 + $0xfc] sm:$0xff] %vm10648_vm15, %v5286_v5  ;;  %v1454_v6 = vpop.f32.mrb[21].mxu0  ;;  %v1574_v45 = vpop.f32.mrb[21].mxu1  ;;  %v2322_v30 = vld [vmem:[#allocation13 + $0x67] sm:$0xff]  ;;  %v2352_v39 = vld [vmem:[#allocation13 + $0x1cf] sm:$0xff] }
 0x453   : > { %v1935_v3 = vld [vmem:[#allocation13 + $0x3b] sm:$0xff]  ;;  %v1815_v7 = vadd.f32 %v1767_v36, %v7348_v46  ;;  %1662 = vst.msk [vmem:[#allocation13 + $0xf4] sm:$0xff] %vm10648_vm15, %v1454_v6  ;;  %1686 = vst.msk [vmem:[#allocation13 + $0x214] sm:$0xff] %vm10648_vm15, %v1574_v45  ;;  %v2330_v8 = vld [vmem:[#allocation13 + $0xc7] sm:$0xff] }
 0x454   : > { %v2031_v40 = vld [vmem:[#allocation13 + $0x3c] sm:$0xff]  ;;  %v1983_v32 = vadd.f32 %v1935_v3, %v1887_v63  ;;  %v2460_v50 = vadd.f32 %v2388_v9, %v7320_v47  ;;  %v2461_v41 = vadd.f32 %v2423_v49, %v2389_v48  ;;  %v2030_v43 = vld [vmem:[#allocation13 + $0x34] sm:$0xff]  ;;  %v1910_v63 = vadd.f32 %v1862_v52, %v1814_v51 }
 0x455   : > { %v1863_v60 = vld [vmem:[#allocation13 + $0x15a] sm:$0xff]  ;;  %v2078_v37 = vadd.f32 %v2030_v43, %v1982_v4 }
 0x456   : > { %v2127_v1 = vld [vmem:[#allocation13 + $0x3d] sm:$0xff]  ;;  %v2079_v24 = vadd.f32 %v2031_v40, %v1983_v32  ;;  %v2126_v33 = vld [vmem:[#allocation13 + $0x35] sm:$0xff]  ;;  %v1911_v28 = vadd.f32 %v1863_v60, %v1815_v7  ;;  %v7360_v47 = vmul.f32 0.012345679, %v2460_v50  ;;  %v7362_v36 = vmul.f32 0.012345679, %v2461_v41 }
 0x457   : > { %v1958_v9 = vld [vmem:[#allocation13 + $0x153] sm:$0xff]  ;;  %v1959_v48 = vld [vmem:[#allocation13 + $0x15b] sm:$0xff]  ;;  %v2174_v49 = vadd.f32 %v2126_v33, %v2078_v37  ;;  %v5289_v40 = vpop.f32.mrb[22].mxu0  ;;  %v5325_v32 = vpop.f32.mrb[22].mxu1  ;;  %v1696_v60 = vld [vmem:[#allocation13 + $0x48] sm:$0xff] }
 0x458   : > { %v2223_v58 = vld [vmem:[#allocation13 + $0x3e] sm:$0xff]  ;;  %v2175_v5 = vadd.f32 %v2127_v1, %v2079_v24  ;;  %v2006_v57 = vadd.f32 %v1958_v9, %v1910_v63  ;;  %v2007_v4 = vadd.f32 %v1959_v48, %v1911_v28  ;;  %v2222_v7 = vld [vmem:[#allocation13 + $0x36] sm:$0xff]  ;;  %1665 = vst.msk [vmem:[#allocation13 + $0x114] sm:$0xff] %vm10648_vm15, %v5289_v40  ;;  %1689 = vst.msk [vmem:[#allocation13 + $0x234] sm:$0xff] %vm10648_vm15, %v5325_v32  ;;  %v1464_v50 = vpop.f32.mrb[23].mxu0  ;;  %v1584_v41 = vpop.f32.mrb[23].mxu1 }
 0x459   : > { %v2055_v3 = vld [vmem:[#allocation13 + $0x15c] sm:$0xff]  ;;  %v2054_v43 = vld [vmem:[#allocation13 + $0x154] sm:$0xff]  ;;  %v2270_v6 = vadd.f32 %v2222_v7, %v2174_v49  ;;  %v1744_v24 = vld [vmem:[#allocation13 + $0x49] sm:$0xff]  ;;  %1664 = vst.msk [vmem:[#allocation13 + $0x10c] sm:$0xff] %vm10648_vm15, %v1464_v50 }
 0x45a   : > { %v2319_v52 = vld [vmem:[#allocation13 + $0x3f] sm:$0xff]  ;;  %v2271_v45 = vadd.f32 %v2223_v58, %v2175_v5  ;;  %v2102_v22 = vadd.f32 %v2054_v43, %v2006_v57  ;;  %v2103_v37 = vadd.f32 %v2055_v3, %v2007_v4  ;;  %v7366_v1 = vld [vmem:[#allocation13 + $0x50] sm:$0xff]  ;;  %1688 = vst.msk [vmem:[#allocation13 + $0x22c] sm:$0xff] %vm10648_vm15, %v1584_v41  ;;  %v1792_v40 = vadd.f32 %v1744_v24, %v1696_v60  ;;  %v1720_v41 = vld [vmem:[#allocation13 + $0x168] sm:$0xff] }
 0x45b   : > { %v2151_v51 = vld [vmem:[#allocation13 + $0x15d] sm:$0xff]  ;;  %v1745_v33 = vld [vmem:[#allocation13 + $0x51] sm:$0xff] }
 0x45c   : > { %v2412_v63 = vld [vmem:[#allocation13 + $0x40] sm:$0xff]  ;;  %v2318_v9 = vld [vmem:[#allocation13 + $0x37] sm:$0xff]  ;;  %v1793_v32 = vadd.f32 %v1745_v33, %v7366_v1  ;;  %v2367_v49 = vadd.f32 %v2319_v52, %v2271_v45  ;;  %v2199_v5 = vadd.f32 %v2151_v51, %v2103_v37  ;;  %v1840_v57 = vld [vmem:[#allocation13 + $0x4a] sm:$0xff] }
 0x45d   : > { %v2247_v28 = vld [vmem:[#allocation13 + $0x15e] sm:$0xff]  ;;  %v2150_v48 = vld [vmem:[#allocation13 + $0x155] sm:$0xff]  ;;  %v2366_v14 = vadd.f32 %v2318_v9, %v2270_v6  ;;  %v1888_v43 = vadd.f32 %v1840_v57, %v1792_v40  ;;  %v1936_v50 = vld [vmem:[#allocation13 + $0x4b] sm:$0xff] }
 0x45e   : > { %v2198_v58 = vadd.f32 %v2150_v48, %v2102_v22  ;;  %v2246_v3 = vld [vmem:[#allocation13 + $0x156] sm:$0xff]  ;;  %v2343_v7 = vld [vmem:[#allocation13 + $0x15f] sm:$0xff]  ;;  %v2439_v23 = vadd.f32 %v2412_v63, %v2367_v49  ;;  %v2295_v60 = vadd.f32 %v2247_v28, %v2199_v5  ;;  %v1768_v6 = vld [vmem:[#allocation13 + $0x169] sm:$0xff] }
 0x45f   : > { %v1841_v4 = vld [vmem:[#allocation13 + $0x52] sm:$0xff]  ;;  %v2438_v59 = vadd.f32 %v2366_v14, %v7338_v25  ;;  %v1984_v45 = vadd.f32 %v1936_v50, %v1888_v43  ;;  %v1816_v9 = vadd.f32 %v1768_v6, %v1720_v41  ;;  %v1864_v63 = vld [vmem:[#allocation13 + $0x16a] sm:$0xff]  ;;  %v2424_v49 = vld [vmem:[#allocation13 + $0x160] sm:$0xff] }
 0x460   : > { %v1889_v26 = vadd.f32 %v1841_v4, %v1793_v32  ;;  %v2294_v20 = vadd.f32 %v2246_v3, %v2198_v58  ;;  %v7372_v24 = vld [vmem:[#allocation13 + $0x170] sm:$0xff]  ;;  %v7377_v32 = vmul.f32 0.012345679, %v2439_v23  ;;  %v2391_v25 = vadd.f32 %v2343_v7, %v2295_v60  ;;  %v1722_v18 = vld [vmem:[#allocation13 + $0x180] sm:$0xff] }
 0x461   : > { %v1769_v52 = vld [vmem:[#allocation13 + $0x171] sm:$0xff]  ;;  %v7375_v40 = vmul.f32 0.012345679, %v2438_v59  ;;  %v1912_v57 = vadd.f32 %v1864_v63, %v1816_v9  ;;  %v2348_v21 = vld [vmem:[#allocation13 + $0x19f] sm:$0xff] }
 0x462   : > { %v2342_v22 = vld [vmem:[#allocation13 + $0x157] sm:$0xff]  ;;  %v1985_v37 = vadd.f32 %v1937_v62, %v1889_v26  ;;  %v2032_v33 = vld [vmem:[#allocation13 + $0x4c] sm:$0xff]  ;;  %v1817_v48 = vadd.f32 %v1769_v52, %v7372_v24  ;;  %v2463_v26 = vadd.f32 %v2424_v49, %v2391_v25  ;;  %v1730_v38 = vld [vmem:[#allocation13 + $0x1e0] sm:$0xff] }
 0x463   : > { %v2033_v51 = vld [vmem:[#allocation13 + $0x54] sm:$0xff]  ;;  %v2390_v14 = vadd.f32 %v2342_v22, %v2294_v20  ;;  %v2080_v5 = vadd.f32 %v2032_v33, %v1984_v45  ;;  %v1960_v50 = vld [vmem:[#allocation13 + $0x16b] sm:$0xff] }
 0x464   : > { %v1865_v28 = vld [vmem:[#allocation13 + $0x172] sm:$0xff]  ;;  %v2081_v3 = vadd.f32 %v2033_v51, %v1985_v37  ;;  %v2008_v20 = vadd.f32 %v1960_v50, %v1912_v57  ;;  %v7382_v22 = vmul.f32 0.012345679, %v2463_v26  ;;  %v7384_v49 = vld [vmem:[#allocation13 + $0x68] sm:$0xff] }
 0x465   : > { %v2129_v58 = vld [vmem:[#allocation13 + $0x55] sm:$0xff]  ;;  %v1913_v4 = vadd.f32 %v1865_v28, %v1817_v48  ;;  %v2462_v62 = vadd.f32 %v2390_v14, %v7348_v46  ;;  %v2128_v43 = vld [vmem:[#allocation13 + $0x4d] sm:$0xff]  ;;  %v1698_v28 = vld [vmem:[#allocation13 + $0x60] sm:$0xff] }
 0x466   : > { %v1961_v41 = vld [vmem:[#allocation13 + $0x173] sm:$0xff]  ;;  %v2176_v23 = vadd.f32 %v2128_v43, %v2080_v5  ;;  %v2177_v52 = vadd.f32 %v2129_v58, %v2081_v3  ;;  %v1746_v58 = vld [vmem:[#allocation13 + $0x61] sm:$0xff]  ;;  %v1747_v5 = vld [vmem:[#allocation13 + $0x69] sm:$0xff] }
 0x467   : > { %v2225_v59 = vld [vmem:[#allocation13 + $0x56] sm:$0xff]  ;;  %v2009_v7 = vadd.f32 %v1961_v41, %v1913_v4  ;;  %v7380_v60 = vmul.f32 0.012345679, %v2462_v62  ;;  %v2224_v37 = vld [vmem:[#allocation13 + $0x4e] sm:$0xff] }
 0x468   : > { %v2057_v6 = vld [vmem:[#allocation13 + $0x174] sm:$0xff]  ;;  %v2056_v33 = vld [vmem:[#allocation13 + $0x16c] sm:$0xff]  ;;  %v2272_v9 = vadd.f32 %v2224_v37, %v2176_v23  ;;  %v2273_v46 = vadd.f32 %v2225_v59, %v2177_v52  ;;  %v1794_v23 = vadd.f32 %v1746_v58, %v1698_v28  ;;  %v1795_v59 = vadd.f32 %v1747_v5, %v7384_v49  ;;  %v1842_v37 = vld [vmem:[#allocation13 + $0x62] sm:$0xff] }
 0x469   : > { %v2321_v45 = vld [vmem:[#allocation13 + $0x57] sm:$0xff]  ;;  %v2320_v48 = vld [vmem:[#allocation13 + $0x4f] sm:$0xff]  ;;  %v2104_v14 = vadd.f32 %v2056_v33, %v2008_v20  ;;  %v2105_v25 = vadd.f32 %v2057_v6, %v2009_v7 }
 0x46a   : > { %v2153_v51 = vld [vmem:[#allocation13 + $0x175] sm:$0xff]  ;;  %v2152_v63 = vld [vmem:[#allocation13 + $0x16d] sm:$0xff]  ;;  %v2368_v4 = vadd.f32 %v2320_v48, %v2272_v9  ;;  %v2369_v62 = vadd.f32 %v2321_v45, %v2273_v46  ;;  %v1890_v55 = vadd.f32 %v1842_v37, %v1794_v23  ;;  %v1770_v45 = vld [vmem:[#allocation13 + $0x181] sm:$0xff] }
 0x46b   : > { %v2413_v3 = vld [vmem:[#allocation13 + $0x58] sm:$0xff]  ;;  %v2200_v26 = vadd.f32 %v2152_v63, %v2104_v14  ;;  %v2201_v43 = vadd.f32 %v2153_v51, %v2105_v25  ;;  %v2248_v41 = vld [vmem:[#allocation13 + $0x16e] sm:$0xff]  ;;  %v1938_v63 = vld [vmem:[#allocation13 + $0x63] sm:$0xff] }
 0x46c   : > { %v2249_v57 = vld [vmem:[#allocation13 + $0x176] sm:$0xff]  ;;  %v2440_v6 = vadd.f32 %v2368_v4, %v7366_v1  ;;  %v2441_v52 = vadd.f32 %v2413_v3, %v2369_v62  ;;  %v1843_v33 = vld [vmem:[#allocation13 + $0x6a] sm:$0xff]  ;;  %v1986_v5 = vadd.f32 %v1938_v63, %v1890_v55 }
 0x46d   : > { %v2345_v50 = vld [vmem:[#allocation13 + $0x177] sm:$0xff]  ;;  %v2296_v20 = vadd.f32 %v2248_v41, %v2200_v26  ;;  %v2297_v7 = vadd.f32 %v2249_v57, %v2201_v43  ;;  %v1891_v11 = vadd.f32 %v1843_v33, %v1795_v59  ;;  %v7388_v9 = vld [vmem:[#allocation13 + $0x188] sm:$0xff]  ;;  %v1818_v57 = vadd.f32 %v1770_v45, %v1722_v18 }
 0x46e   : > { %v1771_v51 = vld [vmem:[#allocation13 + $0x189] sm:$0xff]  ;;  %v7390_v46 = vmul.f32 0.012345679, %v2440_v6  ;;  %v7392_v48 = vmul.f32 0.012345679, %v2441_v52  ;;  %v2425_v28 = vld [vmem:[#allocation13 + $0x178] sm:$0xff] }
 0x46f   : > { %v2392_v14 = vadd.f32 %v2344_v2, %v2296_v20  ;;  %v2393_v25 = vadd.f32 %v2345_v50, %v2297_v7  ;;  %v1939_v1 = vld [vmem:[#allocation13 + $0x6b] sm:$0xff]  ;;  %v1819_v4 = vadd.f32 %v1771_v51, %v7388_v9  ;;  %v1866_v41 = vld [vmem:[#allocation13 + $0x182] sm:$0xff]  ;;  %v2326_v53 = vld [vmem:[#allocation13 + $0x97] sm:$0xff] }
 0x470   : > { %v2035_v58 = vld [vmem:[#allocation13 + $0x6c] sm:$0xff]  ;;  %v1987_v3 = vadd.f32 %v1939_v1, %v1891_v11  ;;  %v2034_v43 = vld [vmem:[#allocation13 + $0x64] sm:$0xff]  ;;  %v1914_v50 = vadd.f32 %v1866_v41, %v1818_v57 }
 0x471   : > { %v2464_v62 = vadd.f32 %v2392_v14, %v7372_v24  ;;  %v2465_v26 = vadd.f32 %v2425_v28, %v2393_v25  ;;  %v1867_v23 = vld [vmem:[#allocation13 + $0x18a] sm:$0xff]  ;;  %v2082_v6 = vadd.f32 %v2034_v43, %v1986_v5  ;;  %v1749_v43 = vld [vmem:[#allocation13 + $0x81] sm:$0xff] }
 0x472   : > { %v2131_v59 = vld [vmem:[#allocation13 + $0x6d] sm:$0xff]  ;;  %v2083_v52 = vadd.f32 %v2035_v58, %v1987_v3  ;;  %v2130_v2 = vld [vmem:[#allocation13 + $0x65] sm:$0xff]  ;;  %v1915_v20 = vadd.f32 %v1867_v23, %v1819_v4  ;;  %v1700_v58 = vld [vmem:[#allocation13 + $0x78] sm:$0xff] }
 0x473   : > { %v7396_v7 = vmul.f32 0.012345679, %v2464_v62  ;;  %v7398_v37 = vmul.f32 0.012345679, %v2465_v26  ;;  %v1962_v11 = vld [vmem:[#allocation13 + $0x183] sm:$0xff]  ;;  %v1963_v55 = vld [vmem:[#allocation13 + $0x18b] sm:$0xff]  ;;  %v2178_v45 = vadd.f32 %v2130_v2, %v2082_v6 }
 0x474   : > { %v2227_v18 = vld [vmem:[#allocation13 + $0x6e] sm:$0xff]  ;;  %v2179_v24 = vadd.f32 %v2131_v59, %v2083_v52  ;;  %v2010_v51 = vadd.f32 %v1962_v11, %v1914_v50  ;;  %v2011_v14 = vadd.f32 %v1963_v55, %v1915_v20  ;;  %v2226_v1 = vld [vmem:[#allocation13 + $0x66] sm:$0xff]  ;;  %v1748_v26 = vld [vmem:[#allocation13 + $0x79] sm:$0xff] }
 0x475   : > { %v2059_v33 = vld [vmem:[#allocation13 + $0x18c] sm:$0xff]  ;;  %v2058_v28 = vld [vmem:[#allocation13 + $0x184] sm:$0xff]  ;;  %v2274_v5 = vadd.f32 %v2226_v1, %v2178_v45  ;;  %v1796_v59 = vadd.f32 %v1748_v26, %v1700_v58  ;;  %v1844_v45 = vld [vmem:[#allocation13 + $0x7a] sm:$0xff] }
 0x476   : > { %v2323_v25 = vld [vmem:[#allocation13 + $0x6f] sm:$0xff]  ;;  %v2275_v3 = vadd.f32 %v2227_v18, %v2179_v24  ;;  %v2106_v57 = vadd.f32 %v2058_v28, %v2010_v51  ;;  %v2107_v4 = vadd.f32 %v2059_v33, %v2011_v14  ;;  %v7400_v62 = vld [vmem:[#allocation13 + $0x80] sm:$0xff]  ;;  %v1724_v28 = vld [vmem:[#allocation13 + $0x198] sm:$0xff] }
 0x477   : > { %v2155_v63 = vld [vmem:[#allocation13 + $0x18d] sm:$0xff]  ;;  %v2154_v6 = vld [vmem:[#allocation13 + $0x185] sm:$0xff]  ;;  %v1797_v52 = vadd.f32 %v1749_v43, %v7400_v62  ;;  %v2370_v2 = vadd.f32 %v2322_v30, %v2274_v5  ;;  %v1892_v33 = vadd.f32 %v1844_v45, %v1796_v59  ;;  %v1940_v14 = vld [vmem:[#allocation13 + $0x7b] sm:$0xff] }
 0x478   : > { %v2414_v41 = vld [vmem:[#allocation13 + $0x70] sm:$0xff]  ;;  %v2371_v50 = vadd.f32 %v2323_v25, %v2275_v3  ;;  %v2202_v20 = vadd.f32 %v2154_v6, %v2106_v57  ;;  %v2203_v11 = vadd.f32 %v2155_v63, %v2107_v4  ;;  %v2250_v55 = vld [vmem:[#allocation13 + $0x186] sm:$0xff]  ;;  %v1772_v30 = vld [vmem:[#allocation13 + $0x199] sm:$0xff] }
 0x479   : > { %v2251_v23 = vld [vmem:[#allocation13 + $0x18e] sm:$0xff]  ;;  %v1845_v18 = vld [vmem:[#allocation13 + $0x82] sm:$0xff]  ;;  %v2442_v44 = vadd.f32 %v2370_v2, %v7384_v49  ;;  %v1988_v3 = vadd.f32 %v1940_v14, %v1892_v33  ;;  %v1820_v43 = vadd.f32 %v1772_v30, %v1724_v28  ;;  %v1868_v2 = vld [vmem:[#allocation13 + $0x19a] sm:$0xff] }
 0x47a   : > { %v2347_v24 = vld [vmem:[#allocation13 + $0x18f] sm:$0xff]  ;;  %v1893_v51 = vadd.f32 %v1845_v18, %v1797_v52  ;;  %v1941_v1 = vld [vmem:[#allocation13 + $0x83] sm:$0xff]  ;;  %v2443_v27 = vadd.f32 %v2414_v41, %v2371_v50  ;;  %v2298_v34 = vadd.f32 %v2250_v55, %v2202_v20  ;;  %v2299_v58 = vadd.f32 %v2251_v23, %v2203_v11 }
 0x47b   : > { %v7404_v26 = vld [vmem:[#allocation13 + $0x1a0] sm:$0xff]  ;;  %v7407_v59 = vmul.f32 0.012345679, %v2442_v44  ;;  %v2426_v50 = vld [vmem:[#allocation13 + $0x190] sm:$0xff]  ;;  %v1916_v45 = vadd.f32 %v1868_v2, %v1820_v43 }
 0x47c   : > { %v1773_v25 = vld [vmem:[#allocation13 + $0x1a1] sm:$0xff]  ;;  %v1989_v57 = vadd.f32 %v1941_v1, %v1893_v51  ;;  %v7409_v52 = vmul.f32 0.012345679, %v2443_v27  ;;  %v2395_v41 = vadd.f32 %v2347_v24, %v2299_v58 }
 0x47d   : > { %v2346_v5 = vld [vmem:[#allocation13 + $0x187] sm:$0xff]  ;;  %v2036_v4 = vld [vmem:[#allocation13 + $0x7c] sm:$0xff]  ;;  %v1821_v6 = vadd.f32 %v1773_v25, %v7404_v26 }
 0x47e   : > { %v2037_v63 = vld [vmem:[#allocation13 + $0x84] sm:$0xff]  ;;  %v2394_v49 = vadd.f32 %v2346_v5, %v2298_v34  ;;  %v2084_v11 = vadd.f32 %v2036_v4, %v1988_v3  ;;  %v2467_v51 = vadd.f32 %v2426_v50, %v2395_v41  ;;  %v1964_v1 = vld [vmem:[#allocation13 + $0x19b] sm:$0xff] }
 0x47f   : > { %v1869_v23 = vld [vmem:[#allocation13 + $0x1a2] sm:$0xff]  ;;  %v2085_v55 = vadd.f32 %v2037_v63, %v1989_v57  ;;  %v2012_v34 = vadd.f32 %v1964_v1, %v1916_v45  ;;  %v7416_v50 = vld [vmem:[#allocation13 + $0x98] sm:$0xff] }
 0x480   : > { %v2133_v20 = vld [vmem:[#allocation13 + $0x85] sm:$0xff]  ;;  %v1917_v18 = vadd.f32 %v1869_v23, %v1821_v6  ;;  %v2466_v33 = vadd.f32 %v2394_v49, %v7388_v9  ;;  %v2132_v14 = vld [vmem:[#allocation13 + $0x7d] sm:$0xff]  ;;  %v7414_v5 = vmul.f32 0.012345679, %v2467_v51  ;;  %v1702_v23 = vld [vmem:[#allocation13 + $0x90] sm:$0xff] }
 0x481   : > { %v1965_v28 = vld [vmem:[#allocation13 + $0x1a3] sm:$0xff]  ;;  %v2180_v27 = vadd.f32 %v2132_v14, %v2084_v11  ;;  %v2181_v25 = vadd.f32 %v2133_v20, %v2085_v55  ;;  %v1750_v20 = vld [vmem:[#allocation13 + $0x91] sm:$0xff]  ;;  %v1751_v11 = vld [vmem:[#allocation13 + $0x99] sm:$0xff] }
 0x482   : > { %v2229_v44 = vld [vmem:[#allocation13 + $0x86] sm:$0xff]  ;;  %v2013_v24 = vadd.f32 %v1965_v28, %v1917_v18  ;;  %v7412_v58 = vmul.f32 0.012345679, %v2466_v33  ;;  %v2228_v57 = vld [vmem:[#allocation13 + $0x7e] sm:$0xff] }
 0x483   : > { %v2061_v30 = vld [vmem:[#allocation13 + $0x1a4] sm:$0xff]  ;;  %v2060_v4 = vld [vmem:[#allocation13 + $0x19c] sm:$0xff]  ;;  %v2276_v43 = vadd.f32 %v2228_v57, %v2180_v27  ;;  %v2277_v9 = vadd.f32 %v2229_v44, %v2181_v25  ;;  %v1798_v27 = vadd.f32 %v1750_v20, %v1702_v23  ;;  %v1799_v44 = vadd.f32 %v1751_v11, %v7416_v50  ;;  %v1846_v57 = vld [vmem:[#allocation13 + $0x92] sm:$0xff] }
 0x484   : > { %v2325_v3 = vld [vmem:[#allocation13 + $0x87] sm:$0xff]  ;;  %v2324_v6 = vld [vmem:[#allocation13 + $0x7f] sm:$0xff]  ;;  %v2108_v49 = vadd.f32 %v2060_v4, %v2012_v34  ;;  %v2109_v41 = vadd.f32 %v2061_v30, %v2013_v24 }
 0x485   : > { %v2157_v63 = vld [vmem:[#allocation13 + $0x1a5] sm:$0xff]  ;;  %v2156_v2 = vld [vmem:[#allocation13 + $0x19d] sm:$0xff]  ;;  %v2372_v18 = vadd.f32 %v2324_v6, %v2276_v43  ;;  %v2373_v33 = vadd.f32 %v2325_v3, %v2277_v9  ;;  %v1894_v56 = vadd.f32 %v1846_v57, %v1798_v27  ;;  %v1774_v3 = vld [vmem:[#allocation13 + $0x1b1] sm:$0xff] }
 0x486   : > { %v2415_v55 = vld [vmem:[#allocation13 + $0x88] sm:$0xff]  ;;  %v2204_v51 = vadd.f32 %v2156_v2, %v2108_v49  ;;  %v2205_v14 = vadd.f32 %v2157_v63, %v2109_v41  ;;  %v2252_v28 = vld [vmem:[#allocation13 + $0x19e] sm:$0xff]  ;;  %v1942_v2 = vld [vmem:[#allocation13 + $0x93] sm:$0xff] }
 0x487   : > { %v2253_v45 = vld [vmem:[#allocation13 + $0x1a6] sm:$0xff]  ;;  %v2444_v30 = vadd.f32 %v2372_v18, %v7400_v62  ;;  %v2445_v25 = vadd.f32 %v2415_v55, %v2373_v33  ;;  %v1847_v4 = vld [vmem:[#allocation13 + $0x9a] sm:$0xff]  ;;  %v1990_v11 = vadd.f32 %v1942_v2, %v1894_v56 }
 0x488   : > { %v2349_v1 = vld [vmem:[#allocation13 + $0x1a7] sm:$0xff]  ;;  %v2300_v34 = vadd.f32 %v2252_v28, %v2204_v51  ;;  %v2301_v24 = vadd.f32 %v2253_v45, %v2205_v14  ;;  %v1895_v42 = vadd.f32 %v1847_v4, %v1799_v44  ;;  %v7420_v43 = vld [vmem:[#allocation13 + $0x1b8] sm:$0xff]  ;;  %v1822_v45 = vadd.f32 %v1774_v3, %v1726_v29 }
 0x489   : > { %v1775_v63 = vld [vmem:[#allocation13 + $0x1b9] sm:$0xff]  ;;  %v7422_v9 = vmul.f32 0.012345679, %v2444_v30  ;;  %v7424_v6 = vmul.f32 0.012345679, %v2445_v25  ;;  %v2427_v23 = vld [vmem:[#allocation13 + $0x1a8] sm:$0xff] }
 0x48a   : > { %v2396_v49 = vadd.f32 %v2348_v21, %v2300_v34  ;;  %v2397_v41 = vadd.f32 %v2349_v1, %v2301_v24  ;;  %v1943_v62 = vld [vmem:[#allocation13 + $0x9b] sm:$0xff]  ;;  %v1823_v18 = vadd.f32 %v1775_v63, %v7420_v43  ;;  %v1870_v28 = vld [vmem:[#allocation13 + $0x1b2] sm:$0xff] }
 0x48b   : > { %v2039_v20 = vld [vmem:[#allocation13 + $0x9c] sm:$0xff]  ;;  %v1991_v55 = vadd.f32 %v1943_v62, %v1895_v42  ;;  %v2038_v14 = vld [vmem:[#allocation13 + $0x94] sm:$0xff]  ;;  %v1918_v1 = vadd.f32 %v1870_v28, %v1822_v45 }
 0x48c   : > { %v2468_v33 = vadd.f32 %v2396_v49, %v7404_v26  ;;  %v2469_v51 = vadd.f32 %v2427_v23, %v2397_v41  ;;  %v1871_v27 = vld [vmem:[#allocation13 + $0x1ba] sm:$0xff]  ;;  %v2086_v30 = vadd.f32 %v2038_v14, %v1990_v11  ;;  %v1753_v14 = vld [vmem:[#allocation13 + $0xb1] sm:$0xff] }
 0x48d   : > { %v2135_v44 = vld [vmem:[#allocation13 + $0x9d] sm:$0xff]  ;;  %v2087_v25 = vadd.f32 %v2039_v20, %v1991_v55  ;;  %v2134_v21 = vld [vmem:[#allocation13 + $0x95] sm:$0xff]  ;;  %v1919_v34 = vadd.f32 %v1871_v27, %v1823_v18  ;;  %v1704_v20 = vld [vmem:[#allocation13 + $0xa8] sm:$0xff] }
 0x48e   : > { %v7428_v24 = vmul.f32 0.012345679, %v2468_v33  ;;  %v7430_v57 = vmul.f32 0.012345679, %v2469_v51  ;;  %v1966_v42 = vld [vmem:[#allocation13 + $0x1b3] sm:$0xff]  ;;  %v1967_v29 = vld [vmem:[#allocation13 + $0x1bb] sm:$0xff]  ;;  %v2182_v3 = vadd.f32 %v2134_v21, %v2086_v30 }
 0x48f   : > { %v2231_v56 = vld [vmem:[#allocation13 + $0x9e] sm:$0xff]  ;;  %v2183_v26 = vadd.f32 %v2135_v44, %v2087_v25  ;;  %v2014_v63 = vadd.f32 %v1966_v42, %v1918_v1  ;;  %v2015_v49 = vadd.f32 %v1967_v29, %v1919_v34  ;;  %v2230_v62 = vld [vmem:[#allocation13 + $0x96] sm:$0xff]  ;;  %v1752_v51 = vld [vmem:[#allocation13 + $0xa9] sm:$0xff] }
 0x490   : > { %10778 = vst [vmem:[#allocation66_spill] sm:$0xff] %v7428_v24  ;;  %10779 = vst [vmem:[#allocation67_spill] sm:$0xff] %v7430_v57  ;;  %v2063_v4 = vld [vmem:[#allocation13 + $0x1bc] sm:$0xff]  ;;  %v2062_v23 = vld [vmem:[#allocation13 + $0x1b4] sm:$0xff]  ;;  %v2278_v11 = vadd.f32 %v2230_v62, %v2182_v3  ;;  %v1800_v44 = vadd.f32 %v1752_v51, %v1704_v20 }
 0x491   : > { %v2327_v41 = vld [vmem:[#allocation13 + $0x9f] sm:$0xff]  ;;  %v2279_v55 = vadd.f32 %v2231_v56, %v2183_v26  ;;  %v2110_v45 = vadd.f32 %v2062_v23, %v2014_v63  ;;  %v2111_v18 = vadd.f32 %v2063_v4, %v2015_v49  ;;  %v7432_v33 = vld [vmem:[#allocation13 + $0xb0] sm:$0xff]  ;;  %v1728_v23 = vld [vmem:[#allocation13 + $0x1c8] sm:$0xff] }
 0x492   : > { %v2159_v2 = vld [vmem:[#allocation13 + $0x1bd] sm:$0xff]  ;;  %v2158_v30 = vld [vmem:[#allocation13 + $0x1b5] sm:$0xff]  ;;  %v1801_v25 = vadd.f32 %v1753_v14, %v7432_v33  ;;  %v2374_v21 = vadd.f32 %v2326_v53, %v2278_v11  ;;  %v1848_v3 = vld [vmem:[#allocation13 + $0xaa] sm:$0xff] }
 0x493   : > { %v2416_v28 = vld [vmem:[#allocation13 + $0xa0] sm:$0xff]  ;;  %v2375_v1 = vadd.f32 %v2327_v41, %v2279_v55  ;;  %v2206_v34 = vadd.f32 %v2158_v30, %v2110_v45  ;;  %v2207_v42 = vadd.f32 %v2159_v2, %v2111_v18  ;;  %v2254_v29 = vld [vmem:[#allocation13 + $0x1b6] sm:$0xff]  ;;  %v1896_v4 = vadd.f32 %v1848_v3, %v1800_v44  ;;  %v1944_v49 = vld [vmem:[#allocation13 + $0xab] sm:$0xff] }
 0x494   : > { %v2255_v27 = vld [vmem:[#allocation13 + $0x1be] sm:$0xff]  ;;  %v1849_v56 = vld [vmem:[#allocation13 + $0xb2] sm:$0xff]  ;;  %v2446_v35 = vadd.f32 %v2374_v21, %v7416_v50  ;;  %v1776_v53 = vld [vmem:[#allocation13 + $0x1c9] sm:$0xff] }
 0x495   : > { %v2351_v26 = vld [vmem:[#allocation13 + $0x1bf] sm:$0xff]  ;;  %v1897_v63 = vadd.f32 %v1849_v56, %v1801_v25  ;;  %v1945_v62 = vld [vmem:[#allocation13 + $0xb3] sm:$0xff]  ;;  %v2447_v10 = vadd.f32 %v2416_v28, %v2375_v1  ;;  %v2302_v61 = vadd.f32 %v2254_v29, %v2206_v34  ;;  %v2303_v20 = vadd.f32 %v2255_v27, %v2207_v42  ;;  %v1872_v21 = vld [vmem:[#allocation13 + $0x1ca] sm:$0xff] }
 0x496   : > { %v7436_v51 = vld [vmem:[#allocation13 + $0x1d0] sm:$0xff]  ;;  %v1992_v55 = vadd.f32 %v1944_v49, %v1896_v4  ;;  %v1824_v14 = vadd.f32 %v1776_v53, %v1728_v23  ;;  %v7439_v44 = vmul.f32 0.012345679, %v2446_v35  ;;  %v2428_v1 = vld [vmem:[#allocation13 + $0x1c0] sm:$0xff] }
 0x497   : > { %v1777_v41 = vld [vmem:[#allocation13 + $0x1d1] sm:$0xff]  ;;  %v1993_v45 = vadd.f32 %v1945_v62, %v1897_v63  ;;  %v7441_v25 = vmul.f32 0.012345679, %v2447_v10  ;;  %v2399_v28 = vadd.f32 %v2351_v26, %v2303_v20 }
 0x498   : > { %v2350_v11 = vld [vmem:[#allocation13 + $0x1b7] sm:$0xff]  ;;  %v2040_v18 = vld [vmem:[#allocation13 + $0xac] sm:$0xff]  ;;  %v1825_v30 = vadd.f32 %v1777_v41, %v7436_v51  ;;  %v1920_v3 = vadd.f32 %v1872_v21, %v1824_v14 }
 0x499   : > { %v2041_v2 = vld [vmem:[#allocation13 + $0xb4] sm:$0xff]  ;;  %v2398_v50 = vadd.f32 %v2350_v11, %v2302_v61  ;;  %v2088_v42 = vadd.f32 %v2040_v18, %v1992_v55  ;;  %v2471_v63 = vadd.f32 %v2428_v1, %v2399_v28  ;;  %v1968_v62 = vld [vmem:[#allocation13 + $0x1cb] sm:$0xff] }
 0x49a   : > { %v1873_v27 = vld [vmem:[#allocation13 + $0x1d2] sm:$0xff]  ;;  %v2089_v29 = vadd.f32 %v2041_v2, %v1993_v45  ;;  %v2016_v61 = vadd.f32 %v1968_v62, %v1920_v3  ;;  %v7448_v1 = vld [vmem:[#allocation13 + $0xc8] sm:$0xff] }
 0x49b   : > { %v2137_v34 = vld [vmem:[#allocation13 + $0xb5] sm:$0xff]  ;;  %v1921_v56 = vadd.f32 %v1873_v27, %v1825_v30  ;;  %v2470_v4 = vadd.f32 %v2398_v50, %v7420_v43  ;;  %v2136_v49 = vld [vmem:[#allocation13 + $0xad] sm:$0xff]  ;;  %v7446_v11 = vmul.f32 0.012345679, %v2471_v63  ;;  %v1706_v27 = vld [vmem:[#allocation13 + $0xc0] sm:$0xff] }
 0x49c   : > { %v1969_v23 = vld [vmem:[#allocation13 + $0x1d3] sm:$0xff]  ;;  %v2184_v10 = vadd.f32 %v2136_v49, %v2088_v42  ;;  %v2185_v41 = vadd.f32 %v2137_v34, %v2089_v29  ;;  %v1754_v34 = vld [vmem:[#allocation13 + $0xc1] sm:$0xff]  ;;  %v1755_v42 = vld [vmem:[#allocation13 + $0xc9] sm:$0xff] }
 0x49d   : > { %v2233_v35 = vld [vmem:[#allocation13 + $0xb6] sm:$0xff]  ;;  %v2017_v26 = vadd.f32 %v1969_v23, %v1921_v56  ;;  %v7444_v20 = vmul.f32 0.012345679, %v2470_v4  ;;  %10781 = vst [vmem:[#allocation69_spill] sm:$0xff] %v7446_v11  ;;  %v2232_v45 = vld [vmem:[#allocation13 + $0xae] sm:$0xff] }
 0x49e   : > { %v2065_v53 = vld [vmem:[#allocation13 + $0x1d4] sm:$0xff]  ;;  %v2064_v18 = vld [vmem:[#allocation13 + $0x1cc] sm:$0xff]  ;;  %v2280_v14 = vadd.f32 %v2232_v45, %v2184_v10  ;;  %v2281_v43 = vadd.f32 %v2233_v35, %v2185_v41  ;;  %v1802_v10 = vadd.f32 %v1754_v34, %v1706_v27  ;;  %v1803_v35 = vadd.f32 %v1755_v42, %v7448_v1  ;;  %v1850_v45 = vld [vmem:[#allocation13 + $0xc2] sm:$0xff] }
 0x49f   : > { %10780 = vst [vmem:[#allocation68_spill] sm:$0xff] %v7444_v20  ;;  %v2329_v55 = vld [vmem:[#allocation13 + $0xb7] sm:$0xff]  ;;  %v2328_v30 = vld [vmem:[#allocation13 + $0xaf] sm:$0xff]  ;;  %v2112_v50 = vadd.f32 %v2064_v18, %v2016_v61  ;;  %v2113_v28 = vadd.f32 %v2065_v53, %v2017_v26 }
 0x4a0   : > { %v2161_v2 = vld [vmem:[#allocation13 + $0x1d5] sm:$0xff]  ;;  %v2160_v21 = vld [vmem:[#allocation13 + $0x1cd] sm:$0xff]  ;;  %v2376_v56 = vadd.f32 %v2328_v30, %v2280_v14  ;;  %v2377_v4 = vadd.f32 %v2329_v55, %v2281_v43  ;;  %v1898_v16 = vadd.f32 %v1850_v45, %v1802_v10  ;;  %v1778_v55 = vld [vmem:[#allocation13 + $0x1e1] sm:$0xff] }
 0x4a1   : > { %v2417_v29 = vld [vmem:[#allocation13 + $0xb8] sm:$0xff]  ;;  %v2208_v63 = vadd.f32 %v2160_v21, %v2112_v50  ;;  %v2209_v49 = vadd.f32 %v2161_v2, %v2113_v28  ;;  %v2256_v23 = vld [vmem:[#allocation13 + $0x1ce] sm:$0xff]  ;;  %v1946_v21 = vld [vmem:[#allocation13 + $0xc3] sm:$0xff] }
 0x4a2   : > { %v2257_v3 = vld [vmem:[#allocation13 + $0x1d6] sm:$0xff]  ;;  %v2448_v53 = vadd.f32 %v2376_v56, %v7432_v33  ;;  %v2449_v41 = vadd.f32 %v2417_v29, %v2377_v4  ;;  %v1851_v18 = vld [vmem:[#allocation13 + $0xca] sm:$0xff]  ;;  %v1994_v42 = vadd.f32 %v1946_v21, %v1898_v16 }
 0x4a3   : > { %v2353_v62 = vld [vmem:[#allocation13 + $0x1d7] sm:$0xff]  ;;  %v2304_v61 = vadd.f32 %v2256_v23, %v2208_v63  ;;  %v2305_v26 = vadd.f32 %v2257_v3, %v2209_v49  ;;  %v1899_v19 = vadd.f32 %v1851_v18, %v1803_v35  ;;  %v7452_v14 = vld [vmem:[#allocation13 + $0x1e8] sm:$0xff]  ;;  %v1826_v3 = vadd.f32 %v1778_v55, %v1730_v38 }
 0x4a4   : > { %v1779_v2 = vld [vmem:[#allocation13 + $0x1e9] sm:$0xff]  ;;  %v7454_v43 = vmul.f32 0.012345679, %v2448_v53  ;;  %v7456_v30 = vmul.f32 0.012345679, %v2449_v41  ;;  %v2429_v27 = vld [vmem:[#allocation13 + $0x1d8] sm:$0xff] }
 0x4a5   : > { %v2400_v50 = vadd.f32 %v2352_v39, %v2304_v61  ;;  %v2401_v28 = vadd.f32 %v2353_v62, %v2305_v26  ;;  %v1947_v33 = vld [vmem:[#allocation13 + $0xcb] sm:$0xff]  ;;  %v1827_v56 = vadd.f32 %v1779_v2, %v7452_v14  ;;  %v1874_v23 = vld [vmem:[#allocation13 + $0x1e2] sm:$0xff] }
 0x4a6   : > { %v2043_v34 = vld [vmem:[#allocation13 + $0xcc] sm:$0xff]  ;;  %v1995_v29 = vadd.f32 %v1947_v33, %v1899_v19  ;;  %v2042_v49 = vld [vmem:[#allocation13 + $0xc4] sm:$0xff]  ;;  %v1922_v62 = vadd.f32 %v1874_v23, %v1826_v3 }
 0x4a7   : > { %v2472_v4 = vadd.f32 %v2400_v50, %v7436_v51  ;;  %v2473_v63 = vadd.f32 %v2429_v27, %v2401_v28  ;;  %v1875_v10 = vld [vmem:[#allocation13 + $0x1ea] sm:$0xff]  ;;  %v2090_v53 = vadd.f32 %v2042_v49, %v1994_v42  ;;  %v1757_v49 = vld [vmem:[#allocation13 + $0xe1] sm:$0xff] }
 0x4a8   : > { %v2139_v35 = vld [vmem:[#allocation13 + $0xcd] sm:$0xff]  ;;  %v2091_v41 = vadd.f32 %v2043_v34, %v1995_v29  ;;  %v2138_v39 = vld [vmem:[#allocation13 + $0xc5] sm:$0xff]  ;;  %v1923_v61 = vadd.f32 %v1875_v10, %v1827_v56  ;;  %v1708_v34 = vld [vmem:[#allocation13 + $0xd8] sm:$0xff] }
 0x4a9   : > { %v7460_v26 = vmul.f32 0.012345679, %v2472_v4  ;;  %v7462_v45 = vmul.f32 0.012345679, %v2473_v63  ;;  %v1970_v19 = vld [vmem:[#allocation13 + $0x1e3] sm:$0xff]  ;;  %v1971_v16 = vld [vmem:[#allocation13 + $0x1eb] sm:$0xff]  ;;  %v2186_v55 = vadd.f32 %v2138_v39, %v2090_v53 }
 0x4aa   : > { %v2235_v38 = vld [vmem:[#allocation13 + $0xce] sm:$0xff]  ;;  %v2187_v51 = vadd.f32 %v2139_v35, %v2091_v41  ;;  %v2018_v2 = vadd.f32 %v1970_v19, %v1922_v62  ;;  %v2019_v50 = vadd.f32 %v1971_v16, %v1923_v61  ;;  %v2234_v33 = vld [vmem:[#allocation13 + $0xc6] sm:$0xff]  ;;  %v1756_v63 = vld [vmem:[#allocation13 + $0xd9] sm:$0xff] }
 0x4ab   : > { %10782 = vst [vmem:[#allocation70_spill] sm:$0xff] %v7460_v26  ;;  %10783 = vst [vmem:[#allocation71_spill] sm:$0xff] %v7462_v45  ;;  %v2067_v18 = vld [vmem:[#allocation13 + $0x1ec] sm:$0xff]  ;;  %v2066_v27 = vld [vmem:[#allocation13 + $0x1e4] sm:$0xff]  ;;  %v2282_v42 = vadd.f32 %v2234_v33, %v2186_v55  ;;  %v1804_v35 = vadd.f32 %v1756_v63, %v1708_v34 }
 0x4ac   : > { %v2331_v28 = vld [vmem:[#allocation13 + $0xcf] sm:$0xff]  ;;  %v2283_v29 = vadd.f32 %v2235_v38, %v2187_v51  ;;  %v2114_v3 = vadd.f32 %v2066_v27, %v2018_v2  ;;  %v2115_v56 = vadd.f32 %v2067_v18, %v2019_v50  ;;  %v7464_v4 = vld [vmem:[#allocation13 + $0xe0] sm:$0xff]  ;;  %v1732_v27 = vld [vmem:[#allocation13 + $0x1f8] sm:$0xff] }
 0x4ad   : > { %v2163_v21 = vld [vmem:[#allocation13 + $0x1ed] sm:$0xff]  ;;  %v2162_v53 = vld [vmem:[#allocation13 + $0x1e5] sm:$0xff]  ;;  %v1805_v41 = vadd.f32 %v1757_v49, %v7464_v4  ;;  %v2378_v39 = vadd.f32 %v2330_v8, %v2282_v42  ;;  %v1852_v55 = vld [vmem:[#allocation13 + $0xda] sm:$0xff] }
 0x4ae   : > { %v2418_v23 = vld [vmem:[#allocation13 + $0xd0] sm:$0xff]  ;;  %v2379_v62 = vadd.f32 %v2331_v28, %v2283_v29  ;;  %v2210_v61 = vadd.f32 %v2162_v53, %v2114_v3  ;;  %v2211_v19 = vadd.f32 %v2163_v21, %v2115_v56  ;;  %v2258_v16 = vld [vmem:[#allocation13 + $0x1e6] sm:$0xff]  ;;  %v1900_v18 = vadd.f32 %v1852_v55, %v1804_v35  ;;  %v1948_v50 = vld [vmem:[#allocation13 + $0xdb] sm:$0xff] }
 0x4af   : > { %v2259_v10 = vld [vmem:[#allocation13 + $0x1ee] sm:$0xff]  ;;  %v1853_v38 = vld [vmem:[#allocation13 + $0xe2] sm:$0xff]  ;;  %v2450_v0 = vadd.f32 %v2378_v39, %v7448_v1  ;;  %v1780_v8 = vld [vmem:[#allocation13 + $0x1f9] sm:$0xff] }
 0x4b0   : > { %v2355_v51 = vld [vmem:[#allocation13 + $0x1ef] sm:$0xff]  ;;  %v1901_v2 = vadd.f32 %v1853_v38, %v1805_v41  ;;  %v1949_v33 = vld [vmem:[#allocation13 + $0xe3] sm:$0xff]  ;;  %v2451_v45 = vadd.f32 %v2418_v23, %v2379_v62  ;;  %v2306_v26 = vadd.f32 %v2258_v16, %v2210_v61  ;;  %v2307_v34 = vadd.f32 %v2259_v10, %v2211_v19  ;;  %v1876_v39 = vld [vmem:[#allocation13 + $0x1fa] sm:$0xff] }
 0x4b1   : > { %v7468_v63 = vld [vmem:[#allocation13 + $0x200] sm:$0xff]  ;;  %v1996_v29 = vadd.f32 %v1948_v50, %v1900_v18  ;;  %v1828_v49 = vadd.f32 %v1780_v8, %v1732_v27  ;;  %v7471_v35 = vmul.f32 0.012345679, %v2450_v0  ;;  %v2430_v62 = vld [vmem:[#allocation13 + $0x1f0] sm:$0xff] }
 0x4b2   : > { %v1781_v28 = vld [vmem:[#allocation13 + $0x201] sm:$0xff]  ;;  %v1997_v3 = vadd.f32 %v1949_v33, %v1901_v2  ;;  %v7473_v41 = vmul.f32 0.012345679, %v2451_v45  ;;  %v2403_v23 = vadd.f32 %v2355_v51, %v2307_v34 }
 0x4b3   : > { %v2354_v42 = vld [vmem:[#allocation13 + $0x1e7] sm:$0xff]  ;;  %v2044_v56 = vld [vmem:[#allocation13 + $0xdc] sm:$0xff]  ;;  %v1829_v53 = vadd.f32 %v1781_v28, %v7468_v63  ;;  %v1924_v55 = vadd.f32 %v1876_v39, %v1828_v49 }
 0x4b4   : > { %v2045_v21 = vld [vmem:[#allocation13 + $0xe4] sm:$0xff]  ;;  %10784 = vst [vmem:[#allocation72_spill] sm:$0xff] %v7473_v41  ;;  %v2402_v1 = vadd.f32 %v2354_v42, %v2306_v26  ;;  %v2092_v19 = vadd.f32 %v2044_v56, %v1996_v29  ;;  %v2475_v2 = vadd.f32 %v2430_v62, %v2403_v23  ;;  %v1972_v33 = vld [vmem:[#allocation13 + $0x1fb] sm:$0xff] }
 0x4b5   : > { %v1877_v10 = vld [vmem:[#allocation13 + $0x202] sm:$0xff]  ;;  %v2093_v16 = vadd.f32 %v2045_v21, %v1997_v3  ;;  %v2020_v26 = vadd.f32 %v1972_v33, %v1924_v55  ;;  %v7480_v62 = vld [vmem:[#allocation13 + $0xf8] sm:$0xff] }
 0x4b6   : > { %v2141_v61 = vld [vmem:[#allocation13 + $0xe5] sm:$0xff]  ;;  %v1925_v38 = vadd.f32 %v1877_v10, %v1829_v53  ;;  %v2474_v18 = vadd.f32 %v2402_v1, %v7452_v14  ;;  %v2140_v50 = vld [vmem:[#allocation13 + $0xdd] sm:$0xff]  ;;  %v7478_v42 = vmul.f32 0.012345679, %v2475_v2  ;;  %v1710_v10 = vld [vmem:[#allocation13 + $0xf0] sm:$0xff] }
 0x4b7   : > { %v1973_v27 = vld [vmem:[#allocation13 + $0x203] sm:$0xff]  ;;  %v2188_v45 = vadd.f32 %v2140_v50, %v2092_v19  ;;  %v2189_v28 = vadd.f32 %v2141_v61, %v2093_v16  ;;  %v1758_v61 = vld [vmem:[#allocation13 + $0xf1] sm:$0xff]  ;;  %v1759_v19 = vld [vmem:[#allocation13 + $0xf9] sm:$0xff] }
 0x4b8   : > { %v2237_v0 = vld [vmem:[#allocation13 + $0xe6] sm:$0xff]  ;;  %v2021_v51 = vadd.f32 %v1973_v27, %v1925_v38  ;;  %v7476_v34 = vmul.f32 0.012345679, %v2474_v18  ;;  %10786 = vst [vmem:[#allocation74_spill] sm:$0xff] %v7478_v42  ;;  %v2236_v3 = vld [vmem:[#allocation13 + $0xde] sm:$0xff] }
 0x4b9   : > { %v2069_v8 = vld [vmem:[#allocation13 + $0x204] sm:$0xff]  ;;  %v2068_v56 = vld [vmem:[#allocation13 + $0x1fc] sm:$0xff]  ;;  %v2284_v49 = vadd.f32 %v2236_v3, %v2188_v45  ;;  %v2285_v14 = vadd.f32 %v2237_v0, %v2189_v28  ;;  %v1806_v45 = vadd.f32 %v1758_v61, %v1710_v10  ;;  %v1807_v0 = vadd.f32 %v1759_v19, %v7480_v62  ;;  %v1854_v3 = vld [vmem:[#allocation13 + $0xf2] sm:$0xff] }
 0x4ba   : > { %10785 = vst [vmem:[#allocation73_spill] sm:$0xff] %v7476_v34  ;;  %v2333_v29 = vld [vmem:[#allocation13 + $0xe7] sm:$0xff]  ;;  %v2332_v53 = vld [vmem:[#allocation13 + $0xdf] sm:$0xff]  ;;  %v2116_v1 = vadd.f32 %v2068_v56, %v2020_v26  ;;  %v2117_v23 = vadd.f32 %v2069_v8, %v2021_v51  ;;  %v1734_v34 = vld [vmem:[#allocation13 + $0x210] sm:$0xff] }
 0x4bb   : > { %v2165_v21 = vld [vmem:[#allocation13 + $0x205] sm:$0xff]  ;;  %v2164_v39 = vld [vmem:[#allocation13 + $0x1fd] sm:$0xff]  ;;  %v2380_v38 = vadd.f32 %v2332_v53, %v2284_v49  ;;  %v2381_v18 = vadd.f32 %v2333_v29, %v2285_v14  ;;  %v1902_v11 = vadd.f32 %v1854_v3, %v1806_v45  ;;  %v1782_v29 = vld [vmem:[#allocation13 + $0x211] sm:$0xff] }
 0x4bc   : > { %v2419_v16 = vld [vmem:[#allocation13 + $0xe8] sm:$0xff]  ;;  %v2212_v2 = vadd.f32 %v2164_v39, %v2116_v1  ;;  %v2213_v50 = vadd.f32 %v2165_v21, %v2117_v23  ;;  %v2260_v27 = vld [vmem:[#allocation13 + $0x1fe] sm:$0xff]  ;;  %v1950_v39 = vld [vmem:[#allocation13 + $0xf3] sm:$0xff] }
 0x4bd   : > { %v2261_v55 = vld [vmem:[#allocation13 + $0x206] sm:$0xff]  ;;  %v2452_v8 = vadd.f32 %v2380_v38, %v7464_v4  ;;  %v2453_v28 = vadd.f32 %v2419_v16, %v2381_v18  ;;  %v1855_v56 = vld [vmem:[#allocation13 + $0xfa] sm:$0xff]  ;;  %v1998_v19 = vadd.f32 %v1950_v39, %v1902_v11 }
 0x4be   : > { %v2357_v33 = vld [vmem:[#allocation13 + $0x207] sm:$0xff]  ;;  %v2356_v42 = vld [vmem:[#allocation13 + $0x1ff] sm:$0xff]  ;;  %v2308_v26 = vadd.f32 %v2260_v27, %v2212_v2  ;;  %v2309_v51 = vadd.f32 %v2261_v55, %v2213_v50  ;;  %v1903_v20 = vadd.f32 %v1855_v56, %v1807_v0  ;;  %v1830_v55 = vadd.f32 %v1782_v29, %v1734_v34  ;;  %v2046_v50 = vld [vmem:[#allocation13 + $0xf4] sm:$0xff] }
 0x4bf   : > { %v7484_v49 = vld [vmem:[#allocation13 + $0x218] sm:$0xff]  ;;  %v7486_v14 = vmul.f32 0.012345679, %v2452_v8  ;;  %v7488_v53 = vmul.f32 0.012345679, %v2453_v28  ;;  %v2431_v10 = vld [vmem:[#allocation13 + $0x208] sm:$0xff]  ;;  %v2094_v8 = vadd.f32 %v2046_v50, %v1998_v19 }
 0x4c0   : > { %v1783_v21 = vld [vmem:[#allocation13 + $0x219] sm:$0xff]  ;;  %v2404_v1 = vadd.f32 %v2356_v42, %v2308_v26  ;;  %v2405_v23 = vadd.f32 %v2357_v33, %v2309_v51  ;;  %v1761_v50 = vld [vmem:[#allocation13 + $0x111] sm:$0xff] }
 0x4c1   : > { %10787 = vst [vmem:[#allocation75_spill] sm:$0xff] %v7486_v14  ;;  %10788 = vst [vmem:[#allocation76_spill] sm:$0xff] %v7488_v53  ;;  %v1951_v4 = vld [vmem:[#allocation13 + $0xfb] sm:$0xff]  ;;  %v1831_v38 = vadd.f32 %v1783_v21, %v7484_v49  ;;  %v1878_v27 = vld [vmem:[#allocation13 + $0x212] sm:$0xff] }
 0x4c2   : > { %v2047_v61 = vld [vmem:[#allocation13 + $0xfc] sm:$0xff]  ;;  %v1999_v16 = vadd.f32 %v1951_v4, %v1903_v20  ;;  %v2476_v18 = vadd.f32 %v2404_v1, %v7468_v63  ;;  %v2477_v2 = vadd.f32 %v2431_v10, %v2405_v23  ;;  %v1926_v33 = vadd.f32 %v1878_v27, %v1830_v55  ;;  %v1974_v20 = vld [vmem:[#allocation13 + $0x213] sm:$0xff] }
 0x4c3   : > { %v1879_v45 = vld [vmem:[#allocation13 + $0x21a] sm:$0xff] }
 0x4c4   : > { %v2143_v0 = vld [vmem:[#allocation13 + $0xfd] sm:$0xff]  ;;  %v2095_v28 = vadd.f32 %v2047_v61, %v1999_v16  ;;  %v2142_v42 = vld [vmem:[#allocation13 + $0xf5] sm:$0xff]  ;;  %v1927_v26 = vadd.f32 %v1879_v45, %v1831_v38  ;;  %v7492_v51 = vmul.f32 0.012345679, %v2476_v18  ;;  %v7494_v3 = vmul.f32 0.012345679, %v2477_v2 }
 0x4c5   : > { %v1975_v11 = vld [vmem:[#allocation13 + $0x21b] sm:$0xff]  ;;  %v2190_v29 = vadd.f32 %v2142_v42, %v2094_v8  ;;  %v2022_v21 = vadd.f32 %v1974_v20, %v1926_v33  ;;  %v1712_v61 = vld [vmem:[#allocation13 + $0x108] sm:$0xff]  ;;  %v7496_v18 = vld [vmem:[#allocation13 + $0x110] sm:$0xff] }
 0x4c6   : > { %10789 = vst [vmem:[#allocation77_spill] sm:$0xff] %v7492_v51  ;;  %10790 = vst [vmem:[#allocation78_spill] sm:$0xff] %v7494_v3  ;;  %v2239_v34 = vld [vmem:[#allocation13 + $0xfe] sm:$0xff]  ;;  %v2191_v63 = vadd.f32 %v2143_v0, %v2095_v28  ;;  %v2023_v1 = vadd.f32 %v1975_v11, %v1927_v26  ;;  %v2238_v4 = vld [vmem:[#allocation13 + $0xf6] sm:$0xff]  ;;  %v1809_v28 = vadd.f32 %v1761_v50, %v7496_v18 }
 0x4c7   : > { %v2071_v56 = vld [vmem:[#allocation13 + $0x21c] sm:$0xff]  ;;  %v2070_v10 = vld [vmem:[#allocation13 + $0x214] sm:$0xff]  ;;  %v2286_v19 = vadd.f32 %v2238_v4, %v2190_v29  ;;  %v1760_v2 = vld [vmem:[#allocation13 + $0x109] sm:$0xff] }
 0x4c8   : > { %v2335_v23 = vld [vmem:[#allocation13 + $0xff] sm:$0xff]  ;;  %v2287_v16 = vadd.f32 %v2239_v34, %v2191_v63  ;;  %v2118_v55 = vadd.f32 %v2070_v10, %v2022_v21  ;;  %v2119_v38 = vadd.f32 %v2071_v56, %v2023_v1  ;;  %v2334_v3 = vld [vmem:[#allocation13 + $0xf7] sm:$0xff]  ;;  %v1808_v0 = vadd.f32 %v1760_v2, %v1712_v61  ;;  %v1856_v29 = vld [vmem:[#allocation13 + $0x10a] sm:$0xff] }
 0x4c9   : > { %v2167_v39 = vld [vmem:[#allocation13 + $0x21d] sm:$0xff]  ;;  %v2166_v8 = vld [vmem:[#allocation13 + $0x215] sm:$0xff]  ;;  %v2382_v42 = vadd.f32 %v2334_v3, %v2286_v19  ;;  %v1952_v1 = vld [vmem:[#allocation13 + $0x10b] sm:$0xff] }
 0x4ca   : > { %v2420_v27 = vld [vmem:[#allocation13 + $0x100] sm:$0xff]  ;;  %v2383_v33 = vadd.f32 %v2335_v23, %v2287_v16  ;;  %v2214_v26 = vadd.f32 %v2166_v8, %v2118_v55  ;;  %v2215_v20 = vadd.f32 %v2167_v39, %v2119_v38  ;;  %v2262_v11 = vld [vmem:[#allocation13 + $0x216] sm:$0xff]  ;;  %v1904_v56 = vadd.f32 %v1856_v29, %v1808_v0  ;;  %v1736_v10 = vld [vmem:[#allocation13 + $0x228] sm:$0xff] }
 0x4cb   : > { %v2263_v45 = vld [vmem:[#allocation13 + $0x21e] sm:$0xff]  ;;  %v1857_v34 = vld [vmem:[#allocation13 + $0x112] sm:$0xff]  ;;  %v2454_v51 = vadd.f32 %v2382_v42, %v7480_v62  ;;  %v1784_v3 = vld [vmem:[#allocation13 + $0x229] sm:$0xff] }
 0x4cc   : > { %v2359_v63 = vld [vmem:[#allocation13 + $0x21f] sm:$0xff]  ;;  %v1905_v21 = vadd.f32 %v1857_v34, %v1809_v28  ;;  %v1953_v4 = vld [vmem:[#allocation13 + $0x113] sm:$0xff]  ;;  %v2455_v57 = vadd.f32 %v2420_v27, %v2383_v33  ;;  %v2310_v24 = vadd.f32 %v2262_v11, %v2214_v26  ;;  %v2311_v61 = vadd.f32 %v2263_v45, %v2215_v20  ;;  %v1880_v42 = vld [vmem:[#allocation13 + $0x22a] sm:$0xff] }
 0x4cd   : > { %v7500_v2 = vld [vmem:[#allocation13 + $0x230] sm:$0xff]  ;;  %v2000_v16 = vadd.f32 %v1952_v1, %v1904_v56  ;;  %v1832_v50 = vadd.f32 %v1784_v3, %v1736_v10  ;;  %v7503_v0 = vmul.f32 0.012345679, %v2454_v51  ;;  %v2432_v33 = vld [vmem:[#allocation13 + $0x220] sm:$0xff] }
 0x4ce   : > { %v1785_v23 = vld [vmem:[#allocation13 + $0x231] sm:$0xff]  ;;  %v2001_v55 = vadd.f32 %v1953_v4, %v1905_v21  ;;  %v7505_v28 = vmul.f32 0.012345679, %v2455_v57  ;;  %v2407_v27 = vadd.f32 %v2359_v63, %v2311_v61 }
 0x4cf   : > { %v2358_v19 = vld [vmem:[#allocation13 + $0x217] sm:$0xff]  ;;  %v2048_v38 = vld [vmem:[#allocation13 + $0x10c] sm:$0xff]  ;;  %v1833_v8 = vadd.f32 %v1785_v23, %v7500_v2  ;;  %10791 = vst [vmem:[#allocation79_spill] sm:$0xff] %v7503_v0  ;;  %v1928_v29 = vadd.f32 %v1880_v42, %v1832_v50 }
 0x4d0   : > { %v2049_v39 = vld [vmem:[#allocation13 + $0x114] sm:$0xff]  ;;  %10792 = vst [vmem:[#allocation80_spill] sm:$0xff] %v7505_v28  ;;  %v2406_v62 = vadd.f32 %v2358_v19, %v2310_v24  ;;  %v2096_v20 = vadd.f32 %v2048_v38, %v2000_v16  ;;  %v2479_v21 = vadd.f32 %v2432_v33, %v2407_v27  ;;  %v1976_v4 = vld [vmem:[#allocation13 + $0x22b] sm:$0xff] }
 0x4d1   : > { %v1881_v45 = vld [vmem:[#allocation13 + $0x232] sm:$0xff]  ;;  %v2097_v11 = vadd.f32 %v2049_v39, %v2001_v55  ;;  %v2024_v24 = vadd.f32 %v1976_v4, %v1928_v29 }
 0x4d2   : > { %v2145_v26 = vld [vmem:[#allocation13 + $0x115] sm:$0xff]  ;;  %v1929_v34 = vadd.f32 %v1881_v45, %v1833_v8  ;;  %v2478_v56 = vadd.f32 %v2406_v62, %v7484_v49  ;;  %v2144_v1 = vld [vmem:[#allocation13 + $0x10d] sm:$0xff]  ;;  %v7510_v19 = vmul.f32 0.012345679, %v2479_v21 }
 0x4d3   : > { %v1977_v10 = vld [vmem:[#allocation13 + $0x233] sm:$0xff]  ;;  %v2192_v57 = vadd.f32 %v2144_v1, %v2096_v20  ;;  %v2193_v23 = vadd.f32 %v2145_v26, %v2097_v11 }
 0x4d4   : > { %v2241_v51 = vld [vmem:[#allocation13 + $0x116] sm:$0xff]  ;;  %v2025_v63 = vadd.f32 %v1977_v10, %v1929_v34  ;;  %v7508_v61 = vmul.f32 0.012345679, %v2478_v56  ;;  %v2240_v16 = vld [vmem:[#allocation13 + $0x10e] sm:$0xff] }
 0x4d5   : > { %v2073_v3 = vld [vmem:[#allocation13 + $0x234] sm:$0xff]  ;;  %v2072_v39 = vld [vmem:[#allocation13 + $0x22c] sm:$0xff]  ;;  %v2288_v38 = vadd.f32 %v2240_v16, %v2192_v57  ;;  %v2289_v50 = vadd.f32 %v2241_v51, %v2193_v23 }
 0x4d6   : > { %v2337_v55 = vld [vmem:[#allocation13 + $0x117] sm:$0xff]  ;;  %v2120_v49 = vadd.f32 %v2072_v39, %v2024_v24  ;;  %v2121_v8 = vadd.f32 %v2073_v3, %v2025_v63  ;;  %v2336_v27 = vld [vmem:[#allocation13 + $0x10f] sm:$0xff] }
 0x4d7   : > { %v2169_v62 = vld [vmem:[#allocation13 + $0x235] sm:$0xff]  ;;  %v2168_v42 = vld [vmem:[#allocation13 + $0x22d] sm:$0xff]  ;;  %v2384_v45 = vadd.f32 %v2336_v27, %v2288_v38  ;;  %v2385_v33 = vadd.f32 %v2337_v55, %v2289_v50  ;;  %v2531_v50 = vmul.f32 %v7325_v13, %v7325_v13  ;;  %v2536_v27 = vmul.f32 %v7390_v46, %v7390_v46 }
 0x4d8   : > { %v2216_v20 = vadd.f32 %v2168_v42, %v2120_v49  ;;  %v2217_v26 = vadd.f32 %v2169_v62, %v2121_v8  ;;  %v2421_v11 = vld [vmem:[#allocation13 + $0x118] sm:$0xff]  ;;  %v2264_v34 = vld [vmem:[#allocation13 + $0x22e] sm:$0xff]  ;;  %v2532_v49 = vmul.f32 %v7350_v15, %v7350_v15  ;;  %v2533_v8 = vmul.f32 %v7352_v12, %v7352_v12 }
 0x4d9   : > { %v2265_v29 = vld [vmem:[#allocation13 + $0x236] sm:$0xff]  ;;  %v2456_v56 = vadd.f32 %v2384_v45, %v7496_v18  ;;  %v2457_v21 = vadd.f32 %v2421_v11, %v2385_v33  ;;  %v2530_v18 = vmul.f32 %v7323_v31, %v7323_v31  ;;  %v2535_v62 = vmul.f32 %v7377_v32, %v7377_v32 }
 0x4da   : > { %v2312_v1 = vadd.f32 %v2264_v34, %v2216_v20  ;;  %v2313_v4 = vadd.f32 %v2265_v29, %v2217_v26  ;;  %v2361_v10 = vld [vmem:[#allocation13 + $0x237] sm:$0xff]  ;;  %v2360_v57 = vld [vmem:[#allocation13 + $0x22f] sm:$0xff]  ;;  %v2537_v42 = vmul.f32 %v7392_v48, %v7392_v48  ;;  %v2538_v45 = vmul.f32 %v7407_v59, %v7407_v59 }
 0x4db   : > { %v7513_v51 = vmul.f32 0.012345679, %v2456_v56  ;;  %v7515_v3 = vmul.f32 0.012345679, %v2457_v21  ;;  %v2433_v63 = vld [vmem:[#allocation13 + $0x238] sm:$0xff]  ;;  %v2539_v33 = vmul.f32 %v7409_v52, %v7409_v52  ;;  %v2540_v20 = vmul.f32 %v7422_v9, %v7422_v9 }
 0x4dc   : > { %v2408_v23 = vadd.f32 %v2360_v57, %v2312_v1  ;;  %v2409_v24 = vadd.f32 %v2361_v10, %v2313_v4  ;;  %v2541_v26 = vmul.f32 %v7424_v6, %v7424_v6  ;;  %v2542_v11 = vmul.f32 %v7439_v44, %v7439_v44 }
 0x4dd   : > { %10793 = vst [vmem:[#allocation81_spill] sm:$0xff] %v7513_v51  ;;  %10794 = vst [vmem:[#allocation82_spill] sm:$0xff] %v7515_v3  ;;  %v2543_v29 = vmul.f32 %v7441_v25, %v7441_v25  ;;  %v2554_v34 = vsub.f32 %v7332_v17, %v2530_v18  ;;  %v2544_v56 = vmul.f32 %v7454_v43, %v7454_v43 }
 0x4de   : > { %v2480_v16 = vadd.f32 %v2408_v23, %v7500_v2  ;;  %v2481_v39 = vadd.f32 %v2433_v63, %v2409_v24  ;;  %v2534_v2 = vmul.f32 %v7375_v40, %v7375_v40  ;;  %v2545_v21 = vmul.f32 %v7456_v30, %v7456_v30 }
 0x4df   : > { %v2546_v1 = vmul.f32 %v7471_v35, %v7471_v35  ;;  %v2555_v4 = vsub.f32 %v7334_v54, %v2531_v50  ;;  %v2547_v10 = vmul.f32 %v7473_v41, %v7473_v41  ;;  %v2548_v57 = vmul.f32 %v7486_v14, %v7486_v14  ;;  %v10796_v14 = vld [vmem:[#allocation67_spill] sm:$0xff] }
 0x4e0   : > { %v7518_v55 = vmul.f32 0.012345679, %v2480_v16  ;;  %v7520_v38 = vmul.f32 0.012345679, %v2481_v39  ;;  %v2549_v17 = vmul.f32 %v7488_v53, %v7488_v53  ;;  %v2556_v23 = vsub.f32 %v7360_v47, %v2532_v49 }
 0x4e1   : > { %v2550_v24 = vmul.f32 %v7503_v0, %v7503_v0  ;;  %v2551_v63 = vmul.f32 %v7505_v28, %v7505_v28  ;;  %v2552_v54 = vmul.f32 %v7513_v51, %v7513_v51  ;;  %v2557_v16 = vsub.f32 %v7362_v36, %v2533_v8  ;;  %v10795_v36 = vld [vmem:[#allocation66_spill] sm:$0xff] }
 0x4e2   : > { %v2553_v39 = vmul.f32 %v7515_v3, %v7515_v3  ;;  %v2558_v18 = vsub.f32 %v7380_v60, %v2534_v2  ;;  %v2559_v50 = vsub.f32 %v7382_v22, %v2535_v62  ;;  %v7576_v53 = vmax.f32 %v2554_v34, 0.0  ;;  %v10797_v60 = vld [vmem:[#allocation68_spill] sm:$0xff]  ;;  %v10798_v2 = vld [vmem:[#allocation69_spill] sm:$0xff]  ;;  %v10799_v34 = vld [vmem:[#allocation70_spill] sm:$0xff] }
 0x4e3   : > { %v2560_v47 = vsub.f32 %v7396_v7, %v2536_v27  ;;  %v2561_v49 = vsub.f32 %v7398_v37, %v2537_v42  ;;  %v2562_v28 = vsub.f32 %v7412_v58, %v2538_v45  ;;  %v7581_v0 = vmax.f32 %v2555_v4, 0.0  ;;  %v10800_v37 = vld [vmem:[#allocation71_spill] sm:$0xff]  ;;  %v10801_v42 = vld [vmem:[#allocation73_spill] sm:$0xff] }
 0x4e4   : > { %v2563_v51 = vsub.f32 %v7414_v5, %v2539_v33  ;;  %v2564_v8 = vsub.f32 %v10795_v36, %v2540_v20  ;;  %v2565_v3 = vsub.f32 %v10796_v14, %v2541_v26  ;;  %v7586_v41 = vmax.f32 %v2556_v23, 0.0  ;;  %v10802_v5 = vld [vmem:[#allocation74_spill] sm:$0xff]  ;;  %v10803_v33 = vld [vmem:[#allocation77_spill] sm:$0xff] }
 0x4e5   : > { %v2566_v22 = vsub.f32 %v10797_v60, %v2542_v11  ;;  %v2567_v62 = vsub.f32 %v10798_v2, %v2543_v29  ;;  %v2568_v7 = vsub.f32 %v10799_v34, %v2544_v56  ;;  %v7591_v27 = vmax.f32 %v2557_v16, 0.0  ;;  %v10804_v11 = vld [vmem:[#allocation78_spill] sm:$0xff] }
 0x4e6   : > { %v2569_v58 = vsub.f32 %v10800_v37, %v2545_v21  ;;  %v2570_v45 = vsub.f32 %v10801_v42, %v2546_v1  ;;  %v7595_v4 = vmax.f32 %v2558_v18, 0.0  ;;  %5601 = vrsqrt.f32 %v7576_v53 }
 0x4e7   : > { %v2571_v14 = vsub.f32 %v10802_v5, %v2547_v10  ;;  %v2572_v20 = vsub.f32 %v10803_v33, %v2548_v57  ;;  %v7600_v26 = vmax.f32 %v2559_v50, 0.0  ;;  %5603 = vrsqrt.f32 %v7581_v0 }
 0x4e8   : > { %v2573_v29 = vsub.f32 %v10804_v11, %v2549_v17  ;;  %v2574_v56 = vsub.f32 %v7508_v61, %v2550_v24  ;;  %v7605_v23 = vmax.f32 %v2560_v47, 0.0  ;;  %5605 = vrsqrt.f32 %v7586_v41 }
 0x4e9   : > { %v2575_v21 = vsub.f32 %v7510_v19, %v2551_v63  ;;  %v2576_v1 = vsub.f32 %v7518_v55, %v2552_v54  ;;  %v7610_v16 = vmax.f32 %v2561_v49, 0.0  ;;  %5607 = vrsqrt.f32 %v7591_v27 }
 0x4ea   : > { %v2577_v10 = vsub.f32 %v7520_v38, %v2553_v39  ;;  %v7614_v57 = vmax.f32 %v2562_v28, 0.0  ;;  %v7616_v18 = vmax.f32 %v2563_v51, 0.0  ;;  %5609 = vrsqrt.f32 %v7595_v4 }
 0x4eb   : > { %v7619_v61 = vmax.f32 %v2564_v8, 0.0  ;;  %v7621_v17 = vmax.f32 %v2565_v3, 0.0  ;;  %v7623_v24 = vmax.f32 %v2566_v22, 0.0  ;;  %5611 = vrsqrt.f32 %v7600_v26 }
 0x4ec   : > { %v7626_v19 = vmax.f32 %v2567_v62, 0.0  ;;  %v7628_v55 = vmax.f32 %v2568_v7, 0.0  ;;  %v7630_v63 = vmax.f32 %v2569_v58, 0.0  ;;  %5613 = vrsqrt.f32 %v7605_v23 }
 0x4ed   : > { %v7633_v28 = vmax.f32 %v2570_v45, 0.0  ;;  %v7635_v51 = vmax.f32 %v2571_v14, 0.0  ;;  %v7637_v38 = vmax.f32 %v2572_v20, 0.0  ;;  %5615 = vrsqrt.f32 %v7610_v16 }
 0x4ee   : > { %v7640_v3 = vmax.f32 %v2573_v29, 0.0  ;;  %v7642_v54 = vmax.f32 %v2574_v56, 0.0  ;;  %v7644_v39 = vmax.f32 %v2575_v21, 0.0  ;;  %5617 = vrsqrt.f32 %v7614_v57 }
 0x4ef   : > { %v7647_v50 = vmax.f32 %v2576_v1, 0.0  ;;  %v7649_v47 = vmax.f32 %v2577_v10, 0.0  ;;  %vm2604_vm3 = vcmp.eq.f32.partialorder %v7576_v53, inf  ;;  %5619 = vrsqrt.f32 %v7616_v18 }
 0x4f0   : > { %v5602_v49 = vpop.eup %5601  ;;  %vm2606_vm5 = vcmp.eq.f32.partialorder %v7576_v53, 0.0  ;;  %v2607_v36 = vand.u32 2147483648, %v7576_v53  ;;  %vm2611_vm6 = vcmp.eq.f32.partialorder %v7581_v0, inf  ;;  %vm2613_vm7 = vcmp.eq.f32.partialorder %v7581_v0, 0.0 }
 0x4f1   : > { %5621 = vrsqrt.f32 %v7619_v61  ;;  %v5604_v8 = vpop.eup %5603  ;;  %v2614_v60 = vand.u32 2147483648, %v7581_v0  ;;  %vm2618_vm8 = vcmp.eq.f32.partialorder %v7586_v41, inf  ;;  %v2621_v22 = vand.u32 2147483648, %v7586_v41 }
 0x4f2   : > { %5623 = vrsqrt.f32 %v7621_v17  ;;  %v5606_v2 = vpop.eup %5605  ;;  %vm2620_vm9 = vcmp.eq.f32.partialorder %v7586_v41, 0.0  ;;  %vm2625_vm10 = vcmp.eq.f32.partialorder %v7591_v27, inf  ;;  %vm2627_vm11 = vcmp.eq.f32.partialorder %v7591_v27, 0.0 }
 0x4f3   : > { %5625 = vrsqrt.f32 %v7623_v24  ;;  %v5608_v34 = vpop.eup %5607  ;;  %vm2632_vm12 = vcmp.eq.f32.partialorder %v7595_v4, inf  ;;  %vm2639_vm13 = vcmp.eq.f32.partialorder %v7600_v26, inf  ;;  %v2603_v42 = vmul.f32 %v5602_v49, %v7576_v53 }
 0x4f4   : > { %v5610_v58 = vpop.eup %5609  ;;  %v2610_v45 = vmul.f32 %v5604_v8, %v7581_v0  ;;  %vm2646_vm0 = vcmp.eq.f32.partialorder %v7605_v23, inf  ;;  %5627 = vrsqrt.f32 %v7626_v19  ;;  %vm2653_vm1 = vcmp.eq.f32.partialorder %v7610_v16, inf }
 0x4f5   : > { %v5612_v5 = vpop.eup %5611  ;;  %v2617_v11 = vmul.f32 %v5606_v2, %v7586_v41  ;;  %v2624_v29 = vmul.f32 %v5608_v34, %v7591_v27  ;;  %v2631_v1 = vmul.f32 %v5610_v58, %v7595_v4  ;;  %v2670_v10 = vand.u32 2147483648, %v7616_v18 }
 0x4f6   : > { %v5614_v20 = vpop.eup %5613  ;;  %v2605_v2 = vsel %vm2604_vm3, %v7576_v53, %v2603_v42  ;;  %v2612_v34 = vsel %vm2611_vm6, %v7581_v0, %v2610_v45  ;;  %v2638_v56 = vmul.f32 %v5612_v5, %v7600_v26  ;;  %vm2662_vm4 = vcmp.eq.f32.partialorder %v7614_v57, 0.0 }
 0x4f7   : > { %v5616_v21 = vpop.eup %5615  ;;  %vm2669_vm15 = vcmp.eq.f32.partialorder %v7616_v18, 0.0  ;;  %5629 = vrsqrt.f32 %v7628_v55  ;;  %vm2681_vm2 = vcmp.eq.f32.partialorder %v7621_v17, inf  ;;  %v2684_v49 = vand.u32 2147483648, %v7621_v17 }
 0x4f8   : > { %v5618_v8 = vpop.eup %5617  ;;  %vm2688_vm14 = vcmp.eq.f32.partialorder %v7623_v24, inf  ;;  %v2691_v42 = vand.u32 2147483648, %v7623_v24  ;;  %v2619_v45 = vsel %vm2618_vm8, %v7586_v41, %v2617_v11  ;;  %v2626_v5 = vsel %vm2625_vm10, %v7591_v27, %v2624_v29 }
 0x4f9   : > { %v5620_v58 = vpop.eup %5619  ;;  %v2645_v14 = vmul.f32 %v5614_v20, %v7605_v23  ;;  %v2652_v37 = vmul.f32 %v5616_v21, %v7610_v16  ;;  %vm2676_vm3 = vcmp.eq.f32.partialorder %v7619_v61, 0.0  ;;  %vm2683_vm6 = vcmp.eq.f32.partialorder %v7621_v17, 0.0 }
 0x4fa   : > { %v7719_v62 = vsel %vm2606_vm5, %v2607_v36, %v2605_v2  ;;  %v7723_v11 = vsel %vm2613_vm7, %v2614_v60, %v2612_v34  ;;  %v2633_v20 = vsel %vm2632_vm12, %v7595_v4, %v2631_v1  ;;  %vm2690_vm8 = vcmp.eq.f32.partialorder %v7623_v24, 0.0 }
 0x4fb   : > { %v5622_v33 = vpop.eup %5621  ;;  %vm2695_vm10 = vcmp.eq.f32.partialorder %v7626_v19, inf  ;;  %v2640_v21 = vsel %vm2639_vm13, %v7600_v26, %v2638_v56  ;;  %v2659_v53 = vmul.f32 %v5618_v8, %v7614_v57  ;;  %v2666_v36 = vmul.f32 %v5620_v58, %v7616_v18 }
 0x4fc   : > { %v5624_v7 = vpop.eup %5623  ;;  %5631 = vrsqrt.f32 %v7630_v63  ;;  %v7740_v0 = vsel %vm2620_vm9, %v2621_v22, %v2619_v45  ;;  %v10805_v60 = vand.u32 2147483648, %v7591_v27  ;;  %vm2697_vm5 = vcmp.eq.f32.partialorder %v7626_v19, 0.0 }
 0x4fd   : > { %v5626_v29 = vpop.eup %5625  ;;  %v2698_v56 = vand.u32 2147483648, %v7626_v19  ;;  %v2647_v2 = vsel %vm2646_vm0, %v7605_v23, %v2645_v14  ;;  %v2654_v41 = vsel %vm2653_vm1, %v7610_v16, %v2652_v37  ;;  %v2673_v22 = vmul.f32 %v5622_v33, %v7619_v61 }
 0x4fe   : > { %v7746_v1 = vsel %vm2627_vm11, %v10805_v60, %v2626_v5  ;;  %v5628_v8 = vpop.eup %5627  ;;  %v2680_v34 = vmul.f32 %v5624_v7, %v7621_v17  ;;  %v10806_v27 = vand.u32 2147483648, %v7595_v4  ;;  %vm10807_vm7 = vcmp.eq.f32.partialorder %v7595_v4, 0.0 }
 0x4ff   : > { %v10808_v45 = vand.u32 2147483648, %v7600_v26  ;;  %vm10809_vm9 = vcmp.eq.f32.partialorder %v7600_v26, 0.0  ;;  %v2687_v14 = vmul.f32 %v5626_v29, %v7623_v24  ;;  %5633 = vrsqrt.f32 %v7633_v28 }
 0x500   : > { %v7762_v58 = vsel %vm10807_vm7, %v10806_v27, %v2633_v20  ;;  %vm10810_vm11 = vcmp.eq.f32.partialorder %v7614_v57, inf  ;;  %vm10811_vm12 = vcmp.eq.f32.partialorder %v7616_v18, inf  ;;  %v2694_v37 = vmul.f32 %v5628_v8, %v7626_v19 }
 0x501   : > { %v7768_v5 = vsel %vm10809_vm9, %v10808_v45, %v2640_v21  ;;  %v2661_v7 = vsel %vm10810_vm11, %v7614_v57, %v2659_v53  ;;  %v2668_v4 = vsel %vm10811_vm12, %v7616_v18, %v2666_v36  ;;  %vm2702_vm13 = vcmp.eq.f32.partialorder %v7628_v55, inf  ;;  %v5630_v21 = vpop.eup %5629 }
 0x502   : > { %v10812_v26 = vand.u32 2147483648, %v7605_v23  ;;  %vm10813_vm0 = vcmp.eq.f32.partialorder %v7605_v23, 0.0  ;;  %v10814_v20 = vand.u32 2147483648, %v7610_v16  ;;  %vm10815_vm1 = vcmp.eq.f32.partialorder %v7610_v16, 0.0 }
 0x503   : > { %vm2704_vm7 = vcmp.eq.f32.partialorder %v7628_v55, 0.0  ;;  %5635 = vrsqrt.f32 %v7635_v51  ;;  %vm10816_vm9 = vcmp.eq.f32.partialorder %v7619_v61, inf  ;;  %v2682_v23 = vsel %vm2681_vm2, %v7621_v17, %v2680_v34 }
 0x504   : > { %v7784_v33 = vsel %vm10813_vm0, %v10812_v26, %v2647_v2  ;;  %v7790_v29 = vsel %vm10815_vm1, %v10814_v20, %v2654_v41  ;;  %v2675_v53 = vsel %vm10816_vm9, %v7619_v61, %v2673_v22  ;;  %v2705_v36 = vand.u32 2147483648, %v7628_v55 }
 0x505   : > { %5637 = vrsqrt.f32 %v7637_v38  ;;  %v10817_v16 = vand.u32 2147483648, %v7614_v57  ;;  %v7810_v8 = vsel %vm2669_vm15, %v2670_v10, %v2668_v4  ;;  %v2689_v2 = vsel %vm2688_vm14, %v7623_v24, %v2687_v14 }
 0x506   : > { %5639 = vrsqrt.f32 %v7640_v3  ;;  %v2696_v41 = vsel %vm2695_vm10, %v7626_v19, %v2694_v37  ;;  %v2701_v22 = vmul.f32 %v5630_v21, %v7628_v55  ;;  %vm2709_vm2 = vcmp.eq.f32.partialorder %v7630_v63, inf  ;;  %v5632_v27 = vpop.eup %5631 }
 0x507   : > { %v7806_v60 = vsel %vm2662_vm4, %v10817_v16, %v2661_v7  ;;  %5641 = vrsqrt.f32 %v7642_v54  ;;  %v10818_v57 = vand.u32 2147483648, %v7619_v61  ;;  %v7830_v10 = vsel %vm2683_vm6, %v2684_v49, %v2682_v23 }
 0x508   : > { %vm2711_vm15 = vcmp.eq.f32.partialorder %v7630_v63, 0.0  ;;  %v2712_v34 = vand.u32 2147483648, %v7630_v63  ;;  %v7836_v45 = vsel %vm2690_vm8, %v2691_v42, %v2689_v2  ;;  %vm2716_vm14 = vcmp.eq.f32.partialorder %v7633_v28, inf }
 0x509   : > { %v7826_v18 = vsel %vm2676_vm3, %v10818_v57, %v2675_v53  ;;  %vm2718_vm4 = vcmp.eq.f32.partialorder %v7633_v28, 0.0  ;;  %5643 = vrsqrt.f32 %v7644_v39  ;;  %v7843_v61 = vsel %vm2697_vm5, %v2698_v56, %v2696_v41  ;;  %v5634_v19 = vpop.eup %5633 }
 0x50a   : > { %v2719_v17 = vand.u32 2147483648, %v7633_v28  ;;  %vm2723_vm3 = vcmp.eq.f32.partialorder %v7635_v51, inf  ;;  %5645 = vrsqrt.f32 %v7647_v50  ;;  %v2703_v24 = vsel %vm2702_vm13, %v7628_v55, %v2701_v22 }
 0x50b   : > { %v2708_v49 = vmul.f32 %v5632_v27, %v7630_v63  ;;  %vm2725_vm6 = vcmp.eq.f32.partialorder %v7635_v51, 0.0  ;;  %v2726_v42 = vand.u32 2147483648, %v7635_v51  ;;  %5647 = vrsqrt.f32 %v7649_v47 }
 0x50c   : > { %vm2730_vm8 = vcmp.eq.f32.partialorder %v7637_v38, inf  ;;  %vm2732_vm10 = vcmp.eq.f32.partialorder %v7637_v38, 0.0  ;;  %v2733_v56 = vand.u32 2147483648, %v7637_v38  ;;  %vm2737_vm5 = vcmp.eq.f32.partialorder %v7640_v3, inf }
 0x50d   : > { %v2715_v14 = vmul.f32 %v5634_v19, %v7633_v28  ;;  %vm2739_vm11 = vcmp.eq.f32.partialorder %v7640_v3, 0.0  ;;  %v2740_v7 = vand.u32 2147483648, %v7640_v3  ;;  %vm2744_vm12 = vcmp.eq.f32.partialorder %v7642_v54, inf  ;;  %v5636_v4 = vpop.eup %5635 }
 0x50e   : > { %v2706_v37 = vsel %vm2704_vm7, %v2705_v36, %v2703_v24  ;;  %v2747_v26 = vand.u32 2147483648, %v7642_v54  ;;  %vm2751_vm13 = vcmp.eq.f32.partialorder %v7644_v39, inf  ;;  %v2754_v20 = vand.u32 2147483648, %v7644_v39 }
 0x50f   : > { %v5638_v21 = vpop.eup %5637  ;;  %v2710_v53 = vsel %vm2709_vm2, %v7630_v63, %v2708_v49  ;;  %v2722_v23 = vmul.f32 %v5636_v4, %v7635_v51  ;;  %vm2758_vm0 = vcmp.eq.f32.partialorder %v7647_v50, inf  ;;  %vm2765_vm7 = vcmp.eq.f32.partialorder %v7649_v47, inf }
 0x510   : > { %v5640_v2 = vpop.eup %5639  ;;  %v2729_v55 = vmul.f32 %v5638_v21, %v7637_v38  ;;  %v2768_v36 = vand.u32 2147483648, %v7649_v47  ;;  %v7879_v41 = vmul.f32 1.0125, %v7719_v62  ;;  %v2717_v57 = vsel %vm2716_vm14, %v7633_v28, %v2715_v14 }
 0x511   : > { %v5642_v22 = vpop.eup %5641  ;;  %v2736_v27 = vmul.f32 %v5640_v2, %v7640_v3  ;;  %vm2753_vm9 = vcmp.eq.f32.partialorder %v7644_v39, 0.0  ;;  %v7887_v24 = vmul.f32 1.0125, %v7723_v11  ;;  %v7890_v49 = vmul.f32 1.0125, %v7740_v0 }
 0x512   : > { %v2713_v19 = vsel %vm2711_vm15, %v2712_v34, %v2710_v53  ;;  %vm2760_vm2 = vcmp.eq.f32.partialorder %v7647_v50, 0.0  ;;  %vm2767_vm1 = vcmp.eq.f32.partialorder %v7649_v47, 0.0  ;;  %v7897_v62 = vmul.f32 1.0125, %v7746_v1  ;;  %v10819_v1 = vld [vmem:[#allocation20_spill] sm:$0xff] }
 0x513   : > { %v7900_v14 = vmul.f32 1.0125, %v7762_v58  ;;  %v7903_v4 = vmul.f32 1.0125, %v7768_v5  ;;  %v5644_v11 = vpop.eup %5643  ;;  %v2724_v0 = vsel %vm2723_vm3, %v7635_v51, %v2722_v23  ;;  %v7909_v63 = vmul.f32 1.0125, %v7784_v33 }
 0x514   : > { %v7912_v34 = vmul.f32 1.0125, %v7790_v29  ;;  %v5646_v53 = vpop.eup %5645  ;;  %v2720_v58 = vsel %vm2718_vm4, %v2719_v17, %v2717_v57  ;;  %v2731_v5 = vsel %vm2730_vm8, %v7637_v38, %v2729_v55  ;;  %v2743_v2 = vmul.f32 %v5642_v22, %v7642_v54 }
 0x515   : > { %v7923_v23 = vmul.f32 1.0125, %v7806_v60  ;;  %v5648_v33 = vpop.eup %5647  ;;  %v2738_v29 = vsel %vm2737_vm5, %v7640_v3, %v2736_v27  ;;  %v2750_v21 = vmul.f32 %v5644_v11, %v7644_v39  ;;  %v7930_v16 = vmul.f32 1.0125, %v7810_v8 }
 0x516   : > { %v7933_v28 = vmul.f32 1.0125, %v7826_v18  ;;  %v2727_v17 = vsel %vm2725_vm6, %v2726_v42, %v2724_v0  ;;  %v2757_v55 = vmul.f32 %v5646_v53, %v7647_v50  ;;  %v2764_v60 = vmul.f32 %v5648_v33, %v7649_v47 }
 0x517   : > { %10820 = vst [vmem:[#allocation66_spill] sm:$0xff] %v7923_v23  ;;  %10821 = vst [vmem:[#allocation67_spill] sm:$0xff] %v7930_v16  ;;  %v7940_v22 = vmul.f32 1.0125, %v7830_v10  ;;  %v2734_v57 = vsel %vm2732_vm10, %v2733_v56, %v2731_v5  ;;  %v2782_v27 = vmul.f32 1.0125, %v7836_v45  ;;  %v2741_v51 = vsel %vm2739_vm11, %v2740_v7, %v2738_v29 }
 0x518   : > { %10822 = vst [vmem:[#allocation68_spill] sm:$0xff] %v7933_v28  ;;  %v2783_v8 = vmul.f32 1.0125, %v7843_v61  ;;  %v2794_v18 = vadd.f32 1e-05, %v7879_v41  ;;  %v2745_v42 = vsel %vm2744_vm12, %v7642_v54, %v2743_v2  ;;  %v2752_v38 = vsel %vm2751_vm13, %v7644_v39, %v2750_v21 }
 0x519   : > { %10823 = vst [vmem:[#allocation69_spill] sm:$0xff] %v7940_v22  ;;  %v2784_v11 = vmul.f32 1.0125, %v2706_v37  ;;  %v2795_v10 = vadd.f32 1e-05, %v7887_v24  ;;  %v2759_v3 = vsel %vm2758_vm0, %v7647_v50, %v2757_v55  ;;  %v2766_v7 = vsel %vm2765_vm7, %v7649_v47, %v2764_v60 }
 0x51a   : > { %v2785_v56 = vmul.f32 1.0125, %v2713_v19  ;;  %v2796_v45 = vadd.f32 1e-05, %v7890_v49  ;;  %v2797_v61 = vadd.f32 1e-05, %v7897_v62  ;;  %5649 = vrcp.f32 %v2794_v18 }
 0x51b   : > { %v2798_v37 = vadd.f32 1e-05, %v7900_v14  ;;  %vm10824_vm15 = vcmp.eq.f32.partialorder %v7642_v54, 0.0  ;;  %v2786_v21 = vmul.f32 1.0125, %v2720_v58  ;;  %5651 = vrcp.f32 %v2795_v10 }
 0x51c   : > { %v2748_v0 = vsel %vm10824_vm15, %v2747_v26, %v2745_v42  ;;  %v2799_v19 = vadd.f32 1e-05, %v7903_v4  ;;  %v2755_v53 = vsel %vm2753_vm9, %v2754_v20, %v2752_v38  ;;  %v2787_v5 = vmul.f32 1.0125, %v2727_v17 }
 0x51d   : > { %v2800_v2 = vadd.f32 1e-05, %v7909_v63  ;;  %5653 = vrcp.f32 %v2796_v45  ;;  %v10825_v33 = vand.u32 2147483648, %v7647_v50  ;;  %v2769_v54 = vsel %vm2767_vm1, %v2768_v36, %v2766_v7 }
 0x51e   : > { %v2801_v26 = vadd.f32 1e-05, %v7912_v34  ;;  %5655 = vrcp.f32 %v2797_v61  ;;  %v2788_v58 = vmul.f32 1.0125, %v2734_v57  ;;  %v2789_v55 = vmul.f32 1.0125, %v2741_v51 }
 0x51f   : > { %v2762_v29 = vsel %vm2760_vm2, %v10825_v33, %v2759_v3  ;;  %v2802_v39 = vadd.f32 1e-05, %v7923_v23  ;;  %5657 = vrcp.f32 %v2798_v37  ;;  %v2790_v20 = vmul.f32 1.0125, %v2748_v0 }
 0x520   : > { %v2791_v17 = vmul.f32 1.0125, %v2755_v53  ;;  %v2803_v60 = vadd.f32 1e-05, %v7930_v16  ;;  %5659 = vrcp.f32 %v2799_v19  ;;  %v2792_v18 = vmul.f32 1.0125, %v2762_v29 }
 0x521   : > { %v2793_v42 = vmul.f32 1.0125, %v2769_v54  ;;  %v2804_v50 = vadd.f32 1e-05, %v7933_v28  ;;  %5661 = vrcp.f32 %v2800_v2  ;;  %v2805_v47 = vadd.f32 1e-05, %v7940_v22 }
 0x522   : > { %v2806_v36 = vadd.f32 1e-05, %v2782_v27  ;;  %v2807_v10 = vadd.f32 1e-05, %v2783_v8  ;;  %5663 = vrcp.f32 %v2801_v26  ;;  %v2808_v57 = vadd.f32 1e-05, %v2784_v11 }
 0x523   : > { %v2809_v51 = vadd.f32 1e-05, %v2785_v56  ;;  %v2810_v38 = vadd.f32 1e-05, %v2786_v21  ;;  %5665 = vrcp.f32 %v2802_v39  ;;  %v2811_v45 = vadd.f32 1e-05, %v2787_v5 }
 0x524   : > { %v2812_v61 = vadd.f32 1e-05, %v2788_v58  ;;  %v2813_v3 = vadd.f32 1e-05, %v2789_v55  ;;  %5667 = vrcp.f32 %v2803_v60  ;;  %v5650_v7 = vpop.eup %5649  ;;  %v2814_v37 = vadd.f32 1e-05, %v2790_v20 }
 0x525   : > { %v2815_v0 = vadd.f32 1e-05, %v2791_v17  ;;  %v2816_v19 = vadd.f32 1e-05, %v2792_v18  ;;  %5669 = vrcp.f32 %v2804_v50  ;;  %v5652_v53 = vpop.eup %5651  ;;  %v2817_v2 = vadd.f32 1e-05, %v2793_v42 }
 0x526   : > { %5671 = vrcp.f32 %v2805_v47  ;;  %v10826_v27 = vld [vmem:[#allocation21_spill] sm:$0xff]  ;;  %v10827_v11 = vld [vmem:[#allocation22_spill] sm:$0xff]  ;;  %v10828_v5 = vld [vmem:[#allocation23_spill] sm:$0xff]  ;;  %vm10841_vm14 = vcmask 130048  }
 0x527   : > { %v2843_v8 = vsub.f32 %v10826_v27, %v7325_v13  ;;  %v2844_v56 = vsub.f32 %v10827_v11, %v7350_v15  ;;  %v5654_v21 = vpop.eup %5653  ;;  %5673 = vrcp.f32 %v2806_v36  ;;  %v2845_v33 = vsub.f32 %v10828_v5, %v7352_v12  ;;  %v10829_v29 = vld [vmem:[#allocation24_spill] sm:$0xff]  ;;  %v10830_v26 = vld [vmem:[#allocation25_spill] sm:$0xff]  ;;  %v10831_v39 = vld [vmem:[#allocation26_spill] sm:$0xff] }
 0x528   : > { %v2846_v54 = vsub.f32 %v10829_v29, %v7375_v40  ;;  %v2847_v58 = vsub.f32 %v10830_v26, %v7377_v32  ;;  %v5656_v55 = vpop.eup %5655  ;;  %5675 = vrcp.f32 %v2807_v10  ;;  %v2854_v20 = vsub.f32 %v10831_v39, %v7390_v46  ;;  %v10832_v13 = vld [vmem:[#allocation27_spill] sm:$0xff]  ;;  %v10833_v15 = vld [vmem:[#allocation28_spill] sm:$0xff]  ;;  %v10834_v12 = vld [vmem:[#allocation29_spill] sm:$0xff] }
 0x529   : > { %v2855_v17 = vsub.f32 %v10832_v13, %v7392_v48  ;;  %v2856_v60 = vsub.f32 %v10833_v15, %v7407_v59  ;;  %v5658_v18 = vpop.eup %5657  ;;  %5677 = vrcp.f32 %v2808_v57  ;;  %v2857_v42 = vsub.f32 %v10834_v12, %v7409_v52  ;;  %v10835_v40 = vld [vmem:[#allocation30_spill] sm:$0xff]  ;;  %v10836_v32 = vld [vmem:[#allocation31_spill] sm:$0xff]  ;;  %v10838_v59 = vld [vmem:[#allocation37_spill] sm:$0xff] }
 0x52a   : > { %v5660_v36 = vpop.eup %5659  ;;  %5679 = vrcp.f32 %v2809_v51  ;;  %v10837_v46 = vsub.f32 %v10819_v1, %v7323_v31  ;;  %v2866_v10 = vsub.f32 %v10838_v59, %v7439_v44  ;;  %v10839_v57 = vld [vmem:[#allocation38_spill] sm:$0xff]  ;;  %v8015_v13 = vmul.f32 %v5652_v53, %v2843_v8  ;;  %v10840_v15 = vld [vmem:[#allocation39_spill] sm:$0xff]  ;;  %v10842_v31 = vld [vmem:[#allocation40_spill] sm:$0xff] }
 0x52b   : > { %v2867_v39 = vsub.f32 %v10839_v57, %v7441_v25  ;;  %v5662_v52 = vpop.eup %5661  ;;  %5681 = vrcp.f32 %v2810_v38  ;;  %v2868_v12 = vsub.f32 %v10840_v15, %v7454_v43  ;;  %v2927_v51 = vsel %vm10841_vm14, %v10819_v1, 0.0  ;;  %vm10843_vm4 = vmmov %vm10841_vm14  ;;  %v10845_v8 = vld [vmem:[#allocation41_spill] sm:$0xff]  ;;  %v10846_v57 = vld [vmem:[#allocation72_spill] sm:$0xff] }
 0x52c   : > { %v8009_v48 = vmul.f32 %v5650_v7, %v10837_v46  ;;  %v5664_v47 = vpop.eup %5663  ;;  %5683 = vrcp.f32 %v2811_v45  ;;  %v2869_v7 = vsub.f32 %v10842_v31, %v7456_v30  ;;  %v2928_v44 = vsel %vm10843_vm4, %v10826_v27, 0.0  ;;  %vm10844_vm3 = vmmov %vm10843_vm4  ;;  %v10847_v45 = vld [vmem:[#allocation42_spill] sm:$0xff]  ;;  %v10848_v50 = vld [vmem:[#allocation75_spill] sm:$0xff] }
 0x52d   : > { %v2930_v25 = vsel %vm10844_vm3, %v10827_v11, 0.0  ;;  %v5666_v38 = vpop.eup %5665  ;;  %5685 = vrcp.f32 %v2812_v61  ;;  %v2850_v53 = vmul.f32 %v5654_v21, %v2844_v56  ;;  %v2870_v43 = vsub.f32 %v10845_v8, %v7471_v35  ;;  %v10849_v30 = vld [vmem:[#allocation45_spill] sm:$0xff]  ;;  %vm10850_vm6 = vmmov %vm10844_vm3  ;;  %v10851_v61 = vld [vmem:[#allocation76_spill] sm:$0xff] }
 0x52e   : > { %v2929_v46 = vadd.f32 %v2928_v44, %v2927_v51  ;;  %v5668_v59 = vpop.eup %5667  ;;  %5687 = vrcp.f32 %v2813_v3  ;;  %v2871_v15 = vsub.f32 %v10847_v45, %v10846_v57  ;;  %v2878_v31 = vsub.f32 %v10849_v30, %v10848_v50  ;;  %v10852_v56 = vld [vmem:[#allocation46_spill] sm:$0xff]  ;;  %v10853_v3 = vld [vmem:[#allocation79_spill] sm:$0xff]  ;;  %vm10855_vm8 = vmmov %vm10844_vm3 }
 0x52f   : > { %v2932_v27 = vsel %vm10850_vm6, %v10828_v5, 0.0  ;;  %v5670_v1 = vpop.eup %5669  ;;  %5689 = vrcp.f32 %v2814_v37  ;;  %v2851_v11 = vmul.f32 %v5656_v55, %v2845_v33  ;;  %v2879_v21 = vsub.f32 %v10852_v56, %v10851_v61  ;;  %v10854_v44 = vld [vmem:[#allocation47_spill] sm:$0xff]  ;;  %v10856_v45 = vld [vmem:[#allocation80_spill] sm:$0xff]  ;;  %v10858_v37 = vld [vmem:[#allocation81_spill] sm:$0xff] }
 0x530   : > { %v2931_v22 = vadd.f32 %v2930_v25, %v2929_v46  ;;  %v5672_v35 = vpop.eup %5671  ;;  %5691 = vrcp.f32 %v2815_v0  ;;  %v2852_v51 = vmul.f32 %v5658_v18, %v2846_v54  ;;  %v2880_v8 = vsub.f32 %v10854_v44, %v10853_v3  ;;  %v10857_v30 = vld [vmem:[#allocation48_spill] sm:$0xff]  ;;  %v10859_v33 = vld [vmem:[#allocation49_spill] sm:$0xff]  ;;  %vm10860_vm10 = vmmov %vm10844_vm3 }
 0x531   : > { %v2934_v57 = vsel %vm10855_vm8, %v10829_v29, 0.0  ;;  %v5674_v50 = vpop.eup %5673  ;;  %5693 = vrcp.f32 %v2816_v19  ;;  %v2881_v5 = vsub.f32 %v10857_v30, %v10856_v45  ;;  %v2882_v55 = vsub.f32 %v10859_v33, %v10858_v37  ;;  %v10861_v3 = vld [vmem:[#allocation82_spill] sm:$0xff] }
 0x532   : > { %v2933_v28 = vadd.f32 %v2932_v27, %v2931_v22  ;;  %v5676_v61 = vpop.eup %5675  ;;  %5695 = vrcp.f32 %v2817_v2  ;;  %v2853_v25 = vmul.f32 %v5660_v36, %v2847_v58  ;;  %v2872_v0 = vmul.f32 %v5674_v50, %v2866_v10  ;;  %v10862_v44 = vld [vmem:[#allocation50_spill] sm:$0xff] }
 0x533   : > { %v2936_v54 = vsel %vm10860_vm10, %v10830_v26, 0.0  ;;  %v5678_v18 = vpop.eup %5677  ;;  %v2860_v46 = vmul.f32 %v5662_v52, %v2854_v20  ;;  %v2873_v56 = vmul.f32 %v5676_v61, %v2867_v39  ;;  %v2883_v19 = vsub.f32 %v10862_v44, %v10861_v3  ;;  %v10865_v61 = vld [vmem:[#allocation66_spill] sm:$0xff]  ;;  %v10868_v44 = vld [vmem:[#allocation69_spill] sm:$0xff] }
 0x534   : > { %v2935_v29 = vadd.f32 %v2934_v57, %v2933_v28  ;;  %v5680_v16 = vpop.eup %5679  ;;  %v2861_v45 = vmul.f32 %v5664_v47, %v2855_v17  ;;  %v2862_v30 = vmul.f32 %v5666_v38, %v2856_v60  ;;  %v2874_v23 = vmul.f32 %v5678_v18, %v2868_v12 }
 0x535   : > { %v2890_v22 = vsub.f32 %v8009_v48, %v2872_v0  ;;  %v5682_v27 = vpop.eup %5681  ;;  %v2863_v2 = vmul.f32 %v5668_v59, %v2857_v42  ;;  %v2875_v58 = vmul.f32 %v5680_v16, %v2869_v7  ;;  %v2891_v36 = vsub.f32 %v8015_v13, %v2873_v56 }
 0x536   : > { %v2937_v10 = vadd.f32 %v2936_v54, %v2935_v29  ;;  %v5684_v50 = vpop.eup %5683  ;;  %v10863_v20 = vsub.f32 %v10835_v40, %v7422_v9  ;;  %v2876_v52 = vmul.f32 %v5682_v27, %v2870_v43  ;;  %v2892_v37 = vsub.f32 %v2850_v53, %v2874_v23  ;;  %v10866_v54 = vld [vmem:[#allocation67_spill] sm:$0xff] }
 0x537   : > { %v8055_v28 = vmul.f32 %v2890_v22, %v7879_v41  ;;  %v5686_v17 = vpop.eup %5685  ;;  %v10864_v60 = vsub.f32 %v10836_v32, %v7424_v6  ;;  %v2877_v42 = vmul.f32 %v5684_v50, %v2871_v15  ;;  %v2893_v16 = vsub.f32 %v2851_v11, %v2875_v58 }
 0x538   : > { %v2864_v39 = vmul.f32 %v5670_v1, %v10863_v20  ;;  %v8061_v48 = vmul.f32 %v2891_v36, %v7887_v24  ;;  %2938 = vadd.xlane.f32.xlu0 %v2937_v10  ;;  %v5688_v29 = vpop.eup %5687  ;;  %v2884_v13 = vmul.f32 %v5686_v17, %v2878_v31  ;;  %v2894_v9 = vsub.f32 %v2852_v51, %v2876_v52 }
 0x539   : > { %v2865_v47 = vmul.f32 %v5672_v35, %v10864_v60  ;;  %v8064_v1 = vmul.f32 %v2892_v37, %v7890_v49  ;;  %v2902_v41 = vand.u32 2147483647, %v8055_v28  ;;  %v5690_v23 = vpop.eup %5689  ;;  %v2885_v40 = vmul.f32 %v5688_v29, %v2879_v21  ;;  %v10870_v37 = vld [vmem:[#allocation21_spill] sm:$0xff]  ;;  %v10871_v60 = vld [vmem:[#allocation22_spill] sm:$0xff]  ;;  %v10873_v29 = vld [vmem:[#allocation24_spill] sm:$0xff] }
 0x53a   : > { %v2895_v12 = vsub.f32 %v2853_v25, %v2877_v42  ;;  %v8068_v6 = vmul.f32 %v2893_v16, %v7897_v62  ;;  %v2903_v11 = vand.u32 2147483647, %v8061_v48  ;;  %v5692_v32 = vpop.eup %5691  ;;  %v2886_v24 = vmul.f32 %v5690_v23, %v2880_v8  ;;  %v10872_v42 = vld [vmem:[#allocation23_spill] sm:$0xff] }
 0x53b   : > { %v8072_v7 = vmul.f32 %v2894_v9, %v7900_v14  ;;  %v2904_v38 = vand.u32 2147483647, %v8064_v1  ;;  %v2908_v53 = vsub.f32 %v2860_v46, %v2884_v13  ;;  %v5694_v49 = vpop.eup %5693  ;;  %v2887_v43 = vmul.f32 %v5692_v32, %v2881_v5  ;;  %v10867_v46 = vld [vmem:[#allocation68_spill] sm:$0xff] }
 0x53c   : > { %v8076_v59 = vmul.f32 %v2895_v12, %v7903_v4  ;;  %v2905_v15 = vand.u32 2147483647, %v8068_v6  ;;  %v2909_v31 = vsub.f32 %v2861_v45, %v2885_v40  ;;  %v5696_v62 = vpop.eup %5695  ;;  %v2888_v21 = vmul.f32 %v5694_v49, %v2882_v55 }
 0x53d   : > { %v2906_v35 = vand.u32 2147483647, %v8072_v7  ;;  %v2910_v51 = vsub.f32 %v2862_v30, %v2886_v24  ;;  %v8081_v8 = vmul.f32 %v2908_v53, %v7909_v63  ;;  %v2889_v14 = vmul.f32 %v5696_v62, %v2883_v19 }
 0x53e   : > { %v2907_v57 = vand.u32 2147483647, %v8076_v59  ;;  %v2911_v33 = vsub.f32 %v2863_v2, %v2887_v43  ;;  %v8085_v5 = vmul.f32 %v2909_v31, %v7912_v34  ;;  %v2912_v4 = vsub.f32 %v2864_v39, %v2888_v21  ;;  %v10869_v39 = vld [vmem:[#allocation20_spill] sm:$0xff] }
 0x53f   : > { %v8088_v25 = vmul.f32 %v2910_v51, %v10865_v61  ;;  %v2920_v0 = vand.u32 2147483647, %v8081_v8  ;;  %v2913_v55 = vsub.f32 %v2865_v47, %v2889_v14 }
 0x540   : > { %v8092_v18 = vmul.f32 %v2911_v33, %v10866_v54  ;;  %v2921_v63 = vand.u32 2147483647, %v8085_v5  ;;  %v8096_v56 = vmul.f32 %v2912_v4, %v10867_v46 }
 0x541   : > { %v2922_v3 = vand.u32 2147483647, %v8088_v25  ;;  %v8100_v34 = vmul.f32 %v2913_v55, %v10868_v44 }
 0x542   : > { %v2923_v19 = vand.u32 2147483647, %v8092_v18  ;;  %v2924_v45 = vand.u32 2147483647, %v8096_v56 }
 0x543   : > { %v2925_v30 = vand.u32 2147483647, %v8100_v34 }
 0x5c5   : > { %v2939_v22 = vpop.xlane.xlu0 %2938 }
 0x5c6   : > { %v2940_v27 = vrot.slane %v2939_v22, 4 }
 0x5c8   : > { %v2941_v2 = vadd.f32 %v2940_v27, %v2939_v22 }
 0x5ca   : > { %v2942_v58 = vrot.slane %v2941_v2, 2 }
 0x5cc   : > { %v2943_v36 = vadd.f32 %v2942_v58, %v2941_v2 }
 0x5ce   : > { %v2944_v10 = vrot.slane %v2943_v36, 1 }
 0x5d0   : > { %v2945_v50 = vadd.f32 %v2944_v10, %v2943_v36 }
 0x5d2   : > { %5337 = vpush %v2945_v50 }
 0x603   : > { %s5338_s23 = spop %5337 }
 0x604   : > { %s8105_s30 = smul.f32 0.0013020834, %s5338_s23 }
 0x606   : > { %v2950_v20 = vstv %s8105_s30  ;;  %s2999_s6 = ssub.f32 0.0, %s8105_s30  ;;  %s3005_s7 = smul.f32 0.5, %s8105_s30 }
 0x607   : > { %v2951_v52 = vsub.f32 %v10869_v39, %v2950_v20  ;;  %v2952_v17 = vsub.f32 %v10870_v37, %v2950_v20  ;;  %v2953_v47 = vsub.f32 %v10871_v60, %v2950_v20  ;;  %v2954_v16 = vsub.f32 %v10872_v42, %v2950_v20 }
 0x608   : > { %v2955_v13 = vsub.f32 %v10873_v29, %v2950_v20  ;;  %v2956_v9 = vsub.f32 %v10830_v26, %v2950_v20  ;;  %v2975_v23 = vsub.f32 %v2950_v20, %v10869_v39  ;;  %v2976_v40 = vsub.f32 %v2950_v20, %v10870_v37  ;;  %s3000_s22 = smul.f32 0.5, %s2999_s6 }
 0x609   : > { %v2957_v12 = vmul.f32 0.5, %v2951_v52  ;;  %v2958_v32 = vmul.f32 0.5, %v2952_v17  ;;  %v2959_v24 = vmul.f32 0.5, %v2953_v47  ;;  %v2960_v53 = vmul.f32 0.5, %v2954_v16 }
 0x60a   : > { %v2961_v49 = vmul.f32 0.5, %v2955_v13  ;;  %v2962_v43 = vmul.f32 0.5, %v2956_v9  ;;  %v2977_v31 = vsub.f32 %v2950_v20, %v10871_v60  ;;  %v2978_v62 = vsub.f32 %v2950_v20, %v10872_v42 }
 0x60b   : > { %v2963_v21 = vmul.f32 1.442695, %v2957_v12  ;;  %v2965_v51 = vmul.f32 1.442695, %v2958_v32  ;;  %v2967_v14 = vmul.f32 1.442695, %v2959_v24  ;;  %v2979_v33 = vsub.f32 %v2950_v20, %v10873_v29 }
 0x60c   : > { %v2969_v4 = vmul.f32 1.442695, %v2960_v53  ;;  %v2971_v61 = vmul.f32 1.442695, %v2961_v49  ;;  %v2980_v55 = vsub.f32 %v2950_v20, %v10830_v26  ;;  %v2981_v54 = vmul.f32 0.5, %v2975_v23 }
 0x60d   : > { %5697 = vpow2.f32 %v2963_v21  ;;  %v2982_v46 = vmul.f32 0.5, %v2976_v40  ;;  %v2983_v44 = vmul.f32 0.5, %v2977_v31  ;;  %v2973_v22 = vmul.f32 1.442695, %v2962_v43 }
 0x60e   : > { %5699 = vpow2.f32 %v2965_v51  ;;  %v2984_v27 = vmul.f32 0.5, %v2978_v62  ;;  %v2985_v2 = vmul.f32 0.5, %v2979_v33  ;;  %v2987_v58 = vmul.f32 1.442695, %v2981_v54 }
 0x60f   : > { %5701 = vpow2.f32 %v2967_v14  ;;  %v2986_v36 = vmul.f32 0.5, %v2980_v55  ;;  %v2989_v10 = vmul.f32 1.442695, %v2982_v46  ;;  %v2991_v50 = vmul.f32 1.442695, %v2983_v44 }
 0x610   : > { %5703 = vpow2.f32 %v2969_v4  ;;  %v2993_v39 = vmul.f32 1.442695, %v2984_v27  ;;  %v3001_v26 = vstv %s3000_s22  ;;  %v2995_v20 = vmul.f32 1.442695, %v2985_v2 }
 0x611   : > { %5705 = vpow2.f32 %v2971_v61  ;;  %v3006_v52 = vstv %s3005_s7  ;;  %v2997_v37 = vmul.f32 1.442695, %v2986_v36  ;;  %v3002_v17 = vmul.f32 1.442695, %v3001_v26 }
 0x612   : > { %5707 = vpow2.f32 %v2973_v22  ;;  %v3007_v60 = vmul.f32 1.442695, %v3006_v52 }
 0x613   : > { %5709 = vpow2.f32 %v2987_v58 }
 0x614   : > { %5711 = vpow2.f32 %v2989_v10 }
 0x615   : > { %5713 = vpow2.f32 %v2991_v50 }
 0x616   : > { %5715 = vpow2.f32 %v2993_v39 }
 0x617   : > { %v8122_v47 = vpop.eup %5697  ;;  %5717 = vpow2.f32 %v2995_v20 }
 0x618   : > { %v8124_v42 = vpop.eup %5699  ;;  %5719 = vpow2.f32 %v2997_v37 }
 0x619   : > { %v8126_v16 = vpop.eup %5701  ;;  %5721 = vpow2.f32 %v3002_v17 }
 0x61a   : > { %10874 = vst [vmem:[#allocation70_spill] sm:$0xff] %v8126_v16  ;;  %v8128_v29 = vpop.eup %5703  ;;  %5723 = vpow2.f32 %v3007_v60 }
 0x61b   : > { %v8130_v13 = vpop.eup %5705 }
 0x61c   : > { %10875 = vst [vmem:[#allocation71_spill] sm:$0xff] %v8130_v13  ;;  %v8132_v9 = vpop.eup %5707 }
 0x61d   : > { %10876 = vst [vmem:[#allocation73_spill] sm:$0xff] %v8132_v9  ;;  %v8134_v23 = vpop.eup %5709 }
 0x61e   : > { %v8136_v40 = vpop.eup %5711 }
 0x61f   : > { %v8138_v12 = vpop.eup %5713 }
 0x620   : > { %v8140_v32 = vpop.eup %5715 }
 0x621   : > { %v8142_v24 = vpop.eup %5717 }
 0x622   : > { %10877 = vst [vmem:[#allocation74_spill] sm:$0xff] %v8142_v24  ;;  %v8144_v53 = vpop.eup %5719 }
 0x623   : > { %10878 = vst [vmem:[#allocation77_spill] sm:$0xff] %v8144_v53  ;;  %v5722_v49 = vpop.eup %5721 }
 0x624   : > { %v5724_v43 = vpop.eup %5723  ;;  %5339 = vpush %v5722_v49 }
 0x625   : > { %5341 = vpush %v5724_v43 }
 0x655   : > { %s5340_s1 = spop %5339 }
 0x656   : > { %s5342_s0 = spop %5341 }
 0x657   : > { %v3010_v31 = vstv %s5340_s1  ;;  %vm3011_vm5 = vcmask 226304   ;;  %vm3026_vm11 = vcmask 48128   ;;  %s6164_s9 = smov 6   ;;  %vm3039_vm12 = vcmask 228528   ;;  %s8338_s11 = smov 0  }
 0x658   : > { %3062 = vrot.lane.b32.xlu1 %v8126_v16, %s6164_s9  ;;  %3058 = vrot.lane.b32.xlu0 %v8122_v47, %s6164_s9  ;;  %3012 = vst.msk [vmem:[#allocation14] sm:$0x3f] %vm3011_vm5, %v3010_v31  ;;  %3013 = vst.msk [vmem:[#allocation14 + $0x1c] sm:$0x3f] %vm3011_vm5, %v3010_v31  ;;  %v3015_v62 = vstv %s5342_s0  ;;  %v6165_v21 = vmov 0.0   ;;  %vm3076_vm13 = vcmask 179248  }
 0x659   : > { %3014 = vst.msk [vmem:[#allocation14 + $0x38] sm:$0x3f] %vm3011_vm5, %v3010_v31  ;;  %3020 = vst.msk [vmem:[#allocation14 + $0x16] sm:$0x3f] %vm3011_vm5, %v3010_v31  ;;  %v8302_v51 = vmov 0.0   ;;  %v8304_v14 = vmov 0.0  }
 0x65a   : > { %3021 = vst.msk [vmem:[#allocation14 + $0x32] sm:$0x3f] %vm3011_vm5, %v3010_v31  ;;  %3022 = vst.msk [vmem:[#allocation14 + $0x4e] sm:$0x3f] %vm3011_vm5, %v3010_v31  ;;  %v8306_v33 = vmov 0.0   ;;  %v8308_v4 = vmov 0.0  }
 0x65b   : > { %3029 = vst.msk [vmem:[#allocation14 + $0x22] sm:$0xff] %vm3026_vm11, %v3010_v31  ;;  %3027 = vst.msk [vmem:[#allocation14 + $0x6] sm:$0xff] %vm3026_vm11, %v3010_v31  ;;  %v8310_v61 = vmov 0.0   ;;  %v8312_v55 = vmov 0.0   ;;  %v8314_v54 = vmov 0.0   ;;  %v8316_v46 = vmov 0.0  }
 0x65c   : > { %3028 = vst.msk [vmem:[#allocation14 + $0xe] sm:$0xff] %vm3026_vm11, %v3010_v31  ;;  %3030 = vst.msk [vmem:[#allocation14 + $0x2a] sm:$0xff] %vm3026_vm11, %v3010_v31  ;;  %3064 = vrot.lane.b32.xlu1 %v8128_v29, %s6164_s9  ;;  %3060 = vrot.lane.b32.xlu0 %v8124_v42, %s6164_s9  ;;  %v8318_v44 = vmov 0.0   ;;  %v8320_v22 = vmov 0.0   ;;  %v8322_v27 = vmov 0.0   ;;  %v8324_v2 = vmov 0.0  }
 0x65d   : > { %3031 = vst.msk [vmem:[#allocation14 + $0x3e] sm:$0xff] %vm3026_vm11, %v3010_v31  ;;  %3032 = vst.msk [vmem:[#allocation14 + $0x46] sm:$0xff] %vm3026_vm11, %v3010_v31  ;;  %v8326_v58 = vmov 0.0   ;;  %v8328_v36 = vmov 0.0   ;;  %v8330_v10 = vmov 0.0   ;;  %v8332_v50 = vmov 0.0  }
 0x65e   : > { %3042 = vst.msk [vmem:[#allocation14 + $0x22] sm:$0xff] %vm3039_vm12, %v3010_v31  ;;  %3040 = vst.msk [vmem:[#allocation14 + $0x6] sm:$0xff] %vm3039_vm12, %v3010_v31  ;;  %v8334_v39 = vmov 0.0   ;;  %v8336_v26 = vmov 0.0  }
 0x65f   : > { %3041 = vst.msk [vmem:[#allocation14 + $0xe] sm:$0xff] %vm3039_vm12, %v3010_v31  ;;  %3043 = vst.msk [vmem:[#allocation14 + $0x2a] sm:$0xff] %vm3039_vm12, %v3010_v31 }
 0x660   : > { %3044 = vst.msk [vmem:[#allocation14 + $0x3e] sm:$0xff] %vm3039_vm12, %v3010_v31  ;;  %3045 = vst.msk [vmem:[#allocation14 + $0x46] sm:$0xff] %vm3039_vm12, %v3010_v31  ;;  %3068 = vrot.lane.b32.xlu1 %v8132_v9, %s6164_s9  ;;  %3066 = vrot.lane.b32.xlu0 %v8130_v13, %s6164_s9 }
 0x661   : > { %3017 = vst.msk [vmem:[#allocation14 + $0x54] sm:$0x3f] %vm3011_vm5, %v3015_v62  ;;  %3018 = vst.msk [vmem:[#allocation14 + $0x70] sm:$0x3f] %vm3011_vm5, %v3015_v62 }
 0x662   : > { %3019 = vst.msk [vmem:[#allocation14 + $0x8c] sm:$0x3f] %vm3011_vm5, %v3015_v62  ;;  %3023 = vst.msk [vmem:[#allocation14 + $0x6a] sm:$0x3f] %vm3011_vm5, %v3015_v62 }
 0x663   : > { %3024 = vst.msk [vmem:[#allocation14 + $0x86] sm:$0x3f] %vm3011_vm5, %v3015_v62  ;;  %3025 = vst.msk [vmem:[#allocation14 + $0xa2] sm:$0x3f] %vm3011_vm5, %v3015_v62 }
 0x664   : > { %3034 = vst.msk [vmem:[#allocation14 + $0x62] sm:$0xff] %vm3026_vm11, %v3015_v62  ;;  %3033 = vst.msk [vmem:[#allocation14 + $0x5a] sm:$0xff] %vm3026_vm11, %v3015_v62  ;;  %3091 = vrot.lane.b32.xlu1 %v8136_v40, %s6164_s9  ;;  %3089 = vrot.lane.b32.xlu0 %v8134_v23, %s6164_s9 }
 0x665   : > { %3035 = vst.msk [vmem:[#allocation14 + $0x76] sm:$0xff] %vm3026_vm11, %v3015_v62  ;;  %3036 = vst.msk [vmem:[#allocation14 + $0x7e] sm:$0xff] %vm3026_vm11, %v3015_v62 }
 0x666   : > { %3037 = vst.msk [vmem:[#allocation14 + $0x92] sm:$0xff] %vm3026_vm11, %v3015_v62  ;;  %3038 = vst.msk [vmem:[#allocation14 + $0x9a] sm:$0xff] %vm3026_vm11, %v3015_v62 }
 0x667   : > { %3047 = vst.msk [vmem:[#allocation14 + $0x62] sm:$0xff] %vm3039_vm12, %v3015_v62  ;;  %3046 = vst.msk [vmem:[#allocation14 + $0x5a] sm:$0xff] %vm3039_vm12, %v3015_v62 }
 0x668   : > { %3048 = vst.msk [vmem:[#allocation14 + $0x76] sm:$0xff] %vm3039_vm12, %v3015_v62  ;;  %3049 = vst.msk [vmem:[#allocation14 + $0x7e] sm:$0xff] %vm3039_vm12, %v3015_v62  ;;  %3095 = vrot.lane.b32.xlu1 %v8140_v32, %s6164_s9  ;;  %3093 = vrot.lane.b32.xlu0 %v8138_v12, %s6164_s9 }
 0x669   : > { %3050 = vst.msk [vmem:[#allocation14 + $0x92] sm:$0xff] %vm3039_vm12, %v3015_v62  ;;  %3051 = vst.msk [vmem:[#allocation14 + $0x9a] sm:$0xff] %vm3039_vm12, %v3015_v62 }
 0x66a   : > { %3113 = vst.msk [vmem:[#allocation15] sm:$0x3f] %vm3011_vm5, %v6165_v21  ;;  %3114 = vst.msk [vmem:[#allocation15 + $0x1c] sm:$0x3f] %vm3011_vm5, %v6165_v21 }
 0x66b   : > { %3115 = vst.msk [vmem:[#allocation15 + $0x38] sm:$0x3f] %vm3011_vm5, %v6165_v21  ;;  %3116 = vst.msk [vmem:[#allocation15 + $0x54] sm:$0x3f] %vm3011_vm5, %v6165_v21 }
 0x66c   : > { %3117 = vst.msk [vmem:[#allocation15 + $0x70] sm:$0x3f] %vm3011_vm5, %v6165_v21  ;;  %3118 = vst.msk [vmem:[#allocation15 + $0x8c] sm:$0x3f] %vm3011_vm5, %v6165_v21  ;;  %3099 = vrot.lane.b32.xlu1 %v8144_v53, %s6164_s9  ;;  %3097 = vrot.lane.b32.xlu0 %v8142_v24, %s6164_s9 }
 0x66d   : > { %3119 = vst.msk [vmem:[#allocation15 + $0x16] sm:$0x3f] %vm3011_vm5, %v6165_v21  ;;  %3120 = vst.msk [vmem:[#allocation15 + $0x32] sm:$0x3f] %vm3011_vm5, %v6165_v21 }
 0x66e   : > { %3121 = vst.msk [vmem:[#allocation15 + $0x4e] sm:$0x3f] %vm3011_vm5, %v6165_v21  ;;  %3122 = vst.msk [vmem:[#allocation15 + $0x6a] sm:$0x3f] %vm3011_vm5, %v6165_v21 }
 0x66f   : > { %3123 = vst.msk [vmem:[#allocation15 + $0x86] sm:$0x3f] %vm3011_vm5, %v6165_v21  ;;  %3124 = vst.msk [vmem:[#allocation15 + $0xa2] sm:$0x3f] %vm3011_vm5, %v6165_v21 }
 0x670   : > { %3126 = vst.msk [vmem:[#allocation15 + $0xe] sm:$0xff] %vm3026_vm11, %v6165_v21  ;;  %3125 = vst.msk [vmem:[#allocation15 + $0x6] sm:$0xff] %vm3026_vm11, %v6165_v21  ;;  %3157 = vrot.lane.b32.xlu1 %v2903_v11, %s6164_s9  ;;  %3155 = vrot.lane.b32.xlu0 %v2902_v41, %s6164_s9 }
 0x671   : > { %3127 = vst.msk [vmem:[#allocation15 + $0x22] sm:$0xff] %vm3026_vm11, %v6165_v21  ;;  %3128 = vst.msk [vmem:[#allocation15 + $0x2a] sm:$0xff] %vm3026_vm11, %v6165_v21 }
 0x672   : > { %3129 = vst.msk [vmem:[#allocation15 + $0x3e] sm:$0xff] %vm3026_vm11, %v6165_v21  ;;  %3130 = vst.msk [vmem:[#allocation15 + $0x46] sm:$0xff] %vm3026_vm11, %v6165_v21 }
 0x673   : > { %3131 = vst.msk [vmem:[#allocation15 + $0x5a] sm:$0xff] %vm3026_vm11, %v6165_v21  ;;  %3132 = vst.msk [vmem:[#allocation15 + $0x62] sm:$0xff] %vm3026_vm11, %v6165_v21 }
 0x674   : > { %3133 = vst.msk [vmem:[#allocation15 + $0x76] sm:$0xff] %vm3026_vm11, %v6165_v21  ;;  %3134 = vst.msk [vmem:[#allocation15 + $0x7e] sm:$0xff] %vm3026_vm11, %v6165_v21  ;;  %3161 = vrot.lane.b32.xlu1 %v2905_v15, %s6164_s9  ;;  %3159 = vrot.lane.b32.xlu0 %v2904_v38, %s6164_s9 }
 0x675   : > { %3135 = vst.msk [vmem:[#allocation15 + $0x92] sm:$0xff] %vm3026_vm11, %v6165_v21  ;;  %3136 = vst.msk [vmem:[#allocation15 + $0x9a] sm:$0xff] %vm3026_vm11, %v6165_v21 }
 0x676   : > { %3138 = vst.msk [vmem:[#allocation15 + $0xe] sm:$0xff] %vm3039_vm12, %v6165_v21  ;;  %3137 = vst.msk [vmem:[#allocation15 + $0x6] sm:$0xff] %vm3039_vm12, %v6165_v21 }
 0x677   : > { %3139 = vst.msk [vmem:[#allocation15 + $0x22] sm:$0xff] %vm3039_vm12, %v6165_v21  ;;  %3140 = vst.msk [vmem:[#allocation15 + $0x2a] sm:$0xff] %vm3039_vm12, %v6165_v21 }
 0x678   : > { %3141 = vst.msk [vmem:[#allocation15 + $0x3e] sm:$0xff] %vm3039_vm12, %v6165_v21  ;;  %3142 = vst.msk [vmem:[#allocation15 + $0x46] sm:$0xff] %vm3039_vm12, %v6165_v21  ;;  %3165 = vrot.lane.b32.xlu1 %v2907_v57, %s6164_s9  ;;  %3163 = vrot.lane.b32.xlu0 %v2906_v35, %s6164_s9 }
 0x679   : > { %3143 = vst.msk [vmem:[#allocation15 + $0x5a] sm:$0xff] %vm3039_vm12, %v6165_v21  ;;  %3144 = vst.msk [vmem:[#allocation15 + $0x62] sm:$0xff] %vm3039_vm12, %v6165_v21 }
 0x67a   : > { %3145 = vst.msk [vmem:[#allocation15 + $0x76] sm:$0xff] %vm3039_vm12, %v6165_v21  ;;  %3146 = vst.msk [vmem:[#allocation15 + $0x7e] sm:$0xff] %vm3039_vm12, %v6165_v21 }
 0x67b   : > { %3147 = vst.msk [vmem:[#allocation15 + $0x92] sm:$0xff] %vm3039_vm12, %v6165_v21  ;;  %3148 = vst.msk [vmem:[#allocation15 + $0x9a] sm:$0xff] %vm3039_vm12, %v6165_v21 }
 0x67c   : > { %3187 = vrot.lane.b32.xlu1 %v2921_v63, %s6164_s9  ;;  %3185 = vrot.lane.b32.xlu0 %v2920_v0, %s6164_s9 }
 0x680   : > { %3191 = vrot.lane.b32.xlu1 %v2923_v19, %s6164_s9  ;;  %3189 = vrot.lane.b32.xlu0 %v2922_v3, %s6164_s9 }
 0x684   : > { %3195 = vrot.lane.b32.xlu1 %v2925_v30, %s6164_s9  ;;  %3193 = vrot.lane.b32.xlu0 %v2924_v45, %s6164_s9 }
 0x6ca   : > { %v3063_v28 = vpop.permute.xlu1 %3062  ;;  %v3059_v48 = vpop.permute.xlu0 %3058 }
 0x6cb   : > { %3079 = vst.msk [vmem:[#allocation14 + $0x22] sm:$0xff] %vm3076_vm13, %v3063_v28  ;;  %3077 = vst.msk [vmem:[#allocation14 + $0x6] sm:$0xff] %vm3076_vm13, %v3059_v48 }
 0x6ce   : > { %v3065_v1 = vpop.permute.xlu1 %3064  ;;  %v3061_v41 = vpop.permute.xlu0 %3060 }
 0x6cf   : > { %3080 = vst.msk [vmem:[#allocation14 + $0x2a] sm:$0xff] %vm3076_vm13, %v3065_v1  ;;  %3078 = vst.msk [vmem:[#allocation14 + $0xe] sm:$0xff] %vm3076_vm13, %v3061_v41 }
 0x6d2   : > { %v3069_v6 = vpop.permute.xlu1 %3068  ;;  %v3067_v11 = vpop.permute.xlu0 %3066 }
 0x6d3   : > { %3082 = vst.msk [vmem:[#allocation14 + $0x46] sm:$0xff] %vm3076_vm13, %v3069_v6  ;;  %3081 = vst.msk [vmem:[#allocation14 + $0x3e] sm:$0xff] %vm3076_vm13, %v3067_v11 }
 0x6d6   : > { %v3092_v7 = vpop.permute.xlu1 %3091  ;;  %v3090_v38 = vpop.permute.xlu0 %3089 }
 0x6d7   : > { %3108 = vst.msk [vmem:[#allocation14 + $0x62] sm:$0xff] %vm3076_vm13, %v3092_v7  ;;  %3107 = vst.msk [vmem:[#allocation14 + $0x5a] sm:$0xff] %vm3076_vm13, %v3090_v38 }
 0x6da   : > { %v3096_v59 = vpop.permute.xlu1 %3095  ;;  %v3094_v15 = vpop.permute.xlu0 %3093 }
 0x6db   : > { %3110 = vst.msk [vmem:[#allocation14 + $0x7e] sm:$0xff] %vm3076_vm13, %v3096_v59  ;;  %3109 = vst.msk [vmem:[#allocation14 + $0x76] sm:$0xff] %vm3076_vm13, %v3094_v15 }
 0x6de   : > { %v3100_v35 = vpop.permute.xlu1 %3099  ;;  %v3098_v8 = vpop.permute.xlu0 %3097 }
 0x6df   : > { %3112 = vst.msk [vmem:[#allocation14 + $0x9a] sm:$0xff] %vm3076_vm13, %v3100_v35  ;;  %3111 = vst.msk [vmem:[#allocation14 + $0x92] sm:$0xff] %vm3076_vm13, %v3098_v8 }
 0x6e2   : > { %v3158_v57 = vpop.permute.xlu1 %3157  ;;  %v3156_v5 = vpop.permute.xlu0 %3155 }
 0x6e3   : > { %3174 = vst.msk [vmem:[#allocation15 + $0xe] sm:$0xff] %vm3076_vm13, %v3158_v57  ;;  %3173 = vst.msk [vmem:[#allocation15 + $0x6] sm:$0xff] %vm3076_vm13, %v3156_v5 }
 0x6e6   : > { %v3162_v25 = vpop.permute.xlu1 %3161  ;;  %v3160_v0 = vpop.permute.xlu0 %3159 }
 0x6e7   : > { %3176 = vst.msk [vmem:[#allocation15 + $0x2a] sm:$0xff] %vm3076_vm13, %v3162_v25  ;;  %3175 = vst.msk [vmem:[#allocation15 + $0x22] sm:$0xff] %vm3076_vm13, %v3160_v0 }
 0x6ea   : > { %v3166_v18 = vpop.permute.xlu1 %3165  ;;  %v3164_v63 = vpop.permute.xlu0 %3163 }
 0x6eb   : > { %3178 = vst.msk [vmem:[#allocation15 + $0x46] sm:$0xff] %vm3076_vm13, %v3166_v18  ;;  %3177 = vst.msk [vmem:[#allocation15 + $0x3e] sm:$0xff] %vm3076_vm13, %v3164_v63 }
 0x6ee   : > { %v3188_v56 = vpop.permute.xlu1 %3187  ;;  %v3186_v3 = vpop.permute.xlu0 %3185 }
 0x6ef   : > { %3205 = vst.msk [vmem:[#allocation15 + $0x62] sm:$0xff] %vm3076_vm13, %v3188_v56  ;;  %3204 = vst.msk [vmem:[#allocation15 + $0x5a] sm:$0xff] %vm3076_vm13, %v3186_v3 }
 0x6f2   : > { %v3192_v34 = vpop.permute.xlu1 %3191  ;;  %v3190_v19 = vpop.permute.xlu0 %3189 }
 0x6f3   : > { %3207 = vst.msk [vmem:[#allocation15 + $0x7e] sm:$0xff] %vm3076_vm13, %v3192_v34  ;;  %3206 = vst.msk [vmem:[#allocation15 + $0x76] sm:$0xff] %vm3076_vm13, %v3190_v19 }
 0x6f6   : > { %v3196_v45 = vpop.permute.xlu1 %3195  ;;  %v3194_v30 = vpop.permute.xlu0 %3193 }
 0x6f7   : > { %3209 = vst.msk [vmem:[#allocation15 + $0x9a] sm:$0xff] %vm3076_vm13, %v3196_v45  ;;  %3208 = vst.msk [vmem:[#allocation15 + $0x92] sm:$0xff] %vm3076_vm13, %v3194_v30 }
 0x6f8 LB: >> { %v10879_v13 = vld [vmem:[#allocation71_spill] sm:$0xff]  ;;  %v10880_v24 = vld [vmem:[#allocation74_spill] sm:$0xff]  ;;  %v10881_v53 = vld [vmem:[#allocation77_spill] sm:$0xff]  ;;  %10882 = vst [vmem:[#allocation83_spill] sm:$0xff] %v6067_v51  ;;  %s8398_s29 = scalar_lea.vmem [#allocation14], %s6139_s11  ;;  %s6166_s12 = smov 127   ;;  %v6075_v33 = vphi %v8306_v33, %v11302_v33   ;;  %v6071_v14 = vphi %v8304_v14, %v11301_v14   ;;  %v6067_v51 = vphi %v8302_v51, %v11300_v51   ;;  %s6139_s11 = sphi %s8338_s11, %s3215_s11   ;;  %v6135_v26 = vphi %v8336_v26, %v11317_v26   ;;  %v6131_v39 = vphi %v8334_v39, %v11316_v39   ;;  %v6127_v50 = vphi %v8332_v50, %v11315_v50   ;;  %v6123_v10 = vphi %v8330_v10, %v11314_v10   ;;  %v6119_v36 = vphi %v8328_v36, %v11313_v36   ;;  %v6115_v58 = vphi %v8326_v58, %v11312_v58   ;;  %v6111_v2 = vphi %v8324_v2, %v11311_v2   ;;  %v6107_v27 = vphi %v8322_v27, %v11310_v27   ;;  %v6103_v22 = vphi %v8320_v22, %v11309_v22   ;;  %v6099_v44 = vphi %v8318_v44, %v11308_v44   ;;  %v6095_v46 = vphi %v8316_v46, %v11307_v46   ;;  %v6091_v54 = vphi %v8314_v54, %v11306_v54   ;;  %v6087_v55 = vphi %v8312_v55, %v11305_v55   ;;  %v6083_v61 = vphi %v8310_v61, %v11304_v61   ;;  %v6079_v4 = vphi %v8308_v4, %v11303_v4  }
 0x6f9   : >> { %10883 = vst [vmem:[#allocation84_spill] sm:$0xff] %v6071_v14  ;;  %10884 = vst [vmem:[#allocation85_spill] sm:$0xff] %v6079_v4  ;;  %v8401_v20 = vld [vmem:[%s8398_s29 + $0x70] sm:$0xff]  ;;  %v8411_v37 = vld [vmem:[%s8398_s29 + $0x78] sm:$0xff]  ;;  %s8461_s8 = scalar_lea.vmem [#allocation15], %s6139_s11  ;;  %s6167_s20 = smov 126  }
 0x6fa   : >> { %v8404_v52 = vld [vmem:[%s8398_s29 + $0x54] sm:$0xff]  ;;  %3318 = vrot.lane.b32.xlu1 %v8401_v20, %s6166_s12  ;;  %v8414_v17 = vld [vmem:[%s8398_s29 + $0x5c] sm:$0xff]  ;;  %v8424_v49 = vld [vmem:[%s8398_s29 + $0x8c] sm:$0xff]  ;;  %s6168_s5 = smov 125   ;;  %s6169_s28 = smov 124  }
 0x6fb   : >> { %3314 = vrot.lane.b32.xlu0 %v8404_v52, %s6166_s12  ;;  %v8421_v60 = vld [vmem:[%s8398_s29 + $0x94] sm:$0xff]  ;;  %v8431_v43 = vld [vmem:[%s8398_s29 + $0x8] sm:$0xff]  ;;  %v8434_v31 = vld [vmem:[%s8398_s29] sm:$0xff]  ;;  %s6170_s13 = smov 123   ;;  %s6171_s10 = smov 122  }
 0x6fc   : >> { %v8441_v62 = vld [vmem:[%s8398_s29 + $0x24] sm:$0xff]  ;;  %v8444_v21 = vld [vmem:[%s8398_s29 + $0x1c] sm:$0xff]  ;;  %s6172_s23 = smov 121   ;;  %s6173_s30 = smov 120  }
 0x6fd   : >> { %v8451_v28 = vld [vmem:[%s8398_s29 + $0x40] sm:$0xff]  ;;  %v8454_v48 = vld [vmem:[%s8398_s29 + $0x38] sm:$0xff]  ;;  %s6174_s6 = smov 119   ;;  %v11026_v16 = vld [vmem:[#allocation70_spill] sm:$0xff]  ;;  %s6175_s22 = smov 118  }
 0x6fe   : >> { %3320 = vrot.lane.b32.xlu1 %v8411_v37, %s6166_s12  ;;  %v8464_v1 = vld [vmem:[%s8461_s8 + $0x8] sm:$0xff]  ;;  %v8467_v41 = vld [vmem:[%s8461_s8] sm:$0xff]  ;;  %v8487_v38 = vld [vmem:[%s8461_s8 + $0x38] sm:$0xff]  ;;  %s6176_s7 = smov 117   ;;  %s3215_s11 = sadd.s32 1, %s6139_s11  }
 0x6ff   : >> { %3316 = vrot.lane.b32.xlu0 %v8414_v17, %s6166_s12  ;;  %v8474_v6 = vld [vmem:[%s8461_s8 + $0x24] sm:$0xff]  ;;  %v8477_v11 = vld [vmem:[%s8461_s8 + $0x1c] sm:$0xff]  ;;  %v8497_v15 = vld [vmem:[%s8461_s8 + $0x54] sm:$0xff]  ;;  %p10338_p13 = scmp.ge.s32.totalorder %s3215_s11, 12  }
 0x700   : >> { %v8484_v7 = vld [vmem:[%s8461_s8 + $0x40] sm:$0xff]  ;;  %v8504_v35 = vld [vmem:[%s8461_s8 + $0x78] sm:$0xff]  ;;  %v8507_v8 = vld [vmem:[%s8461_s8 + $0x70] sm:$0xff]  ;;  %vm11332_vm7 = vcmask (%p10338_p13), 130048   ;;  %p11359_p8 = scmp.ne.s32.totalorder (%p10338_p13), %s10693_s26, 0 }
 0x701   : >> { %v8494_v59 = vld [vmem:[%s8461_s8 + $0x5c] sm:$0xff]  ;;  %v8514_v57 = vld [vmem:[%s8461_s8 + $0x94] sm:$0xff]  ;;  %v8517_v5 = vld [vmem:[%s8461_s8 + $0x8c] sm:$0xff] }
 0x702   : >> { %3324 = vrot.lane.b32.xlu1 %v8421_v60, %s6166_s12  ;;  %v11027_v9 = vld [vmem:[#allocation73_spill] sm:$0xff]  ;;  %vm11333_vm9 = vmmov (%p10338_p13), %vm11332_vm7 }
 0x703   : >> { %3322 = vrot.lane.b32.xlu0 %v8424_v49, %s6166_s12  ;;  %vm11334_vm2 = vmmov (%p10338_p13), %vm11332_vm7 }
 0x704   : > { %vm11335_vm15 = vmmov (%p10338_p13), %vm11334_vm2 }
 0x705   : > { %vm11336_vm14 = vmmov (%p10338_p13), %vm11334_vm2 }
 0x706   : >> { %3346 = vrot.lane.b32.xlu1 %v8431_v43, %s6166_s12  ;;  %vm11337_vm4 = vmmov (%p10338_p13), %vm11334_vm2 }
 0x707   : >> { %3344 = vrot.lane.b32.xlu0 %v8434_v31, %s6166_s12  ;;  %vm11338_vm3 = vmmov (%p10338_p13), %vm11334_vm2 }
 0x708   : > { %vm11339_vm10 = vmmov (%p10338_p13), %vm11334_vm2 }
 0x709   : > { %vm11340_vm5 = vmmov (%p10338_p13), %vm11334_vm2 }
 0x70a   : >> { %3350 = vrot.lane.b32.xlu1 %v8441_v62, %s6166_s12  ;;  %vm11341_vm11 = vmmov (%p10338_p13), %vm11334_vm2 }
 0x70b   : >> { %3348 = vrot.lane.b32.xlu0 %v8444_v21, %s6166_s12  ;;  %vm11347_vm12 = vmmov (%p10338_p13), %vm11334_vm2 }
 0x70c   : > { %vm11348_vm13 = vmmov (%p10338_p13), %vm11334_vm2 }
 0x70e   : >> { %3354 = vrot.lane.b32.xlu1 %v8451_v28, %s6166_s12 }
 0x70f   : >> { %3352 = vrot.lane.b32.xlu0 %v8454_v48, %s6166_s12 }
 0x712   : >> { %3388 = vrot.lane.b32.xlu1 %v8464_v1, %s6166_s12 }
 0x713   : >> { %3386 = vrot.lane.b32.xlu0 %v8467_v41, %s6166_s12 }
 0x716   : >> { %3392 = vrot.lane.b32.xlu1 %v8474_v6, %s6166_s12 }
 0x717   : >> { %3390 = vrot.lane.b32.xlu0 %v8477_v11, %s6166_s12 }
 0x71a   : >> { %3396 = vrot.lane.b32.xlu1 %v8484_v7, %s6166_s12 }
 0x71b   : >> { %3394 = vrot.lane.b32.xlu0 %v8487_v38, %s6166_s12 }
 0x71e   : >> { %3424 = vrot.lane.b32.xlu1 %v8494_v59, %s6166_s12 }
 0x71f   : >> { %3422 = vrot.lane.b32.xlu0 %v8497_v15, %s6166_s12 }
 0x722   : >> { %3428 = vrot.lane.b32.xlu1 %v8504_v35, %s6166_s12 }
 0x723   : >> { %3426 = vrot.lane.b32.xlu0 %v8507_v8, %s6166_s12 }
 0x726   : >> { %3432 = vrot.lane.b32.xlu1 %v8514_v57, %s6166_s12 }
 0x727   : >> { %3430 = vrot.lane.b32.xlu0 %v8517_v5, %s6166_s12 }
 0x72a   : >> { %3454 = vrot.lane.b32.xlu1 %v8414_v17, %s6167_s20 }
 0x72b   : >> { %3452 = vrot.lane.b32.xlu0 %v8404_v52, %s6167_s20 }
 0x72e   : >> { %3458 = vrot.lane.b32.xlu1 %v8411_v37, %s6167_s20 }
 0x72f   : >> { %3456 = vrot.lane.b32.xlu0 %v8401_v20, %s6167_s20 }
 0x732   : >> { %3462 = vrot.lane.b32.xlu1 %v8421_v60, %s6167_s20 }
 0x733   : >> { %3460 = vrot.lane.b32.xlu0 %v8424_v49, %s6167_s20 }
 0x736   : >> { %3478 = vrot.lane.b32.xlu1 %v8431_v43, %s6167_s20 }
 0x737   : >> { %3476 = vrot.lane.b32.xlu0 %v8434_v31, %s6167_s20 }
 0x73a   : >> { %3482 = vrot.lane.b32.xlu1 %v8441_v62, %s6167_s20 }
 0x73b   : >> { %3480 = vrot.lane.b32.xlu0 %v8444_v21, %s6167_s20 }
 0x73e   : >> { %3486 = vrot.lane.b32.xlu1 %v8451_v28, %s6167_s20 }
 0x73f   : >> { %3484 = vrot.lane.b32.xlu0 %v8454_v48, %s6167_s20 }
 0x742   : >> { %3514 = vrot.lane.b32.xlu1 %v8464_v1, %s6167_s20 }
 0x743   : >> { %3512 = vrot.lane.b32.xlu0 %v8467_v41, %s6167_s20 }
 0x746   : >> { %3518 = vrot.lane.b32.xlu1 %v8474_v6, %s6167_s20 }
 0x747   : >> { %3516 = vrot.lane.b32.xlu0 %v8477_v11, %s6167_s20 }
 0x74a   : >> { %3522 = vrot.lane.b32.xlu1 %v8484_v7, %s6167_s20 }
 0x74b   : >> { %3520 = vrot.lane.b32.xlu0 %v8487_v38, %s6167_s20 }
 0x74e   : >> { %3544 = vrot.lane.b32.xlu1 %v8494_v59, %s6167_s20 }
 0x74f   : >> { %3542 = vrot.lane.b32.xlu0 %v8497_v15, %s6167_s20 }
 0x752   : >> { %3548 = vrot.lane.b32.xlu1 %v8504_v35, %s6167_s20 }
 0x753   : >> { %3546 = vrot.lane.b32.xlu0 %v8507_v8, %s6167_s20 }
 0x756   : >> { %3552 = vrot.lane.b32.xlu1 %v8514_v57, %s6167_s20 }
 0x757   : >> { %3550 = vrot.lane.b32.xlu0 %v8517_v5, %s6167_s20 }
 0x75a   : >> { %3574 = vrot.lane.b32.xlu1 %v8414_v17, %s6168_s5 }
 0x75b   : >> { %3572 = vrot.lane.b32.xlu0 %v8404_v52, %s6168_s5 }
 0x75e   : >> { %3578 = vrot.lane.b32.xlu1 %v8411_v37, %s6168_s5 }
 0x75f   : >> { %3576 = vrot.lane.b32.xlu0 %v8401_v20, %s6168_s5 }
 0x762   : >> { %3582 = vrot.lane.b32.xlu1 %v8421_v60, %s6168_s5 }
 0x763   : >> { %3580 = vrot.lane.b32.xlu0 %v8424_v49, %s6168_s5 }
 0x766   : >> { %3598 = vrot.lane.b32.xlu1 %v8431_v43, %s6168_s5 }
 0x767   : >> { %3596 = vrot.lane.b32.xlu0 %v8434_v31, %s6168_s5 }
 0x76a   : >> { %3602 = vrot.lane.b32.xlu1 %v8441_v62, %s6168_s5 }
 0x76b   : >> { %3600 = vrot.lane.b32.xlu0 %v8444_v21, %s6168_s5 }
 0x76c   : >> { %v8567_v25 = vpop.permute.xlu1 %3318 }
 0x76d   : >> { %10885 = vst [vmem:[#allocation86_spill] sm:$0xff] %v8567_v25  ;;  %v8569_v0 = vpop.permute.xlu0 %3314 }
 0x76e   : >> { %10886 = vst [vmem:[#allocation87_spill] sm:$0xff] %v8569_v0  ;;  %3606 = vrot.lane.b32.xlu1 %v8451_v28, %s6168_s5  ;;  %v3266_v0 = vmul.f32 %v8134_v23, %v8434_v31 }
 0x76f   : >> { %3604 = vrot.lane.b32.xlu0 %v8454_v48, %s6168_s5 }
 0x770   : >> { %v8575_v18 = vpop.permute.xlu1 %3320 }
 0x771   : >> { %10887 = vst [vmem:[#allocation88_spill] sm:$0xff] %v8575_v18  ;;  %v8577_v63 = vpop.permute.xlu0 %3316 }
 0x772   : >> { %10888 = vst [vmem:[#allocation89_spill] sm:$0xff] %v8577_v63  ;;  %3634 = vrot.lane.b32.xlu1 %v8464_v1, %s6168_s5 }
 0x773   : >> { %3632 = vrot.lane.b32.xlu0 %v8467_v41, %s6168_s5 }
 0x774   : >> { %v8583_v56 = vpop.permute.xlu1 %3324 }
 0x775   : >> { %10889 = vst [vmem:[#allocation90_spill] sm:$0xff] %v8583_v56  ;;  %v8585_v3 = vpop.permute.xlu0 %3322 }
 0x776   : >> { %10890 = vst [vmem:[#allocation91_spill] sm:$0xff] %v8585_v3  ;;  %3638 = vrot.lane.b32.xlu1 %v8474_v6, %s6168_s5 }
 0x777   : >> { %3636 = vrot.lane.b32.xlu0 %v8477_v11, %s6168_s5 }
 0x778   : >> { %v8591_v34 = vpop.permute.xlu1 %3346 }
 0x779   : >> { %v8593_v19 = vpop.permute.xlu0 %3344 }
 0x77a   : >> { %3642 = vrot.lane.b32.xlu1 %v8484_v7, %s6168_s5 }
 0x77b   : >> { %3640 = vrot.lane.b32.xlu0 %v8487_v38, %s6168_s5 }
 0x77c   : >> { %v8599_v45 = vpop.permute.xlu1 %3350 }
 0x77d   : >> { %v8601_v30 = vpop.permute.xlu0 %3348 }
 0x77e   : >> { %3664 = vrot.lane.b32.xlu1 %v8494_v59, %s6168_s5 }
 0x77f   : >> { %3662 = vrot.lane.b32.xlu0 %v8497_v15, %s6168_s5 }
 0x780   : >> { %v8607_v14 = vpop.permute.xlu1 %3354 }
 0x781   : >> { %v8609_v51 = vpop.permute.xlu0 %3352 }
 0x782   : >> { %10891 = vst [vmem:[#allocation92_spill] sm:$0xff] %v8609_v51  ;;  %3668 = vrot.lane.b32.xlu1 %v8504_v35, %s6168_s5  ;;  %v3269_v51 = vmul.f32 %v8140_v32, %v8441_v62 }
 0x783   : >> { %3666 = vrot.lane.b32.xlu0 %v8507_v8, %s6168_s5 }
 0x784   : >> { %v8615_v4 = vpop.permute.xlu1 %3388 }
 0x785   : >> { %10892 = vst [vmem:[#allocation93_spill] sm:$0xff] %v8615_v4  ;;  %v8617_v3 = vpop.permute.xlu0 %3386 }
 0x786   : >> { %10893 = vst [vmem:[#allocation94_spill] sm:$0xff] %v8617_v3  ;;  %3672 = vrot.lane.b32.xlu1 %v8514_v57, %s6168_s5 }
 0x787   : >> { %3670 = vrot.lane.b32.xlu0 %v8517_v5, %s6168_s5 }
 0x788   : >> { %v8623_v56 = vpop.permute.xlu1 %3392 }
 0x789   : >> { %10894 = vst [vmem:[#allocation95_spill] sm:$0xff] %v8623_v56  ;;  %v8625_v25 = vpop.permute.xlu0 %3390 }
 0x78a   : >> { %10895 = vst [vmem:[#allocation96_spill] sm:$0xff] %v8625_v25  ;;  %3694 = vrot.lane.b32.xlu1 %v8414_v17, %s6169_s28 }
 0x78b   : >> { %3692 = vrot.lane.b32.xlu0 %v8404_v52, %s6169_s28 }
 0x78c   : >> { %v8631_v4 = vpop.permute.xlu1 %3396 }
 0x78d   : >> { %10896 = vst [vmem:[#allocation97_spill] sm:$0xff] %v8631_v4  ;;  %v8633_v3 = vpop.permute.xlu0 %3394 }
 0x78e   : >> { %10897 = vst [vmem:[#allocation98_spill] sm:$0xff] %v8633_v3  ;;  %3698 = vrot.lane.b32.xlu1 %v8411_v37, %s6169_s28 }
 0x78f   : >> { %3696 = vrot.lane.b32.xlu0 %v8401_v20, %s6169_s28 }
 0x790   : >> { %v8639_v56 = vpop.permute.xlu1 %3424 }
 0x791   : >> { %10898 = vst [vmem:[#allocation99_spill] sm:$0xff] %v8639_v56  ;;  %v8641_v25 = vpop.permute.xlu0 %3422 }
 0x792   : >> { %10899 = vst [vmem:[#allocation100_spill] sm:$0xff] %v8641_v25  ;;  %3702 = vrot.lane.b32.xlu1 %v8421_v60, %s6169_s28 }
 0x793   : >> { %3700 = vrot.lane.b32.xlu0 %v8424_v49, %s6169_s28 }
 0x794   : >> { %v8647_v63 = vpop.permute.xlu1 %3428 }
 0x795   : >> { %10900 = vst [vmem:[#allocation101_spill] sm:$0xff] %v8647_v63  ;;  %v8649_v4 = vpop.permute.xlu0 %3426 }
 0x796   : >> { %10901 = vst [vmem:[#allocation102_spill] sm:$0xff] %v8649_v4  ;;  %3718 = vrot.lane.b32.xlu1 %v8431_v43, %s6169_s28 }
 0x797   : >> { %3716 = vrot.lane.b32.xlu0 %v8434_v31, %s6169_s28 }
 0x798   : >> { %v8655_v3 = vpop.permute.xlu1 %3432 }
 0x799   : >> { %10902 = vst [vmem:[#allocation103_spill] sm:$0xff] %v8655_v3  ;;  %v8657_v56 = vpop.permute.xlu0 %3430 }
 0x79a   : >> { %10903 = vst [vmem:[#allocation104_spill] sm:$0xff] %v8657_v56  ;;  %3722 = vrot.lane.b32.xlu1 %v8441_v62, %s6169_s28 }
 0x79b   : >> { %3720 = vrot.lane.b32.xlu0 %v8444_v21, %s6169_s28 }
 0x79c   : >> { %v8663_v25 = vpop.permute.xlu1 %3454 }
 0x79d   : >> { %10904 = vst [vmem:[#allocation105_spill] sm:$0xff] %v8663_v25  ;;  %v8665_v63 = vpop.permute.xlu0 %3452 }
 0x79e   : >> { %10905 = vst [vmem:[#allocation106_spill] sm:$0xff] %v8665_v63  ;;  %3726 = vrot.lane.b32.xlu1 %v8451_v28, %s6169_s28 }
 0x79f   : >> { %3724 = vrot.lane.b32.xlu0 %v8454_v48, %s6169_s28 }
 0x7a0   : >> { %v8671_v4 = vpop.permute.xlu1 %3458 }
 0x7a1   : >> { %10906 = vst [vmem:[#allocation107_spill] sm:$0xff] %v8671_v4  ;;  %v8673_v3 = vpop.permute.xlu0 %3456 }
 0x7a2   : >> { %10907 = vst [vmem:[#allocation108_spill] sm:$0xff] %v8673_v3  ;;  %3754 = vrot.lane.b32.xlu1 %v8464_v1, %s6169_s28 }
 0x7a3   : >> { %3752 = vrot.lane.b32.xlu0 %v8467_v41, %s6169_s28 }
 0x7a4   : >> { %v8679_v56 = vpop.permute.xlu1 %3462 }
 0x7a5   : >> { %10908 = vst [vmem:[#allocation109_spill] sm:$0xff] %v8679_v56  ;;  %v8681_v25 = vpop.permute.xlu0 %3460 }
 0x7a6   : >> { %10909 = vst [vmem:[#allocation110_spill] sm:$0xff] %v8681_v25  ;;  %3758 = vrot.lane.b32.xlu1 %v8474_v6, %s6169_s28 }
 0x7a7   : >> { %3756 = vrot.lane.b32.xlu0 %v8477_v11, %s6169_s28 }
 0x7a8   : >> { %v8687_v63 = vpop.permute.xlu1 %3478 }
 0x7a9   : >> { %10910 = vst [vmem:[#allocation111_spill] sm:$0xff] %v8687_v63  ;;  %v8689_v4 = vpop.permute.xlu0 %3476 }
 0x7aa   : >> { %10911 = vst [vmem:[#allocation112_spill] sm:$0xff] %v8689_v4  ;;  %3762 = vrot.lane.b32.xlu1 %v8484_v7, %s6169_s28 }
 0x7ab   : >> { %3760 = vrot.lane.b32.xlu0 %v8487_v38, %s6169_s28 }
 0x7ac   : >> { %v8695_v3 = vpop.permute.xlu1 %3482 }
 0x7ad   : >> { %10912 = vst [vmem:[#allocation113_spill] sm:$0xff] %v8695_v3  ;;  %v8697_v56 = vpop.permute.xlu0 %3480 }
 0x7ae   : >> { %10913 = vst [vmem:[#allocation114_spill] sm:$0xff] %v8697_v56  ;;  %3784 = vrot.lane.b32.xlu1 %v8494_v59, %s6169_s28 }
 0x7af   : >> { %3782 = vrot.lane.b32.xlu0 %v8497_v15, %s6169_s28 }
 0x7b0   : >> { %v8703_v25 = vpop.permute.xlu1 %3486 }
 0x7b1   : >> { %10914 = vst [vmem:[#allocation115_spill] sm:$0xff] %v8703_v25  ;;  %v8705_v63 = vpop.permute.xlu0 %3484 }
 0x7b2   : >> { %10915 = vst [vmem:[#allocation116_spill] sm:$0xff] %v8705_v63  ;;  %3788 = vrot.lane.b32.xlu1 %v8504_v35, %s6169_s28 }
 0x7b3   : >> { %3786 = vrot.lane.b32.xlu0 %v8507_v8, %s6169_s28 }
 0x7b4   : >> { %v8711_v4 = vpop.permute.xlu1 %3514 }
 0x7b5   : >> { %10916 = vst [vmem:[#allocation117_spill] sm:$0xff] %v8711_v4  ;;  %v8713_v3 = vpop.permute.xlu0 %3512 }
 0x7b6   : >> { %10917 = vst [vmem:[#allocation118_spill] sm:$0xff] %v8713_v3  ;;  %3792 = vrot.lane.b32.xlu1 %v8514_v57, %s6169_s28 }
 0x7b7   : >> { %3790 = vrot.lane.b32.xlu0 %v8517_v5, %s6169_s28  ;;  %s5195_s28 = sshll.u32 (%p10338_p13), %s6225_s19, 4  ;;  %s4918_s19 = scalar_lea.sflag (%p10338_p13), [#allocation4], %s6437_s14 }
 0x7b8   : >> { %v8719_v56 = vpop.permute.xlu1 %3518 }
 0x7b9   : >> { %10918 = vst [vmem:[#allocation119_spill] sm:$0xff] %v8719_v56  ;;  %v8721_v25 = vpop.permute.xlu0 %3516 }
 0x7ba   : >> { %10919 = vst [vmem:[#allocation120_spill] sm:$0xff] %v8721_v25  ;;  %3814 = vrot.lane.b32.xlu1 %v8414_v17, %s6170_s13 }
 0x7bb   : >> { %3812 = vrot.lane.b32.xlu0 %v8404_v52, %s6170_s13 }
 0x7bc   : >> { %v8727_v4 = vpop.permute.xlu1 %3522 }
 0x7bd   : >> { %10920 = vst [vmem:[#allocation121_spill] sm:$0xff] %v8727_v4  ;;  %v8729_v3 = vpop.permute.xlu0 %3520 }
 0x7be   : >> { %10921 = vst [vmem:[#allocation122_spill] sm:$0xff] %v8729_v3  ;;  %3818 = vrot.lane.b32.xlu1 %v8411_v37, %s6170_s13 }
 0x7bf   : >> { %3816 = vrot.lane.b32.xlu0 %v8401_v20, %s6170_s13 }
 0x7c0   : >> { %v8735_v56 = vpop.permute.xlu1 %3544 }
 0x7c1   : >> { %10922 = vst [vmem:[#allocation123_spill] sm:$0xff] %v8735_v56  ;;  %v8737_v25 = vpop.permute.xlu0 %3542 }
 0x7c2   : >> { %10923 = vst [vmem:[#allocation124_spill] sm:$0xff] %v8737_v25  ;;  %3822 = vrot.lane.b32.xlu1 %v8421_v60, %s6170_s13 }
 0x7c3   : >> { %3820 = vrot.lane.b32.xlu0 %v8424_v49, %s6170_s13 }
 0x7c4   : >> { %v8743_v63 = vpop.permute.xlu1 %3548 }
 0x7c5   : >> { %10924 = vst [vmem:[#allocation125_spill] sm:$0xff] %v8743_v63  ;;  %v8745_v4 = vpop.permute.xlu0 %3546 }
 0x7c6   : >> { %10925 = vst [vmem:[#allocation126_spill] sm:$0xff] %v8745_v4  ;;  %3838 = vrot.lane.b32.xlu1 %v8431_v43, %s6170_s13 }
 0x7c7   : >> { %3836 = vrot.lane.b32.xlu0 %v8434_v31, %s6170_s13 }
 0x7c8   : >> { %v8751_v3 = vpop.permute.xlu1 %3552 }
 0x7c9   : >> { %10926 = vst [vmem:[#allocation127_spill] sm:$0xff] %v8751_v3  ;;  %v8753_v56 = vpop.permute.xlu0 %3550 }
 0x7ca   : >> { %10927 = vst [vmem:[#allocation128_spill] sm:$0xff] %v8753_v56  ;;  %3842 = vrot.lane.b32.xlu1 %v8441_v62, %s6170_s13 }
 0x7cb   : >> { %3840 = vrot.lane.b32.xlu0 %v8444_v21, %s6170_s13 }
 0x7cc   : >> { %v8759_v25 = vpop.permute.xlu1 %3574 }
 0x7cd   : >> { %10928 = vst [vmem:[#allocation129_spill] sm:$0xff] %v8759_v25  ;;  %v8761_v63 = vpop.permute.xlu0 %3572 }
 0x7ce   : >> { %10929 = vst [vmem:[#allocation130_spill] sm:$0xff] %v8761_v63  ;;  %3846 = vrot.lane.b32.xlu1 %v8451_v28, %s6170_s13 }
 0x7cf   : >> { %3844 = vrot.lane.b32.xlu0 %v8454_v48, %s6170_s13 }
 0x7d0   : >> { %v8767_v4 = vpop.permute.xlu1 %3578 }
 0x7d1   : >> { %10930 = vst [vmem:[#allocation131_spill] sm:$0xff] %v8767_v4  ;;  %v8769_v3 = vpop.permute.xlu0 %3576 }
 0x7d2   : >> { %10931 = vst [vmem:[#allocation132_spill] sm:$0xff] %v8769_v3  ;;  %3874 = vrot.lane.b32.xlu1 %v8464_v1, %s6170_s13 }
 0x7d3   : >> { %3872 = vrot.lane.b32.xlu0 %v8467_v41, %s6170_s13 }
 0x7d4   : >> { %v8775_v56 = vpop.permute.xlu1 %3582 }
 0x7d5   : >> { %10932 = vst [vmem:[#allocation133_spill] sm:$0xff] %v8775_v56  ;;  %v8777_v25 = vpop.permute.xlu0 %3580 }
 0x7d6   : >> { %10933 = vst [vmem:[#allocation134_spill] sm:$0xff] %v8777_v25  ;;  %3878 = vrot.lane.b32.xlu1 %v8474_v6, %s6170_s13 }
 0x7d7   : >> { %3876 = vrot.lane.b32.xlu0 %v8477_v11, %s6170_s13 }
 0x7d8   : >> { %v8783_v63 = vpop.permute.xlu1 %3598 }
 0x7d9   : >> { %10934 = vst [vmem:[#allocation135_spill] sm:$0xff] %v8783_v63  ;;  %v8785_v4 = vpop.permute.xlu0 %3596 }
 0x7da   : >> { %10935 = vst [vmem:[#allocation136_spill] sm:$0xff] %v8785_v4  ;;  %3882 = vrot.lane.b32.xlu1 %v8484_v7, %s6170_s13 }
 0x7db   : >> { %3880 = vrot.lane.b32.xlu0 %v8487_v38, %s6170_s13 }
 0x7dc   : >> { %v8791_v3 = vpop.permute.xlu1 %3602 }
 0x7dd   : >> { %10936 = vst [vmem:[#allocation137_spill] sm:$0xff] %v8791_v3  ;;  %v8793_v56 = vpop.permute.xlu0 %3600 }
 0x7de   : >> { %10937 = vst [vmem:[#allocation138_spill] sm:$0xff] %v8793_v56  ;;  %3904 = vrot.lane.b32.xlu1 %v8494_v59, %s6170_s13 }
 0x7df   : >> { %3902 = vrot.lane.b32.xlu0 %v8497_v15, %s6170_s13 }
 0x7e0   : >> { %v8799_v25 = vpop.permute.xlu1 %3606 }
 0x7e1   : >> { %10938 = vst [vmem:[#allocation139_spill] sm:$0xff] %v8799_v25  ;;  %v8801_v63 = vpop.permute.xlu0 %3604 }
 0x7e2   : >> { %10939 = vst [vmem:[#allocation140_spill] sm:$0xff] %v8801_v63  ;;  %3908 = vrot.lane.b32.xlu1 %v8504_v35, %s6170_s13 }
 0x7e3   : >> { %3906 = vrot.lane.b32.xlu0 %v8507_v8, %s6170_s13 }
 0x7e4   : >> { %v8807_v4 = vpop.permute.xlu1 %3634 }
 0x7e5   : >> { %10940 = vst [vmem:[#allocation141_spill] sm:$0xff] %v8807_v4  ;;  %v8809_v3 = vpop.permute.xlu0 %3632 }
 0x7e6   : >> { %10941 = vst [vmem:[#allocation142_spill] sm:$0xff] %v8809_v3  ;;  %3912 = vrot.lane.b32.xlu1 %v8514_v57, %s6170_s13 }
 0x7e7   : >> { %3910 = vrot.lane.b32.xlu0 %v8517_v5, %s6170_s13  ;;  %s4930_s13 = sshll.u32 (%p10338_p13), %s331_s25, 4  ;;  %s10532_s13 = int_to_ptr.vmem [resolvable:$true] %s4930_s13 }
 0x7e8   : >> { %v8815_v56 = vpop.permute.xlu1 %3638 }
 0x7e9   : >> { %10942 = vst [vmem:[#allocation143_spill] sm:$0xff] %v8815_v56  ;;  %v8817_v25 = vpop.permute.xlu0 %3636 }
 0x7ea   : >> { %10943 = vst [vmem:[#allocation144_spill] sm:$0xff] %v8817_v25  ;;  %3934 = vrot.lane.b32.xlu1 %v8414_v17, %s6171_s10 }
 0x7eb   : >> { %3932 = vrot.lane.b32.xlu0 %v8404_v52, %s6171_s10 }
 0x7ec   : >> { %v8823_v4 = vpop.permute.xlu1 %3642 }
 0x7ed   : >> { %10944 = vst [vmem:[#allocation145_spill] sm:$0xff] %v8823_v4  ;;  %v8825_v3 = vpop.permute.xlu0 %3640 }
 0x7ee   : >> { %10945 = vst [vmem:[#allocation146_spill] sm:$0xff] %v8825_v3  ;;  %3938 = vrot.lane.b32.xlu1 %v8411_v37, %s6171_s10 }
 0x7ef   : >> { %3936 = vrot.lane.b32.xlu0 %v8401_v20, %s6171_s10 }
 0x7f0   : >> { %v8831_v56 = vpop.permute.xlu1 %3664 }
 0x7f1   : >> { %10946 = vst [vmem:[#allocation147_spill] sm:$0xff] %v8831_v56  ;;  %v8833_v25 = vpop.permute.xlu0 %3662 }
 0x7f2   : >> { %10947 = vst [vmem:[#allocation148_spill] sm:$0xff] %v8833_v25  ;;  %3942 = vrot.lane.b32.xlu1 %v8421_v60, %s6171_s10 }
 0x7f3   : >> { %3940 = vrot.lane.b32.xlu0 %v8424_v49, %s6171_s10 }
 0x7f4   : >> { %v8839_v63 = vpop.permute.xlu1 %3668 }
 0x7f5   : >> { %10948 = vst [vmem:[#allocation149_spill] sm:$0xff] %v8839_v63  ;;  %v8841_v4 = vpop.permute.xlu0 %3666 }
 0x7f6   : >> { %10949 = vst [vmem:[#allocation150_spill] sm:$0xff] %v8841_v4  ;;  %3958 = vrot.lane.b32.xlu1 %v8431_v43, %s6171_s10 }
 0x7f7   : >> { %3956 = vrot.lane.b32.xlu0 %v8434_v31, %s6171_s10 }
 0x7f8   : >> { %v8847_v3 = vpop.permute.xlu1 %3672 }
 0x7f9   : >> { %10950 = vst [vmem:[#allocation151_spill] sm:$0xff] %v8847_v3  ;;  %v8849_v56 = vpop.permute.xlu0 %3670 }
 0x7fa   : >> { %10951 = vst [vmem:[#allocation152_spill] sm:$0xff] %v8849_v56  ;;  %3962 = vrot.lane.b32.xlu1 %v8441_v62, %s6171_s10 }
 0x7fb   : >> { %3960 = vrot.lane.b32.xlu0 %v8444_v21, %s6171_s10 }
 0x7fc   : >> { %v8855_v25 = vpop.permute.xlu1 %3694 }
 0x7fd   : >> { %10952 = vst [vmem:[#allocation153_spill] sm:$0xff] %v8855_v25  ;;  %v8857_v63 = vpop.permute.xlu0 %3692 }
 0x7fe   : >> { %10953 = vst [vmem:[#allocation154_spill] sm:$0xff] %v8857_v63  ;;  %3966 = vrot.lane.b32.xlu1 %v8451_v28, %s6171_s10 }
 0x7ff   : >> { %3964 = vrot.lane.b32.xlu0 %v8454_v48, %s6171_s10 }
 0x800   : >> { %v8863_v4 = vpop.permute.xlu1 %3698 }
 0x801   : >> { %10954 = vst [vmem:[#allocation155_spill] sm:$0xff] %v8863_v4  ;;  %v8865_v3 = vpop.permute.xlu0 %3696 }
 0x802   : >> { %10955 = vst [vmem:[#allocation156_spill] sm:$0xff] %v8865_v3  ;;  %3994 = vrot.lane.b32.xlu1 %v8464_v1, %s6171_s10 }
 0x803   : >> { %3992 = vrot.lane.b32.xlu0 %v8467_v41, %s6171_s10 }
 0x804   : >> { %v8871_v56 = vpop.permute.xlu1 %3702 }
 0x805   : >> { %10956 = vst [vmem:[#allocation157_spill] sm:$0xff] %v8871_v56  ;;  %v8873_v25 = vpop.permute.xlu0 %3700 }
 0x806   : >> { %10957 = vst [vmem:[#allocation158_spill] sm:$0xff] %v8873_v25  ;;  %3998 = vrot.lane.b32.xlu1 %v8474_v6, %s6171_s10 }
 0x807   : >> { %3996 = vrot.lane.b32.xlu0 %v8477_v11, %s6171_s10 }
 0x808   : >> { %v8879_v63 = vpop.permute.xlu1 %3718 }
 0x809   : >> { %10958 = vst [vmem:[#allocation159_spill] sm:$0xff] %v8879_v63  ;;  %v8881_v4 = vpop.permute.xlu0 %3716 }
 0x80a   : >> { %10959 = vst [vmem:[#allocation160_spill] sm:$0xff] %v8881_v4  ;;  %4002 = vrot.lane.b32.xlu1 %v8484_v7, %s6171_s10 }
 0x80b   : >> { %4000 = vrot.lane.b32.xlu0 %v8487_v38, %s6171_s10 }
 0x80c   : >> { %v8887_v3 = vpop.permute.xlu1 %3722 }
 0x80d   : >> { %10960 = vst [vmem:[#allocation161_spill] sm:$0xff] %v8887_v3  ;;  %v8889_v56 = vpop.permute.xlu0 %3720 }
 0x80e   : >> { %10961 = vst [vmem:[#allocation162_spill] sm:$0xff] %v8889_v56  ;;  %4024 = vrot.lane.b32.xlu1 %v8494_v59, %s6171_s10 }
 0x80f   : >> { %4022 = vrot.lane.b32.xlu0 %v8497_v15, %s6171_s10 }
 0x810   : >> { %v8895_v25 = vpop.permute.xlu1 %3726 }
 0x811   : >> { %10962 = vst [vmem:[#allocation163_spill] sm:$0xff] %v8895_v25  ;;  %v8897_v63 = vpop.permute.xlu0 %3724 }
 0x812   : >> { %10963 = vst [vmem:[#allocation164_spill] sm:$0xff] %v8897_v63  ;;  %4028 = vrot.lane.b32.xlu1 %v8504_v35, %s6171_s10 }
 0x813   : >> { %4026 = vrot.lane.b32.xlu0 %v8507_v8, %s6171_s10 }
 0x814   : >> { %v8903_v4 = vpop.permute.xlu1 %3754 }
 0x815   : >> { %10964 = vst [vmem:[#allocation165_spill] sm:$0xff] %v8903_v4  ;;  %v8905_v3 = vpop.permute.xlu0 %3752 }
 0x816   : >> { %10965 = vst [vmem:[#allocation166_spill] sm:$0xff] %v8905_v3  ;;  %4032 = vrot.lane.b32.xlu1 %v8514_v57, %s6171_s10 }
 0x817   : >> { %4030 = vrot.lane.b32.xlu0 %v8517_v5, %s6171_s10 }
 0x818   : >> { %v8911_v56 = vpop.permute.xlu1 %3758 }
 0x819   : >> { %10966 = vst [vmem:[#allocation167_spill] sm:$0xff] %v8911_v56  ;;  %v8913_v25 = vpop.permute.xlu0 %3756 }
 0x81a   : >> { %10967 = vst [vmem:[#allocation168_spill] sm:$0xff] %v8913_v25  ;;  %4054 = vrot.lane.b32.xlu1 %v8414_v17, %s6172_s23 }
 0x81b   : >> { %4052 = vrot.lane.b32.xlu0 %v8404_v52, %s6172_s23 }
 0x81c   : >> { %v8919_v4 = vpop.permute.xlu1 %3762 }
 0x81d   : >> { %10968 = vst [vmem:[#allocation169_spill] sm:$0xff] %v8919_v4  ;;  %v8921_v3 = vpop.permute.xlu0 %3760 }
 0x81e   : >> { %10969 = vst [vmem:[#allocation170_spill] sm:$0xff] %v8921_v3  ;;  %4058 = vrot.lane.b32.xlu1 %v8411_v37, %s6172_s23 }
 0x81f   : >> { %4056 = vrot.lane.b32.xlu0 %v8401_v20, %s6172_s23 }
 0x820   : >> { %v8927_v56 = vpop.permute.xlu1 %3784 }
 0x821   : >> { %10970 = vst [vmem:[#allocation171_spill] sm:$0xff] %v8927_v56  ;;  %v8929_v25 = vpop.permute.xlu0 %3782 }
 0x822   : >> { %10971 = vst [vmem:[#allocation172_spill] sm:$0xff] %v8929_v25  ;;  %4062 = vrot.lane.b32.xlu1 %v8421_v60, %s6172_s23 }
 0x823   : >> { %4060 = vrot.lane.b32.xlu0 %v8424_v49, %s6172_s23 }
 0x824   : >> { %v8935_v63 = vpop.permute.xlu1 %3788 }
 0x825   : >> { %10972 = vst [vmem:[#allocation173_spill] sm:$0xff] %v8935_v63  ;;  %v8937_v4 = vpop.permute.xlu0 %3786 }
 0x826   : >> { %10973 = vst [vmem:[#allocation174_spill] sm:$0xff] %v8937_v4  ;;  %4078 = vrot.lane.b32.xlu1 %v8431_v43, %s6172_s23 }
 0x827   : >> { %4076 = vrot.lane.b32.xlu0 %v8434_v31, %s6172_s23 }
 0x828   : >> { %v8943_v3 = vpop.permute.xlu1 %3792 }
 0x829   : >> { %10974 = vst [vmem:[#allocation175_spill] sm:$0xff] %v8943_v3  ;;  %v8945_v56 = vpop.permute.xlu0 %3790 }
 0x82a   : >> { %10975 = vst [vmem:[#allocation176_spill] sm:$0xff] %v8945_v56  ;;  %4082 = vrot.lane.b32.xlu1 %v8441_v62, %s6172_s23 }
 0x82b   : >> { %4080 = vrot.lane.b32.xlu0 %v8444_v21, %s6172_s23 }
 0x82c   : >> { %v8951_v25 = vpop.permute.xlu1 %3814 }
 0x82d   : >> { %10976 = vst [vmem:[#allocation177_spill] sm:$0xff] %v8951_v25  ;;  %v8953_v63 = vpop.permute.xlu0 %3812 }
 0x82e   : >> { %10977 = vst [vmem:[#allocation178_spill] sm:$0xff] %v8953_v63  ;;  %4086 = vrot.lane.b32.xlu1 %v8451_v28, %s6172_s23 }
 0x82f   : >> { %4084 = vrot.lane.b32.xlu0 %v8454_v48, %s6172_s23 }
 0x830   : >> { %v8959_v4 = vpop.permute.xlu1 %3818 }
 0x831   : >> { %10978 = vst [vmem:[#allocation179_spill] sm:$0xff] %v8959_v4  ;;  %v8961_v3 = vpop.permute.xlu0 %3816 }
 0x832   : >> { %10979 = vst [vmem:[#allocation180_spill] sm:$0xff] %v8961_v3  ;;  %4114 = vrot.lane.b32.xlu1 %v8464_v1, %s6172_s23 }
 0x833   : >> { %4112 = vrot.lane.b32.xlu0 %v8467_v41, %s6172_s23 }
 0x834   : >> { %v8967_v56 = vpop.permute.xlu1 %3822 }
 0x835   : >> { %10980 = vst [vmem:[#allocation181_spill] sm:$0xff] %v8967_v56  ;;  %v8969_v25 = vpop.permute.xlu0 %3820 }
 0x836   : >> { %10981 = vst [vmem:[#allocation182_spill] sm:$0xff] %v8969_v25  ;;  %4118 = vrot.lane.b32.xlu1 %v8474_v6, %s6172_s23 }
 0x837   : >> { %4116 = vrot.lane.b32.xlu0 %v8477_v11, %s6172_s23 }
 0x838   : >> { %v8975_v63 = vpop.permute.xlu1 %3838 }
 0x839   : >> { %10982 = vst [vmem:[#allocation183_spill] sm:$0xff] %v8975_v63  ;;  %v8977_v4 = vpop.permute.xlu0 %3836 }
 0x83a   : >> { %10983 = vst [vmem:[#allocation184_spill] sm:$0xff] %v8977_v4  ;;  %4122 = vrot.lane.b32.xlu1 %v8484_v7, %s6172_s23 }
 0x83b   : >> { %4120 = vrot.lane.b32.xlu0 %v8487_v38, %s6172_s23 }
 0x83c   : >> { %v8983_v3 = vpop.permute.xlu1 %3842 }
 0x83d   : >> { %10984 = vst [vmem:[#allocation185_spill] sm:$0xff] %v8983_v3  ;;  %v8985_v56 = vpop.permute.xlu0 %3840 }
 0x83e   : >> { %10985 = vst [vmem:[#allocation186_spill] sm:$0xff] %v8985_v56  ;;  %4144 = vrot.lane.b32.xlu1 %v8494_v59, %s6172_s23 }
 0x83f   : >> { %4142 = vrot.lane.b32.xlu0 %v8497_v15, %s6172_s23 }
 0x840   : >> { %v8991_v25 = vpop.permute.xlu1 %3846 }
 0x841   : >> { %10986 = vst [vmem:[#allocation187_spill] sm:$0xff] %v8991_v25  ;;  %v8993_v63 = vpop.permute.xlu0 %3844 }
 0x842   : >> { %10987 = vst [vmem:[#allocation188_spill] sm:$0xff] %v8993_v63  ;;  %4148 = vrot.lane.b32.xlu1 %v8504_v35, %s6172_s23 }
 0x843   : >> { %4146 = vrot.lane.b32.xlu0 %v8507_v8, %s6172_s23 }
 0x844   : >> { %v8999_v4 = vpop.permute.xlu1 %3874 }
 0x845   : >> { %10988 = vst [vmem:[#allocation189_spill] sm:$0xff] %v8999_v4  ;;  %v9001_v3 = vpop.permute.xlu0 %3872 }
 0x846   : >> { %10989 = vst [vmem:[#allocation190_spill] sm:$0xff] %v9001_v3  ;;  %4152 = vrot.lane.b32.xlu1 %v8514_v57, %s6172_s23 }
 0x847   : >> { %4150 = vrot.lane.b32.xlu0 %v8517_v5, %s6172_s23 }
 0x848   : >> { %v9007_v56 = vpop.permute.xlu1 %3878 }
 0x849   : >> { %10990 = vst [vmem:[#allocation191_spill] sm:$0xff] %v9007_v56  ;;  %v9009_v25 = vpop.permute.xlu0 %3876 }
 0x84a   : >> { %10991 = vst [vmem:[#allocation192_spill] sm:$0xff] %v9009_v25  ;;  %4174 = vrot.lane.b32.xlu1 %v8414_v17, %s6173_s30 }
 0x84b   : >> { %4172 = vrot.lane.b32.xlu0 %v8404_v52, %s6173_s30 }
 0x84c   : >> { %v9015_v4 = vpop.permute.xlu1 %3882 }
 0x84d   : >> { %10992 = vst [vmem:[#allocation193_spill] sm:$0xff] %v9015_v4  ;;  %v9017_v3 = vpop.permute.xlu0 %3880 }
 0x84e   : >> { %10993 = vst [vmem:[#allocation194_spill] sm:$0xff] %v9017_v3  ;;  %4178 = vrot.lane.b32.xlu1 %v8411_v37, %s6173_s30 }
 0x84f   : >> { %4176 = vrot.lane.b32.xlu0 %v8401_v20, %s6173_s30 }
 0x850   : >> { %v9023_v56 = vpop.permute.xlu1 %3904 }
 0x851   : >> { %10994 = vst [vmem:[#allocation195_spill] sm:$0xff] %v9023_v56  ;;  %v9025_v25 = vpop.permute.xlu0 %3902 }
 0x852   : >> { %10995 = vst [vmem:[#allocation196_spill] sm:$0xff] %v9025_v25  ;;  %4182 = vrot.lane.b32.xlu1 %v8421_v60, %s6173_s30 }
 0x853   : >> { %4180 = vrot.lane.b32.xlu0 %v8424_v49, %s6173_s30 }
 0x854   : >> { %v9031_v63 = vpop.permute.xlu1 %3908 }
 0x855   : >> { %10996 = vst [vmem:[#allocation197_spill] sm:$0xff] %v9031_v63  ;;  %v9033_v4 = vpop.permute.xlu0 %3906 }
 0x856   : >> { %10997 = vst [vmem:[#allocation198_spill] sm:$0xff] %v9033_v4  ;;  %4198 = vrot.lane.b32.xlu1 %v8431_v43, %s6173_s30 }
 0x857   : >> { %4196 = vrot.lane.b32.xlu0 %v8434_v31, %s6173_s30 }
 0x858   : >> { %v9039_v3 = vpop.permute.xlu1 %3912 }
 0x859   : >> { %10998 = vst [vmem:[#allocation199_spill] sm:$0xff] %v9039_v3  ;;  %v9041_v56 = vpop.permute.xlu0 %3910 }
 0x85a   : >> { %10999 = vst [vmem:[#allocation200_spill] sm:$0xff] %v9041_v56  ;;  %4202 = vrot.lane.b32.xlu1 %v8441_v62, %s6173_s30 }
 0x85b   : >> { %4200 = vrot.lane.b32.xlu0 %v8444_v21, %s6173_s30 }
 0x85c   : >> { %v9047_v25 = vpop.permute.xlu1 %3934 }
 0x85d   : >> { %11000 = vst [vmem:[#allocation201_spill] sm:$0xff] %v9047_v25  ;;  %v9049_v63 = vpop.permute.xlu0 %3932 }
 0x85e   : >> { %11001 = vst [vmem:[#allocation202_spill] sm:$0xff] %v9049_v63  ;;  %4206 = vrot.lane.b32.xlu1 %v8451_v28, %s6173_s30 }
 0x85f   : >> { %4204 = vrot.lane.b32.xlu0 %v8454_v48, %s6173_s30 }
 0x860   : >> { %v9055_v4 = vpop.permute.xlu1 %3938 }
 0x861   : >> { %11002 = vst [vmem:[#allocation203_spill] sm:$0xff] %v9055_v4  ;;  %v9057_v3 = vpop.permute.xlu0 %3936 }
 0x862   : >> { %11003 = vst [vmem:[#allocation204_spill] sm:$0xff] %v9057_v3  ;;  %4234 = vrot.lane.b32.xlu1 %v8464_v1, %s6173_s30 }
 0x863   : >> { %4232 = vrot.lane.b32.xlu0 %v8467_v41, %s6173_s30 }
 0x864   : >> { %v9063_v56 = vpop.permute.xlu1 %3942 }
 0x865   : >> { %11004 = vst [vmem:[#allocation205_spill] sm:$0xff] %v9063_v56  ;;  %v9065_v25 = vpop.permute.xlu0 %3940 }
 0x866   : >> { %11005 = vst [vmem:[#allocation206_spill] sm:$0xff] %v9065_v25  ;;  %4238 = vrot.lane.b32.xlu1 %v8474_v6, %s6173_s30 }
 0x867   : >> { %4236 = vrot.lane.b32.xlu0 %v8477_v11, %s6173_s30 }
 0x868   : >> { %v9071_v63 = vpop.permute.xlu1 %3958 }
 0x869   : >> { %11006 = vst [vmem:[#allocation207_spill] sm:$0xff] %v9071_v63  ;;  %v9073_v4 = vpop.permute.xlu0 %3956 }
 0x86a   : >> { %11007 = vst [vmem:[#allocation208_spill] sm:$0xff] %v9073_v4  ;;  %4242 = vrot.lane.b32.xlu1 %v8484_v7, %s6173_s30 }
 0x86b   : >> { %4240 = vrot.lane.b32.xlu0 %v8487_v38, %s6173_s30 }
 0x86c   : >> { %v9079_v3 = vpop.permute.xlu1 %3962 }
 0x86d   : >> { %11008 = vst [vmem:[#allocation209_spill] sm:$0xff] %v9079_v3  ;;  %v9081_v56 = vpop.permute.xlu0 %3960 }
 0x86e   : >> { %11009 = vst [vmem:[#allocation210_spill] sm:$0xff] %v9081_v56  ;;  %4264 = vrot.lane.b32.xlu1 %v8494_v59, %s6173_s30 }
 0x86f   : >> { %4262 = vrot.lane.b32.xlu0 %v8497_v15, %s6173_s30 }
 0x870   : >> { %v9087_v25 = vpop.permute.xlu1 %3966 }
 0x871   : >> { %11010 = vst [vmem:[#allocation211_spill] sm:$0xff] %v9087_v25  ;;  %v9089_v63 = vpop.permute.xlu0 %3964 }
 0x872   : >> { %11011 = vst [vmem:[#allocation212_spill] sm:$0xff] %v9089_v63  ;;  %4268 = vrot.lane.b32.xlu1 %v8504_v35, %s6173_s30 }
 0x873   : >> { %4266 = vrot.lane.b32.xlu0 %v8507_v8, %s6173_s30 }
 0x874   : >> { %v9095_v4 = vpop.permute.xlu1 %3994 }
 0x875   : >> { %11012 = vst [vmem:[#allocation213_spill] sm:$0xff] %v9095_v4  ;;  %v9097_v3 = vpop.permute.xlu0 %3992 }
 0x876   : >> { %11013 = vst [vmem:[#allocation214_spill] sm:$0xff] %v9097_v3  ;;  %4272 = vrot.lane.b32.xlu1 %v8514_v57, %s6173_s30 }
 0x877   : >> { %4270 = vrot.lane.b32.xlu0 %v8517_v5, %s6173_s30  ;;  %s10530_s30 = scalar_lea.hbm (%p10338_p13), %s10580_s4, %s5195_s28 }
 0x878   : >> { %v9103_v56 = vpop.permute.xlu1 %3998 }
 0x879   : >> { %11014 = vst [vmem:[#allocation215_spill] sm:$0xff] %v9103_v56  ;;  %v9105_v25 = vpop.permute.xlu0 %3996 }
 0x87a   : >> { %11015 = vst [vmem:[#allocation216_spill] sm:$0xff] %v9105_v25  ;;  %4294 = vrot.lane.b32.xlu1 %v8414_v17, %s6174_s6 }
 0x87b   : >> { %4292 = vrot.lane.b32.xlu0 %v8404_v52, %s6174_s6 }
 0x87c   : >> { %v9111_v4 = vpop.permute.xlu1 %4002 }
 0x87d   : >> { %11016 = vst [vmem:[#allocation217_spill] sm:$0xff] %v9111_v4  ;;  %v9113_v3 = vpop.permute.xlu0 %4000 }
 0x87e   : >> { %11017 = vst [vmem:[#allocation218_spill] sm:$0xff] %v9113_v3  ;;  %4298 = vrot.lane.b32.xlu1 %v8411_v37, %s6174_s6 }
 0x87f   : >> { %4296 = vrot.lane.b32.xlu0 %v8401_v20, %s6174_s6 }
 0x880   : >> { %v9119_v56 = vpop.permute.xlu1 %4024 }
 0x881   : >> { %11018 = vst [vmem:[#allocation219_spill] sm:$0xff] %v9119_v56  ;;  %v9121_v25 = vpop.permute.xlu0 %4022 }
 0x882   : >> { %11019 = vst [vmem:[#allocation220_spill] sm:$0xff] %v9121_v25  ;;  %4302 = vrot.lane.b32.xlu1 %v8421_v60, %s6174_s6  ;;  %v3260_v25 = vmul.f32 %v8122_v47, %v8404_v52  ;;  %v3265_v52 = vmul.f32 %v11027_v9, %v8421_v60  ;;  %v3264_v60 = vmul.f32 %v10879_v13, %v8424_v49 }
 0x883   : >> { %4300 = vrot.lane.b32.xlu0 %v8424_v49, %s6174_s6  ;;  %v3270_v9 = vmul.f32 %v10880_v24, %v8454_v48 }
 0x884   : >> { %v9127_v63 = vpop.permute.xlu1 %4028 }
 0x885   : >> { %11020 = vst [vmem:[#allocation221_spill] sm:$0xff] %v9127_v63  ;;  %v9129_v4 = vpop.permute.xlu0 %4026  ;;  %v3261_v63 = vmul.f32 %v8124_v42, %v8414_v17  ;;  %v3262_v17 = vmul.f32 %v11026_v16, %v8401_v20  ;;  %v3272_v20 = vmin.f32 %v3260_v25, %v3266_v0 }
 0x886   : >> { %11021 = vst [vmem:[#allocation222_spill] sm:$0xff] %v9129_v4  ;;  %4318 = vrot.lane.b32.xlu1 %v8431_v43, %s6174_s6  ;;  %v3267_v4 = vmul.f32 %v8136_v40, %v8431_v43  ;;  %v3268_v43 = vmul.f32 %v8138_v12, %v8444_v21 }
 0x887   : >> { %4316 = vrot.lane.b32.xlu0 %v8434_v31, %s6174_s6  ;;  %v9191_v25 = vadd.f32 %v6135_v26, %v3272_v20  ;;  %v3284_v26 = vmul.f32 %v3272_v20, %v8467_v41 }
 0x888   : >> { %v9135_v3 = vpop.permute.xlu1 %4032  ;;  %v3273_v31 = vmin.f32 %v3261_v63, %v3267_v4  ;;  %v3276_v63 = vmin.f32 %v3264_v60, %v3270_v9 }
 0x889   : >> { %11022 = vst [vmem:[#allocation223_spill] sm:$0xff] %v9135_v3  ;;  %v9137_v56 = vpop.permute.xlu0 %4030  ;;  %v3263_v3 = vmul.f32 %v8128_v29, %v8411_v37  ;;  %v3271_v37 = vmul.f32 %v10881_v53, %v8451_v28 }
 0x88a   : >> { %11023 = vst [vmem:[#allocation224_spill] sm:$0xff] %v9137_v56  ;;  %4322 = vrot.lane.b32.xlu1 %v8441_v62, %s6174_s6  ;;  %v9184_v4 = vadd.f32 %v6131_v39, %v3273_v31  ;;  %v3285_v39 = vmul.f32 %v3273_v31, %v8464_v1 }
 0x88b   : >> { %4320 = vrot.lane.b32.xlu0 %v8444_v21, %s6174_s6  ;;  %v3274_v21 = vmin.f32 %v3262_v17, %v3268_v43  ;;  %v3277_v16 = vmin.f32 %v3265_v52, %v3271_v37  ;;  %v3288_v17 = vmul.f32 %v3276_v63, %v8487_v38 }
 0x88c   : >> { %v9151_v18 = vpop.permute.xlu1 %4054  ;;  %v9231_v37 = vadd.f32 %v6107_v27, %v3285_v39  ;;  %v11041_v39 = vld [vmem:[#allocation89_spill] sm:$0xff] }
 0x88d   : >> { %11024 = vst [vmem:[#allocation225_spill] sm:$0xff] %v9151_v18  ;;  %v9153_v56 = vpop.permute.xlu0 %4052  ;;  %v3275_v18 = vmin.f32 %v3263_v3, %v3269_v51  ;;  %v9200_v0 = vadd.f32 %v6115_v58, %v3277_v16  ;;  %v3286_v58 = vmul.f32 %v3274_v21, %v8477_v11  ;;  %v3289_v9 = vmul.f32 %v3277_v16, %v8484_v7 }
 0x88e   : >> { %11025 = vst [vmem:[#allocation226_spill] sm:$0xff] %v9153_v56  ;;  %4326 = vrot.lane.b32.xlu1 %v8451_v28, %s6174_s6 }
 0x88f   : >> { %4324 = vrot.lane.b32.xlu0 %v8454_v48, %s6174_s6  ;;  %v9194_v49 = vadd.f32 %v6123_v10, %v3275_v18  ;;  %v9197_v48 = vadd.f32 %v6127_v50, %v3274_v21  ;;  %v3287_v10 = vmul.f32 %v3275_v18, %v8474_v6  ;;  %v3299_v43 = vmul.f32 %v3275_v18, %v8504_v35 }
 0x890   : >> { %v9171_v62 = vpop.permute.xlu1 %4058  ;;  %v9246_v18 = vadd.f32 %v6095_v46, %v3288_v17  ;;  %v3301_v46 = vmul.f32 %v3277_v16, %v8514_v57  ;;  %v3367_v16 = vmul.f32 %v10881_v53, %v8607_v14  ;;  %v11043_v14 = vld [vmem:[#allocation70_spill] sm:$0xff] }
 0x891   : >> { %11028 = vst [vmem:[#allocation227_spill] sm:$0xff] %v9171_v62  ;;  %v9173_v56 = vpop.permute.xlu0 %4056 }
 0x892   : >> { %11029 = vst [vmem:[#allocation228_spill] sm:$0xff] %v9173_v56  ;;  %4354 = vrot.lane.b32.xlu1 %v8464_v1, %s6174_s6  ;;  %v3297_v1 = vmul.f32 %v3273_v31, %v8494_v59  ;;  %v9240_v31 = vadd.f32 %v6103_v22, %v3286_v58  ;;  %v3298_v22 = vmul.f32 %v3274_v21, %v8507_v8  ;;  %v11038_v21 = vld [vmem:[#allocation92_spill] sm:$0xff]  ;;  %v11044_v58 = vld [vmem:[#allocation90_spill] sm:$0xff] }
 0x893   : >> { %4352 = vrot.lane.b32.xlu0 %v8467_v41, %s6174_s6  ;;  %v3296_v41 = vmul.f32 %v3272_v20, %v8497_v15  ;;  %v3366_v60 = vmul.f32 %v10880_v24, %v11038_v21 }
 0x894   : >> { %v9186_v28 = vpop.permute.xlu1 %4062  ;;  %v9253_v27 = vadd.f32 %v6083_v61, %v3297_v1  ;;  %v3363_v61 = vmul.f32 %v8136_v40, %v8591_v34  ;;  %v11039_v34 = vld [vmem:[#allocation87_spill] sm:$0xff] }
 0x895   : >> { %11030 = vst [vmem:[#allocation229_spill] sm:$0xff] %v9186_v28  ;;  %v9188_v51 = vpop.permute.xlu0 %4060  ;;  %v11046_v1 = vld [vmem:[#allocation91_spill] sm:$0xff] }
 0x896   : >> { %11031 = vst [vmem:[#allocation230_spill] sm:$0xff] %v9188_v51  ;;  %4358 = vrot.lane.b32.xlu1 %v8474_v6, %s6174_s6  ;;  %v9223_v6 = vadd.f32 %v6119_v36, %v3276_v63  ;;  %v9243_v36 = vadd.f32 %v6091_v54, %v3289_v9  ;;  %v9260_v54 = vadd.f32 %v6075_v33, %v3299_v43  ;;  %v11045_v9 = vld [vmem:[#allocation73_spill] sm:$0xff] }
 0x897   : >> { %4356 = vrot.lane.b32.xlu0 %v8477_v11, %s6174_s6  ;;  %v3364_v33 = vmul.f32 %v8138_v12, %v8601_v30  ;;  %v3333_v30 = vmul.f32 %v8124_v42, %v11041_v39  ;;  %v3337_v17 = vmul.f32 %v11045_v9, %v11044_v58  ;;  %v11108_v28 = vld [vmem:[#allocation139_spill] sm:$0xff] }
 0x898   : >> { %v9209_v3 = vpop.permute.xlu1 %4078 }
 0x899   : >> { %11032 = vst [vmem:[#allocation231_spill] sm:$0xff] %v9209_v3  ;;  %v9211_v50 = vpop.permute.xlu0 %4076  ;;  %v3369_v43 = vmin.f32 %v3333_v30, %v3363_v61 }
 0x89a   : >> { %11033 = vst [vmem:[#allocation232_spill] sm:$0xff] %v9211_v50  ;;  %4362 = vrot.lane.b32.xlu1 %v8484_v7, %s6174_s6  ;;  %v9234_v7 = vadd.f32 %v6111_v2, %v3284_v26  ;;  %v3300_v2 = vmul.f32 %v3276_v63, %v8517_v5  ;;  %v11040_v63 = vld [vmem:[#allocation88_spill] sm:$0xff]  ;;  %v11042_v26 = vld [vmem:[#allocation86_spill] sm:$0xff] }
 0x89b   : >> { %4360 = vrot.lane.b32.xlu0 %v8487_v38, %s6174_s6  ;;  %v9237_v38 = vadd.f32 %v6099_v44, %v3287_v10  ;;  %v9256_v44 = vadd.f32 %v6087_v55, %v3296_v41  ;;  %v3362_v55 = vmul.f32 %v8134_v23, %v8593_v19  ;;  %v3332_v19 = vmul.f32 %v8122_v47, %v11039_v34  ;;  %v11081_v50 = vld [vmem:[#allocation110_spill] sm:$0xff] }
 0x89c   : >> { %v9226_v11 = vpop.permute.xlu1 %4082  ;;  %v3334_v10 = vmul.f32 %v11043_v14, %v11042_v26  ;;  %v11050_v26 = vld [vmem:[#allocation93_spill] sm:$0xff] }
 0x89d   : >> { %11034 = vst [vmem:[#allocation233_spill] sm:$0xff] %v9226_v11  ;;  %v9228_v52 = vpop.permute.xlu0 %4080  ;;  %v3368_v21 = vmin.f32 %v3332_v19, %v3362_v55  ;;  %v3405_v58 = vmul.f32 %v11050_v26, %v3369_v43  ;;  %v11053_v55 = vld [vmem:[#allocation84_spill] sm:$0xff]  ;;  %v11080_v11 = vld [vmem:[#allocation109_spill] sm:$0xff] }
 0x89e   : >> { %11035 = vst [vmem:[#allocation234_spill] sm:$0xff] %v9228_v52  ;;  %4384 = vrot.lane.b32.xlu1 %v8494_v59, %s6174_s6  ;;  %v3370_v39 = vmin.f32 %v3334_v10, %v3364_v33  ;;  %v3373_v52 = vmin.f32 %v3337_v17, %v3367_v16  ;;  %v11055_v16 = vld [vmem:[#allocation96_spill] sm:$0xff]  ;;  %v9324_v17 = vadd.f32 %v3369_v43, %v9184_v4  ;;  %v9346_v4 = vld [vmem:[%s8398_s29 + $0x54] sm:$0xff] }
 0x89f   : >> { %4382 = vrot.lane.b32.xlu0 %v8497_v15, %s6174_s6  ;;  %v3365_v15 = vmul.f32 %v8140_v32, %v8599_v45  ;;  %v3335_v45 = vmul.f32 %v8128_v29, %v11040_v63  ;;  %v11049_v63 = vld [vmem:[#allocation85_spill] sm:$0xff] }
 0x8a0   : >> { %v9264_v20 = vpop.permute.xlu1 %4086  ;;  %v9301_v56 = vadd.f32 %v11049_v63, %v3298_v22  ;;  %v9313_v22 = vadd.f32 %v11053_v55, %v3300_v2  ;;  %v11060_v2 = vld [vmem:[#allocation99_spill] sm:$0xff]  ;;  %v9338_v55 = vadd.f32 %v3373_v52, %v9200_v0  ;;  %v11062_v0 = vld [vmem:[#allocation101_spill] sm:$0xff] }
 0x8a1   : >> { %11036 = vst [vmem:[#allocation235_spill] sm:$0xff] %v9264_v20  ;;  %v9266_v59 = vpop.permute.xlu0 %4084  ;;  %v3371_v34 = vmin.f32 %v3335_v45, %v3365_v15  ;;  %v11054_v15 = vld [vmem:[#allocation95_spill] sm:$0xff]  ;;  %v11057_v45 = vld [vmem:[#allocation98_spill] sm:$0xff] }
 0x8a2   : >> { %11037 = vst [vmem:[#allocation236_spill] sm:$0xff] %v9266_v59  ;;  %4388 = vrot.lane.b32.xlu1 %v8504_v35, %s6174_s6  ;;  %v3336_v35 = vmul.f32 %v10879_v13, %v11046_v1  ;;  %v11051_v1 = vld [vmem:[#allocation94_spill] sm:$0xff]  ;;  %v3619_v59 = vmul.f32 %v10881_v53, %v11108_v28 }
 0x8a3   : >> { %4386 = vrot.lane.b32.xlu0 %v8507_v8, %s6174_s6  ;;  %v3407_v33 = vmul.f32 %v11054_v15, %v3371_v34  ;;  %v9332_v26 = vadd.f32 %v3371_v34, %v9194_v49  ;;  %v9341_v15 = vld [vmem:[%s8398_s29 + $0x5c] sm:$0xff]  ;;  %v9354_v49 = vadd.f32 %v3405_v58, %v9231_v37 }
 0x8a4   : >> { %v9296_v41 = vpop.permute.xlu1 %4114  ;;  %v3372_v62 = vmin.f32 %v3336_v35, %v3366_v60  ;;  %v3406_v60 = vmul.f32 %v11055_v16, %v3370_v39  ;;  %v3441_v35 = vmul.f32 %v11060_v2, %v3369_v43  ;;  %v3443_v43 = vmul.f32 %v11062_v0, %v3371_v34  ;;  %v9392_v2 = vld [vmem:[%s8398_s29 + $0x78] sm:$0xff]  ;;  %v11072_v0 = vld [vmem:[#allocation116_spill] sm:$0xff] }
 0x8a5   : >> { %11047 = vst [vmem:[#allocation92_spill] sm:$0xff] %v9296_v41  ;;  %v9298_v8 = vpop.permute.xlu0 %4112  ;;  %v3404_v41 = vmul.f32 %v11051_v1, %v3368_v21  ;;  %v9335_v1 = vadd.f32 %v3370_v39, %v9197_v48 }
 0x8a6   : >> { %11048 = vst [vmem:[#allocation87_spill] sm:$0xff] %v9298_v8  ;;  %4392 = vrot.lane.b32.xlu1 %v8514_v57, %s6174_s6  ;;  %v11052_v8 = vld [vmem:[#allocation83_spill] sm:$0xff]  ;;  %v11056_v57 = vld [vmem:[#allocation97_spill] sm:$0xff]  ;;  %v9364_v16 = vadd.f32 %v3406_v60, %v9240_v31 }
 0x8a7   : >> { %4390 = vrot.lane.b32.xlu0 %v8517_v5, %s6174_s6  ;;  %v9310_v61 = vadd.f32 %v11052_v8, %v3301_v46  ;;  %v3409_v19 = vmul.f32 %v11056_v57, %v3373_v52  ;;  %v3408_v5 = vmul.f32 %v11057_v45, %v3372_v62  ;;  %v9327_v46 = vadd.f32 %v3368_v21, %v9191_v25  ;;  %v11061_v8 = vld [vmem:[#allocation100_spill] sm:$0xff]  ;;  %v11066_v31 = vld [vmem:[#allocation111_spill] sm:$0xff]  ;;  %v11069_v45 = vld [vmem:[#allocation114_spill] sm:$0xff]  ;;  %s5913_s6 = scalar_lea.vmem (%p10338_p13), %s10532_s13, 16 }
 0x8a8   : >> { %v9319_v30 = vpop.permute.xlu1 %4118  ;;  %v3440_v63 = vmul.f32 %v11061_v8, %v3368_v21  ;;  %v9351_v25 = vadd.f32 %v3372_v62, %v9223_v6  ;;  %v9357_v48 = vadd.f32 %v3404_v41, %v9234_v7  ;;  %v9361_v21 = vadd.f32 %v3407_v33, %v9237_v38  ;;  %v11065_v38 = vld [vmem:[#allocation102_spill] sm:$0xff]  ;;  %v11071_v8 = vld [vmem:[#allocation115_spill] sm:$0xff]  ;;  %p5914_p0 = scmp.ne.s32.totalorder (%p10338_p13), %s10532_s13, %s5913_s6 }
 0x8a9   : >> { %11058 = vst [vmem:[#allocation88_spill] sm:$0xff] %v9319_v30  ;;  %v9321_v10 = vpop.permute.xlu0 %4116  ;;  %v9367_v57 = vadd.f32 %v3409_v19, %v9243_v36  ;;  %v9370_v6 = vadd.f32 %v3408_v5, %v9246_v18  ;;  %v9377_v7 = vadd.f32 %v3441_v35, %v9253_v27  ;;  %v3442_v34 = vmul.f32 %v11065_v38, %v3370_v39  ;;  %v11067_v36 = vld [vmem:[#allocation112_spill] sm:$0xff]  ;;  %v11068_v18 = vld [vmem:[#allocation113_spill] sm:$0xff] }
 0x8aa   : >> { %11059 = vst [vmem:[#allocation89_spill] sm:$0xff] %v9321_v10  ;;  %4414 = vrot.lane.b32.xlu1 %v9341_v15, %s6175_s22  ;;  %v9380_v41 = vadd.f32 %v3440_v63, %v9256_v44  ;;  %v3495_v33 = vmul.f32 %v8136_v40, %v11066_v31  ;;  %v3494_v60 = vmul.f32 %v8134_v23, %v11067_v36  ;;  %v9397_v27 = vld [vmem:[%s8398_s29 + $0x70] sm:$0xff]  ;;  %v11073_v31 = vld [vmem:[#allocation103_spill] sm:$0xff]  ;;  %p5915_p10 = pnand (%p10338_p13), %p5914_p0, %p11359_p8 }
 0x8ab   : >> { %4412 = vrot.lane.b32.xlu0 %v9346_v4, %s6175_s22  ;;  %v3497_v19 = vmul.f32 %v8140_v32, %v11068_v18  ;;  %v3496_v5 = vmul.f32 %v8138_v12, %v11069_v45  ;;  %v9402_v44 = vadd.f32 %v3443_v43, %v9260_v54  ;;  %v11070_v39 = vld [vmem:[#allocation105_spill] sm:$0xff]  ;;  %v3499_v63 = vmul.f32 %v10881_v53, %v11071_v8  ;;  %v11074_v18 = vld [vmem:[#allocation106_spill] sm:$0xff]  ;;  %v11076_v43 = vld [vmem:[#allocation108_spill] sm:$0xff] }
 0x8ac   : >> { %v9372_v37 = vpop.permute.xlu1 %4122  ;;  %v3471_v35 = vmul.f32 %v8124_v42, %v11070_v39  ;;  %v3498_v38 = vmul.f32 %v10880_v24, %v11072_v0  ;;  %v3445_v36 = vmul.f32 %v11073_v31, %v3373_v52  ;;  %v3470_v45 = vmul.f32 %v8122_v47, %v11074_v18  ;;  %v11079_v8 = vld [vmem:[#allocation104_spill] sm:$0xff]  ;;  %p5916_p11 = pneg (%p10338_p13), %p5915_p10 }
 0x8ad   : >> { %11063 = vst [vmem:[#allocation86_spill] sm:$0xff] %v9372_v37  ;;  %v9374_v58 = vpop.permute.xlu0 %4120  ;;  %v3472_v37 = vmul.f32 %v11043_v14, %v11076_v43  ;;  %v3444_v30 = vmul.f32 %v11079_v8, %v3372_v62  ;;  %v3475_v0 = vmul.f32 %v11045_v9, %v11080_v11  ;;  %v3474_v52 = vmul.f32 %v10879_v13, %v11081_v50  ;;  %v9432_v43 = vld [vmem:[%s8398_s29 + $0x8c] sm:$0xff] }
 0x8ae   : >> { %11064 = vst [vmem:[#allocation90_spill] sm:$0xff] %v9374_v58  ;;  %4418 = vrot.lane.b32.xlu1 %v9392_v2, %s6175_s22  ;;  %v11075_v58 = vld [vmem:[#allocation107_spill] sm:$0xff]  ;;  %v3501_v31 = vmin.f32 %v3471_v35, %v3495_v33  ;;  %v3500_v18 = vmin.f32 %v3470_v45, %v3494_v60  ;;  %v9437_v62 = vadd.f32 %v3442_v34, %v9301_v56  ;;  %v11082_v33 = vld [vmem:[#allocation117_spill] sm:$0xff] }
 0x8af   : >> { %4416 = vrot.lane.b32.xlu0 %v9397_v27, %s6175_s22  ;;  %v3473_v54 = vmul.f32 %v8128_v29, %v11075_v58  ;;  %v3502_v51 = vmin.f32 %v3472_v37, %v3496_v5  ;;  %v9427_v58 = vld [vmem:[%s8398_s29 + $0x94] sm:$0xff]  ;;  %v3505_v11 = vmin.f32 %v3475_v0, %v3499_v63  ;;  %v3504_v50 = vmin.f32 %v3474_v52, %v3498_v38  ;;  %v11084_v35 = vld [vmem:[#allocation119_spill] sm:$0xff] }
 0x8b0   : >> { %v9417_v39 = vpop.permute.xlu1 %4144  ;;  %v3531_v60 = vmul.f32 %v11082_v33, %v3501_v31  ;;  %v3451_v37 = vadd.f32 %v3445_v36, %v9310_v61  ;;  %v3450_v56 = vadd.f32 %v3444_v30, %v9313_v22  ;;  %v3507_v34 = vadd.f32 %v3501_v31, %v9324_v17  ;;  %v11088_v63 = vld [vmem:[#allocation121_spill] sm:$0xff]  ;;  %v11089_v0 = vld [vmem:[#allocation122_spill] sm:$0xff]  ;;  %v11090_v33 = vld [vmem:[#allocation123_spill] sm:$0xff] }
 0x8b1   : >> { %11077 = vst [vmem:[#allocation91_spill] sm:$0xff] %v9417_v39  ;;  %v9419_v10 = vpop.permute.xlu0 %4142  ;;  %v3503_v3 = vmin.f32 %v3473_v54, %v3497_v19  ;;  %v11083_v19 = vld [vmem:[#allocation118_spill] sm:$0xff]  ;;  %v11085_v54 = vld [vmem:[#allocation120_spill] sm:$0xff]  ;;  %v3535_v38 = vmul.f32 %v11088_v63, %v3505_v11  ;;  %v3534_v52 = vmul.f32 %v11089_v0, %v3504_v50  ;;  %v9453_v61 = vadd.f32 %v3500_v18, %v9327_v46  ;;  %v11093_v63 = vld [vmem:[#allocation135_spill] sm:$0xff] }
 0x8b2   : >> { %11078 = vst [vmem:[#allocation85_spill] sm:$0xff] %v9419_v10  ;;  %4422 = vrot.lane.b32.xlu1 %v9427_v58, %s6175_s22  ;;  %v3530_v5 = vmul.f32 %v11083_v19, %v3500_v18  ;;  %v3532_v8 = vmul.f32 %v11085_v54, %v3502_v51  ;;  %v3561_v19 = vmul.f32 %v11090_v33, %v3501_v31  ;;  %v9465_v22 = vld [vmem:[%s8398_s29] sm:$0xff] }
 0x8b3   : >> { %4420 = vrot.lane.b32.xlu0 %v9432_v43, %s6175_s22  ;;  %v3533_v45 = vmul.f32 %v11084_v35, %v3503_v3  ;;  %v9456_v36 = vadd.f32 %v3503_v3, %v9332_v26  ;;  %v9460_v35 = vld [vmem:[%s8398_s29 + $0x8] sm:$0xff]  ;;  %11092 = vst [vmem:[#allocation84_spill] sm:$0xff] %v9465_v22  ;;  %v9470_v30 = vadd.f32 %v3502_v51, %v9335_v1 }
 0x8b4   : >> { %v9444_v10 = vpop.permute.xlu1 %4148  ;;  %11091 = vst [vmem:[#allocation83_spill] sm:$0xff] %v9460_v35  ;;  %v9473_v17 = vadd.f32 %v3505_v11, %v9338_v55  ;;  %v9476_v46 = vadd.f32 %v3504_v50, %v9351_v25  ;;  %v9479_v26 = vadd.f32 %v3531_v60, %v9354_v49  ;;  %v9482_v31 = vadd.f32 %v3530_v5, %v9357_v48  ;;  %v11096_v48 = vld [vmem:[#allocation124_spill] sm:$0xff] }
 0x8b5   : >> { %11086 = vst [vmem:[#allocation93_spill] sm:$0xff] %v9444_v10  ;;  %v9446_v39 = vpop.permute.xlu0 %4146  ;;  %v9485_v54 = vadd.f32 %v3533_v45, %v9361_v21  ;;  %v9488_v1 = vadd.f32 %v3532_v8, %v9364_v16  ;;  %v3615_v55 = vmul.f32 %v8136_v40, %v11093_v63  ;;  %v9497_v49 = vadd.f32 %v3535_v38, %v9367_v57  ;;  %v11097_v21 = vld [vmem:[#allocation125_spill] sm:$0xff]  ;;  %v11099_v63 = vld [vmem:[#allocation136_spill] sm:$0xff]  ;;  %v9517_v57 = vld [vmem:[%s8398_s29 + $0x1c] sm:$0xff] }
 0x8b6   : >> { %11087 = vst [vmem:[#allocation94_spill] sm:$0xff] %v9446_v39  ;;  %4438 = vrot.lane.b32.xlu1 %v9460_v35, %s6175_s22  ;;  %v9500_v60 = vadd.f32 %v3534_v52, %v9370_v6  ;;  %v3560_v5 = vmul.f32 %v11096_v48, %v3500_v18  ;;  %v3563_v45 = vmul.f32 %v11097_v21, %v3503_v3  ;;  %v11098_v8 = vld [vmem:[#allocation129_spill] sm:$0xff]  ;;  %v9512_v10 = vld [vmem:[%s8398_s29 + $0x24] sm:$0xff]  ;;  %11101 = vst [vmem:[#allocation98_spill] sm:$0xff] %v9517_v57 }
 0x8b7   : >> { %4436 = vrot.lane.b32.xlu0 %v9465_v22, %s6175_s22  ;;  %v9505_v16 = vadd.f32 %v3561_v19, %v9377_v7  ;;  %v3591_v33 = vmul.f32 %v8124_v42, %v11098_v8  ;;  %v3614_v39 = vmul.f32 %v8134_v23, %v11099_v63  ;;  %11100 = vst [vmem:[#allocation97_spill] sm:$0xff] %v9512_v10  ;;  %v11102_v3 = vld [vmem:[#allocation126_spill] sm:$0xff]  ;;  %v11103_v7 = vld [vmem:[#allocation127_spill] sm:$0xff]  ;;  %v11104_v38 = vld [vmem:[#allocation128_spill] sm:$0xff] }
 0x8b8   : >> { %v9492_v0 = vpop.permute.xlu1 %4152  ;;  %v3562_v6 = vmul.f32 %v11102_v3, %v3502_v51  ;;  %v3565_v18 = vmul.f32 %v11103_v7, %v3505_v11  ;;  %v3564_v52 = vmul.f32 %v11104_v38, %v3504_v50  ;;  %v11105_v19 = vld [vmem:[#allocation137_spill] sm:$0xff]  ;;  %v11106_v21 = vld [vmem:[#allocation130_spill] sm:$0xff]  ;;  %v3566_v50 = vadd.f32 %v3560_v5, %v9380_v41  ;;  %v11109_v7 = vld [vmem:[#allocation131_spill] sm:$0xff] }
 0x8b9   : >> { %11094 = vst [vmem:[#allocation95_spill] sm:$0xff] %v9492_v0  ;;  %v9494_v25 = vpop.permute.xlu0 %4150  ;;  %v3617_v48 = vmul.f32 %v8140_v32, %v11105_v19  ;;  %v3590_v8 = vmul.f32 %v8122_v47, %v11106_v21  ;;  %v3621_v63 = vmin.f32 %v3591_v33, %v3615_v55  ;;  %v3569_v3 = vadd.f32 %v3563_v45, %v9402_v44  ;;  %v11110_v19 = vld [vmem:[#allocation140_spill] sm:$0xff]  ;;  %v11112_v21 = vld [vmem:[#allocation133_spill] sm:$0xff]  ;;  %v11115_v45 = vld [vmem:[#allocation134_spill] sm:$0xff] }
 0x8ba   : >> { %11095 = vst [vmem:[#allocation96_spill] sm:$0xff] %v9494_v25  ;;  %4442 = vrot.lane.b32.xlu1 %v9512_v10, %s6175_s22  ;;  %v11107_v25 = vld [vmem:[#allocation138_spill] sm:$0xff]  ;;  %v3593_v38 = vmul.f32 %v8128_v29, %v11109_v7  ;;  %v3618_v55 = vmul.f32 %v10880_v24, %v11110_v19  ;;  %v11111_v33 = vld [vmem:[#allocation132_spill] sm:$0xff]  ;;  %v3595_v28 = vmul.f32 %v11045_v9, %v11112_v21 }
 0x8bb   : >> { %4440 = vrot.lane.b32.xlu0 %v9517_v57, %s6175_s22  ;;  %v3616_v0 = vmul.f32 %v8138_v12, %v11107_v25  ;;  %v3592_v25 = vmul.f32 %v11043_v14, %v11111_v33  ;;  %v3620_v20 = vmin.f32 %v3590_v8, %v3614_v39  ;;  %v9547_v57 = vld [vmem:[%s8398_s29 + $0x40] sm:$0xff]  ;;  %v9552_v41 = vld [vmem:[%s8398_s29 + $0x38] sm:$0xff]  ;;  %v3568_v44 = vadd.f32 %v3562_v6, %v9437_v62 }
 0x8bc   : >> { %v9532_v51 = vpop.permute.xlu1 %4174  ;;  %11113 = vst [vmem:[#allocation99_spill] sm:$0xff] %v9547_v57  ;;  %11114 = vst [vmem:[#allocation100_spill] sm:$0xff] %v9552_v41  ;;  %v3571_v5 = vadd.f32 %v3565_v18, %v3451_v37  ;;  %v3594_v7 = vmul.f32 %v10879_v13, %v11115_v45  ;;  %v3623_v19 = vmin.f32 %v3593_v38, %v3617_v48  ;;  %v11117_v62 = vld [vmem:[#allocation142_spill] sm:$0xff]  ;;  %v11118_v6 = vld [vmem:[#allocation143_spill] sm:$0xff] }
 0x8bd   : >> { %v9534_v11 = vpop.permute.xlu0 %4172  ;;  %v3570_v39 = vadd.f32 %v3564_v52, %v3450_v56  ;;  %v9559_v8 = vadd.f32 %v3621_v63, %v3507_v34  ;;  %v3622_v33 = vmin.f32 %v3592_v25, %v3616_v0  ;;  %v3625_v21 = vmin.f32 %v3595_v28, %v3619_v59  ;;  %v11119_v48 = vld [vmem:[#allocation144_spill] sm:$0xff]  ;;  %v11120_v34 = vld [vmem:[#allocation145_spill] sm:$0xff]  ;;  %v9579_v59 = vld [vmem:[%s8461_s8] sm:$0xff] }
 0x8be   : >> { %4446 = vrot.lane.b32.xlu1 %v9547_v57, %s6175_s22  ;;  %v3624_v22 = vmin.f32 %v3594_v7, %v3618_v55  ;;  %v3650_v37 = vmul.f32 %v11117_v62, %v3620_v20  ;;  %v3653_v18 = vmul.f32 %v11118_v6, %v3623_v19  ;;  %v9569_v45 = vadd.f32 %v3620_v20, %v9453_v61  ;;  %v9574_v0 = vld [vmem:[%s8461_s8 + $0x8] sm:$0xff]  ;;  %v11124_v55 = vld [vmem:[#allocation146_spill] sm:$0xff] }
 0x8bf   : >> { %4444 = vrot.lane.b32.xlu0 %v9552_v41, %s6175_s22  ;;  %v11116_v41 = vld [vmem:[#allocation141_spill] sm:$0xff]  ;;  %v3652_v56 = vmul.f32 %v11119_v48, %v3622_v33  ;;  %v3655_v52 = vmul.f32 %v11120_v34, %v3625_v21  ;;  %11121 = vst [vmem:[#allocation101_spill] sm:$0xff] %v9574_v0  ;;  %11122 = vst [vmem:[#allocation102_spill] sm:$0xff] %v9579_v59  ;;  %v9584_v38 = vadd.f32 %v3623_v19, %v9456_v36  ;;  %v11125_v25 = vld [vmem:[#allocation147_spill] sm:$0xff] }
 0x8c0   : >> { %v9561_v57 = vpop.permute.xlu1 %4178  ;;  %v3651_v35 = vmul.f32 %v11116_v41, %v3621_v63  ;;  %v3654_v61 = vmul.f32 %v11124_v55, %v3624_v22  ;;  %v3681_v28 = vmul.f32 %v11125_v25, %v3621_v63  ;;  %v11126_v41 = vld [vmem:[#allocation148_spill] sm:$0xff]  ;;  %v9590_v62 = vadd.f32 %v3622_v33, %v9470_v30  ;;  %v11127_v48 = vld [vmem:[#allocation149_spill] sm:$0xff] }
 0x8c1   : >> { %v9563_v10 = vpop.permute.xlu0 %4176  ;;  %11123 = vst [vmem:[#allocation111_spill] sm:$0xff] %v9584_v38  ;;  %v3680_v7 = vmul.f32 %v11126_v41, %v3620_v20  ;;  %v9593_v6 = vadd.f32 %v3625_v21, %v9473_v17  ;;  %v3683_v34 = vmul.f32 %v11127_v48, %v3623_v19  ;;  %v9598_v55 = vadd.f32 %v3624_v22, %v9476_v46  ;;  %v9617_v25 = vld [vmem:[%s8461_s8 + $0x24] sm:$0xff] }
 0x8c2   : >> { %4474 = vrot.lane.b32.xlu1 %v9574_v0, %s6175_s22  ;;  %v9601_v63 = vadd.f32 %v3651_v35, %v9479_v26  ;;  %v9604_v20 = vadd.f32 %v3650_v37, %v9482_v31  ;;  %v9607_v30 = vadd.f32 %v3653_v18, %v9485_v54  ;;  %v9610_v17 = vadd.f32 %v3652_v56, %v9488_v1  ;;  %v9622_v35 = vld [vmem:[%s8461_s8 + $0x1c] sm:$0xff]  ;;  %v11132_v54 = vld [vmem:[#allocation152_spill] sm:$0xff] }
 0x8c3   : >> { %4472 = vrot.lane.b32.xlu0 %v9579_v59, %s6175_s22  ;;  %v11128_v59 = vld [vmem:[#allocation150_spill] sm:$0xff]  ;;  %v9613_v19 = vadd.f32 %v3655_v52, %v9497_v49  ;;  %11130 = vst [vmem:[#allocation112_spill] sm:$0xff] %v9617_v25  ;;  %11131 = vst [vmem:[#allocation113_spill] sm:$0xff] %v9622_v35  ;;  %v9627_v46 = vadd.f32 %v3654_v61, %v9500_v60  ;;  %v9630_v26 = vadd.f32 %v3681_v28, %v9505_v16  ;;  %v11133_v37 = vld [vmem:[#allocation159_spill] sm:$0xff] }
 0x8c4   : >> { %v3682_v0 = vmul.f32 %v11128_v59, %v3622_v33  ;;  %v4183_v36 = vpop.permute.xlu1 %4182  ;;  %v11129_v33 = vld [vmem:[#allocation151_spill] sm:$0xff]  ;;  %v9632_v31 = vadd.f32 %v3680_v7, %v3566_v50  ;;  %v3684_v1 = vmul.f32 %v11132_v54, %v3624_v22  ;;  %v9635_v49 = vadd.f32 %v3683_v34, %v3569_v3  ;;  %v11134_v56 = vld [vmem:[#allocation160_spill] sm:$0xff]  ;;  %v11136_v28 = vld [vmem:[#allocation154_spill] sm:$0xff] }
 0x8c5   : >> { %v4181_v38 = vpop.permute.xlu0 %4180  ;;  %v3685_v59 = vmul.f32 %v11129_v33, %v3625_v21  ;;  %v3735_v18 = vmul.f32 %v8136_v40, %v11133_v37  ;;  %v3734_v52 = vmul.f32 %v8134_v23, %v11134_v56  ;;  %v4191_v16 = vmul.f32 %v8124_v42, %v9532_v51  ;;  %v11140_v54 = vld [vmem:[#allocation161_spill] sm:$0xff]  ;;  %v11141_v56 = vld [vmem:[#allocation162_spill] sm:$0xff] }
 0x8c6   : >> { %4478 = vrot.lane.b32.xlu1 %v9617_v25, %s6175_s22  ;;  %v9637_v21 = vadd.f32 %v3682_v0, %v3568_v44  ;;  %v4190_v50 = vmul.f32 %v8122_v47, %v9534_v11  ;;  %v11135_v0 = vld [vmem:[#allocation153_spill] sm:$0xff]  ;;  %v3710_v7 = vmul.f32 %v8122_v47, %v11136_v28  ;;  %v9659_v51 = vadd.f32 %v3684_v1, %v3570_v39  ;;  %v11137_v11 = vld [vmem:[#allocation155_spill] sm:$0xff] }
 0x8c7   : >> { %4476 = vrot.lane.b32.xlu0 %v9622_v35, %s6175_s22  ;;  %v9649_v44 = vadd.f32 %v3685_v59, %v3571_v5  ;;  %v3711_v61 = vmul.f32 %v8124_v42, %v11135_v0  ;;  %v3713_v48 = vmul.f32 %v8128_v29, %v11137_v11  ;;  %v3737_v37 = vmul.f32 %v8140_v32, %v11140_v54  ;;  %v11190_v35 = vld [vmem:[#allocation229_spill] sm:$0xff] }
 0x8c8   : >> { %v4199_v41 = vpop.permute.xlu1 %4198  ;;  %v3740_v59 = vmin.f32 %v3710_v7, %v3734_v52  ;;  %v4192_v39 = vmul.f32 %v11043_v14, %v9563_v10  ;;  %v11145_v10 = vld [vmem:[#allocation157_spill] sm:$0xff]  ;;  %v4075_v25 = vmul.f32 %v11045_v9, %v11190_v35 }
 0x8c9   : >> { %v4197_v60 = vpop.permute.xlu0 %4196  ;;  %v4215_v22 = vmul.f32 %v8136_v40, %v4199_v41  ;;  %v3741_v33 = vmin.f32 %v3711_v61, %v3735_v18  ;;  %v11142_v18 = vld [vmem:[#allocation156_spill] sm:$0xff]  ;;  %v11146_v61 = vld [vmem:[#allocation158_spill] sm:$0xff] }
 0x8ca   : >> { %v4214_v3 = vmul.f32 %v8134_v23, %v4197_v60  ;;  %4534 = vrot.lane.b32.xlu1 %v9341_v15, %s6176_s7  ;;  %v3736_v15 = vmul.f32 %v8138_v12, %v11141_v56  ;;  %v3712_v52 = vmul.f32 %v11043_v14, %v11142_v18  ;;  %v3714_v28 = vmul.f32 %v10879_v13, %v11146_v61  ;;  %v9856_v35 = vld [vmem:[%s8461_s8 + $0x38] sm:$0xff] }
 0x8cb   : >> { %4532 = vrot.lane.b32.xlu0 %v9346_v4, %s6176_s7  ;;  %v9663_v5 = vmin.f32 %v4191_v16, %v4215_v22  ;;  %v4193_v4 = vmul.f32 %v8128_v29, %v9561_v57  ;;  %v3715_v57 = vmul.f32 %v11045_v9, %v11145_v10  ;;  %v9696_v54 = vadd.f32 %v3741_v33, %v9559_v8 }
 0x8cc   : >> { %v9665_v34 = vmin.f32 %v4190_v50, %v4214_v3  ;;  %v4203_v41 = vpop.permute.xlu1 %4202  ;;  %v11143_v50 = vld [vmem:[#allocation163_spill] sm:$0xff]  ;;  %v11144_v3 = vld [vmem:[#allocation164_spill] sm:$0xff]  ;;  %v9699_v56 = vadd.f32 %v3740_v59, %v9569_v45  ;;  %v4195_v18 = vmul.f32 %v11045_v9, %v4183_v36  ;;  %v11148_v45 = vld [vmem:[#allocation166_spill] sm:$0xff]  ;;  %11198 = vst [vmem:[#allocation118_spill] sm:$0xff] %v9856_v35 }
 0x8cd   : >> { %11138 = vst [vmem:[#allocation114_spill] sm:$0xff] %v9663_v5  ;;  %v4201_v60 = vpop.permute.xlu0 %4200  ;;  %v4217_v1 = vmul.f32 %v8140_v32, %v4203_v41  ;;  %v3739_v22 = vmul.f32 %v10881_v53, %v11143_v50  ;;  %v3738_v0 = vmul.f32 %v10880_v24, %v11144_v3  ;;  %v3742_v41 = vmin.f32 %v3712_v52, %v3736_v15  ;;  %v11150_v52 = vld [vmem:[#allocation111_spill] sm:$0xff] }
 0x8ce   : >> { %11139 = vst [vmem:[#allocation105_spill] sm:$0xff] %v9665_v34  ;;  %v4216_v16 = vmul.f32 %v8138_v12, %v4201_v60  ;;  %4538 = vrot.lane.b32.xlu1 %v9392_v2, %s6176_s7  ;;  %v3743_v2 = vmin.f32 %v3713_v48, %v3737_v37  ;;  %v4194_v50 = vmul.f32 %v10879_v13, %v4181_v38  ;;  %v11149_v37 = vld [vmem:[#allocation167_spill] sm:$0xff] }
 0x8cf   : >> { %4536 = vrot.lane.b32.xlu0 %v9397_v27, %s6176_s7  ;;  %v9691_v7 = vmin.f32 %v4193_v4, %v4217_v1  ;;  %v3744_v1 = vmin.f32 %v3714_v28, %v3738_v0  ;;  %v3770_v48 = vmul.f32 %v11148_v45, %v3740_v59  ;;  %v11153_v28 = vld [vmem:[#allocation170_spill] sm:$0xff] }
 0x8d0   : >> { %v9693_v11 = vmin.f32 %v4192_v39, %v4216_v16  ;;  %v4207_v60 = vpop.permute.xlu1 %4206  ;;  %v3745_v39 = vmin.f32 %v3715_v57, %v3739_v22  ;;  %v11147_v16 = vld [vmem:[#allocation165_spill] sm:$0xff]  ;;  %v3773_v36 = vmul.f32 %v11149_v37, %v3743_v2  ;;  %v9717_v10 = vadd.f32 %v3743_v2, %v11150_v52  ;;  %v11151_v22 = vld [vmem:[#allocation168_spill] sm:$0xff] }
 0x8d1   : >> { %v4205_v27 = vpop.permute.xlu0 %4204  ;;  %v4219_v3 = vmul.f32 %v10881_v53, %v4207_v60  ;;  %v3771_v8 = vmul.f32 %v11147_v16, %v3741_v33  ;;  %v3772_v0 = vmul.f32 %v11151_v22, %v3742_v41  ;;  %v11152_v57 = vld [vmem:[#allocation169_spill] sm:$0xff]  ;;  %v11154_v16 = vld [vmem:[#allocation171_spill] sm:$0xff]  ;;  %v9746_v52 = vadd.f32 %v3770_v48, %v9604_v20 }
 0x8d2   : >> { %v4218_v4 = vmul.f32 %v10880_v24, %v4205_v27  ;;  %4542 = vrot.lane.b32.xlu1 %v9427_v58, %s6176_s7  ;;  %v3775_v61 = vmul.f32 %v11152_v57, %v3745_v39  ;;  %v3774_v58 = vmul.f32 %v11153_v28, %v3744_v1  ;;  %v3801_v45 = vmul.f32 %v11154_v16, %v3741_v33  ;;  %v11158_v33 = vld [vmem:[#allocation84_spill] sm:$0xff] }
 0x8d3   : >> { %4540 = vrot.lane.b32.xlu0 %v9432_v43, %s6176_s7  ;;  %v9712_v15 = vmin.f32 %v4195_v18, %v4219_v3  ;;  %v9723_v43 = vadd.f32 %v3742_v41, %v9590_v62  ;;  %v9733_v3 = vadd.f32 %v3745_v39, %v9593_v6  ;;  %v9739_v37 = vadd.f32 %v3771_v8, %v9601_v63  ;;  %v11157_v62 = vld [vmem:[#allocation83_spill] sm:$0xff]  ;;  %v11160_v28 = vld [vmem:[#allocation176_spill] sm:$0xff] }
 0x8d4   : >> { %v9714_v38 = vmin.f32 %v4194_v50, %v4218_v4  ;;  %v4235_v60 = vpop.permute.xlu1 %4234  ;;  %v9736_v4 = vadd.f32 %v3744_v1, %v9598_v55  ;;  %v9749_v22 = vadd.f32 %v3773_v36, %v9607_v30  ;;  %v11159_v6 = vld [vmem:[#allocation175_spill] sm:$0xff]  ;;  %v3804_v55 = vmul.f32 %v11160_v28, %v3744_v1  ;;  %v11166_v36 = vld [vmem:[#allocation173_spill] sm:$0xff] }
 0x8d5   : >> { %v4233_v27 = vpop.permute.xlu0 %4232  ;;  %v9727_v18 = vmul.f32 %v4235_v60, %v9663_v5  ;;  %v3805_v57 = vmul.f32 %v11159_v6, %v3745_v39  ;;  %v9754_v60 = vadd.f32 %v3772_v0, %v9610_v17  ;;  %v9757_v63 = vadd.f32 %v3775_v61, %v9613_v19  ;;  %v11163_v39 = vld [vmem:[#allocation187_spill] sm:$0xff]  ;;  %v11167_v0 = vld [vmem:[#allocation174_spill] sm:$0xff]  ;;  %v11171_v6 = vld [vmem:[#allocation177_spill] sm:$0xff] }
 0x8d6   : >> { %v9730_v50 = vmul.f32 %v4233_v27, %v9665_v34  ;;  %4558 = vrot.lane.b32.xlu1 %v11157_v62, %s6176_s7  ;;  %v9760_v8 = vadd.f32 %v3774_v58, %v9627_v46  ;;  %v11161_v27 = vld [vmem:[#allocation172_spill] sm:$0xff]  ;;  %v9766_v30 = vadd.f32 %v3801_v45, %v9630_v26  ;;  %v3859_v1 = vmul.f32 %v10881_v53, %v11163_v39  ;;  %v11169_v62 = vld [vmem:[#allocation97_spill] sm:$0xff]  ;;  %v11170_v26 = vld [vmem:[#allocation98_spill] sm:$0xff] }
 0x8d7   : >> { %11155 = vst [vmem:[#allocation115_spill] sm:$0xff] %v9727_v18  ;;  %4556 = vrot.lane.b32.xlu0 %v11158_v33, %s6176_s7  ;;  %v9763_v16 = vmul.f32 %v11161_v27, %v3740_v59  ;;  %v3803_v46 = vmul.f32 %v11166_v36, %v3743_v2  ;;  %v3802_v61 = vmul.f32 %v11167_v0, %v3742_v41  ;;  %v11168_v59 = vld [vmem:[#allocation188_spill] sm:$0xff]  ;;  %v11172_v27 = vld [vmem:[#allocation181_spill] sm:$0xff]  ;;  %v11173_v41 = vld [vmem:[#allocation178_spill] sm:$0xff] }
 0x8d8   : >> { %11156 = vst [vmem:[#allocation116_spill] sm:$0xff] %v9730_v50  ;;  %v4239_v20 = vpop.permute.xlu1 %4238  ;;  %11162 = vst [vmem:[#allocation103_spill] sm:$0xff] %v9766_v30  ;;  %v3858_v58 = vmul.f32 %v10880_v24, %v11168_v59  ;;  %v3811_v45 = vadd.f32 %v3805_v57, %v9649_v44  ;;  %v3810_v33 = vadd.f32 %v3804_v55, %v9659_v51  ;;  %v11175_v36 = vld [vmem:[#allocation211_spill] sm:$0xff]  ;;  %v11176_v59 = vld [vmem:[#allocation212_spill] sm:$0xff] }
 0x8d9   : >> { %v4237_v48 = vpop.permute.xlu0 %4236  ;;  %v9771_v17 = vmul.f32 %v4239_v20, %v9691_v7  ;;  %v3831_v28 = vmul.f32 %v8124_v42, %v11171_v6  ;;  %v3835_v2 = vmul.f32 %v11045_v9, %v11172_v27  ;;  %v3830_v20 = vmul.f32 %v8122_v47, %v11173_v41  ;;  %v11177_v55 = vld [vmem:[#allocation179_spill] sm:$0xff] }
 0x8da   : >> { %v9774_v19 = vmul.f32 %v4237_v48, %v9693_v11  ;;  %4562 = vrot.lane.b32.xlu1 %v11169_v62, %s6176_s7  ;;  %v11174_v48 = vld [vmem:[#allocation182_spill] sm:$0xff]  ;;  %v3979_v0 = vmul.f32 %v10881_v53, %v11175_v36  ;;  %v3978_v44 = vmul.f32 %v10880_v24, %v11176_v59  ;;  %v3833_v62 = vmul.f32 %v8128_v29, %v11177_v55  ;;  %v11185_v55 = vld [vmem:[#allocation184_spill] sm:$0xff] }
 0x8db   : >> { %11164 = vst [vmem:[#allocation106_spill] sm:$0xff] %v9771_v17  ;;  %4560 = vrot.lane.b32.xlu0 %v11170_v26, %s6176_s7  ;;  %v3834_v39 = vmul.f32 %v10879_v13, %v11174_v48  ;;  %v9800_v26 = vmin.f32 %v3835_v2, %v3859_v1  ;;  %v11180_v48 = vld [vmem:[#allocation205_spill] sm:$0xff]  ;;  %v11182_v17 = vld [vmem:[#allocation99_spill] sm:$0xff]  ;;  %v11183_v1 = vld [vmem:[#allocation100_spill] sm:$0xff] }
 0x8dc   : >> { %11165 = vst [vmem:[#allocation107_spill] sm:$0xff] %v9774_v19  ;;  %v4243_v57 = vpop.permute.xlu1 %4242  ;;  %v3955_v36 = vmul.f32 %v11045_v9, %v11180_v48  ;;  %v11181_v19 = vld [vmem:[#allocation206_spill] sm:$0xff]  ;;  %v11184_v2 = vld [vmem:[#allocation183_spill] sm:$0xff]  ;;  %v11187_v48 = vld [vmem:[#allocation236_spill] sm:$0xff] }
 0x8dd   : >> { %v4241_v51 = vpop.permute.xlu0 %4240  ;;  %v9803_v6 = vmul.f32 %v4243_v57, %v9712_v15  ;;  %v9808_v41 = vmin.f32 %v3834_v39, %v3858_v58  ;;  %v3954_v59 = vmul.f32 %v10879_v13, %v11181_v19  ;;  %v3855_v57 = vmul.f32 %v8136_v40, %v11184_v2  ;;  %v11186_v58 = vld [vmem:[#allocation235_spill] sm:$0xff] }
 0x8de   : >> { %v9806_v27 = vmul.f32 %v4241_v51, %v9714_v38  ;;  %4566 = vrot.lane.b32.xlu1 %v11182_v17, %s6176_s7  ;;  %v3854_v51 = vmul.f32 %v8134_v23, %v11185_v55  ;;  %v4099_v39 = vmul.f32 %v10881_v53, %v11186_v58  ;;  %v11188_v19 = vld [vmem:[#allocation199_spill] sm:$0xff]  ;;  %v9830_v50 = vmin.f32 %v3955_v36, %v3979_v0  ;;  %v11191_v58 = vld [vmem:[#allocation230_spill] sm:$0xff] }
 0x8df   : >> { %11178 = vst [vmem:[#allocation108_spill] sm:$0xff] %v9803_v6  ;;  %4564 = vrot.lane.b32.xlu0 %v11183_v1, %s6176_s7  ;;  %v3925_v17 = vmul.f32 %v11188_v19, %v9800_v26  ;;  %v11189_v6 = vld [vmem:[#allocation200_spill] sm:$0xff]  ;;  %v9832_v2 = vmin.f32 %v3954_v59, %v3978_v44  ;;  %v4074_v53 = vmul.f32 %v10879_v13, %v11191_v58  ;;  %v11196_v36 = vld [vmem:[#allocation186_spill] sm:$0xff] }
 0x8e0   : >> { %11179 = vst [vmem:[#allocation104_spill] sm:$0xff] %v9806_v27  ;;  %v4098_v27 = vmul.f32 %v10880_v24, %v11187_v48  ;;  %v3924_v1 = vmul.f32 %v11189_v6, %v9808_v41  ;;  %v4265_v18 = vpop.permute.xlu1 %4264  ;;  %v11194_v24 = vld [vmem:[#allocation180_spill] sm:$0xff]  ;;  %v11195_v6 = vld [vmem:[#allocation185_spill] sm:$0xff]  ;;  %v3856_v59 = vmul.f32 %v8138_v12, %v11196_v36  ;;  %v9851_v30 = vld [vmem:[%s8461_s8 + $0x40] sm:$0xff] }
 0x8e1   : >> { %v4263_v55 = vpop.permute.xlu0 %4262  ;;  %v9839_v48 = vmul.f32 %v4265_v18, %v9663_v5  ;;  %v3832_v0 = vmul.f32 %v11043_v14, %v11194_v24  ;;  %v3857_v44 = vmul.f32 %v8140_v32, %v11195_v6  ;;  %11197 = vst [vmem:[#allocation117_spill] sm:$0xff] %v9851_v30  ;;  %v11199_v18 = vld [vmem:[#allocation223_spill] sm:$0xff]  ;;  %v11200_v24 = vld [vmem:[#allocation224_spill] sm:$0xff]  ;;  %v9864_v6 = vmin.f32 %v4075_v25, %v4099_v39 }
 0x8e2   : >> { %v9842_v19 = vmul.f32 %v4263_v55, %v9665_v34  ;;  %4482 = vrot.lane.b32.xlu1 %v9851_v30, %s6175_s22  ;;  %v4045_v55 = vmul.f32 %v11199_v18, %v9830_v50  ;;  %v4044_v58 = vmul.f32 %v11200_v24, %v9832_v2  ;;  %v9866_v36 = vmin.f32 %v4074_v53, %v4098_v27  ;;  %v11202_v30 = vld [vmem:[#allocation96_spill] sm:$0xff] }
 0x8e3   : >> { %11192 = vst [vmem:[#allocation109_spill] sm:$0xff] %v9839_v48  ;;  %4480 = vrot.lane.b32.xlu0 %v9856_v35, %s6175_s22  ;;  %v9870_v48 = vmin.f32 %v3830_v20, %v3854_v51  ;;  %v3931_v13 = vadd.f32 %v3925_v17, %v3811_v45  ;;  %v3930_v9 = vadd.f32 %v3924_v1, %v3810_v33  ;;  %v11201_v35 = vld [vmem:[#allocation95_spill] sm:$0xff] }
 0x8e4   : >> { %11193 = vst [vmem:[#allocation110_spill] sm:$0xff] %v9842_v19  ;;  %v9868_v19 = vmin.f32 %v3831_v28, %v3855_v57  ;;  %v4269_v34 = vpop.permute.xlu1 %4268  ;;  %v4165_v18 = vmul.f32 %v11201_v35, %v9864_v6  ;;  %v4164_v24 = vmul.f32 %v11202_v30, %v9866_v36  ;;  %v9884_v28 = vadd.f32 %v9763_v16, %v9632_v31  ;;  %v9893_v20 = vld [vmem:[%s8461_s8 + $0x5c] sm:$0xff] }
 0x8e5   : >> { %v4267_v5 = vpop.permute.xlu0 %4266  ;;  %v9877_v25 = vmul.f32 %v4269_v34, %v9691_v7  ;;  %v9887_v45 = vadd.f32 %v3803_v46, %v9635_v49  ;;  %v9890_v33 = vadd.f32 %v3802_v61, %v9637_v21  ;;  %v9898_v34 = vld [vmem:[%s8461_s8 + $0x54] sm:$0xff]  ;;  %v9904_v31 = vmin.f32 %v3832_v0, %v3856_v59 }
 0x8e6   : >> { %v9880_v53 = vmul.f32 %v4267_v5, %v9693_v11  ;;  %4504 = vrot.lane.b32.xlu1 %v9893_v20, %s6175_s22  ;;  %v9902_v5 = vmin.f32 %v3833_v62, %v3857_v44  ;;  %v4051_v49 = vadd.f32 %v4045_v55, %v3931_v13  ;;  %v4050_v16 = vadd.f32 %v4044_v58, %v3930_v9  ;;  %v11209_v46 = vld [vmem:[#allocation189_spill] sm:$0xff]  ;;  %v11210_v62 = vld [vmem:[#allocation190_spill] sm:$0xff] }
 0x8e7   : >> { %11203 = vst [vmem:[#allocation119_spill] sm:$0xff] %v9877_v25  ;;  %11205 = vst [vmem:[#allocation121_spill] sm:$0xff] %v9887_v45  ;;  %4502 = vrot.lane.b32.xlu0 %v9898_v34, %s6175_s22  ;;  %v9908_v21 = vadd.f32 %v9868_v19, %v9696_v54  ;;  %v9912_v30 = vadd.f32 %v9870_v48, %v9699_v56  ;;  %v3891_v61 = vmul.f32 %v11209_v46, %v9868_v19  ;;  %v11211_v54 = vld [vmem:[#allocation191_spill] sm:$0xff]  ;;  %v11212_v56 = vld [vmem:[#allocation192_spill] sm:$0xff] }
 0x8e8   : >> { %11204 = vst [vmem:[#allocation120_spill] sm:$0xff] %v9880_v53  ;;  %11206 = vst [vmem:[#allocation122_spill] sm:$0xff] %v9890_v33  ;;  %v3890_v27 = vmul.f32 %v11210_v62, %v9870_v48  ;;  %v4273_v57 = vpop.permute.xlu1 %4272  ;;  %v4171_v39 = vadd.f32 %v4165_v18, %v4051_v49  ;;  %v4170_v13 = vadd.f32 %v4164_v24, %v4050_v16  ;;  %v11213_v44 = vld [vmem:[#allocation193_spill] sm:$0xff]  ;;  %v11228_v53 = vld [vmem:[#allocation204_spill] sm:$0xff] }
 0x8e9   : >> { %11207 = vst [vmem:[#allocation123_spill] sm:$0xff] %v9902_v5  ;;  %11208 = vst [vmem:[#allocation135_spill] sm:$0xff] %v9904_v31  ;;  %v4271_v51 = vpop.permute.xlu0 %4270  ;;  %v4285_v9 = vmul.f32 %v4273_v57, %v9712_v15  ;;  %v3893_v1 = vmul.f32 %v11211_v54, %v9902_v5  ;;  %v3892_v0 = vmul.f32 %v11212_v56, %v9904_v31  ;;  %v9927_v35 = vld [vmem:[%s8461_s8 + $0x78] sm:$0xff]  ;;  %v9932_v55 = vld [vmem:[%s8461_s8 + $0x70] sm:$0xff] }
 0x8ea   : >> { %v4284_v17 = vmul.f32 %v4271_v51, %v9714_v38  ;;  %v3895_v59 = vmul.f32 %v11213_v44, %v9800_v26  ;;  %4508 = vrot.lane.b32.xlu1 %v9927_v35, %s6175_s22  ;;  %v3869_v58 = vadd.f32 %v9902_v5, %v9717_v10  ;;  %v3868_v18 = vadd.f32 %v9904_v31, %v9723_v43  ;;  %v11216_v57 = vld [vmem:[#allocation194_spill] sm:$0xff]  ;;  %v11219_v56 = vld [vmem:[#allocation209_spill] sm:$0xff] }
 0x8eb   : >> { %4506 = vrot.lane.b32.xlu0 %v9932_v55, %s6175_s22  ;;  %v9940_v24 = vadd.f32 %v4285_v9, %v4171_v39  ;;  %v3871_v16 = vadd.f32 %v9800_v26, %v9733_v3  ;;  %v3870_v46 = vadd.f32 %v9808_v41, %v9736_v4  ;;  %v3897_v62 = vadd.f32 %v3891_v61, %v9739_v37  ;;  %v11217_v39 = vld [vmem:[#allocation207_spill] sm:$0xff]  ;;  %v11218_v9 = vld [vmem:[#allocation208_spill] sm:$0xff]  ;;  %v11220_v61 = vld [vmem:[#allocation201_spill] sm:$0xff] }
 0x8ec   : >> { %v9942_v49 = vadd.f32 %v4284_v17, %v4170_v13  ;;  %v3894_v10 = vmul.f32 %v11216_v57, %v9808_v41  ;;  %v4295_v51 = vpop.permute.xlu1 %4294  ;;  %v3896_v43 = vadd.f32 %v3890_v27, %v9746_v52  ;;  %v3975_v13 = vmul.f32 %v8136_v40, %v11217_v39  ;;  %v9966_v41 = vld [vmem:[%s8461_s8 + $0x94] sm:$0xff]  ;;  %v9971_v52 = vld [vmem:[%s8461_s8 + $0x8c] sm:$0xff]  ;;  %v11225_v57 = vld [vmem:[#allocation195_spill] sm:$0xff] }
 0x8ed   : >> { %11214 = vst [vmem:[#allocation124_spill] sm:$0xff] %v9940_v24  ;;  %v4293_v54 = vpop.permute.xlu0 %4292  ;;  %v3974_v17 = vmul.f32 %v8134_v23, %v11218_v9  ;;  %v3977_v3 = vmul.f32 %v8140_v32, %v11219_v56  ;;  %v3899_v4 = vadd.f32 %v3893_v1, %v9749_v22  ;;  %v9960_v37 = vadd.f32 %v3892_v0, %v9754_v60  ;;  %v11221_v22 = vld [vmem:[#allocation202_spill] sm:$0xff]  ;;  %v11222_v1 = vld [vmem:[#allocation203_spill] sm:$0xff]  ;;  %v11233_v33 = vld [vmem:[#allocation233_spill] sm:$0xff] }
 0x8ee   : >> { %11215 = vst [vmem:[#allocation125_spill] sm:$0xff] %v9942_v49  ;;  %v9963_v26 = vadd.f32 %v3895_v59, %v9757_v63  ;;  %4512 = vrot.lane.b32.xlu1 %v9966_v41, %s6175_s22  ;;  %v3951_v27 = vmul.f32 %v8124_v42, %v11220_v61  ;;  %v3950_v60 = vmul.f32 %v8122_v47, %v11221_v22  ;;  %v11223_v0 = vld [vmem:[#allocation210_spill] sm:$0xff]  ;;  %v11226_v9 = vld [vmem:[#allocation231_spill] sm:$0xff]  ;;  %v11227_v49 = vld [vmem:[#allocation232_spill] sm:$0xff] }
 0x8ef   : >> { %4510 = vrot.lane.b32.xlu0 %v9971_v52, %s6175_s22  ;;  %v3953_v63 = vmul.f32 %v8128_v29, %v11222_v1  ;;  %v3976_v44 = vmul.f32 %v8138_v12, %v11223_v0  ;;  %v9984_v59 = vadd.f32 %v3894_v10, %v9760_v8  ;;  %v3921_v39 = vmul.f32 %v11225_v57, %v9868_v19  ;;  %v11231_v10 = vld [vmem:[#allocation225_spill] sm:$0xff]  ;;  %v11232_v57 = vld [vmem:[#allocation226_spill] sm:$0xff]  ;;  %s6178_s22 = smov (%p10338_p13), [#allocation10]  }
 0x8f0   : >> { %v4095_v56 = vmul.f32 %v8136_v40, %v11226_v9  ;;  %v4094_v61 = vmul.f32 %v8134_v23, %v11227_v49  ;;  %v4299_v24 = vpop.permute.xlu1 %4298  ;;  %v3952_v1 = vmul.f32 %v11043_v14, %v11228_v53  ;;  %v9994_v25 = vmin.f32 %v3951_v27, %v3975_v13  ;;  %v11234_v45 = vld [vmem:[#allocation101_spill] sm:$0xff]  ;;  %v11235_v53 = vld [vmem:[#allocation102_spill] sm:$0xff]  ;;  %v11236_v13 = vld [vmem:[#allocation196_spill] sm:$0xff] }
 0x8f1   : >> { %11224 = vst [vmem:[#allocation129_spill] sm:$0xff] %v9984_v59  ;;  %v4297_v22 = vpop.permute.xlu0 %4296  ;;  %v9996_v0 = vmin.f32 %v3950_v60, %v3974_v17  ;;  %v9998_v8 = vmin.f32 %v3953_v63, %v3977_v3  ;;  %v4071_v19 = vmul.f32 %v8124_v42, %v11231_v10  ;;  %v4070_v9 = vmul.f32 %v8122_v47, %v11232_v57  ;;  %v11237_v27 = vld [vmem:[#allocation213_spill] sm:$0xff]  ;;  %v11238_v63 = vld [vmem:[#allocation214_spill] sm:$0xff]  ;;  %v11239_v57 = vld [vmem:[#allocation227_spill] sm:$0xff] }
 0x8f2   : >> { %v4097_v49 = vmul.f32 %v8140_v32, %v11233_v33  ;;  %4594 = vrot.lane.b32.xlu1 %v11234_v45, %s6176_s7  ;;  %v10012_v17 = vmul.f32 %v11236_v13, %v9870_v48  ;;  %v10014_v3 = vmin.f32 %v3952_v1, %v3976_v44  ;;  %v4011_v60 = vmul.f32 %v11237_v27, %v9994_v25  ;;  %v11241_v44 = vld [vmem:[#allocation103_spill] sm:$0xff]  ;;  %v11245_v59 = vld [vmem:[#allocation112_spill] sm:$0xff] }
 0x8f3   : >> { %11229 = vst [vmem:[#allocation136_spill] sm:$0xff] %v9996_v0  ;;  %11230 = vst [vmem:[#allocation126_spill] sm:$0xff] %v9998_v8  ;;  %4592 = vrot.lane.b32.xlu0 %v11235_v53, %s6176_s7  ;;  %v4010_v10 = vmul.f32 %v11238_v63, %v9996_v0  ;;  %v4073_v33 = vmul.f32 %v8128_v29, %v11239_v57  ;;  %v10022_v31 = vmin.f32 %v4071_v19, %v4095_v56  ;;  %v11240_v53 = vld [vmem:[#allocation234_spill] sm:$0xff]  ;;  %v11243_v56 = vld [vmem:[#allocation215_spill] sm:$0xff] }
 0x8f4   : >> { %v10024_v45 = vmin.f32 %v4070_v9, %v4094_v61  ;;  %v4096_v5 = vmul.f32 %v8138_v12, %v11240_v53  ;;  %v4303_v48 = vpop.permute.xlu1 %4302  ;;  %v10029_v1 = vadd.f32 %v3921_v39, %v11241_v44  ;;  %v3987_v27 = vadd.f32 %v9994_v25, %v9908_v21  ;;  %v11244_v19 = vld [vmem:[#allocation228_spill] sm:$0xff]  ;;  %v11246_v39 = vld [vmem:[#allocation113_spill] sm:$0xff] }
 0x8f5   : >> { %v4301_v13 = vpop.permute.xlu0 %4300  ;;  %v3986_v63 = vadd.f32 %v9996_v0, %v9912_v30  ;;  %v3989_v57 = vadd.f32 %v9998_v8, %v3869_v58  ;;  %v4013_v61 = vmul.f32 %v11243_v56, %v9998_v8  ;;  %v4072_v9 = vmul.f32 %v11043_v14, %v11244_v19 }
 0x8f6   : >> { %11242 = vst [vmem:[#allocation127_spill] sm:$0xff] %v10029_v1  ;;  %v10040_v53 = vmin.f32 %v4073_v33, %v4097_v49  ;;  %4598 = vrot.lane.b32.xlu1 %v11245_v59, %s6176_s7  ;;  %v3988_v21 = vadd.f32 %v10014_v3, %v3868_v18  ;;  %v3991_v30 = vadd.f32 %v9830_v50, %v3871_v16 }
 0x8f7   : >> { %4596 = vrot.lane.b32.xlu0 %v11246_v39, %s6176_s7  ;;  %v3990_v58 = vadd.f32 %v9832_v2, %v3870_v46  ;;  %v4017_v44 = vadd.f32 %v4011_v60, %v3897_v62  ;;  %v4016_v1 = vadd.f32 %v4010_v10, %v3896_v43  ;;  %v4107_v56 = vadd.f32 %v10022_v31, %v3987_v27  ;;  %v11247_v46 = vld [vmem:[#allocation216_spill] sm:$0xff]  ;;  %v11248_v60 = vld [vmem:[#allocation117_spill] sm:$0xff]  ;;  %v11250_v10 = vld [vmem:[#allocation114_spill] sm:$0xff] }
 0x8f8   : >> { %v4106_v19 = vadd.f32 %v10024_v45, %v3986_v63  ;;  %v10051_v49 = vmin.f32 %v4072_v9, %v4096_v5  ;;  %v4319_v33 = vpop.permute.xlu1 %4318  ;;  %v4311_v59 = vmul.f32 %v8124_v42, %v4295_v51  ;;  %v4310_v39 = vmul.f32 %v8122_v47, %v4293_v54  ;;  %v11249_v5 = vld [vmem:[#allocation118_spill] sm:$0xff]  ;;  %v11251_v27 = vld [vmem:[#allocation105_spill] sm:$0xff] }
 0x8f9   : >> { %v4317_v8 = vpop.permute.xlu0 %4316  ;;  %v4335_v18 = vmul.f32 %v8136_v40, %v4319_v33  ;;  %v4019_v0 = vadd.f32 %v4013_v61, %v3899_v4  ;;  %v4012_v62 = vmul.f32 %v11247_v46, %v10014_v3  ;;  %v4109_v43 = vadd.f32 %v10040_v53, %v3989_v57 }
 0x8fa   : >> { %v4334_v16 = vmul.f32 %v8134_v23, %v4317_v8  ;;  %4602 = vrot.lane.b32.xlu1 %v11248_v60, %s6176_s7  ;;  %v4227_v51 = vadd.f32 %v11250_v10, %v4107_v56  ;;  %v4226_v54 = vadd.f32 %v11251_v27, %v4106_v19  ;;  %v4108_v4 = vadd.f32 %v10051_v49, %v3988_v21  ;;  %v11252_v8 = vld [vmem:[#allocation92_spill] sm:$0xff] }
 0x8fb   : >> { %4600 = vrot.lane.b32.xlu0 %v11249_v5, %s6176_s7  ;;  %v10066_v63 = vmin.f32 %v4311_v59, %v4335_v18  ;;  %v4131_v61 = vmul.f32 %v11252_v8, %v10022_v31  ;;  %v4313_v57 = vmul.f32 %v8128_v29, %v4299_v24  ;;  %v4312_v33 = vmul.f32 %v11043_v14, %v4297_v22  ;;  %v11253_v24 = vld [vmem:[#allocation87_spill] sm:$0xff] }
 0x8fc   : >> { %v10068_v9 = vmin.f32 %v4310_v39, %v4334_v16  ;;  %v4323_v46 = vpop.permute.xlu1 %4322  ;;  %v4018_v21 = vadd.f32 %v4012_v62, %v9960_v37  ;;  %v4111_v39 = vadd.f32 %v9864_v6, %v3991_v30  ;;  %v4130_v18 = vmul.f32 %v11253_v24, %v10024_v45  ;;  %v11254_v62 = vld [vmem:[#allocation73_spill] sm:$0xff] }
 0x8fd   : >> { %v4321_v60 = vpop.permute.xlu0 %4320  ;;  %v10076_v5 = vadd.f32 %v10066_v63, %v4227_v51  ;;  %v4337_v19 = vmul.f32 %v8140_v32, %v4323_v46  ;;  %v4229_v22 = vadd.f32 %v9691_v7, %v4109_v43  ;;  %v4228_v16 = vadd.f32 %v9693_v11, %v4108_v4  ;;  %v11256_v11 = vld [vmem:[#allocation77_spill] sm:$0xff]  ;;  %v11257_v43 = vld [vmem:[#allocation74_spill] sm:$0xff] }
 0x8fe   : >> { %v10079_v56 = vadd.f32 %v10068_v9, %v4226_v54  ;;  %v4336_v59 = vmul.f32 %v8138_v12, %v4321_v60  ;;  %4624 = vrot.lane.b32.xlu1 %v9893_v20, %s6176_s7  ;;  %v4110_v37 = vadd.f32 %v9866_v36, %v3990_v58  ;;  %v4137_v30 = vadd.f32 %v4131_v61, %v4017_v44  ;;  %v11255_v54 = vld [vmem:[#allocation71_spill] sm:$0xff]  ;;  %v11258_v58 = vld [vmem:[#allocation88_spill] sm:$0xff] }
 0x8ff   : >> { %4622 = vrot.lane.b32.xlu0 %v9898_v34, %s6176_s7  ;;  %v10093_v10 = vmin.f32 %v4313_v57, %v4337_v19  ;;  %v4315_v27 = vmul.f32 %v11254_v62, %v4303_v48  ;;  %v4314_v8 = vmul.f32 %v11255_v54, %v4301_v13  ;;  %v4136_v57 = vadd.f32 %v4130_v18, %v4016_v1  ;;  %v11259_v48 = vld [vmem:[#allocation89_spill] sm:$0xff]  ;;  %v11261_v18 = vld [vmem:[#allocation218_spill] sm:$0xff] }
 0x900   : >> { %v10095_v51 = vmin.f32 %v4312_v33, %v4336_v59  ;;  %v4327_v46 = vpop.permute.xlu1 %4326  ;;  %v4133_v44 = vmul.f32 %v11258_v58, %v10040_v53  ;;  %v4132_v61 = vmul.f32 %v11259_v48, %v10051_v49  ;;  %v4231_v13 = vadd.f32 %v9712_v15, %v4111_v39  ;;  %v11260_v1 = vld [vmem:[#allocation217_spill] sm:$0xff] }
 0x901   : >> { %v4325_v20 = vpop.permute.xlu0 %4324  ;;  %v10101_v60 = vadd.f32 %v10093_v10, %v4229_v22  ;;  %v4339_v34 = vmul.f32 %v11256_v11, %v4327_v46  ;;  %v4230_v33 = vadd.f32 %v9714_v38, %v4110_v37  ;;  %v4015_v24 = vmul.f32 %v11260_v1, %v9830_v50 }
 0x902   : >> { %v10104_v7 = vadd.f32 %v10095_v51, %v4228_v16  ;;  %v4338_v4 = vmul.f32 %v11257_v43, %v4325_v20  ;;  %4628 = vrot.lane.b32.xlu1 %v9927_v35, %s6176_s7  ;;  %v4014_v22 = vmul.f32 %v11261_v18, %v9832_v2  ;;  %v11262_v16 = vld [vmem:[#allocation115_spill] sm:$0xff]  ;;  %v11263_v35 = vld [vmem:[#allocation116_spill] sm:$0xff]  ;;  %v3926_v50 = vadd.f32 %v10012_v17, %v9884_v28 }
 0x903   : >> { %4626 = vrot.lane.b32.xlu0 %v9932_v55, %s6176_s7  ;;  %v10118_v19 = vmin.f32 %v4315_v27, %v4339_v34  ;;  %v4257_v46 = vadd.f32 %v11262_v16, %v4137_v30  ;;  %v4256_v20 = vadd.f32 %v11263_v35, %v4136_v57  ;;  %v4139_v2 = vadd.f32 %v4133_v44, %v4019_v0  ;;  %v11264_v30 = vld [vmem:[#allocation86_spill] sm:$0xff]  ;;  %v11266_v0 = vld [vmem:[#allocation129_spill] sm:$0xff]  ;;  %v11268_v44 = vld [vmem:[#allocation136_spill] sm:$0xff] }
 0x904   : >> { %v10120_v59 = vmin.f32 %v4314_v8, %v4338_v4  ;;  %v4355_v58 = vpop.permute.xlu1 %4354  ;;  %v4138_v27 = vadd.f32 %v4132_v61, %v4018_v21  ;;  %v4135_v8 = vmul.f32 %v11264_v30, %v9864_v6  ;;  %v11265_v34 = vld [vmem:[#allocation90_spill] sm:$0xff]  ;;  %v4021_v28 = vadd.f32 %v4015_v24, %v9963_v26  ;;  %v11267_v21 = vld [vmem:[#allocation219_spill] sm:$0xff]  ;;  %v11269_v61 = vld [vmem:[#allocation220_spill] sm:$0xff] }
 0x905   : >> { %v4353_v55 = vpop.permute.xlu0 %4352  ;;  %v10129_v15 = vadd.f32 %v10118_v19, %v4231_v13  ;;  %v4371_v39 = vmul.f32 %v4355_v58, %v10066_v63  ;;  %v4134_v4 = vmul.f32 %v11265_v34, %v9866_v36  ;;  %v4020_v17 = vadd.f32 %v4014_v22, %v11266_v0  ;;  %v11270_v6 = vld [vmem:[#allocation106_spill] sm:$0xff]  ;;  %v11271_v18 = vld [vmem:[#allocation107_spill] sm:$0xff]  ;;  %v11273_v26 = vld [vmem:[#allocation197_spill] sm:$0xff] }
 0x906   : >> { %v10132_v38 = vadd.f32 %v10120_v59, %v4230_v33  ;;  %v4370_v37 = vmul.f32 %v4353_v55, %v10068_v9  ;;  %4632 = vrot.lane.b32.xlu1 %v9966_v41, %s6176_s7  ;;  %v4041_v41 = vmul.f32 %v11267_v21, %v9994_v25  ;;  %v4259_v1 = vadd.f32 %v11270_v6, %v4139_v2  ;;  %v11272_v35 = vld [vmem:[#allocation123_spill] sm:$0xff]  ;;  %v11281_v6 = vld [vmem:[#allocation222_spill] sm:$0xff] }
 0x907   : >> { %4630 = vrot.lane.b32.xlu0 %v9971_v52, %s6176_s7  ;;  %v10146_v57 = vadd.f32 %v4371_v39, %v4257_v46  ;;  %v4040_v52 = vmul.f32 %v11269_v61, %v11268_v44  ;;  %v4258_v36 = vadd.f32 %v11271_v18, %v4138_v27  ;;  %v3923_v24 = vmul.f32 %v11273_v26, %v11272_v35  ;;  %v11274_v22 = vld [vmem:[#allocation135_spill] sm:$0xff]  ;;  %v11277_v39 = vld [vmem:[#allocation85_spill] sm:$0xff]  ;;  %v11279_v61 = vld [vmem:[#allocation126_spill] sm:$0xff]  ;;  %s5917_s7 = sshll.u32 (%p10338_p13), %s6178_s22, 4  ;;  %s5918_s7 = int_to_ptr.vmem [resolvable:$false] %s5917_s7 }
 0x908   : >> { %v10148_v48 = vadd.f32 %v4370_v37, %v4256_v20  ;;  %v4359_v13 = vpop.permute.xlu1 %4358  ;;  %v11275_v20 = vld [vmem:[#allocation198_spill] sm:$0xff]  ;;  %v11276_v25 = vld [vmem:[#allocation91_spill] sm:$0xff]  ;;  %v4160_v37 = vmul.f32 %v11277_v39, %v10024_v45  ;;  %v4141_v30 = vadd.f32 %v4135_v8, %v4021_v28  ;;  %v4140_v2 = vadd.f32 %v4134_v4, %v4020_v17  ;;  %v11282_v26 = vld [vmem:[#allocation108_spill] sm:$0xff]  ;;  %s5919_s1 = scalar_lea.vmem (%p10338_p13), %s5918_s7, 32  ;;  %p5920_p4 = scmp.lt.s32.totalorder (%p10338_p13), %s10532_s13, %s5918_s7 }
 0x909   : >> { %v4357_v33 = vpop.permute.xlu0 %4356  ;;  %v4373_v16 = vmul.f32 %v4359_v13, %v10093_v10  ;;  %v3922_v58 = vmul.f32 %v11275_v20, %v11274_v22  ;;  %v4161_v55 = vmul.f32 %v11276_v25, %v10022_v31  ;;  %v11278_v0 = vld [vmem:[#allocation127_spill] sm:$0xff]  ;;  %v4046_v44 = vadd.f32 %v4040_v52, %v3926_v50  ;;  %v11280_v13 = vld [vmem:[#allocation221_spill] sm:$0xff]  ;;  %v11283_v45 = vld [vmem:[#allocation104_spill] sm:$0xff]  ;;  %p5921_p3 = scmp.lt.s32.totalorder (%p10338_p13), %s5919_s1, %s5913_s6 }
 0x90a   : >> { %v4372_v46 = vmul.f32 %v4357_v33, %v10095_v51  ;;  %v4047_v21 = vadd.f32 %v4041_v41, %v11278_v0  ;;  %v4043_v33 = vmul.f32 %v11280_v13, %v11279_v61  ;;  %v4042_v18 = vmul.f32 %v11281_v6, %v10014_v3  ;;  %v11284_v17 = vld [vmem:[#allocation121_spill] sm:$0xff]  ;;  %v11285_v41 = vld [vmem:[#allocation122_spill] sm:$0xff] }
 0x90b   : >> { %v10168_v34 = vadd.f32 %v4373_v16, %v4259_v1  ;;  %v4261_v22 = vadd.f32 %v11282_v26, %v4141_v30  ;;  %v4260_v8 = vadd.f32 %v11283_v45, %v4140_v2  ;;  %v3929_v1 = vadd.f32 %v3923_v24, %v11284_v17  ;;  %v11286_v16 = vld [vmem:[#allocation93_spill] sm:$0xff]  ;;  %v11287_v3 = vld [vmem:[#allocation94_spill] sm:$0xff]  ;;  %v11291_v26 = vld [vmem:[#allocation120_spill] sm:$0xff]  ;;  %p5922_p5 = por (%p10338_p13), %p5921_p3, %p5920_p4 }
 0x90c   : >> { %v10170_v27 = vadd.f32 %v4372_v46, %v4258_v36  ;;  %v4363_v35 = vpop.permute.xlu1 %4362  ;;  %v3928_v50 = vadd.f32 %v3922_v58, %v11285_v41  ;;  %v4167_v52 = vadd.f32 %v4161_v55, %v4047_v21  ;;  %v4166_v36 = vadd.f32 %v4160_v37, %v4046_v44  ;;  %v11288_v13 = vld [vmem:[#allocation109_spill] sm:$0xff]  ;;  %v11289_v6 = vld [vmem:[#allocation110_spill] sm:$0xff]  ;;  %v11292_v41 = vld [vmem:[#allocation124_spill] sm:$0xff] }
 0x90d   : >> { %v4361_v31 = vpop.permute.xlu0 %4360  ;;  %v4375_v4 = vmul.f32 %v4363_v35, %v10118_v19  ;;  %v4163_v46 = vmul.f32 %v11286_v16, %v10040_v53  ;;  %v4162_v20 = vmul.f32 %v11287_v3, %v10051_v49  ;;  %v4049_v30 = vadd.f32 %v4043_v33, %v3929_v1  ;;  %v11290_v33 = vld [vmem:[#allocation119_spill] sm:$0xff]  ;;  %p5923_p1 = pnand (%p10338_p13), %p5922_p5, %p5916_p11 }
 0x90e   : >> { %v4374_v28 = vmul.f32 %v4361_v31, %v10120_v59  ;;  %v4048_v2 = vadd.f32 %v4042_v18, %v3928_v50  ;;  %v4287_v24 = vadd.f32 %v11288_v13, %v4167_v52  ;;  %v4286_v58 = vadd.f32 %v11289_v6, %v4166_v36  ;;  %v11293_v52 = vld [vmem:[#allocation125_spill] sm:$0xff] }
 0x90f   : >> { %v10187_v25 = vadd.f32 %v4375_v4, %v4261_v22  ;;  %v4169_v53 = vadd.f32 %v4163_v46, %v4049_v30 }
 0x910   : >> { %v10189_v39 = vadd.f32 %v4374_v28, %v4260_v8  ;;  %v4385_v0 = vpop.permute.xlu1 %4384  ;;  %v4168_v21 = vadd.f32 %v4162_v20, %v4048_v2 }
 0x911   : >> { %v4383_v61 = vpop.permute.xlu0 %4382  ;;  %v4401_v55 = vmul.f32 %v4385_v0, %v10066_v63  ;;  %v4289_v18 = vadd.f32 %v11290_v33, %v4169_v53 }
 0x912   : >> { %v4400_v37 = vmul.f32 %v4383_v61, %v10068_v9  ;;  %v4288_v22 = vadd.f32 %v11291_v26, %v4168_v21 }
 0x913   : >> { %v10195_v44 = vadd.f32 %v4401_v55, %v4287_v24 }
 0x914   : >> { %v10197_v49 = vadd.f32 %v4400_v37, %v4286_v58  ;;  %v4389_v35 = vpop.permute.xlu1 %4388 }
 0x915   : >> { %v4387_v31 = vpop.permute.xlu0 %4386  ;;  %v4403_v45 = vmul.f32 %v4389_v35, %v10093_v10 }
 0x916   : >> { %v4402_v8 = vmul.f32 %v4387_v31, %v10095_v51 }
 0x917   : >> { %v10203_v4 = vadd.f32 %v4403_v45, %v4289_v18 }
 0x918   : >> { %v10205_v63 = vadd.f32 %v4402_v8, %v4288_v22  ;;  %v4393_v9 = vpop.permute.xlu1 %4392 }
 0x919   : >> { %v4391_v28 = vpop.permute.xlu0 %4390  ;;  %v4405_v17 = vmul.f32 %v4393_v9, %v10118_v19 }
 0x91a   : >> { %v4404_v1 = vmul.f32 %v4391_v28, %v10120_v59 }
 0x91b   : >> { %v10210_v50 = vadd.f32 %v4405_v17, %v11292_v41 }
 0x91c   : >> { %v10213_v36 = vadd.f32 %v4404_v1, %v11293_v52  ;;  %v4415_v16 = vpop.permute.xlu1 %4414 }
 0x91d   : >> { %v4413_v10 = vpop.permute.xlu0 %4412  ;;  %v4431_v0 = vmul.f32 %v8124_v42, %v4415_v16 }
 0x91e   : >> { %v4430_v19 = vmul.f32 %v8122_v47, %v4413_v10 }
 0x920   : >> { %v4419_v46 = vpop.permute.xlu1 %4418 }
 0x921   : >> { %v4417_v51 = vpop.permute.xlu0 %4416  ;;  %v4433_v6 = vmul.f32 %v8128_v29, %v4419_v46 }
 0x922   : >> { %v4432_v58 = vmul.f32 %v11043_v14, %v4417_v51 }
 0x924   : >> { %v4423_v3 = vpop.permute.xlu1 %4422 }
 0x925   : >> { %v4421_v20 = vpop.permute.xlu0 %4420  ;;  %v4435_v26 = vmul.f32 %v11254_v62, %v4423_v3 }
 0x926   : >> { %v4434_v22 = vmul.f32 %v11255_v54, %v4421_v20 }
 0x928   : >> { %v4439_v30 = vpop.permute.xlu1 %4438 }
 0x929   : >> { %v4437_v2 = vpop.permute.xlu0 %4436  ;;  %v4455_v59 = vmul.f32 %v8136_v40, %v4439_v30 }
 0x92a   : >> { %v4454_v61 = vmul.f32 %v8134_v23, %v4437_v2 }
 0x92b   : >> { %v10219_v13 = vmin.f32 %v4431_v0, %v4455_v59 }
 0x92c   : >> { %v10221_v24 = vmin.f32 %v4430_v19, %v4454_v61  ;;  %v4443_v55 = vpop.permute.xlu1 %4442 }
 0x92d   : >> { %v4441_v37 = vpop.permute.xlu0 %4440  ;;  %v4467_v53 = vadd.f32 %v10219_v13, %v10076_v5  ;;  %v4457_v35 = vmul.f32 %v8140_v32, %v4443_v55 }
 0x92e   : >> { %v4466_v21 = vadd.f32 %v10221_v24, %v10079_v56  ;;  %v4456_v31 = vmul.f32 %v8138_v12, %v4441_v37 }
 0x92f   : >> { %v10231_v33 = vmin.f32 %v4433_v6, %v4457_v35 }
 0x930   : >> { %v10233_v18 = vmin.f32 %v4432_v58, %v4456_v31  ;;  %v4447_v45 = vpop.permute.xlu1 %4446 }
 0x931   : >> { %v4445_v8 = vpop.permute.xlu0 %4444  ;;  %v4469_v5 = vadd.f32 %v10231_v33, %v10101_v60  ;;  %v4459_v9 = vmul.f32 %v11256_v11, %v4447_v45 }
 0x932   : >> { %v4468_v56 = vadd.f32 %v10233_v18, %v10104_v7  ;;  %v4458_v28 = vmul.f32 %v11257_v43, %v4445_v8 }
 0x933   : >> { %v10243_v17 = vmin.f32 %v4435_v26, %v4459_v9 }
 0x934   : >> { %v10245_v1 = vmin.f32 %v4434_v22, %v4458_v28  ;;  %v4475_v41 = vpop.permute.xlu1 %4474 }
 0x935   : >> { %v4473_v52 = vpop.permute.xlu0 %4472  ;;  %v4471_v16 = vadd.f32 %v10243_v17, %v10129_v15  ;;  %v4491_v60 = vmul.f32 %v4475_v41, %v10219_v13 }
 0x936   : >> { %v4470_v10 = vadd.f32 %v10245_v1, %v10132_v38  ;;  %v4490_v7 = vmul.f32 %v4473_v52, %v10221_v24 }
 0x937   : >> { %v10254_v46 = vadd.f32 %v4491_v60, %v10146_v57 }
 0x938   : >> { %v10257_v51 = vadd.f32 %v4490_v7, %v10148_v48  ;;  %v4479_v3 = vpop.permute.xlu1 %4478 }
 0x939   : >> { %v4477_v20 = vpop.permute.xlu0 %4476  ;;  %v4493_v30 = vmul.f32 %v4479_v3, %v10231_v33 }
 0x93a   : >> { %v4492_v2 = vmul.f32 %v4477_v20, %v10233_v18 }
 0x93b   : >> { %v10262_v15 = vadd.f32 %v4493_v30, %v10168_v34 }
 0x93c   : >> { %v10265_v38 = vadd.f32 %v4492_v2, %v10170_v27  ;;  %v4535_v0 = vpop.permute.xlu1 %4534 }
 0x93d   : >> { %v4533_v19 = vpop.permute.xlu0 %4532  ;;  %v4551_v55 = vmul.f32 %v8124_v42, %v4535_v0 }
 0x93e   : >> { %v4550_v37 = vmul.f32 %v8122_v47, %v4533_v19 }
 0x940   : >> { %v4539_v59 = vpop.permute.xlu1 %4538 }
 0x941   : >> { %v4537_v57 = vpop.permute.xlu0 %4536  ;;  %v4553_v26 = vmul.f32 %v8128_v29, %v4539_v59 }
 0x942   : >> { %v4552_v22 = vmul.f32 %v11043_v14, %v4537_v57 }
 0x944   : >> { %v4543_v61 = vpop.permute.xlu1 %4542 }
 0x945   : >> { %v4541_v6 = vpop.permute.xlu0 %4540  ;;  %v4555_v3 = vmul.f32 %v11254_v62, %v4543_v61 }
 0x946   : >> { %v4554_v14 = vmul.f32 %v11255_v54, %v4541_v6 }
 0x948   : >> { %v4559_v48 = vpop.permute.xlu1 %4558 }
 0x949   : >> { %v4557_v58 = vpop.permute.xlu0 %4556  ;;  %v4575_v35 = vmul.f32 %v8136_v40, %v4559_v48 }
 0x94a   : >> { %v4574_v34 = vmul.f32 %v8134_v23, %v4557_v58 }
 0x94b   : >> { %v10271_v31 = vmin.f32 %v4551_v55, %v4575_v35 }
 0x94c   : >> { %v10273_v27 = vmin.f32 %v4550_v37, %v4574_v34  ;;  %v4563_v45 = vpop.permute.xlu1 %4562 }
 0x94d   : >> { %v4561_v8 = vpop.permute.xlu0 %4560  ;;  %v10278_v9 = vadd.f32 %v10271_v31, %v4467_v53   ;;  %v4577_v41 = vmul.f32 %v8140_v32, %v4563_v45 }
 0x94e   : >> { %v10281_v28 = vadd.f32 %v10273_v27, %v4466_v21   ;;  %v4576_v52 = vmul.f32 %v8138_v12, %v4561_v8 }
 0x94f   : >> { %v10285_v60 = vmin.f32 %v4553_v26, %v4577_v41 }
 0x950   : >> { %v10287_v7 = vmin.f32 %v4552_v22, %v4576_v52  ;;  %v4567_v20 = vpop.permute.xlu1 %4566  ;;  %5749 = vrcp.f32 (%p10338_p13), %v10281_v28 }
 0x951   : >> { %v4565_v30 = vpop.permute.xlu0 %4564  ;;  %v10292_v53 = vadd.f32 %v10285_v60, %v4469_v5   ;;  %v4579_v2 = vmul.f32 %v11256_v11, %v4567_v20  ;;  %5751 = vrcp.f32 (%p10338_p13), %v10278_v9 }
 0x952   : >> { %v10295_v21 = vadd.f32 %v10287_v7, %v4468_v56   ;;  %v4578_v0 = vmul.f32 %v11257_v43, %v4565_v30 }
 0x953   : >> { %v4585_v19 = vmin.f32 %v4555_v3, %v4579_v2 }
 0x954   : >> { %v4584_v59 = vmin.f32 %v4554_v14, %v4578_v0  ;;  %v4483_v57 = vpop.permute.xlu1 %4482  ;;  %5753 = vrcp.f32 (%p10338_p13), %v10295_v21 }
 0x955   : >> { %v4481_v48 = vpop.permute.xlu0 %4480  ;;  %v10299_v58 = vadd.f32 %v4585_v19, %v4471_v16   ;;  %v4495_v54 = vmul.f32 %v4483_v57, %v10243_v17  ;;  %5755 = vrcp.f32 (%p10338_p13), %v10292_v53 }
 0x956   : >> { %v10301_v61 = vadd.f32 %v4584_v59, %v4470_v10   ;;  %v4494_v5 = vmul.f32 %v4481_v48, %v10245_v1 }
 0x957   : >> { %v11294_v62 = vmov %v10299_v58  ;;  %v4501_v55 = vadd.f32 %v4495_v54, %v10187_v25 }
 0x958   : >> { %v11295_v6 = vmov %v10301_v61  ;;  %v4500_v56 = vadd.f32 %v4494_v5, %v10189_v39  ;;  %v4505_v37 = vpop.permute.xlu1 %4504 }
 0x959   : >> { %v4503_v11 = vpop.permute.xlu0 %4502  ;;  %v4521_v43 = vmul.f32 %v4505_v37, %v10219_v13  ;;  %5757 = vrcp.f32 (%p10338_p13), %v11295_v6 }
 0x95a   : >> { %v4520_v35 = vmul.f32 %v4503_v11, %v10221_v24  ;;  %5759 = vrcp.f32 (%p10338_p13), %v11294_v62 }
 0x95b   : >> { %v4527_v34 = vadd.f32 %v4521_v43, %v10195_v44 }
 0x95c   : >> { %v4526_v16 = vadd.f32 %v4520_v35, %v10197_v49  ;;  %v4509_v10 = vpop.permute.xlu1 %4508 }
 0x95d   : >> { %v4507_v58 = vpop.permute.xlu0 %4506  ;;  %v4523_v26 = vmul.f32 %v4509_v10, %v10231_v33 }
 0x95e   : >> { %v4522_v22 = vmul.f32 %v4507_v58, %v10233_v18 }
 0x95f   : >> { %v4529_v25 = vadd.f32 %v4523_v26, %v10203_v4 }
 0x960   : >> { %v4528_v39 = vadd.f32 %v4522_v22, %v10205_v63  ;;  %v4513_v45 = vpop.permute.xlu1 %4512 }
 0x961   : >> { %v4511_v8 = vpop.permute.xlu0 %4510  ;;  %v4525_v13 = vmul.f32 %v4513_v45, %v10243_v17 }
 0x962   : >> { %v4524_v24 = vmul.f32 %v4511_v8, %v10245_v1 }
 0x963   : >> { %v4531_v44 = vadd.f32 %v4525_v13, %v10210_v50 }
 0x964   : >> { %v4530_v49 = vadd.f32 %v4524_v24, %v10213_v36  ;;  %v4595_v41 = vpop.permute.xlu1 %4594 }
 0x965   : >> { %v4593_v52 = vpop.permute.xlu0 %4592  ;;  %v4611_v33 = vmul.f32 %v4595_v41, %v10271_v31 }
 0x966   : >> { %v4610_v18 = vmul.f32 %v4593_v52, %v10273_v27 }
 0x967   : >> { %v10322_v4 = vadd.f32 %v4611_v33, %v10254_v46  }
 0x968   : >> { %v4616_v63 = vadd.f32 %v4610_v18, %v10257_v51   ;;  %v4599_v14 = vpop.permute.xlu1 %4598 }
 0x969   : >> { %v11296_v3 = vmov %v10322_v4  ;;  %v4597_v20 = vpop.permute.xlu0 %4596  ;;  %v4613_v17 = vmul.f32 %v4599_v14, %v10285_v60 }
 0x96a   : >> { %v4612_v1 = vmul.f32 %v4597_v20, %v10287_v7 }
 0x96b   : >> { %v10328_v50 = vadd.f32 %v4613_v17, %v10262_v15   ;;  %v11324_v17 = vld [vmem:[#allocation52_spill] sm:$0xff] (%p10338_p13) }
 0x96c   : >> { %v4618_v0 = vadd.f32 %v4612_v1, %v10265_v38   ;;  %v4603_v36 = vpop.permute.xlu1 %4602  ;;  %v11325_v1 = vld [vmem:[#allocation35_spill] sm:$0xff] (%p10338_p13) }
 0x96d   : >> { %v11297_v30 = vmov %v10328_v50  ;;  %v4601_v2 = vpop.permute.xlu0 %4600  ;;  %v4615_v57 = vmul.f32 %v4603_v36, %v4585_v19  ;;  %v11313_v36 = vmov %v11295_v6  ;;  %v11315_v50 = vmov %v10295_v21  ;;  %v11319_v6 = vld [vmem:[#allocation32_spill] sm:$0xff] (%p10338_p13) }
 0x96e   : >> { %v4614_v48 = vmul.f32 %v4601_v2, %v4584_v59  ;;  %v11309_v22 = vmov %v4618_v0  ;;  %v11311_v2 = vmov %v4616_v63  ;;  %v4719_v50 = vsub.f32 (%p10338_p13), %v11325_v1, %v11324_v17 }
 0x96f   : >> { %v10331_v54 = vadd.f32 %v4615_v57, %v4501_v55   ;;  %v11320_v22 = vld [vmem:[#allocation44_spill] sm:$0xff] (%p10338_p13)  ;;  %v11326_v57 = vld [vmem:[#allocation53_spill] sm:$0xff] (%p10338_p13) }
 0x970   : >> { %v4620_v37 = vadd.f32 %v4614_v48, %v4500_v56   ;;  %v4625_v46 = vpop.permute.xlu1 %4624  ;;  %v4670_v48 = vmul.f32 (%p10338_p13), 0.5, %v11326_v57 }
 0x971   : >> { %v11298_v5 = vmov %v10331_v54  ;;  %v4623_v51 = vpop.permute.xlu0 %4622  ;;  %v4641_v61 = vmul.f32 %v4625_v46, %v10271_v31  ;;  %v5750_v31 = vpop.eup (%p10338_p13), %5749 }
 0x972   : >> { %v4640_v11 = vmul.f32 %v4623_v51, %v10273_v27  ;;  %v11307_v46 = vmov %v4620_v37  ;;  %v11310_v27 = vmov %v11296_v3 }
 0x973   : >> { %v4647_v43 = vadd.f32 %v4641_v61, %v4527_v34  }
 0x974   : >> { %v4646_v35 = vadd.f32 %v4640_v11, %v4526_v16   ;;  %v4629_v10 = vpop.permute.xlu1 %4628 }
 0x975   : >> { %v4627_v15 = vpop.permute.xlu0 %4626  ;;  %v4643_v58 = vmul.f32 %v4629_v10, %v10285_v60  ;;  %v11304_v61 = vmov %v4647_v43  ;;  %v11314_v10 = vmov %v10292_v53  ;;  %v5752_v60 = vpop.eup (%p10338_p13), %5751 }
 0x976   : >> { %v4642_v38 = vmul.f32 %v4627_v15, %v10287_v7  ;;  %v4658_v7 = vmul.f32 (%p10338_p13), %v5750_v31, %v4616_v63  ;;  %v4659_v34 = vmul.f32 (%p10338_p13), %v5752_v60, %v11296_v3  ;;  %v10400_v47 = vmul.f32 (%p10338_p13), %v5752_v60, %v4647_v43  ;;  %v11323_v3 = vld [vmem:[#allocation34_spill] sm:$0xff] (%p10338_p13)  ;;  %v11329_v10 = vld [vmem:[#allocation56_spill] sm:$0xff] (%p10338_p13) }
 0x977   : >> { %v4649_v45 = vadd.f32 %v4643_v58, %v4529_v25   ;;  %v11312_v58 = vmov %v11294_v62  ;;  %v11318_v62 = vld [vmem:[#allocation43_spill] sm:$0xff] (%p10338_p13)  ;;  %v11321_v25 = vld [vmem:[#allocation33_spill] sm:$0xff] (%p10338_p13)  ;;  %v4673_v15 = vmul.f32 (%p10338_p13), 0.5, %v11329_v10 }
 0x978   : >> { %v4648_v8 = vadd.f32 %v4642_v38, %v4528_v39   ;;  %v4633_v26 = vpop.permute.xlu1 %4632  ;;  %v11316_v39 = vmov %v10278_v9  ;;  %3214 = sbr.rel (!%p10338_p13) target bundleno = 1784 (0x6f8), region = 135  ;;  %v4706_v16 = vsub.f32 (%p10338_p13), %v11319_v6, %v11318_v62  ;;  %v4677_v61 = vmul.f32 (%p10338_p13), 0.5, %v4659_v34  ;;  %v11328_v43 = vld [vmem:[#allocation55_spill] sm:$0xff] (%p10338_p13) }
 0x979   : >> { %v4631_v55 = vpop.permute.xlu0 %4630  ;;  %v4645_v54 = vmul.f32 %v4633_v26, %v4585_v19  ;;  %v11302_v33 = vmov %v4649_v45  ;;  %v11317_v26 = vmov %v10281_v28  ;;  %v10397_v19 = vmul.f32 (%p10338_p13), %v5750_v31, %v4646_v35 }
 0x97a   : >> { %v4644_v56 = vmul.f32 %v4631_v55, %v4584_v59  ;;  %v11303_v4 = vmov %v4648_v8  ;;  %v11305_v55 = vmov %v4646_v35  ;;  %v5754_v59 = vpop.eup (%p10338_p13), %5753  ;;  %v4707_v39 = vsub.f32 (%p10338_p13), %v11321_v25, %v11320_v22 }
 0x97b   : >> { %v4651_v13 = vadd.f32 %v4645_v54, %v4531_v44   ;;  %v11306_v54 = vmov %v11298_v5  ;;  %v11308_v44 = vmov %v11297_v30  ;;  %v5756_v42 = vpop.eup (%p10338_p13), %5755  ;;  %v4660_v29 = vmul.f32 (%p10338_p13), %v5754_v59, %v4618_v0  ;;  %v11322_v4 = vld [vmem:[#allocation51_spill] sm:$0xff] (%p10338_p13) }
 0x97c   : >> { %v4650_v24 = vadd.f32 %v4644_v56, %v4530_v49   ;;  %v10402_v23 = vmul.f32 (%p10338_p13), %v5754_v59, %v4648_v8  ;;  %v5758_v40 = vpop.eup (%p10338_p13), %5757  ;;  %v4661_v12 = vmul.f32 (%p10338_p13), %v5756_v42, %v11297_v30  ;;  %v10405_v32 = vmul.f32 (%p10338_p13), %v5756_v42, %v4649_v45  ;;  %v11330_v45 = vld [vmem:[#allocation57_spill] sm:$0xff] (%p10338_p13)  ;;  %v11331_v56 = vld [vmem:[#allocation58_spill] sm:$0xff] (%p10338_p13) }
 0x97d   : >> { %v11300_v51 = vmov %v4651_v13  ;;  %v5760_v27 = vpop.eup (%p10338_p13), %5759  ;;  %v4662_v9 = vmul.f32 (%p10338_p13), %v5758_v40, %v4620_v37  ;;  %v4708_v44 = vand.u32 (%p10338_p13), 2147483647, %v4706_v16  ;;  %v4709_v49 = vand.u32 (%p10338_p13), 2147483647, %v4707_v39  ;;  %v11327_v37 = vld [vmem:[#allocation54_spill] sm:$0xff] (%p10338_p13) }
 0x97e   : >> { %v11301_v14 = vmov %v4650_v24  ;;  %v10407_v28 = vmul.f32 (%p10338_p13), %v5758_v40, %v4650_v24  ;;  %v4663_v53 = vmul.f32 (%p10338_p13), %v5760_v27, %v11298_v5  ;;  %v10410_v21 = vmul.f32 (%p10338_p13), %v5760_v27, %v4651_v13 }
 0x97f   : > { %v4710_v41 = vmax.f32 %v4708_v44, 0.0  ;;  %v4711_v52 = vmax.f32 %v4709_v49, 0.0  ;;  %v4718_v63 = vsub.f32 %v11323_v3, %v11322_v4  ;;  %v4721_v0 = vand.u32 2147483647, %v4719_v50 }
 0x980   : > { %v4671_v46 = vmul.f32 0.5, %v11327_v37  ;;  %v4676_v51 = vmul.f32 0.5, %v4658_v7  ;;  %v4672_v35 = vmul.f32 0.5, %v11328_v43  ;;  %v4678_v58 = vmul.f32 0.5, %v4660_v29 }
 0x981   : > { %v4712_v33 = vmul.f32 -0.6931, %v4710_v41  ;;  %v4713_v18 = vmul.f32 -0.6931, %v4711_v52  ;;  %v4720_v30 = vand.u32 2147483647, %v4718_v63 }
 0x982   : > { %v4723_v2 = vmax.f32 %v4721_v0, 0.0  ;;  %v4674_v8 = vmul.f32 0.5, %v11330_v45  ;;  %v4679_v26 = vmul.f32 0.5, %v4661_v12  ;;  %v4680_v55 = vmul.f32 0.5, %v4662_v9 }
 0x983   : > { %v4714_v14 = vmul.f32 1.442695, %v4712_v33  ;;  %v4716_v20 = vmul.f32 1.442695, %v4713_v18  ;;  %v4722_v36 = vmax.f32 %v4720_v30, 0.0  ;;  %v4675_v13 = vmul.f32 0.5, %v11331_v56 }
 0x984   : > { %v4725_v11 = vmul.f32 -0.6931, %v4723_v2  ;;  %v4681_v24 = vmul.f32 0.5, %v4663_v53  ;;  %v4682_v31 = vadd.f32 %v4676_v51, %v4670_v48  ;;  %v4684_v60 = vadd.f32 %v4678_v58, %v4672_v35 }
 0x985   : > { %5761 = vpow2.f32 %v4714_v14  ;;  %v4724_v5 = vmul.f32 -0.6931, %v4722_v36  ;;  %v4683_v59 = vadd.f32 %v4677_v61, %v4671_v46  ;;  %v4685_v34 = vadd.f32 %v4679_v26, %v4673_v15 }
 0x986   : > { %5763 = vpow2.f32 %v4716_v20  ;;  %v4728_v54 = vmul.f32 1.442695, %v4725_v11  ;;  %v4686_v42 = vadd.f32 %v4680_v55, %v4674_v8  ;;  %v4687_v29 = vadd.f32 %v4681_v24, %v4675_v13 }
 0x987   : > { %v4726_v38 = vmul.f32 1.442695, %v4724_v5  ;;  %v6177_v12 = vmov 0.0  }
 0x989   : > { %5765 = vpow2.f32 %v4726_v38 }
 0x98a   : > { %5767 = vpow2.f32 %v4728_v54 }
 0x98f   : > { %v10426_v7 = vpop.eup %5761 }
 0x990   : > { %v10428_v40 = vpop.eup %5763  ;;  %vm4730_vm0 = vcmp.gt.f32.partialorder %v10426_v7, 0.5  ;;  %v4742_v9 = vsub.f32 1.0, %v10426_v7 }
 0x991   : > { %vm4731_vm1 = vcmp.gt.f32.partialorder %v10428_v40, 0.5  ;;  %v5191_v27 = vsel %vm4730_vm0, 1.0, %v6177_v12  ;;  %v4743_v53 = vsub.f32 1.0, %v10428_v40  ;;  %vm11350_vm0 = vmmov %vm11334_vm2 }
 0x992   : > { %v5192_v62 = vsel %vm4731_vm1, 1.0, %v6177_v12  ;;  %v4844_v6 = vsel %vm11332_vm7, %v5191_v27, 0.0  ;;  %v4818_v16 = vmul.f32 %v5191_v27, %v4682_v31  ;;  %v4820_v22 = vmul.f32 %v5191_v27, %v4684_v60  ;;  %vm11351_vm1 = vmmov %vm11350_vm0 }
 0x993   : > { %v4845_v25 = vsel %vm11333_vm9, %v5192_v62, 0.0  ;;  %v4819_v39 = vmul.f32 %v5192_v62, %v4683_v59  ;;  %v4821_v44 = vmul.f32 %v5192_v62, %v4685_v34  ;;  %v4822_v49 = vmul.f32 %v5191_v27, %v4686_v42  ;;  %v10442_v3 = vpop.eup %5765  ;;  %v11342_v27 = vld [vmem:[#allocation59_spill] sm:$0xff]  ;;  %vm11352_vm7 = vmmov %vm11350_vm0 }
 0x994   : > { %v4846_v41 = vadd.f32 %v4845_v25, %v4844_v6  ;;  %v4824_v52 = vsel %vm11334_vm2, %v4818_v16, 0.0  ;;  %v4827_v18 = vsel %vm11336_vm14, %v4820_v22, 0.0  ;;  %v10440_v4 = vmax.f32 %v4742_v9, %v10426_v7  ;;  %v10452_v0 = vpop.eup %5767  ;;  %v11343_v6 = vld [vmem:[#allocation60_spill] sm:$0xff]  ;;  %vm11353_vm9 = vmmov %vm11350_vm0 }
 0x995   : > { %v4825_v33 = vsel %vm11335_vm15, %v4819_v39, 0.0  ;;  %v4823_v63 = vmul.f32 %v5192_v62, %v4687_v29  ;;  %v10445_v20 = vmax.f32 %v4743_v53, %v10428_v40  ;;  %v4829_v17 = vsel %vm11337_vm4, %v4821_v44, 0.0  ;;  %vm11354_vm2 = vmmov %vm11350_vm0 }
 0x996   : > { %4847 = vadd.xlane.f32.xlu1 %v4846_v41  ;;  %v4826_v14 = vadd.f32 %v4825_v33, %v4824_v52  ;;  %v4831_v1 = vsel %vm11338_vm3, %v4822_v49, 0.0  ;;  %v4746_v50 = vsub.f32 %v4742_v9, %v10440_v4  ;;  %v4752_v30 = vsub.f32 %v10426_v7, %v10440_v4  ;;  %v11344_v41 = vld [vmem:[#allocation61_spill] sm:$0xff]  ;;  %vm11355_vm15 = vmmov %vm11350_vm0 }
 0x997   : > { %v4747_v2 = vsub.f32 %v4743_v53, %v10445_v20  ;;  %v4753_v57 = vsub.f32 %v10428_v40, %v10445_v20  ;;  %vm4736_vm6 = vcmp.gt.f32.partialorder %v10442_v3, 0.5  ;;  %vm4737_vm8 = vcmp.gt.f32.partialorder %v10452_v0, 0.5  ;;  %vm11356_vm14 = vmmov %vm11350_vm0 }
 0x998   : > { %v4828_v36 = vadd.f32 %v4827_v18, %v4826_v14  ;;  %v4748_v48 = vmul.f32 1.442695, %v4746_v50  ;;  %v4754_v5 = vmul.f32 1.442695, %v4752_v30  ;;  %v4780_v37 = vsub.f32 1.0, %v10442_v3  ;;  %vm11357_vm4 = vmmov %vm11350_vm0 }
 0x999   : > { %v4750_v51 = vmul.f32 1.442695, %v4747_v2  ;;  %v4756_v61 = vmul.f32 1.442695, %v4753_v57  ;;  %v4833_v11 = vsel %vm11339_vm10, %v4823_v63, 0.0  ;;  %v10461_v43 = vsel %vm4736_vm6, 1.0, %v6177_v12 }
 0x99a   : > { %v4830_v46 = vadd.f32 %v4829_v17, %v4828_v36  ;;  %5769 = vpow2.f32 %v4748_v48  ;;  %v10463_v10 = vsel %vm4737_vm8, 1.0, %v6177_v12  ;;  %v4781_v15 = vsub.f32 1.0, %v10452_v0  ;;  %v11345_v17 = vld [vmem:[#allocation62_spill] sm:$0xff]  ;;  %v11346_v48 = vld [vmem:[#allocation63_spill] sm:$0xff] }
 0x99b   : > { %5771 = vpow2.f32 %v4750_v51  ;;  %v4883_v58 = vsel %vm11340_vm5, %v10461_v43, 0.0  ;;  %v4884_v38 = vsel %vm11341_vm11, %v10463_v10, 0.0  ;;  %v10471_v45 = vmax.f32 %v4780_v37, %v10442_v3 }
 0x99c   : > { %v4832_v35 = vadd.f32 %v4831_v1, %v4830_v46  ;;  %5773 = vpow2.f32 %v4754_v5  ;;  %v10474_v26 = vmax.f32 %v4781_v15, %v10452_v0  ;;  %v4885_v56 = vadd.f32 %v4884_v38, %v4883_v58  ;;  %v11349_v38 = vld [vmem:[#allocation64_spill] sm:$0xff] }
 0x99d   : > { %5775 = vpow2.f32 %v4756_v61  ;;  %v4784_v55 = vsub.f32 %v4780_v37, %v10471_v45  ;;  %v4790_v54 = vsub.f32 %v10442_v3, %v10471_v45  ;;  %v4688_v9 = vmul.f32 0.5, %v11342_v27 }
 0x99e   : > { %v4834_v8 = vadd.f32 %v4833_v11, %v4832_v35  ;;  %v4785_v13 = vsub.f32 %v4781_v15, %v10474_v26  ;;  %v4791_v24 = vsub.f32 %v10452_v0, %v10474_v26  ;;  %v4689_v16 = vmul.f32 0.5, %v11343_v6 }
 0x99f   : > { %v4786_v31 = vmul.f32 1.442695, %v4784_v55  ;;  %v4792_v60 = vmul.f32 1.442695, %v4790_v54  ;;  %v4694_v22 = vmul.f32 0.5, %v10397_v19  ;;  %v4695_v25 = vmul.f32 0.5, %v10400_v47 }
 0x9a0   : > { %4835 = vadd.xlane.f32.xlu1 %v4834_v8  ;;  %v4788_v59 = vmul.f32 1.442695, %v4785_v13  ;;  %v4794_v34 = vmul.f32 1.442695, %v4791_v24  ;;  %v4690_v52 = vmul.f32 0.5, %v11344_v41  ;;  %v4696_v33 = vmul.f32 0.5, %v10402_v23 }
 0x9a1   : > { %5777 = vpow2.f32 %v4786_v31  ;;  %v4700_v44 = vadd.f32 %v4694_v22, %v4688_v9  ;;  %v4701_v49 = vadd.f32 %v4695_v25, %v4689_v16  ;;  %v4691_v1 = vmul.f32 0.5, %v11345_v17 }
 0x9a2   : > { %5779 = vpow2.f32 %v4788_v59  ;;  %v4697_v50 = vmul.f32 0.5, %v10405_v32  ;;  %v4702_v2 = vadd.f32 %v4696_v33, %v4690_v52  ;;  %v4692_v5 = vmul.f32 0.5, %v11346_v48 }
 0x9a3   : > { %5781 = vpow2.f32 %v4792_v60  ;;  %v4857_v19 = vmul.f32 %v10461_v43, %v4700_v44  ;;  %v4858_v47 = vmul.f32 %v10463_v10, %v4701_v49  ;;  %v4698_v23 = vmul.f32 0.5, %v10407_v28 }
 0x9a4   : > { %4886 = vadd.xlane.f32.xlu1 %v4885_v56  ;;  %v5770_v42 = vpop.eup %5769  ;;  %5783 = vpow2.f32 %v4794_v34  ;;  %v4703_v46 = vadd.f32 %v4697_v50, %v4691_v1  ;;  %v4859_v51 = vmul.f32 %v10461_v43, %v4702_v2  ;;  %v4693_v8 = vmul.f32 0.5, %v11349_v38 }
 0x9a5   : > { %v5772_v29 = vpop.eup %5771  ;;  %v4863_v32 = vsel %vm11347_vm12, %v4857_v19, 0.0  ;;  %v4864_v61 = vsel %vm11348_vm13, %v4858_v47, 0.0  ;;  %v4699_v55 = vmul.f32 0.5, %v10410_v21  ;;  %v4704_v56 = vadd.f32 %v4698_v23, %v4692_v5 }
 0x9a6   : > { %v5774_v12 = vpop.eup %5773  ;;  %v4865_v54 = vadd.f32 %v4864_v61, %v4863_v32  ;;  %v4860_v13 = vmul.f32 %v10463_v10, %v4703_v46  ;;  %v4866_v24 = vsel %vm11350_vm0, %v4859_v51, 0.0 }
 0x9a7   : > { %v5776_v53 = vpop.eup %5775  ;;  %v4758_v62 = vadd.f32 %v5774_v12, %v5770_v42  ;;  %v4861_v21 = vmul.f32 %v10461_v43, %v4704_v56 }
 0x9a8   : > { %v4759_v39 = vadd.f32 %v5776_v53, %v5772_v29  ;;  %v4867_v34 = vadd.f32 %v4866_v24, %v4865_v54  ;;  %v4705_v29 = vadd.f32 %v4699_v55, %v4693_v8 }
 0x9a9   : > { %5785 = vlog2.f32 %v4758_v62  ;;  %v4870_v16 = vsel %vm11354_vm2, %v4861_v21, 0.0 }
 0x9aa   : > { %5787 = vlog2.f32 %v4759_v39  ;;  %v4862_v6 = vmul.f32 %v10463_v10, %v4705_v29 }
 0x9ab   : > { %v5778_v18 = vpop.eup %5777 }
 0x9ac   : > { %v5780_v63 = vpop.eup %5779  ;;  %v4872_v49 = vsel %vm11357_vm4, %v4862_v6, 0.0 }
 0x9ad   : > { %v5782_v14 = vpop.eup %5781 }
 0x9ae   : > { %v5784_v30 = vpop.eup %5783  ;;  %v4796_v36 = vadd.f32 %v5782_v14, %v5778_v18 }
 0x9af   : > { %v4797_v57 = vadd.f32 %v5784_v30, %v5780_v63 }
 0x9b0   : > { %5789 = vlog2.f32 %v4796_v36 }
 0x9b1   : > { %5791 = vlog2.f32 %v4797_v57 }
 0x9b3   : > { %v5786_v37 = vpop.eup %5785 }
 0x9b4   : > { %v5788_v11 = vpop.eup %5787  ;;  %v4761_v35 = vmul.f32 0.6931472, %v5786_v37 }
 0x9b5   : > { %v4763_v15 = vmul.f32 0.6931472, %v5788_v11 }
 0x9b6   : > { %v4764_v58 = vadd.f32 %v4761_v35, %v10440_v4 }
 0x9b7   : > { %v4765_v28 = vadd.f32 %v4763_v15, %v10445_v20  ;;  %v4868_v20 = vsel %vm11353_vm9, %v4860_v13, 0.0 }
 0x9b8   : > { %v4766_v31 = vsub.f32 %v4764_v58, %v10426_v7  ;;  %v4869_v62 = vadd.f32 %v4868_v20, %v4867_v34 }
 0x9b9   : > { %v4767_v60 = vsub.f32 %v4765_v28, %v10428_v40 }
 0x9ba   : > { %v4768_v59 = vsel %vm11351_vm1, %v4766_v31, 0.0  ;;  %v5790_v4 = vpop.eup %5789  ;;  %v4871_v39 = vadd.f32 %v4870_v16, %v4869_v62 }
 0x9bb   : > { %v4769_v42 = vsel %vm11352_vm7, %v4767_v60, 0.0  ;;  %v5792_v12 = vpop.eup %5791  ;;  %v4799_v9 = vmul.f32 0.6931472, %v5790_v4  ;;  %v11358_v4 = vld [vmem:[#allocation65_spill] sm:$0xff] }
 0x9bc   : > { %v4770_v27 = vadd.f32 %v4769_v42, %v4768_v59  ;;  %v4801_v53 = vmul.f32 0.6931472, %v5792_v12  ;;  %vm4903_vm3 = vcmp.eq.s32.totalorder %v11358_v4, 5  ;;  %vm4902_vm6 = vcmp.eq.s32.totalorder %v11358_v4, 4 }
 0x9bd   : > { %v4802_v7 = vadd.f32 %v4799_v9, %v10471_v45  ;;  %v4873_v45 = vadd.f32 %v4872_v49, %v4871_v39  ;;  %vm4901_vm8 = vcmp.eq.s32.totalorder %v11358_v4, 3  ;;  %vm4900_vm10 = vcmp.eq.s32.totalorder %v11358_v4, 2 }
 0x9be   : > { %4771 = vadd.xlane.f32.xlu0 %v4770_v27  ;;  %v4803_v40 = vadd.f32 %v4801_v53, %v10474_v26  ;;  %vm4899_vm5 = vcmp.eq.s32.totalorder %v11358_v4, 1  ;;  %vm4898_vm11 = vcmp.eq.s32.totalorder %v11358_v4, 0 }
 0x9bf   : > { %v4804_v22 = vsub.f32 %v4802_v7, %v10442_v3 }
 0x9c0   : > { %v4805_v43 = vsub.f32 %v4803_v40, %v10452_v0 }
 0x9c1   : > { %v4806_v25 = vsel %vm11355_vm15, %v4804_v22, 0.0 }
 0x9c2   : > { %v4807_v44 = vsel %vm11356_vm14, %v4805_v43, 0.0 }
 0x9c3   : > { %v4808_v41 = vadd.f32 %v4807_v44, %v4806_v25 }
 0x9c5   : > { %4809 = vadd.xlane.f32.xlu0 %v4808_v41 }
 0x9c9   : > { %4874 = vadd.xlane.f32.xlu0 %v4873_v45 }
 0xa23   : > { %v4848_v26 = vpop.xlane.xlu1 %4847 }
 0xa24   : > { %v4849_v18 = vrot.slane %v4848_v26, 4 }
 0xa26   : > { %v4850_v1 = vadd.f32 %v4849_v18, %v4848_v26 }
 0xa28   : > { %v4851_v2 = vrot.slane %v4850_v1, 2 }
 0xa2a   : > { %v4852_v11 = vadd.f32 %v4851_v2, %v4850_v1 }
 0xa2c   : > { %v4853_v54 = vrot.slane %v4852_v11, 1 }
 0xa2d   : > { %v4836_v52 = vpop.xlane.xlu1 %4835 }
 0xa2e   : > { %v4837_v10 = vrot.slane %v4836_v52, 4  ;;  %v4854_v31 = vadd.f32 %v4853_v54, %v4852_v11 }
 0xa30   : > { %v4838_v0 = vadd.f32 %v4837_v10, %v4836_v52 }
 0xa31   : > { %v4887_v3 = vpop.xlane.xlu1 %4886 }
 0xa32   : > { %v4888_v17 = vrot.slane %v4887_v3, 4  ;;  %v4839_v19 = vrot.slane %v4838_v0, 2 }
 0xa34   : > { %v4889_v47 = vadd.f32 %v4888_v17, %v4887_v3  ;;  %v4840_v51 = vadd.f32 %v4839_v19, %v4838_v0 }
 0xa36   : > { %v4890_v37 = vrot.slane %v4889_v47, 2  ;;  %v4841_v38 = vrot.slane %v4840_v51, 1 }
 0xa38   : > { %v4891_v58 = vadd.f32 %v4890_v37, %v4889_v47  ;;  %v4842_v13 = vadd.f32 %v4841_v38, %v4840_v51 }
 0xa3a   : > { %v4892_v24 = vrot.slane %v4891_v58, 1 }
 0xa3c   : > { %v4893_v34 = vadd.f32 %v4892_v24, %v4891_v58 }
 0xa4b   : > { %v4772_v33 = vpop.xlane.xlu0 %4771 }
 0xa4c   : > { %v4773_v63 = vrot.slane %v4772_v33, 4 }
 0xa4e   : > { %v4774_v14 = vadd.f32 %v4773_v63, %v4772_v33 }
 0xa50   : > { %v4775_v50 = vrot.slane %v4774_v14, 2 }
 0xa52   : > { %v4776_v30 = vadd.f32 %v4775_v50, %v4774_v14  ;;  %v4810_v36 = vpop.xlane.xlu0 %4809 }
 0xa53   : > { %v4811_v57 = vrot.slane %v4810_v36, 4 }
 0xa54   : > { %v4777_v48 = vrot.slane %v4776_v30, 1 }
 0xa55   : > { %v4812_v5 = vadd.f32 %v4811_v57, %v4810_v36 }
 0xa56   : > { %v4778_v23 = vadd.f32 %v4777_v48, %v4776_v30  ;;  %v4875_v46 = vpop.xlane.xlu0 %4874 }
 0xa57   : > { %v4813_v32 = vrot.slane %v4812_v5, 2  ;;  %v4876_v61 = vrot.slane %v4875_v46, 4 }
 0xa58   : > { %5343 = vpush %v4778_v23 }
 0xa59   : > { %v4877_v35 = vadd.f32 %v4876_v61, %v4875_v46  ;;  %v4814_v15 = vadd.f32 %v4813_v32, %v4812_v5 }
 0xa5b   : > { %v4878_v8 = vrot.slane %v4877_v35, 2  ;;  %v4815_v55 = vrot.slane %v4814_v15, 1 }
 0xa5d   : > { %v4879_v28 = vadd.f32 %v4878_v8, %v4877_v35  ;;  %v4816_v56 = vadd.f32 %v4815_v55, %v4814_v15 }
 0xa5f   : > { %5345 = vpush %v4816_v56  ;;  %v4880_v60 = vrot.slane %v4879_v28, 1 }
 0xa60   : > { %5347 = vpush %v4842_v13 }
 0xa61   : > { %5349 = vpush %v4854_v31  ;;  %v4881_v59 = vadd.f32 %v4880_v60, %v4879_v28 }
 0xa63   : > { %5351 = vpush %v4881_v59 }
 0xa64   : > { %5353 = vpush %v4893_v34 }
 0xa89   : > { %s5344_s0 = spop %5343 }
 0xa8a   : > { %v4906_v21 = vstv %s5344_s0 }
 0xa90   : > { %s5346_s9 = spop %5345 }
 0xa91   : > { %s5348_s11 = spop %5347  ;;  %v4904_v42 = vstv %s5346_s9 }
 0xa92   : > { %s5350_s29 = spop %5349  ;;  %v4905_v29 = vsel %vm4903_vm3, %v4904_v42, 0.0  ;;  %v4914_v62 = vstv %s5348_s11 }
 0xa93   : > { %s4856_s8 = smul.f32 3.0, %s5350_s29  ;;  %v4907_v20 = vsel %vm4902_vm6, %v4906_v21, %v4905_v29 }
 0xa94   : > { %s5352_s12 = spop %5351 }
 0xa95   : > { %s5354_s20 = spop %5353  ;;  %v4910_v27 = vstv %s5352_s12  ;;  %v4912_v53 = vstv %s4856_s8 }
 0xa96   : > { %s4895_s5 = smul.f32 3.0, %s5354_s20 }
 0xa98   : > { %v4908_v12 = vstv %s4895_s5 }
 0xa99   : > { %v4909_v9 = vsel %vm4901_vm8, %v4908_v12, %v4907_v20 }
 0xa9a   : > { %v4911_v7 = vsel %vm4900_vm10, %v4910_v27, %v4909_v9 }
 0xa9b   : > { %v4913_v40 = vsel %vm4899_vm5, %v4912_v53, %v4911_v7 }
 0xa9c   : > { %v4915_v6 = vsel %vm4898_vm11, %v4914_v62, %v4913_v40 }
 0xa9d   : > { %4916 = vst [vmem:[%s331_s25] sm:$0x1] %v4915_v6 }
 0xa9e   : > { %5926 = shalt.err (!%p5923_p1)
}
 0xa9f   : > { %s5927_s14 = scalar_lea.hbm %s10530_s30, 16  ;;  %s5931_s9 = scalar_lea.hbm %s10580_s4, 32 }
 0xaa0   : > { %p5928_p7 = scmp.ne.s32.totalorder %s10530_s30, %s5927_s14  ;;  %p5932_p2 = scmp.lt.u32.totalorder %s10530_s30, %s10580_s4 }
 0xaa1   : > { %p5933_p6 = scmp.lt.u32.totalorder %s5931_s9, %s5927_s14  ;;  %p5935_p0 = scmp.lt.u32.totalorder %s5927_s14, %s10530_s30 }
 0xaa2   : > { %p5929_p9 = pnand %p5928_p7, %p11359_p8 }
 0xaa3   : > { %p5934_p13 = por %p5933_p6, %p5932_p2 }
 0xaa4   : > { %p5930_p12 = pneg %p5929_p9 }
 0xaa5   : > { %p5936_p10 = por %p5935_p0, %p5934_p13 }
 0xaa7   : > { %p5937_p11 = pnand %p5936_p10, %p5930_p12 }
 0xaa9   : > { %5940 = shalt.err (!%p5937_p11)
}
 0xaaa   : > { %5363 = dma.vmem_to_hbm [thread:$0]  (%p11359_p8), %s10532_s13, 16, %s10530_s30, %s4918_s19  }
 0xaab PF: > { %s4942_s12 = sand.u32 1, %s6051_s15   ;;  %p11360_p4 = scmp.ne.s32.totalorder %s10694_s27, 0 }
 0xaac   : > { %p11361_p3 = scmp.ge.s32.totalorder %s6063_s18, 2  ;;  %s4943_s8 = scalar_lea.sflag [#allocation4], %s4942_s12 }
 0xaae   : > { %p5379_p5 = pnand %p11361_p3, %p11360_p4 }
 0xab0   : > { %6046 = dma.done.wait (!%p5379_p5), %s4943_s8, 16  }
 0xab1   : > { %6048 = vsyncadd (!%p5379_p5), %s4943_s8, 4294967280  ;;  %p23_p1 = scmp.ge.s32.totalorder %s6229_s21, 4   ;;  %s11362_s15 = smov %s6055_s16 }
 0xab2   : > { %s11363_s16 = smov %s6059_s17  ;;  %s11364_s17 = smov %s6241_s24 }
 0xab3   : > { %s11365_s18 = smov %s6229_s21  ;;  %25 = sbr.rel (!%p23_p1) target bundleno = 12 (0xc), region = 146 }
 0xaba   :  { %4947 = vsyncpa [#allocation3], 1 }
 0xabb   :  { %4949 = vsyncpa [#allocation3 + $0x1], 1 }
 0xabc   :  { %4950 = vsyncpa [#allocation6], 1 }
 0xabd   :  { %4952 = vsyncpa [#allocation6 + $0x1], 1 }
 0xabe   :  { %4953 = vsyncpa [#allocation9], 1 }
 0xabf   :  { %4955 = vsyncpa [#allocation9 + $0x1], 1 }
 0xac0   :  { %4956 = vsyncpa [#allocation4], 1 }
 0xac1   :  { %4958 = vsyncpa [#allocation4 + $0x1], 1 }

</bundles_post_ra>
